<compile_context>
chip_gen: v7x
topology: tpu7x:2x2x1
jax: 0.10.0
libtpu: 0.0.40
codegen_flags: <defaults>
</compile_context>

<pallas_src>
import numpy as np
import jax
import jax.numpy as jnp
from jax.experimental import pallas as pl
from jax.experimental.pallas import tpu as pltpu

# ---------------- config (scaled-down GPT2) ----------------
B = 2            # batch
M = 3            # number of series / channels
L = 8            # slen (seq_len)
PATCH = 1
STRIDE = 1
N = (L - PATCH) // STRIDE + 1 + 1   # patch_num = L + 1 = 9
D = 64           # n_embd   (GPT2: 768)
NH = 4           # n_head   (GPT2: 12)
HD = D // NH
NL = 2           # n_layer  (GPT2: 12)
DFF = 4 * D
HID = 200        # hidden_layer output dim (as in the module)
BM = B * M       # number of (batch, series) sequences = 6
BMP = 8          # BM padded to the 8-sublane tile
RP = N * BMP     # padded token count = 72 (row r = n*BMP + bm)

EPS_LN = 1e-5
EPS_REVIN = 1e-5
INV_SQRT_HD = 1.0 / (HD ** 0.5)
GELU_C = 0.7978845608028654          # sqrt(2/pi)

f32 = jnp.float32
bf16 = jnp.bfloat16
_VMEM = pl.BlockSpec(memory_space=pltpu.MemorySpace.VMEM)


# ---------------- the single fused kernel ----------------
def _gpt4ts_kernel(xt_ref, const_ref, misc_ref, wk_ref, wfc2_ref, vec_ref,
                   hid_w_ref, out_w_ref,
                   hidden_ref, y_ref,
                   qkv_ref, attn_ref, hf_ref, hid_in_ref):
    # ---------- RevIN normalize (stats stay in VMEM for the final de-norm) ----------
    xt = xt_ref[...]                                       # (BMP, L), time on lanes
    mean = jnp.mean(xt, axis=-1, keepdims=True)            # (BMP, 1)
    xc = xt - mean
    var = jnp.mean(xc * xc, axis=-1, keepdims=True)        # unbiased=False
    std = jnp.sqrt(var + EPS_REVIN)
    xn = xc / std                                          # (BMP, L)

    # ---------- hoisted constants (built in the wrapper, loaded once) ----------
    mask_bias = const_ref[:, 0:RP]                         # (RP, RP) additive 0/-1e9
    emb_bias = const_ref[:, RP:RP + D]                     # (RP, D)  in_b + wpe[n(r)]
    tok_sel = const_ref[:, RP + D:RP + D + L]              # (RP, L)  token time-pick

    in_w = misc_ref[:, 0:D]                                # (1, D)
    lnf_g = misc_ref[:, D:2 * D]
    lnf_b = misc_ref[:, 2 * D:3 * D]
    hid_b = misc_ref[:, 3 * D:3 * D + HID]
    out_b = misc_ref[:, 3 * D + HID:3 * D + HID + L]

    # ---------- tokenization (ReplicationPad1d + unfold) + in_layer + wpe ----------
    # row r = n*BMP + bm reads xn[bm, min(n, L-1)].
    rows_rep = jnp.concatenate([xn] * N, axis=0)           # (RP, L)  8-row aligned tile copies
    s = jnp.sum(tok_sel * rows_rep, axis=-1, keepdims=True)   # (RP, 1) token scalar
    h2 = s * in_w + emb_bias                               # (RP, D)
    # TODO(synk): GPT2 train-mode dropouts (embd/attn/resid/mlp, p=0.1) are stochastic; omitted.

    def layer_norm(h, g, bb):
        mu = jnp.mean(h, axis=-1, keepdims=True)
        hc = h - mu
        v = jnp.mean(hc * hc, axis=-1, keepdims=True)
        return hc * jax.lax.rsqrt(v + EPS_LN) * g + bb

    def gelu_new(u):
        return 0.5 * u * (1.0 + jnp.tanh(GELU_C * (u + 0.044715 * u * u * u)))

    # ---------- GPT2 transformer blocks ----------
    for i in range(NL):
        ln1_g = vec_ref[i, :, 0:D]
        ln1_b = vec_ref[i, :, D:2 * D]
        attn_b = vec_ref[i, :, 2 * D:5 * D]                # head-major (q|k|v per head)
        proj_b = vec_ref[i, :, 5 * D:6 * D]
        ln2_g = vec_ref[i, :, 6 * D:7 * D]
        ln2_b = vec_ref[i, :, 7 * D:8 * D]
        fc_b = vec_ref[i, :, 8 * D:8 * D + DFF]
        fc2_b = vec_ref[i, :, 8 * D + DFF:9 * D + DFF]

        # --- attention block: h <- h + c_proj(MHA(ln_1(h))) ---
        a = layer_norm(h2, ln1_g, ln1_b)                   # (RP, D)
        qkv_ref[...] = (jnp.dot(a.astype(bf16), wk_ref[i, :, 0:3 * D],
                                preferred_element_type=f32) + attn_b)   # (RP, 3D)
        for h in range(NH):
            base = 3 * HD * h                              # head-major: q|k|v contiguous
            qh = qkv_ref[:, base:base + HD]                # (RP, HD)
            kh = qkv_ref[:, base + HD:base + 2 * HD]
            vh = qkv_ref[:, base + 2 * HD:base + 3 * HD]
            sc = jax.lax.dot_general(qh, kh, (((1,), (1,)), ((), ())),
                                     preferred_element_type=f32) * INV_SQRT_HD
            sc = sc + mask_bias                            # block-diag causal bias
            sc = sc - jnp.max(sc, axis=-1, keepdims=True)
            p = jnp.exp(sc)
            p = p / jnp.sum(p, axis=-1, keepdims=True)     # exact divide (parity)
            attn_ref[:, h * HD:(h + 1) * HD] = jnp.dot(p, vh, preferred_element_type=f32)
        attn_out = (jnp.dot(attn_ref[...].astype(bf16), wk_ref[i, :, 3 * D:4 * D],
                            preferred_element_type=f32) + proj_b)       # one proj matmul
        h2 = h2 + attn_out                                 # residual add in-kernel

        # --- MLP block: h <- h + c_proj(gelu_new(c_fc(ln_2(h)))) ---
        a = layer_norm(h2, ln2_g, ln2_b)
        ff = jnp.dot(a.astype(bf16), wk_ref[i, :, 4 * D:8 * D],
                     preferred_element_type=f32) + fc_b
        ff = gelu_new(ff)
        h2 = h2 + jnp.dot(ff.astype(bf16), wfc2_ref[i],
                          preferred_element_type=f32) + fc2_b

    # ---------- final GPT2 layer norm (last_hidden_state), staged for the gather ----------
    hf_ref[...] = layer_norm(h2, lnf_g, lnf_b)             # (RP, D)

    # ---------- hidden_layer: gather (BMP, N*D) with aligned slices, ONE matmul ----------
    for n in range(N):
        hid_in_ref[:, n * D:(n + 1) * D] = hf_ref[n * BMP:(n + 1) * BMP, :]
    hidden = (jnp.dot(hid_in_ref[...].astype(bf16), hid_w_ref[...],
                      preferred_element_type=f32) + hid_b)  # (BMP, HID)
    hidden_ref[...] = hidden

    # ---------- out_layer + RevIN de-normalize (stats never left VMEM) ----------
    y = jnp.dot(hidden, out_w_ref[...], preferred_element_type=f32) + out_b
    y_ref[...] = y * std + mean                             # (BMP, L)


# ---------------- parameters (deterministic synthetic init) ----------------
def init_params(key):
    ks = jax.random.split(key, 8)

    def w(k, shape, scale=0.02):
        return scale * jax.random.normal(k, shape, dtype=f32)

    return {
        "in_w": w(ks[0], (1, D)), "in_b": jnp.zeros((1, D), f32),
        "wpe": w(ks[1], (N, D)),
        "ln1_g": jnp.ones((NL, 1, D), f32), "ln1_b": jnp.zeros((NL, 1, D), f32),
        "attn_w": w(ks[2], (NL, D, 3 * D)), "attn_b": jnp.zeros((NL, 1, 3 * D), f32),
        "proj_w": w(ks[3], (NL, D, D)), "proj_b": jnp.zeros((NL, 1, D), f32),
        "ln2_g": jnp.ones((NL, 1, D), f32), "ln2_b": jnp.zeros((NL, 1, D), f32),
        "fc_w": w(ks[4], (NL, D, DFF)), "fc_b": jnp.zeros((NL, 1, DFF), f32),
        "fc2_w": w(ks[5], (NL, DFF, D)), "fc2_b": jnp.zeros((NL, 1, D), f32),
        "lnf_g": jnp.ones((1, D), f32), "lnf_b": jnp.zeros((1, D), f32),
        "hid_w": w(ks[6], (N * D, HID)), "hid_b": jnp.zeros((1, HID), f32),
        "out_w": w(ks[7], (HID, L)), "out_b": jnp.zeros((1, L), f32),
    }


# ---------------- pack weights/constants into a few DMA-friendly buffers ----------------
def pack_params(params):
    def head_major(t):  # reorder last-dim [Q|K|V] (D each) -> per-head [q_h|k_h|v_h]
        q, k, v = jnp.split(t, 3, axis=-1)
        def hm(u):
            return u.reshape(u.shape[:-1] + (NH, HD))
        return jnp.concatenate([hm(q), hm(k), hm(v)], axis=-1).reshape(t.shape)

    attn_w_hm = head_major(params["attn_w"])               # (NL, D, 3D)
    attn_b_hm = head_major(params["attn_b"])               # (NL, 1, 3D)

    # per-layer big weights along lanes: [attn_w | proj_w | fc_w] -> (NL, D, 8D)
    wk = jnp.concatenate([attn_w_hm, params["proj_w"], params["fc_w"]], axis=-1)
    # per-layer vectors along lanes -> (NL, 1, 9D + DFF) = (NL, 1, 832)
    vec = jnp.concatenate([params["ln1_g"], params["ln1_b"], attn_b_hm,
                           params["proj_b"], params["ln2_g"], params["ln2_b"],
                           params["fc_b"], params["fc2_b"]], axis=-1)
    # misc vectors -> (1, 3D + HID + L) = (1, 400)
    misc = jnp.concatenate([params["in_w"], params["lnf_g"], params["lnf_b"],
                            params["hid_b"], params["out_b"]], axis=-1)

    # compile-time constants: block-causal mask bias, tiled wpe + in_b, token time-pick
    r = np.arange(RP)
    n_of_r = r // BMP
    bm_of_r = r % BMP
    allowed = (bm_of_r[:, None] == bm_of_r[None, :]) & (n_of_r[None, :] <= n_of_r[:, None])
    mask_bias = np.where(allowed, 0.0, -1e9).astype(np.float32)          # (RP, RP)
    tok = np.zeros((RP, L), np.float32)
    tok[r, np.minimum(n_of_r, L - 1)] = 1.0                              # (RP, L)
    emb = params["in_b"] + jnp.repeat(params["wpe"], BMP, axis=0)        # (RP, D)
    const = jnp.concatenate([jnp.asarray(mask_bias), emb, jnp.asarray(tok)], axis=-1)

    return {
        "const": const.astype(f32),          # (RP, RP + D + L)
        "misc": misc.astype(f32),            # (1, 400)
        "wk": wk.astype(bf16),               # (NL, D, 8D)
        "wfc2": params["fc2_w"].astype(bf16),  # (NL, DFF, D)
        "vec": vec.astype(f32),              # (NL, 1, 832)
        "hid_w": params["hid_w"].astype(bf16),  # (N*D, HID)
        "out_w": params["out_w"].astype(f32),   # (HID, L)
    }


# ---------------- forward ----------------
def gpt4ts_forward(x, packed):
    Bx, Lx, Mx = x.shape
    assert (Bx, Lx, Mx) == (B, L, M), (Bx, Lx, Mx)

    # (B, L, M) -> (B*M, L) and pad the sequence axis to 8 rows so every in-kernel
    # tile is (8,128)-aligned.  Pure I/O plumbing; everything else is one Pallas call.
    x_t = jnp.transpose(x, (0, 2, 1)).reshape(BM, Lx)
    x_p = jnp.zeros((BMP, Lx), f32).at[:BM].set(x_t)

    args = (x_p, packed["const"], packed["misc"], packed["wk"], packed["wfc2"],
            packed["vec"], packed["hid_w"], packed["out_w"])

    hidden_p, y_p = pl.pallas_call(
        _gpt4ts_kernel,
        out_shape=(jax.ShapeDtypeStruct((BMP, HID), f32),   # hidden (padded rows)
                   jax.ShapeDtypeStruct((BMP, Lx), f32)),   # de-normalized forecast
        in_specs=[_VMEM] * len(args),
        out_specs=(_VMEM, _VMEM),
        scratch_shapes=[pltpu.VMEM((RP, 3 * D), f32),       # qkv (head-major)
                        pltpu.VMEM((RP, D), f32),           # merged head outputs
                        pltpu.VMEM((RP, D), f32),           # ln_f output (gather source)
                        pltpu.VMEM((BMP, N * D), f32)],     # hidden_layer input slab
    )(*args)

    hidden = hidden_p[:BM]
    outputs = y_p[:BM].reshape(Bx, Mx, Lx).transpose(0, 2, 1)   # '(b m) l -> b l m'
    return hidden, outputs


if __name__ == "__main__":
    key = jax.random.PRNGKey(0)
    pkey, xkey = jax.random.split(key)
    params = init_params(pkey)
    packed = pack_params(params)
    x = jax.random.normal(xkey, (B, L, M), dtype=f32)

    fwd = jax.jit(lambda inp: gpt4ts_forward(inp, packed))
    hidden, outputs = fwd(x)
    jax.block_until_ready((hidden, outputs))

    assert hidden.shape == (B * M, HID), hidden.shape
    assert outputs.shape == (B, L, M), outputs.shape
    assert bool(jnp.all(jnp.isfinite(hidden))) and bool(jnp.all(jnp.isfinite(outputs)))
    print("KERNEL_OK")
</pallas_src>

<mosaic_0001>
module attributes {stable_mosaic.version = 11 : i64} {
  func.func @_gpt4ts_kernel(%arg0: memref<8x8xf32, #tpu.memory_space<vmem>>, %arg1: memref<72x144xf32, #tpu.memory_space<vmem>>, %arg2: memref<1x400xf32, #tpu.memory_space<vmem>>, %arg3: memref<2x64x512xbf16, #tpu.memory_space<vmem>>, %arg4: memref<2x256x64xbf16, #tpu.memory_space<vmem>>, %arg5: memref<2x1x832xf32, #tpu.memory_space<vmem>>, %arg6: memref<576x200xbf16, #tpu.memory_space<vmem>>, %arg7: memref<200x8xf32, #tpu.memory_space<vmem>>, %arg8: memref<8x200xf32, #tpu.memory_space<vmem>>, %arg9: memref<8x8xf32, #tpu.memory_space<vmem>>, %arg10: memref<72x192xf32, #tpu.memory_space<vmem>>, %arg11: memref<72x64xf32, #tpu.memory_space<vmem>>, %arg12: memref<72x64xf32, #tpu.memory_space<vmem>>, %arg13: memref<8x576xf32, #tpu.memory_space<vmem>>) attributes {dimension_semantics = [], scalar_prefetch = 0 : i64, scratch_operands = 4 : i64, tpu.core_type = #tpu.core_type<tc>} {
    %c0 = arith.constant 0 : index
    %c0_0 = arith.constant 0 : index
    %0 = vector.load %arg0[%c0, %c0_0] : memref<8x8xf32, #tpu.memory_space<vmem>>, vector<8x8xf32>
    %cst = arith.constant dense<0.000000e+00> : vector<8xf32>
    %1 = vector.multi_reduction <add>, %0, %cst [1] : vector<8x8xf32> to vector<8xf32>
    %2 = vector.shape_cast %1 : vector<8xf32> to vector<8x1xf32>
    %cst_1 = arith.constant 8.000000e+00 : f32
    %3 = vector.broadcast %cst_1 : f32 to vector<8x1xf32>
    %4 = arith.divf %2, %3 : vector<8x1xf32>
    %5 = vector.broadcast %4 : vector<8x1xf32> to vector<8x8xf32>
    %6 = arith.subf %0, %5 : vector<8x8xf32>
    %7 = arith.mulf %6, %6 : vector<8x8xf32>
    %cst_2 = arith.constant dense<0.000000e+00> : vector<8xf32>
    %8 = vector.multi_reduction <add>, %7, %cst_2 [1] : vector<8x8xf32> to vector<8xf32>
    %9 = vector.shape_cast %8 : vector<8xf32> to vector<8x1xf32>
    %cst_3 = arith.constant 8.000000e+00 : f32
    %10 = vector.broadcast %cst_3 : f32 to vector<8x1xf32>
    %11 = arith.divf %9, %10 : vector<8x1xf32>
    %cst_4 = arith.constant 9.99999974E-6 : f32
    %12 = vector.broadcast %cst_4 : f32 to vector<8x1xf32>
    %13 = arith.addf %11, %12 : vector<8x1xf32>
    %14 = math.sqrt %13 : vector<8x1xf32>
    %15 = vector.broadcast %14 : vector<8x1xf32> to vector<8x8xf32>
    %16 = arith.divf %6, %15 : vector<8x8xf32>
    %c0_5 = arith.constant 0 : index
    %c0_6 = arith.constant 0 : index
    %17 = vector.load %arg1[%c0_5, %c0_6] : memref<72x144xf32, #tpu.memory_space<vmem>>, vector<72x72xf32>
    %c0_7 = arith.constant 0 : index
    %c72 = arith.constant 72 : index
    %18 = vector.load %arg1[%c0_7, %c72] : memref<72x144xf32, #tpu.memory_space<vmem>>, vector<72x64xf32>
    %c0_8 = arith.constant 0 : index
    %c136 = arith.constant 136 : index
    %19 = vector.load %arg1[%c0_8, %c136] : memref<72x144xf32, #tpu.memory_space<vmem>>, vector<72x8xf32>
    %c0_9 = arith.constant 0 : index
    %c0_10 = arith.constant 0 : index
    %20 = vector.load %arg2[%c0_9, %c0_10] : memref<1x400xf32, #tpu.memory_space<vmem>>, vector<1x64xf32>
    %c0_11 = arith.constant 0 : index
    %c64 = arith.constant 64 : index
    %21 = vector.load %arg2[%c0_11, %c64] : memref<1x400xf32, #tpu.memory_space<vmem>>, vector<1x64xf32>
    %c0_12 = arith.constant 0 : index
    %c128 = arith.constant 128 : index
    %22 = vector.load %arg2[%c0_12, %c128] : memref<1x400xf32, #tpu.memory_space<vmem>>, vector<1x64xf32>
    %c0_13 = arith.constant 0 : index
    %c192 = arith.constant 192 : index
    %23 = vector.load %arg2[%c0_13, %c192] : memref<1x400xf32, #tpu.memory_space<vmem>>, vector<1x200xf32>
    %c0_14 = arith.constant 0 : index
    %c392 = arith.constant 392 : index
    %24 = vector.load %arg2[%c0_14, %c392] : memref<1x400xf32, #tpu.memory_space<vmem>>, vector<1x8xf32>
    %25 = tpu.concatenate %16, %16, %16, %16, %16, %16, %16, %16, %16 in 0 : vector<8x8xf32>, vector<8x8xf32>, vector<8x8xf32>, vector<8x8xf32>, vector<8x8xf32>, vector<8x8xf32>, vector<8x8xf32>, vector<8x8xf32>, vector<8x8xf32> -> vector<72x8xf32>
    %26 = arith.mulf %19, %25 : vector<72x8xf32>
    %cst_15 = arith.constant dense<0.000000e+00> : vector<72xf32>
    %27 = vector.multi_reduction <add>, %26, %cst_15 [1] : vector<72x8xf32> to vector<72xf32>
    %28 = vector.shape_cast %27 : vector<72xf32> to vector<72x1xf32>
    %29 = vector.broadcast %28 : vector<72x1xf32> to vector<72x64xf32>
    %30 = vector.broadcast %20 : vector<1x64xf32> to vector<72x64xf32>
    %31 = arith.mulf %29, %30 : vector<72x64xf32>
    %32 = arith.addf %31, %18 : vector<72x64xf32>
    %c0_16 = arith.constant 0 : index
    %c0_17 = arith.constant 0 : index
    %c0_18 = arith.constant 0 : index
    %33 = vector.load %arg5[%c0_16, %c0_17, %c0_18] : memref<2x1x832xf32, #tpu.memory_space<vmem>>, vector<1x1x64xf32>
    %34 = vector.shape_cast %33 : vector<1x1x64xf32> to vector<1x64xf32>
    %c0_19 = arith.constant 0 : index
    %c0_20 = arith.constant 0 : index
    %c64_21 = arith.constant 64 : index
    %35 = vector.load %arg5[%c0_19, %c0_20, %c64_21] : memref<2x1x832xf32, #tpu.memory_space<vmem>>, vector<1x1x64xf32>
    %36 = vector.shape_cast %35 : vector<1x1x64xf32> to vector<1x64xf32>
    %c0_22 = arith.constant 0 : index
    %c0_23 = arith.constant 0 : index
    %c128_24 = arith.constant 128 : index
    %37 = vector.load %arg5[%c0_22, %c0_23, %c128_24] : memref<2x1x832xf32, #tpu.memory_space<vmem>>, vector<1x1x192xf32>
    %38 = vector.shape_cast %37 : vector<1x1x192xf32> to vector<1x192xf32>
    %c0_25 = arith.constant 0 : index
    %c0_26 = arith.constant 0 : index
    %c320 = arith.constant 320 : index
    %39 = vector.load %arg5[%c0_25, %c0_26, %c320] : memref<2x1x832xf32, #tpu.memory_space<vmem>>, vector<1x1x64xf32>
    %40 = vector.shape_cast %39 : vector<1x1x64xf32> to vector<1x64xf32>
    %c0_27 = arith.constant 0 : index
    %c0_28 = arith.constant 0 : index
    %c384 = arith.constant 384 : index
    %41 = vector.load %arg5[%c0_27, %c0_28, %c384] : memref<2x1x832xf32, #tpu.memory_space<vmem>>, vector<1x1x64xf32>
    %42 = vector.shape_cast %41 : vector<1x1x64xf32> to vector<1x64xf32>
    %c0_29 = arith.constant 0 : index
    %c0_30 = arith.constant 0 : index
    %c448 = arith.constant 448 : index
    %43 = vector.load %arg5[%c0_29, %c0_30, %c448] : memref<2x1x832xf32, #tpu.memory_space<vmem>>, vector<1x1x64xf32>
    %44 = vector.shape_cast %43 : vector<1x1x64xf32> to vector<1x64xf32>
    %c0_31 = arith.constant 0 : index
    %c0_32 = arith.constant 0 : index
    %c512 = arith.constant 512 : index
    %45 = vector.load %arg5[%c0_31, %c0_32, %c512] : memref<2x1x832xf32, #tpu.memory_space<vmem>>, vector<1x1x256xf32>
    %46 = vector.shape_cast %45 : vector<1x1x256xf32> to vector<1x256xf32>
    %c0_33 = arith.constant 0 : index
    %c0_34 = arith.constant 0 : index
    %c768 = arith.constant 768 : index
    %47 = vector.load %arg5[%c0_33, %c0_34, %c768] : memref<2x1x832xf32, #tpu.memory_space<vmem>>, vector<1x1x64xf32>
    %48 = vector.shape_cast %47 : vector<1x1x64xf32> to vector<1x64xf32>
    %cst_35 = arith.constant dense<0.000000e+00> : vector<72xf32>
    %49 = vector.multi_reduction <add>, %32, %cst_35 [1] : vector<72x64xf32> to vector<72xf32>
    %50 = vector.shape_cast %49 : vector<72xf32> to vector<72x1xf32>
    %cst_36 = arith.constant 6.400000e+01 : f32
    %51 = vector.broadcast %cst_36 : f32 to vector<72x1xf32>
    %52 = arith.divf %50, %51 : vector<72x1xf32>
    %53 = vector.broadcast %52 : vector<72x1xf32> to vector<72x64xf32>
    %54 = arith.subf %32, %53 : vector<72x64xf32>
    %55 = arith.mulf %54, %54 : vector<72x64xf32>
    %cst_37 = arith.constant dense<0.000000e+00> : vector<72xf32>
    %56 = vector.multi_reduction <add>, %55, %cst_37 [1] : vector<72x64xf32> to vector<72xf32>
    %57 = vector.shape_cast %56 : vector<72xf32> to vector<72x1xf32>
    %cst_38 = arith.constant 6.400000e+01 : f32
    %58 = vector.broadcast %cst_38 : f32 to vector<72x1xf32>
    %59 = arith.divf %57, %58 : vector<72x1xf32>
    %cst_39 = arith.constant 9.99999974E-6 : f32
    %60 = vector.broadcast %cst_39 : f32 to vector<72x1xf32>
    %61 = arith.addf %59, %60 : vector<72x1xf32>
    %62 = math.rsqrt %61 : vector<72x1xf32>
    %63 = vector.broadcast %62 : vector<72x1xf32> to vector<72x64xf32>
    %64 = arith.mulf %54, %63 : vector<72x64xf32>
    %65 = vector.broadcast %34 : vector<1x64xf32> to vector<72x64xf32>
    %66 = arith.mulf %64, %65 : vector<72x64xf32>
    %67 = vector.broadcast %36 : vector<1x64xf32> to vector<72x64xf32>
    %68 = arith.addf %66, %67 : vector<72x64xf32>
    %69 = arith.truncf %68 : vector<72x64xf32> to vector<72x64xbf16>
    %c0_40 = arith.constant 0 : index
    %c0_41 = arith.constant 0 : index
    %c0_42 = arith.constant 0 : index
    %70 = vector.load %arg3[%c0_40, %c0_41, %c0_42] : memref<2x64x512xbf16, #tpu.memory_space<vmem>>, vector<1x64x192xbf16>
    %71 = vector.shape_cast %70 : vector<1x64x192xbf16> to vector<64x192xbf16>
    %cst_43 = arith.constant dense<0.000000e+00> : vector<72x192xf32>
    %72 = tpu.matmul %69, %71, %cst_43 {dimension_numbers = #tpu.dot_dimension_numbers<[1], [0], [0], [1], [0, 0, 1, 1], [], []>} : vector<72x64xbf16>, vector<64x192xbf16>, vector<72x192xf32> -> vector<72x192xf32>
    %73 = vector.broadcast %38 : vector<1x192xf32> to vector<72x192xf32>
    %74 = arith.addf %72, %73 : vector<72x192xf32>
    %c0_44 = arith.constant 0 : index
    %c0_45 = arith.constant 0 : index
    %75 = vector.load %arg10[%c0_44, %c0_45] : memref<72x192xf32, #tpu.memory_space<vmem>>, vector<72x192xf32>
    tpu.vector_store %arg10[%c0_44, %c0_45], %74 {strides = array<i32>} : memref<72x192xf32, #tpu.memory_space<vmem>>, vector<72x192xf32>,
    %c0_46 = arith.constant 0 : index
    %c0_47 = arith.constant 0 : index
    %76 = vector.load %arg10[%c0_46, %c0_47] : memref<72x192xf32, #tpu.memory_space<vmem>>, vector<72x16xf32>
    %c0_48 = arith.constant 0 : index
    %c16 = arith.constant 16 : index
    %77 = vector.load %arg10[%c0_48, %c16] : memref<72x192xf32, #tpu.memory_space<vmem>>, vector<72x16xf32>
    %c0_49 = arith.constant 0 : index
    %c32 = arith.constant 32 : index
    %78 = vector.load %arg10[%c0_49, %c32] : memref<72x192xf32, #tpu.memory_space<vmem>>, vector<72x16xf32>
    %cst_50 = arith.constant dense<0.000000e+00> : vector<72x72xf32>
    %79 = tpu.matmul %76, %77, %cst_50 {dimension_numbers = #tpu.dot_dimension_numbers<[1], [1], [0], [0], [0, 0, 1, 0], [], []>} : vector<72x16xf32>, vector<72x16xf32>, vector<72x72xf32> -> vector<72x72xf32>
    %cst_51 = arith.constant 2.500000e-01 : f32
    %80 = vector.broadcast %cst_51 : f32 to vector<72x72xf32>
    %81 = arith.mulf %79, %80 : vector<72x72xf32>
    %82 = arith.addf %81, %17 : vector<72x72xf32>
    %cst_52 = arith.constant dense<0xFF800000> : vector<72xf32>
    %83 = vector.multi_reduction <maximumf>, %82, %cst_52 [1] : vector<72x72xf32> to vector<72xf32>
    %84 = vector.shape_cast %83 : vector<72xf32> to vector<72x1xf32>
    %85 = vector.broadcast %84 : vector<72x1xf32> to vector<72x72xf32>
    %86 = arith.subf %82, %85 : vector<72x72xf32>
    %87 = math.exp %86 : vector<72x72xf32>
    %cst_53 = arith.constant dense<0.000000e+00> : vector<72xf32>
    %88 = vector.multi_reduction <add>, %87, %cst_53 [1] : vector<72x72xf32> to vector<72xf32>
    %89 = vector.shape_cast %88 : vector<72xf32> to vector<72x1xf32>
    %90 = vector.broadcast %89 : vector<72x1xf32> to vector<72x72xf32>
    %91 = arith.divf %87, %90 : vector<72x72xf32>
    %cst_54 = arith.constant dense<0.000000e+00> : vector<72x16xf32>
    %92 = tpu.matmul %91, %78, %cst_54 {dimension_numbers = #tpu.dot_dimension_numbers<[1], [0], [0], [1], [0, 0, 1, 1], [], []>} : vector<72x72xf32>, vector<72x16xf32>, vector<72x16xf32> -> vector<72x16xf32>
    %c0_55 = arith.constant 0 : index
    %c0_56 = arith.constant 0 : index
    %93 = vector.load %arg11[%c0_55, %c0_56] : memref<72x64xf32, #tpu.memory_space<vmem>>, vector<72x16xf32>
    tpu.vector_store %arg11[%c0_55, %c0_56], %92 {strides = array<i32>} : memref<72x64xf32, #tpu.memory_space<vmem>>, vector<72x16xf32>,
    %c0_57 = arith.constant 0 : index
    %c48 = arith.constant 48 : index
    %94 = vector.load %arg10[%c0_57, %c48] : memref<72x192xf32, #tpu.memory_space<vmem>>, vector<72x16xf32>
    %c0_58 = arith.constant 0 : index
    %c64_59 = arith.constant 64 : index
    %95 = vector.load %arg10[%c0_58, %c64_59] : memref<72x192xf32, #tpu.memory_space<vmem>>, vector<72x16xf32>
    %c0_60 = arith.constant 0 : index
    %c80 = arith.constant 80 : index
    %96 = vector.load %arg10[%c0_60, %c80] : memref<72x192xf32, #tpu.memory_space<vmem>>, vector<72x16xf32>
    %cst_61 = arith.constant dense<0.000000e+00> : vector<72x72xf32>
    %97 = tpu.matmul %94, %95, %cst_61 {dimension_numbers = #tpu.dot_dimension_numbers<[1], [1], [0], [0], [0, 0, 1, 0], [], []>} : vector<72x16xf32>, vector<72x16xf32>, vector<72x72xf32> -> vector<72x72xf32>
    %cst_62 = arith.constant 2.500000e-01 : f32
    %98 = vector.broadcast %cst_62 : f32 to vector<72x72xf32>
    %99 = arith.mulf %97, %98 : vector<72x72xf32>
    %100 = arith.addf %99, %17 : vector<72x72xf32>
    %cst_63 = arith.constant dense<0xFF800000> : vector<72xf32>
    %101 = vector.multi_reduction <maximumf>, %100, %cst_63 [1] : vector<72x72xf32> to vector<72xf32>
    %102 = vector.shape_cast %101 : vector<72xf32> to vector<72x1xf32>
    %103 = vector.broadcast %102 : vector<72x1xf32> to vector<72x72xf32>
    %104 = arith.subf %100, %103 : vector<72x72xf32>
    %105 = math.exp %104 : vector<72x72xf32>
    %cst_64 = arith.constant dense<0.000000e+00> : vector<72xf32>
    %106 = vector.multi_reduction <add>, %105, %cst_64 [1] : vector<72x72xf32> to vector<72xf32>
    %107 = vector.shape_cast %106 : vector<72xf32> to vector<72x1xf32>
    %108 = vector.broadcast %107 : vector<72x1xf32> to vector<72x72xf32>
    %109 = arith.divf %105, %108 : vector<72x72xf32>
    %cst_65 = arith.constant dense<0.000000e+00> : vector<72x16xf32>
    %110 = tpu.matmul %109, %96, %cst_65 {dimension_numbers = #tpu.dot_dimension_numbers<[1], [0], [0], [1], [0, 0, 1, 1], [], []>} : vector<72x72xf32>, vector<72x16xf32>, vector<72x16xf32> -> vector<72x16xf32>
    %c0_66 = arith.constant 0 : index
    %c16_67 = arith.constant 16 : index
    %111 = vector.load %arg11[%c0_66, %c16_67] : memref<72x64xf32, #tpu.memory_space<vmem>>, vector<72x16xf32>
    tpu.vector_store %arg11[%c0_66, %c16_67], %110 {strides = array<i32>} : memref<72x64xf32, #tpu.memory_space<vmem>>, vector<72x16xf32>,
    %c0_68 = arith.constant 0 : index
    %c96 = arith.constant 96 : index
    %112 = vector.load %arg10[%c0_68, %c96] : memref<72x192xf32, #tpu.memory_space<vmem>>, vector<72x16xf32>
    %c0_69 = arith.constant 0 : index
    %c112 = arith.constant 112 : index
    %113 = vector.load %arg10[%c0_69, %c112] : memref<72x192xf32, #tpu.memory_space<vmem>>, vector<72x16xf32>
    %c0_70 = arith.constant 0 : index
    %c128_71 = arith.constant 128 : index
    %114 = vector.load %arg10[%c0_70, %c128_71] : memref<72x192xf32, #tpu.memory_space<vmem>>, vector<72x16xf32>
    %cst_72 = arith.constant dense<0.000000e+00> : vector<72x72xf32>
    %115 = tpu.matmul %112, %113, %cst_72 {dimension_numbers = #tpu.dot_dimension_numbers<[1], [1], [0], [0], [0, 0, 1, 0], [], []>} : vector<72x16xf32>, vector<72x16xf32>, vector<72x72xf32> -> vector<72x72xf32>
    %cst_73 = arith.constant 2.500000e-01 : f32
    %116 = vector.broadcast %cst_73 : f32 to vector<72x72xf32>
    %117 = arith.mulf %115, %116 : vector<72x72xf32>
    %118 = arith.addf %117, %17 : vector<72x72xf32>
    %cst_74 = arith.constant dense<0xFF800000> : vector<72xf32>
    %119 = vector.multi_reduction <maximumf>, %118, %cst_74 [1] : vector<72x72xf32> to vector<72xf32>
    %120 = vector.shape_cast %119 : vector<72xf32> to vector<72x1xf32>
    %121 = vector.broadcast %120 : vector<72x1xf32> to vector<72x72xf32>
    %122 = arith.subf %118, %121 : vector<72x72xf32>
    %123 = math.exp %122 : vector<72x72xf32>
    %cst_75 = arith.constant dense<0.000000e+00> : vector<72xf32>
    %124 = vector.multi_reduction <add>, %123, %cst_75 [1] : vector<72x72xf32> to vector<72xf32>
    %125 = vector.shape_cast %124 : vector<72xf32> to vector<72x1xf32>
    %126 = vector.broadcast %125 : vector<72x1xf32> to vector<72x72xf32>
    %127 = arith.divf %123, %126 : vector<72x72xf32>
    %cst_76 = arith.constant dense<0.000000e+00> : vector<72x16xf32>
    %128 = tpu.matmul %127, %114, %cst_76 {dimension_numbers = #tpu.dot_dimension_numbers<[1], [0], [0], [1], [0, 0, 1, 1], [], []>} : vector<72x72xf32>, vector<72x16xf32>, vector<72x16xf32> -> vector<72x16xf32>
    %c0_77 = arith.constant 0 : index
    %c32_78 = arith.constant 32 : index
    %129 = vector.load %arg11[%c0_77, %c32_78] : memref<72x64xf32, #tpu.memory_space<vmem>>, vector<72x16xf32>
    tpu.vector_store %arg11[%c0_77, %c32_78], %128 {strides = array<i32>} : memref<72x64xf32, #tpu.memory_space<vmem>>, vector<72x16xf32>,
    %c0_79 = arith.constant 0 : index
    %c144 = arith.constant 144 : index
    %130 = vector.load %arg10[%c0_79, %c144] : memref<72x192xf32, #tpu.memory_space<vmem>>, vector<72x16xf32>
    %c0_80 = arith.constant 0 : index
    %c160 = arith.constant 160 : index
    %131 = vector.load %arg10[%c0_80, %c160] : memref<72x192xf32, #tpu.memory_space<vmem>>, vector<72x16xf32>
    %c0_81 = arith.constant 0 : index
    %c176 = arith.constant 176 : index
    %132 = vector.load %arg10[%c0_81, %c176] : memref<72x192xf32, #tpu.memory_space<vmem>>, vector<72x16xf32>
    %cst_82 = arith.constant dense<0.000000e+00> : vector<72x72xf32>
    %133 = tpu.matmul %130, %131, %cst_82 {dimension_numbers = #tpu.dot_dimension_numbers<[1], [1], [0], [0], [0, 0, 1, 0], [], []>} : vector<72x16xf32>, vector<72x16xf32>, vector<72x72xf32> -> vector<72x72xf32>
    %cst_83 = arith.constant 2.500000e-01 : f32
    %134 = vector.broadcast %cst_83 : f32 to vector<72x72xf32>
    %135 = arith.mulf %133, %134 : vector<72x72xf32>
    %136 = arith.addf %135, %17 : vector<72x72xf32>
    %cst_84 = arith.constant dense<0xFF800000> : vector<72xf32>
    %137 = vector.multi_reduction <maximumf>, %136, %cst_84 [1] : vector<72x72xf32> to vector<72xf32>
    %138 = vector.shape_cast %137 : vector<72xf32> to vector<72x1xf32>
    %139 = vector.broadcast %138 : vector<72x1xf32> to vector<72x72xf32>
    %140 = arith.subf %136, %139 : vector<72x72xf32>
    %141 = math.exp %140 : vector<72x72xf32>
    %cst_85 = arith.constant dense<0.000000e+00> : vector<72xf32>
    %142 = vector.multi_reduction <add>, %141, %cst_85 [1] : vector<72x72xf32> to vector<72xf32>
    %143 = vector.shape_cast %142 : vector<72xf32> to vector<72x1xf32>
    %144 = vector.broadcast %143 : vector<72x1xf32> to vector<72x72xf32>
    %145 = arith.divf %141, %144 : vector<72x72xf32>
    %cst_86 = arith.constant dense<0.000000e+00> : vector<72x16xf32>
    %146 = tpu.matmul %145, %132, %cst_86 {dimension_numbers = #tpu.dot_dimension_numbers<[1], [0], [0], [1], [0, 0, 1, 1], [], []>} : vector<72x72xf32>, vector<72x16xf32>, vector<72x16xf32> -> vector<72x16xf32>
    %c0_87 = arith.constant 0 : index
    %c48_88 = arith.constant 48 : index
    %147 = vector.load %arg11[%c0_87, %c48_88] : memref<72x64xf32, #tpu.memory_space<vmem>>, vector<72x16xf32>
    tpu.vector_store %arg11[%c0_87, %c48_88], %146 {strides = array<i32>} : memref<72x64xf32, #tpu.memory_space<vmem>>, vector<72x16xf32>,
    %c0_89 = arith.constant 0 : index
    %c0_90 = arith.constant 0 : index
    %148 = vector.load %arg11[%c0_89, %c0_90] : memref<72x64xf32, #tpu.memory_space<vmem>>, vector<72x64xf32>
    %149 = arith.truncf %148 : vector<72x64xf32> to vector<72x64xbf16>
    %c0_91 = arith.constant 0 : index
    %c0_92 = arith.constant 0 : index
    %c192_93 = arith.constant 192 : index
    %150 = vector.load %arg3[%c0_91, %c0_92, %c192_93] : memref<2x64x512xbf16, #tpu.memory_space<vmem>>, vector<1x64x64xbf16>
    %151 = vector.shape_cast %150 : vector<1x64x64xbf16> to vector<64x64xbf16>
    %cst_94 = arith.constant dense<0.000000e+00> : vector<72x64xf32>
    %152 = tpu.matmul %149, %151, %cst_94 {dimension_numbers = #tpu.dot_dimension_numbers<[1], [0], [0], [1], [0, 0, 1, 1], [], []>} : vector<72x64xbf16>, vector<64x64xbf16>, vector<72x64xf32> -> vector<72x64xf32>
    %153 = vector.broadcast %40 : vector<1x64xf32> to vector<72x64xf32>
    %154 = arith.addf %152, %153 : vector<72x64xf32>
    %155 = arith.addf %32, %154 : vector<72x64xf32>
    %cst_95 = arith.constant dense<0.000000e+00> : vector<72xf32>
    %156 = vector.multi_reduction <add>, %155, %cst_95 [1] : vector<72x64xf32> to vector<72xf32>
    %157 = vector.shape_cast %156 : vector<72xf32> to vector<72x1xf32>
    %cst_96 = arith.constant 6.400000e+01 : f32
    %158 = vector.broadcast %cst_96 : f32 to vector<72x1xf32>
    %159 = arith.divf %157, %158 : vector<72x1xf32>
    %160 = vector.broadcast %159 : vector<72x1xf32> to vector<72x64xf32>
    %161 = arith.subf %155, %160 : vector<72x64xf32>
    %162 = arith.mulf %161, %161 : vector<72x64xf32>
    %cst_97 = arith.constant dense<0.000000e+00> : vector<72xf32>
    %163 = vector.multi_reduction <add>, %162, %cst_97 [1] : vector<72x64xf32> to vector<72xf32>
    %164 = vector.shape_cast %163 : vector<72xf32> to vector<72x1xf32>
    %cst_98 = arith.constant 6.400000e+01 : f32
    %165 = vector.broadcast %cst_98 : f32 to vector<72x1xf32>
    %166 = arith.divf %164, %165 : vector<72x1xf32>
    %cst_99 = arith.constant 9.99999974E-6 : f32
    %167 = vector.broadcast %cst_99 : f32 to vector<72x1xf32>
    %168 = arith.addf %166, %167 : vector<72x1xf32>
    %169 = math.rsqrt %168 : vector<72x1xf32>
    %170 = vector.broadcast %169 : vector<72x1xf32> to vector<72x64xf32>
    %171 = arith.mulf %161, %170 : vector<72x64xf32>
    %172 = vector.broadcast %42 : vector<1x64xf32> to vector<72x64xf32>
    %173 = arith.mulf %171, %172 : vector<72x64xf32>
    %174 = vector.broadcast %44 : vector<1x64xf32> to vector<72x64xf32>
    %175 = arith.addf %173, %174 : vector<72x64xf32>
    %176 = arith.truncf %175 : vector<72x64xf32> to vector<72x64xbf16>
    %c0_100 = arith.constant 0 : index
    %c0_101 = arith.constant 0 : index
    %c256 = arith.constant 256 : index
    %177 = vector.load %arg3[%c0_100, %c0_101, %c256] : memref<2x64x512xbf16, #tpu.memory_space<vmem>>, vector<1x64x256xbf16>
    %178 = vector.shape_cast %177 : vector<1x64x256xbf16> to vector<64x256xbf16>
    %cst_102 = arith.constant dense<0.000000e+00> : vector<72x256xf32>
    %179 = tpu.matmul %176, %178, %cst_102 {dimension_numbers = #tpu.dot_dimension_numbers<[1], [0], [0], [1], [0, 0, 1, 1], [], []>} : vector<72x64xbf16>, vector<64x256xbf16>, vector<72x256xf32> -> vector<72x256xf32>
    %180 = vector.broadcast %46 : vector<1x256xf32> to vector<72x256xf32>
    %181 = arith.addf %179, %180 : vector<72x256xf32>
    %cst_103 = arith.constant 5.000000e-01 : f32
    %182 = vector.broadcast %cst_103 : f32 to vector<72x256xf32>
    %183 = arith.mulf %182, %181 : vector<72x256xf32>
    %cst_104 = arith.constant 4.471500e-02 : f32
    %184 = vector.broadcast %cst_104 : f32 to vector<72x256xf32>
    %185 = arith.mulf %184, %181 : vector<72x256xf32>
    %186 = arith.mulf %185, %181 : vector<72x256xf32>
    %187 = arith.mulf %186, %181 : vector<72x256xf32>
    %188 = arith.addf %181, %187 : vector<72x256xf32>
    %cst_105 = arith.constant 0.797884583 : f32
    %189 = vector.broadcast %cst_105 : f32 to vector<72x256xf32>
    %190 = arith.mulf %189, %188 : vector<72x256xf32>
    %191 = math.tanh %190 : vector<72x256xf32>
    %cst_106 = arith.constant 1.000000e+00 : f32
    %192 = vector.broadcast %cst_106 : f32 to vector<72x256xf32>
    %193 = arith.addf %192, %191 : vector<72x256xf32>
    %194 = arith.mulf %183, %193 : vector<72x256xf32>
    %195 = arith.truncf %194 : vector<72x256xf32> to vector<72x256xbf16>
    %c0_107 = arith.constant 0 : index
    %c0_108 = arith.constant 0 : index
    %c0_109 = arith.constant 0 : index
    %196 = vector.load %arg4[%c0_107, %c0_108, %c0_109] : memref<2x256x64xbf16, #tpu.memory_space<vmem>>, vector<1x256x64xbf16>
    %197 = vector.shape_cast %196 : vector<1x256x64xbf16> to vector<256x64xbf16>
    %cst_110 = arith.constant dense<0.000000e+00> : vector<72x64xf32>
    %198 = tpu.matmul %195, %197, %cst_110 {dimension_numbers = #tpu.dot_dimension_numbers<[1], [0], [0], [1], [0, 0, 1, 1], [], []>} : vector<72x256xbf16>, vector<256x64xbf16>, vector<72x64xf32> -> vector<72x64xf32>
    %199 = arith.addf %155, %198 : vector<72x64xf32>
    %200 = vector.broadcast %48 : vector<1x64xf32> to vector<72x64xf32>
    %201 = arith.addf %199, %200 : vector<72x64xf32>
    %c1 = arith.constant 1 : index
    %c0_111 = arith.constant 0 : index
    %c0_112 = arith.constant 0 : index
    %202 = vector.load %arg5[%c1, %c0_111, %c0_112] : memref<2x1x832xf32, #tpu.memory_space<vmem>>, vector<1x1x64xf32>
    %203 = vector.shape_cast %202 : vector<1x1x64xf32> to vector<1x64xf32>
    %c1_113 = arith.constant 1 : index
    %c0_114 = arith.constant 0 : index
    %c64_115 = arith.constant 64 : index
    %204 = vector.load %arg5[%c1_113, %c0_114, %c64_115] : memref<2x1x832xf32, #tpu.memory_space<vmem>>, vector<1x1x64xf32>
    %205 = vector.shape_cast %204 : vector<1x1x64xf32> to vector<1x64xf32>
    %c1_116 = arith.constant 1 : index
    %c0_117 = arith.constant 0 : index
    %c128_118 = arith.constant 128 : index
    %206 = vector.load %arg5[%c1_116, %c0_117, %c128_118] : memref<2x1x832xf32, #tpu.memory_space<vmem>>, vector<1x1x192xf32>
    %207 = vector.shape_cast %206 : vector<1x1x192xf32> to vector<1x192xf32>
    %c1_119 = arith.constant 1 : index
    %c0_120 = arith.constant 0 : index
    %c320_121 = arith.constant 320 : index
    %208 = vector.load %arg5[%c1_119, %c0_120, %c320_121] : memref<2x1x832xf32, #tpu.memory_space<vmem>>, vector<1x1x64xf32>
    %209 = vector.shape_cast %208 : vector<1x1x64xf32> to vector<1x64xf32>
    %c1_122 = arith.constant 1 : index
    %c0_123 = arith.constant 0 : index
    %c384_124 = arith.constant 384 : index
    %210 = vector.load %arg5[%c1_122, %c0_123, %c384_124] : memref<2x1x832xf32, #tpu.memory_space<vmem>>, vector<1x1x64xf32>
    %211 = vector.shape_cast %210 : vector<1x1x64xf32> to vector<1x64xf32>
    %c1_125 = arith.constant 1 : index
    %c0_126 = arith.constant 0 : index
    %c448_127 = arith.constant 448 : index
    %212 = vector.load %arg5[%c1_125, %c0_126, %c448_127] : memref<2x1x832xf32, #tpu.memory_space<vmem>>, vector<1x1x64xf32>
    %213 = vector.shape_cast %212 : vector<1x1x64xf32> to vector<1x64xf32>
    %c1_128 = arith.constant 1 : index
    %c0_129 = arith.constant 0 : index
    %c512_130 = arith.constant 512 : index
    %214 = vector.load %arg5[%c1_128, %c0_129, %c512_130] : memref<2x1x832xf32, #tpu.memory_space<vmem>>, vector<1x1x256xf32>
    %215 = vector.shape_cast %214 : vector<1x1x256xf32> to vector<1x256xf32>
    %c1_131 = arith.constant 1 : index
    %c0_132 = arith.constant 0 : index
    %c768_133 = arith.constant 768 : index
    %216 = vector.load %arg5[%c1_131, %c0_132, %c768_133] : memref<2x1x832xf32, #tpu.memory_space<vmem>>, vector<1x1x64xf32>
    %217 = vector.shape_cast %216 : vector<1x1x64xf32> to vector<1x64xf32>
    %cst_134 = arith.constant dense<0.000000e+00> : vector<72xf32>
    %218 = vector.multi_reduction <add>, %201, %cst_134 [1] : vector<72x64xf32> to vector<72xf32>
    %219 = vector.shape_cast %218 : vector<72xf32> to vector<72x1xf32>
    %cst_135 = arith.constant 6.400000e+01 : f32
    %220 = vector.broadcast %cst_135 : f32 to vector<72x1xf32>
    %221 = arith.divf %219, %220 : vector<72x1xf32>
    %222 = vector.broadcast %221 : vector<72x1xf32> to vector<72x64xf32>
    %223 = arith.subf %201, %222 : vector<72x64xf32>
    %224 = arith.mulf %223, %223 : vector<72x64xf32>
    %cst_136 = arith.constant dense<0.000000e+00> : vector<72xf32>
    %225 = vector.multi_reduction <add>, %224, %cst_136 [1] : vector<72x64xf32> to vector<72xf32>
    %226 = vector.shape_cast %225 : vector<72xf32> to vector<72x1xf32>
    %cst_137 = arith.constant 6.400000e+01 : f32
    %227 = vector.broadcast %cst_137 : f32 to vector<72x1xf32>
    %228 = arith.divf %226, %227 : vector<72x1xf32>
    %cst_138 = arith.constant 9.99999974E-6 : f32
    %229 = vector.broadcast %cst_138 : f32 to vector<72x1xf32>
    %230 = arith.addf %228, %229 : vector<72x1xf32>
    %231 = math.rsqrt %230 : vector<72x1xf32>
    %232 = vector.broadcast %231 : vector<72x1xf32> to vector<72x64xf32>
    %233 = arith.mulf %223, %232 : vector<72x64xf32>
    %234 = vector.broadcast %203 : vector<1x64xf32> to vector<72x64xf32>
    %235 = arith.mulf %233, %234 : vector<72x64xf32>
    %236 = vector.broadcast %205 : vector<1x64xf32> to vector<72x64xf32>
    %237 = arith.addf %235, %236 : vector<72x64xf32>
    %238 = arith.truncf %237 : vector<72x64xf32> to vector<72x64xbf16>
    %c1_139 = arith.constant 1 : index
    %c0_140 = arith.constant 0 : index
    %c0_141 = arith.constant 0 : index
    %239 = vector.load %arg3[%c1_139, %c0_140, %c0_141] : memref<2x64x512xbf16, #tpu.memory_space<vmem>>, vector<1x64x192xbf16>
    %240 = vector.shape_cast %239 : vector<1x64x192xbf16> to vector<64x192xbf16>
    %cst_142 = arith.constant dense<0.000000e+00> : vector<72x192xf32>
    %241 = tpu.matmul %238, %240, %cst_142 {dimension_numbers = #tpu.dot_dimension_numbers<[1], [0], [0], [1], [0, 0, 1, 1], [], []>} : vector<72x64xbf16>, vector<64x192xbf16>, vector<72x192xf32> -> vector<72x192xf32>
    %242 = vector.broadcast %207 : vector<1x192xf32> to vector<72x192xf32>
    %243 = arith.addf %241, %242 : vector<72x192xf32>
    %c0_143 = arith.constant 0 : index
    %c0_144 = arith.constant 0 : index
    %244 = vector.load %arg10[%c0_143, %c0_144] : memref<72x192xf32, #tpu.memory_space<vmem>>, vector<72x192xf32>
    tpu.vector_store %arg10[%c0_143, %c0_144], %243 {strides = array<i32>} : memref<72x192xf32, #tpu.memory_space<vmem>>, vector<72x192xf32>,
    %c0_145 = arith.constant 0 : index
    %c0_146 = arith.constant 0 : index
    %245 = vector.load %arg10[%c0_145, %c0_146] : memref<72x192xf32, #tpu.memory_space<vmem>>, vector<72x16xf32>
    %c0_147 = arith.constant 0 : index
    %c16_148 = arith.constant 16 : index
    %246 = vector.load %arg10[%c0_147, %c16_148] : memref<72x192xf32, #tpu.memory_space<vmem>>, vector<72x16xf32>
    %c0_149 = arith.constant 0 : index
    %c32_150 = arith.constant 32 : index
    %247 = vector.load %arg10[%c0_149, %c32_150] : memref<72x192xf32, #tpu.memory_space<vmem>>, vector<72x16xf32>
    %cst_151 = arith.constant dense<0.000000e+00> : vector<72x72xf32>
    %248 = tpu.matmul %245, %246, %cst_151 {dimension_numbers = #tpu.dot_dimension_numbers<[1], [1], [0], [0], [0, 0, 1, 0], [], []>} : vector<72x16xf32>, vector<72x16xf32>, vector<72x72xf32> -> vector<72x72xf32>
    %cst_152 = arith.constant 2.500000e-01 : f32
    %249 = vector.broadcast %cst_152 : f32 to vector<72x72xf32>
    %250 = arith.mulf %248, %249 : vector<72x72xf32>
    %251 = arith.addf %250, %17 : vector<72x72xf32>
    %cst_153 = arith.constant dense<0xFF800000> : vector<72xf32>
    %252 = vector.multi_reduction <maximumf>, %251, %cst_153 [1] : vector<72x72xf32> to vector<72xf32>
    %253 = vector.shape_cast %252 : vector<72xf32> to vector<72x1xf32>
    %254 = vector.broadcast %253 : vector<72x1xf32> to vector<72x72xf32>
    %255 = arith.subf %251, %254 : vector<72x72xf32>
    %256 = math.exp %255 : vector<72x72xf32>
    %cst_154 = arith.constant dense<0.000000e+00> : vector<72xf32>
    %257 = vector.multi_reduction <add>, %256, %cst_154 [1] : vector<72x72xf32> to vector<72xf32>
    %258 = vector.shape_cast %257 : vector<72xf32> to vector<72x1xf32>
    %259 = vector.broadcast %258 : vector<72x1xf32> to vector<72x72xf32>
    %260 = arith.divf %256, %259 : vector<72x72xf32>
    %cst_155 = arith.constant dense<0.000000e+00> : vector<72x16xf32>
    %261 = tpu.matmul %260, %247, %cst_155 {dimension_numbers = #tpu.dot_dimension_numbers<[1], [0], [0], [1], [0, 0, 1, 1], [], []>} : vector<72x72xf32>, vector<72x16xf32>, vector<72x16xf32> -> vector<72x16xf32>
    %c0_156 = arith.constant 0 : index
    %c0_157 = arith.constant 0 : index
    %262 = vector.load %arg11[%c0_156, %c0_157] : memref<72x64xf32, #tpu.memory_space<vmem>>, vector<72x16xf32>
    tpu.vector_store %arg11[%c0_156, %c0_157], %261 {strides = array<i32>} : memref<72x64xf32, #tpu.memory_space<vmem>>, vector<72x16xf32>,
    %c0_158 = arith.constant 0 : index
    %c48_159 = arith.constant 48 : index
    %263 = vector.load %arg10[%c0_158, %c48_159] : memref<72x192xf32, #tpu.memory_space<vmem>>, vector<72x16xf32>
    %c0_160 = arith.constant 0 : index
    %c64_161 = arith.constant 64 : index
    %264 = vector.load %arg10[%c0_160, %c64_161] : memref<72x192xf32, #tpu.memory_space<vmem>>, vector<72x16xf32>
    %c0_162 = arith.constant 0 : index
    %c80_163 = arith.constant 80 : index
    %265 = vector.load %arg10[%c0_162, %c80_163] : memref<72x192xf32, #tpu.memory_space<vmem>>, vector<72x16xf32>
    %cst_164 = arith.constant dense<0.000000e+00> : vector<72x72xf32>
    %266 = tpu.matmul %263, %264, %cst_164 {dimension_numbers = #tpu.dot_dimension_numbers<[1], [1], [0], [0], [0, 0, 1, 0], [], []>} : vector<72x16xf32>, vector<72x16xf32>, vector<72x72xf32> -> vector<72x72xf32>
    %cst_165 = arith.constant 2.500000e-01 : f32
    %267 = vector.broadcast %cst_165 : f32 to vector<72x72xf32>
    %268 = arith.mulf %266, %267 : vector<72x72xf32>
    %269 = arith.addf %268, %17 : vector<72x72xf32>
    %cst_166 = arith.constant dense<0xFF800000> : vector<72xf32>
    %270 = vector.multi_reduction <maximumf>, %269, %cst_166 [1] : vector<72x72xf32> to vector<72xf32>
    %271 = vector.shape_cast %270 : vector<72xf32> to vector<72x1xf32>
    %272 = vector.broadcast %271 : vector<72x1xf32> to vector<72x72xf32>
    %273 = arith.subf %269, %272 : vector<72x72xf32>
    %274 = math.exp %273 : vector<72x72xf32>
    %cst_167 = arith.constant dense<0.000000e+00> : vector<72xf32>
    %275 = vector.multi_reduction <add>, %274, %cst_167 [1] : vector<72x72xf32> to vector<72xf32>
    %276 = vector.shape_cast %275 : vector<72xf32> to vector<72x1xf32>
    %277 = vector.broadcast %276 : vector<72x1xf32> to vector<72x72xf32>
    %278 = arith.divf %274, %277 : vector<72x72xf32>
    %cst_168 = arith.constant dense<0.000000e+00> : vector<72x16xf32>
    %279 = tpu.matmul %278, %265, %cst_168 {dimension_numbers = #tpu.dot_dimension_numbers<[1], [0], [0], [1], [0, 0, 1, 1], [], []>} : vector<72x72xf32>, vector<72x16xf32>, vector<72x16xf32> -> vector<72x16xf32>
    %c0_169 = arith.constant 0 : index
    %c16_170 = arith.constant 16 : index
    %280 = vector.load %arg11[%c0_169, %c16_170] : memref<72x64xf32, #tpu.memory_space<vmem>>, vector<72x16xf32>
    tpu.vector_store %arg11[%c0_169, %c16_170], %279 {strides = array<i32>} : memref<72x64xf32, #tpu.memory_space<vmem>>, vector<72x16xf32>,
    %c0_171 = arith.constant 0 : index
    %c96_172 = arith.constant 96 : index
    %281 = vector.load %arg10[%c0_171, %c96_172] : memref<72x192xf32, #tpu.memory_space<vmem>>, vector<72x16xf32>
    %c0_173 = arith.constant 0 : index
    %c112_174 = arith.constant 112 : index
    %282 = vector.load %arg10[%c0_173, %c112_174] : memref<72x192xf32, #tpu.memory_space<vmem>>, vector<72x16xf32>
    %c0_175 = arith.constant 0 : index
    %c128_176 = arith.constant 128 : index
    %283 = vector.load %arg10[%c0_175, %c128_176] : memref<72x192xf32, #tpu.memory_space<vmem>>, vector<72x16xf32>
    %cst_177 = arith.constant dense<0.000000e+00> : vector<72x72xf32>
    %284 = tpu.matmul %281, %282, %cst_177 {dimension_numbers = #tpu.dot_dimension_numbers<[1], [1], [0], [0], [0, 0, 1, 0], [], []>} : vector<72x16xf32>, vector<72x16xf32>, vector<72x72xf32> -> vector<72x72xf32>
    %cst_178 = arith.constant 2.500000e-01 : f32
    %285 = vector.broadcast %cst_178 : f32 to vector<72x72xf32>
    %286 = arith.mulf %284, %285 : vector<72x72xf32>
    %287 = arith.addf %286, %17 : vector<72x72xf32>
    %cst_179 = arith.constant dense<0xFF800000> : vector<72xf32>
    %288 = vector.multi_reduction <maximumf>, %287, %cst_179 [1] : vector<72x72xf32> to vector<72xf32>
    %289 = vector.shape_cast %288 : vector<72xf32> to vector<72x1xf32>
    %290 = vector.broadcast %289 : vector<72x1xf32> to vector<72x72xf32>
    %291 = arith.subf %287, %290 : vector<72x72xf32>
    %292 = math.exp %291 : vector<72x72xf32>
    %cst_180 = arith.constant dense<0.000000e+00> : vector<72xf32>
    %293 = vector.multi_reduction <add>, %292, %cst_180 [1] : vector<72x72xf32> to vector<72xf32>
    %294 = vector.shape_cast %293 : vector<72xf32> to vector<72x1xf32>
    %295 = vector.broadcast %294 : vector<72x1xf32> to vector<72x72xf32>
    %296 = arith.divf %292, %295 : vector<72x72xf32>
    %cst_181 = arith.constant dense<0.000000e+00> : vector<72x16xf32>
    %297 = tpu.matmul %296, %283, %cst_181 {dimension_numbers = #tpu.dot_dimension_numbers<[1], [0], [0], [1], [0, 0, 1, 1], [], []>} : vector<72x72xf32>, vector<72x16xf32>, vector<72x16xf32> -> vector<72x16xf32>
    %c0_182 = arith.constant 0 : index
    %c32_183 = arith.constant 32 : index
    %298 = vector.load %arg11[%c0_182, %c32_183] : memref<72x64xf32, #tpu.memory_space<vmem>>, vector<72x16xf32>
    tpu.vector_store %arg11[%c0_182, %c32_183], %297 {strides = array<i32>} : memref<72x64xf32, #tpu.memory_space<vmem>>, vector<72x16xf32>,
    %c0_184 = arith.constant 0 : index
    %c144_185 = arith.constant 144 : index
    %299 = vector.load %arg10[%c0_184, %c144_185] : memref<72x192xf32, #tpu.memory_space<vmem>>, vector<72x16xf32>
    %c0_186 = arith.constant 0 : index
    %c160_187 = arith.constant 160 : index
    %300 = vector.load %arg10[%c0_186, %c160_187] : memref<72x192xf32, #tpu.memory_space<vmem>>, vector<72x16xf32>
    %c0_188 = arith.constant 0 : index
    %c176_189 = arith.constant 176 : index
    %301 = vector.load %arg10[%c0_188, %c176_189] : memref<72x192xf32, #tpu.memory_space<vmem>>, vector<72x16xf32>
    %cst_190 = arith.constant dense<0.000000e+00> : vector<72x72xf32>
    %302 = tpu.matmul %299, %300, %cst_190 {dimension_numbers = #tpu.dot_dimension_numbers<[1], [1], [0], [0], [0, 0, 1, 0], [], []>} : vector<72x16xf32>, vector<72x16xf32>, vector<72x72xf32> -> vector<72x72xf32>
    %cst_191 = arith.constant 2.500000e-01 : f32
    %303 = vector.broadcast %cst_191 : f32 to vector<72x72xf32>
    %304 = arith.mulf %302, %303 : vector<72x72xf32>
    %305 = arith.addf %304, %17 : vector<72x72xf32>
    %cst_192 = arith.constant dense<0xFF800000> : vector<72xf32>
    %306 = vector.multi_reduction <maximumf>, %305, %cst_192 [1] : vector<72x72xf32> to vector<72xf32>
    %307 = vector.shape_cast %306 : vector<72xf32> to vector<72x1xf32>
    %308 = vector.broadcast %307 : vector<72x1xf32> to vector<72x72xf32>
    %309 = arith.subf %305, %308 : vector<72x72xf32>
    %310 = math.exp %309 : vector<72x72xf32>
    %cst_193 = arith.constant dense<0.000000e+00> : vector<72xf32>
    %311 = vector.multi_reduction <add>, %310, %cst_193 [1] : vector<72x72xf32> to vector<72xf32>
    %312 = vector.shape_cast %311 : vector<72xf32> to vector<72x1xf32>
    %313 = vector.broadcast %312 : vector<72x1xf32> to vector<72x72xf32>
    %314 = arith.divf %310, %313 : vector<72x72xf32>
    %cst_194 = arith.constant dense<0.000000e+00> : vector<72x16xf32>
    %315 = tpu.matmul %314, %301, %cst_194 {dimension_numbers = #tpu.dot_dimension_numbers<[1], [0], [0], [1], [0, 0, 1, 1], [], []>} : vector<72x72xf32>, vector<72x16xf32>, vector<72x16xf32> -> vector<72x16xf32>
    %c0_195 = arith.constant 0 : index
    %c48_196 = arith.constant 48 : index
    %316 = vector.load %arg11[%c0_195, %c48_196] : memref<72x64xf32, #tpu.memory_space<vmem>>, vector<72x16xf32>
    tpu.vector_store %arg11[%c0_195, %c48_196], %315 {strides = array<i32>} : memref<72x64xf32, #tpu.memory_space<vmem>>, vector<72x16xf32>,
    %c0_197 = arith.constant 0 : index
    %c0_198 = arith.constant 0 : index
    %317 = vector.load %arg11[%c0_197, %c0_198] : memref<72x64xf32, #tpu.memory_space<vmem>>, vector<72x64xf32>
    %318 = arith.truncf %317 : vector<72x64xf32> to vector<72x64xbf16>
    %c1_199 = arith.constant 1 : index
    %c0_200 = arith.constant 0 : index
    %c192_201 = arith.constant 192 : index
    %319 = vector.load %arg3[%c1_199, %c0_200, %c192_201] : memref<2x64x512xbf16, #tpu.memory_space<vmem>>, vector<1x64x64xbf16>
    %320 = vector.shape_cast %319 : vector<1x64x64xbf16> to vector<64x64xbf16>
    %cst_202 = arith.constant dense<0.000000e+00> : vector<72x64xf32>
    %321 = tpu.matmul %318, %320, %cst_202 {dimension_numbers = #tpu.dot_dimension_numbers<[1], [0], [0], [1], [0, 0, 1, 1], [], []>} : vector<72x64xbf16>, vector<64x64xbf16>, vector<72x64xf32> -> vector<72x64xf32>
    %322 = vector.broadcast %209 : vector<1x64xf32> to vector<72x64xf32>
    %323 = arith.addf %321, %322 : vector<72x64xf32>
    %324 = arith.addf %201, %323 : vector<72x64xf32>
    %cst_203 = arith.constant dense<0.000000e+00> : vector<72xf32>
    %325 = vector.multi_reduction <add>, %324, %cst_203 [1] : vector<72x64xf32> to vector<72xf32>
    %326 = vector.shape_cast %325 : vector<72xf32> to vector<72x1xf32>
    %cst_204 = arith.constant 6.400000e+01 : f32
    %327 = vector.broadcast %cst_204 : f32 to vector<72x1xf32>
    %328 = arith.divf %326, %327 : vector<72x1xf32>
    %329 = vector.broadcast %328 : vector<72x1xf32> to vector<72x64xf32>
    %330 = arith.subf %324, %329 : vector<72x64xf32>
    %331 = arith.mulf %330, %330 : vector<72x64xf32>
    %cst_205 = arith.constant dense<0.000000e+00> : vector<72xf32>
    %332 = vector.multi_reduction <add>, %331, %cst_205 [1] : vector<72x64xf32> to vector<72xf32>
    %333 = vector.shape_cast %332 : vector<72xf32> to vector<72x1xf32>
    %cst_206 = arith.constant 6.400000e+01 : f32
    %334 = vector.broadcast %cst_206 : f32 to vector<72x1xf32>
    %335 = arith.divf %333, %334 : vector<72x1xf32>
    %cst_207 = arith.constant 9.99999974E-6 : f32
    %336 = vector.broadcast %cst_207 : f32 to vector<72x1xf32>
    %337 = arith.addf %335, %336 : vector<72x1xf32>
    %338 = math.rsqrt %337 : vector<72x1xf32>
    %339 = vector.broadcast %338 : vector<72x1xf32> to vector<72x64xf32>
    %340 = arith.mulf %330, %339 : vector<72x64xf32>
    %341 = vector.broadcast %211 : vector<1x64xf32> to vector<72x64xf32>
    %342 = arith.mulf %340, %341 : vector<72x64xf32>
    %343 = vector.broadcast %213 : vector<1x64xf32> to vector<72x64xf32>
    %344 = arith.addf %342, %343 : vector<72x64xf32>
    %345 = arith.truncf %344 : vector<72x64xf32> to vector<72x64xbf16>
    %c1_208 = arith.constant 1 : index
    %c0_209 = arith.constant 0 : index
    %c256_210 = arith.constant 256 : index
    %346 = vector.load %arg3[%c1_208, %c0_209, %c256_210] : memref<2x64x512xbf16, #tpu.memory_space<vmem>>, vector<1x64x256xbf16>
    %347 = vector.shape_cast %346 : vector<1x64x256xbf16> to vector<64x256xbf16>
    %cst_211 = arith.constant dense<0.000000e+00> : vector<72x256xf32>
    %348 = tpu.matmul %345, %347, %cst_211 {dimension_numbers = #tpu.dot_dimension_numbers<[1], [0], [0], [1], [0, 0, 1, 1], [], []>} : vector<72x64xbf16>, vector<64x256xbf16>, vector<72x256xf32> -> vector<72x256xf32>
    %349 = vector.broadcast %215 : vector<1x256xf32> to vector<72x256xf32>
    %350 = arith.addf %348, %349 : vector<72x256xf32>
    %cst_212 = arith.constant 5.000000e-01 : f32
    %351 = vector.broadcast %cst_212 : f32 to vector<72x256xf32>
    %352 = arith.mulf %351, %350 : vector<72x256xf32>
    %cst_213 = arith.constant 4.471500e-02 : f32
    %353 = vector.broadcast %cst_213 : f32 to vector<72x256xf32>
    %354 = arith.mulf %353, %350 : vector<72x256xf32>
    %355 = arith.mulf %354, %350 : vector<72x256xf32>
    %356 = arith.mulf %355, %350 : vector<72x256xf32>
    %357 = arith.addf %350, %356 : vector<72x256xf32>
    %cst_214 = arith.constant 0.797884583 : f32
    %358 = vector.broadcast %cst_214 : f32 to vector<72x256xf32>
    %359 = arith.mulf %358, %357 : vector<72x256xf32>
    %360 = math.tanh %359 : vector<72x256xf32>
    %cst_215 = arith.constant 1.000000e+00 : f32
    %361 = vector.broadcast %cst_215 : f32 to vector<72x256xf32>
    %362 = arith.addf %361, %360 : vector<72x256xf32>
    %363 = arith.mulf %352, %362 : vector<72x256xf32>
    %364 = arith.truncf %363 : vector<72x256xf32> to vector<72x256xbf16>
    %c1_216 = arith.constant 1 : index
    %c0_217 = arith.constant 0 : index
    %c0_218 = arith.constant 0 : index
    %365 = vector.load %arg4[%c1_216, %c0_217, %c0_218] : memref<2x256x64xbf16, #tpu.memory_space<vmem>>, vector<1x256x64xbf16>
    %366 = vector.shape_cast %365 : vector<1x256x64xbf16> to vector<256x64xbf16>
    %cst_219 = arith.constant dense<0.000000e+00> : vector<72x64xf32>
    %367 = tpu.matmul %364, %366, %cst_219 {dimension_numbers = #tpu.dot_dimension_numbers<[1], [0], [0], [1], [0, 0, 1, 1], [], []>} : vector<72x256xbf16>, vector<256x64xbf16>, vector<72x64xf32> -> vector<72x64xf32>
    %368 = arith.addf %324, %367 : vector<72x64xf32>
    %369 = vector.broadcast %217 : vector<1x64xf32> to vector<72x64xf32>
    %370 = arith.addf %368, %369 : vector<72x64xf32>
    %cst_220 = arith.constant dense<0.000000e+00> : vector<72xf32>
    %371 = vector.multi_reduction <add>, %370, %cst_220 [1] : vector<72x64xf32> to vector<72xf32>
    %372 = vector.shape_cast %371 : vector<72xf32> to vector<72x1xf32>
    %cst_221 = arith.constant 6.400000e+01 : f32
    %373 = vector.broadcast %cst_221 : f32 to vector<72x1xf32>
    %374 = arith.divf %372, %373 : vector<72x1xf32>
    %375 = vector.broadcast %374 : vector<72x1xf32> to vector<72x64xf32>
    %376 = arith.subf %370, %375 : vector<72x64xf32>
    %377 = arith.mulf %376, %376 : vector<72x64xf32>
    %cst_222 = arith.constant dense<0.000000e+00> : vector<72xf32>
    %378 = vector.multi_reduction <add>, %377, %cst_222 [1] : vector<72x64xf32> to vector<72xf32>
    %379 = vector.shape_cast %378 : vector<72xf32> to vector<72x1xf32>
    %cst_223 = arith.constant 6.400000e+01 : f32
    %380 = vector.broadcast %cst_223 : f32 to vector<72x1xf32>
    %381 = arith.divf %379, %380 : vector<72x1xf32>
    %cst_224 = arith.constant 9.99999974E-6 : f32
    %382 = vector.broadcast %cst_224 : f32 to vector<72x1xf32>
    %383 = arith.addf %381, %382 : vector<72x1xf32>
    %384 = math.rsqrt %383 : vector<72x1xf32>
    %385 = vector.broadcast %384 : vector<72x1xf32> to vector<72x64xf32>
    %386 = arith.mulf %376, %385 : vector<72x64xf32>
    %387 = vector.broadcast %21 : vector<1x64xf32> to vector<72x64xf32>
    %388 = arith.mulf %386, %387 : vector<72x64xf32>
    %389 = vector.broadcast %22 : vector<1x64xf32> to vector<72x64xf32>
    %390 = arith.addf %388, %389 : vector<72x64xf32>
    %c0_225 = arith.constant 0 : index
    %c0_226 = arith.constant 0 : index
    %391 = vector.load %arg12[%c0_225, %c0_226] : memref<72x64xf32, #tpu.memory_space<vmem>>, vector<72x64xf32>
    tpu.vector_store %arg12[%c0_225, %c0_226], %390 {strides = array<i32>} : memref<72x64xf32, #tpu.memory_space<vmem>>, vector<72x64xf32>,
    %c0_227 = arith.constant 0 : index
    %c0_228 = arith.constant 0 : index
    %392 = vector.load %arg12[%c0_227, %c0_228] : memref<72x64xf32, #tpu.memory_space<vmem>>, vector<8x64xf32>
    %c0_229 = arith.constant 0 : index
    %c0_230 = arith.constant 0 : index
    %393 = vector.load %arg13[%c0_229, %c0_230] : memref<8x576xf32, #tpu.memory_space<vmem>>, vector<8x64xf32>
    tpu.vector_store %arg13[%c0_229, %c0_230], %392 {strides = array<i32>} : memref<8x576xf32, #tpu.memory_space<vmem>>, vector<8x64xf32>,
    %c8 = arith.constant 8 : index
    %c0_231 = arith.constant 0 : index
    %394 = vector.load %arg12[%c8, %c0_231] : memref<72x64xf32, #tpu.memory_space<vmem>>, vector<8x64xf32>
    %c0_232 = arith.constant 0 : index
    %c64_233 = arith.constant 64 : index
    %395 = vector.load %arg13[%c0_232, %c64_233] : memref<8x576xf32, #tpu.memory_space<vmem>>, vector<8x64xf32>
    tpu.vector_store %arg13[%c0_232, %c64_233], %394 {strides = array<i32>} : memref<8x576xf32, #tpu.memory_space<vmem>>, vector<8x64xf32>,
    %c16_234 = arith.constant 16 : index
    %c0_235 = arith.constant 0 : index
    %396 = vector.load %arg12[%c16_234, %c0_235] : memref<72x64xf32, #tpu.memory_space<vmem>>, vector<8x64xf32>
    %c0_236 = arith.constant 0 : index
    %c128_237 = arith.constant 128 : index
    %397 = vector.load %arg13[%c0_236, %c128_237] : memref<8x576xf32, #tpu.memory_space<vmem>>, vector<8x64xf32>
    tpu.vector_store %arg13[%c0_236, %c128_237], %396 {strides = array<i32>} : memref<8x576xf32, #tpu.memory_space<vmem>>, vector<8x64xf32>,
    %c24 = arith.constant 24 : index
    %c0_238 = arith.constant 0 : index
    %398 = vector.load %arg12[%c24, %c0_238] : memref<72x64xf32, #tpu.memory_space<vmem>>, vector<8x64xf32>
    %c0_239 = arith.constant 0 : index
    %c192_240 = arith.constant 192 : index
    %399 = vector.load %arg13[%c0_239, %c192_240] : memref<8x576xf32, #tpu.memory_space<vmem>>, vector<8x64xf32>
    tpu.vector_store %arg13[%c0_239, %c192_240], %398 {strides = array<i32>} : memref<8x576xf32, #tpu.memory_space<vmem>>, vector<8x64xf32>,
    %c32_241 = arith.constant 32 : index
    %c0_242 = arith.constant 0 : index
    %400 = vector.load %arg12[%c32_241, %c0_242] : memref<72x64xf32, #tpu.memory_space<vmem>>, vector<8x64xf32>
    %c0_243 = arith.constant 0 : index
    %c256_244 = arith.constant 256 : index
    %401 = vector.load %arg13[%c0_243, %c256_244] : memref<8x576xf32, #tpu.memory_space<vmem>>, vector<8x64xf32>
    tpu.vector_store %arg13[%c0_243, %c256_244], %400 {strides = array<i32>} : memref<8x576xf32, #tpu.memory_space<vmem>>, vector<8x64xf32>,
    %c40 = arith.constant 40 : index
    %c0_245 = arith.constant 0 : index
    %402 = vector.load %arg12[%c40, %c0_245] : memref<72x64xf32, #tpu.memory_space<vmem>>, vector<8x64xf32>
    %c0_246 = arith.constant 0 : index
    %c320_247 = arith.constant 320 : index
    %403 = vector.load %arg13[%c0_246, %c320_247] : memref<8x576xf32, #tpu.memory_space<vmem>>, vector<8x64xf32>
    tpu.vector_store %arg13[%c0_246, %c320_247], %402 {strides = array<i32>} : memref<8x576xf32, #tpu.memory_space<vmem>>, vector<8x64xf32>,
    %c48_248 = arith.constant 48 : index
    %c0_249 = arith.constant 0 : index
    %404 = vector.load %arg12[%c48_248, %c0_249] : memref<72x64xf32, #tpu.memory_space<vmem>>, vector<8x64xf32>
    %c0_250 = arith.constant 0 : index
    %c384_251 = arith.constant 384 : index
    %405 = vector.load %arg13[%c0_250, %c384_251] : memref<8x576xf32, #tpu.memory_space<vmem>>, vector<8x64xf32>
    tpu.vector_store %arg13[%c0_250, %c384_251], %404 {strides = array<i32>} : memref<8x576xf32, #tpu.memory_space<vmem>>, vector<8x64xf32>,
    %c56 = arith.constant 56 : index
    %c0_252 = arith.constant 0 : index
    %406 = vector.load %arg12[%c56, %c0_252] : memref<72x64xf32, #tpu.memory_space<vmem>>, vector<8x64xf32>
    %c0_253 = arith.constant 0 : index
    %c448_254 = arith.constant 448 : index
    %407 = vector.load %arg13[%c0_253, %c448_254] : memref<8x576xf32, #tpu.memory_space<vmem>>, vector<8x64xf32>
    tpu.vector_store %arg13[%c0_253, %c448_254], %406 {strides = array<i32>} : memref<8x576xf32, #tpu.memory_space<vmem>>, vector<8x64xf32>,
    %c64_255 = arith.constant 64 : index
    %c0_256 = arith.constant 0 : index
    %408 = vector.load %arg12[%c64_255, %c0_256] : memref<72x64xf32, #tpu.memory_space<vmem>>, vector<8x64xf32>
    %c0_257 = arith.constant 0 : index
    %c512_258 = arith.constant 512 : index
    %409 = vector.load %arg13[%c0_257, %c512_258] : memref<8x576xf32, #tpu.memory_space<vmem>>, vector<8x64xf32>
    tpu.vector_store %arg13[%c0_257, %c512_258], %408 {strides = array<i32>} : memref<8x576xf32, #tpu.memory_space<vmem>>, vector<8x64xf32>,
    %c0_259 = arith.constant 0 : index
    %c0_260 = arith.constant 0 : index
    %410 = vector.load %arg13[%c0_259, %c0_260] : memref<8x576xf32, #tpu.memory_space<vmem>>, vector<8x576xf32>
    %411 = arith.truncf %410 : vector<8x576xf32> to vector<8x576xbf16>
    %c0_261 = arith.constant 0 : index
    %c0_262 = arith.constant 0 : index
    %412 = vector.load %arg6[%c0_261, %c0_262] : memref<576x200xbf16, #tpu.memory_space<vmem>>, vector<576x200xbf16>
    %cst_263 = arith.constant dense<0.000000e+00> : vector<8x200xf32>
    %413 = tpu.matmul %411, %412, %cst_263 {dimension_numbers = #tpu.dot_dimension_numbers<[1], [0], [0], [1], [0, 0, 1, 1], [], []>} : vector<8x576xbf16>, vector<576x200xbf16>, vector<8x200xf32> -> vector<8x200xf32>
    %414 = vector.broadcast %23 : vector<1x200xf32> to vector<8x200xf32>
    %415 = arith.addf %413, %414 : vector<8x200xf32>
    %c0_264 = arith.constant 0 : index
    %c0_265 = arith.constant 0 : index
    %416 = vector.load %arg8[%c0_264, %c0_265] : memref<8x200xf32, #tpu.memory_space<vmem>>, vector<8x200xf32>
    tpu.vector_store %arg8[%c0_264, %c0_265], %415 {strides = array<i32>} : memref<8x200xf32, #tpu.memory_space<vmem>>, vector<8x200xf32>,
    %c0_266 = arith.constant 0 : index
    %c0_267 = arith.constant 0 : index
    %417 = vector.load %arg7[%c0_266, %c0_267] : memref<200x8xf32, #tpu.memory_space<vmem>>, vector<200x8xf32>
    %cst_268 = arith.constant dense<0.000000e+00> : vector<8x8xf32>
    %418 = tpu.matmul %415, %417, %cst_268 {dimension_numbers = #tpu.dot_dimension_numbers<[1], [0], [0], [1], [0, 0, 1, 1], [], []>} : vector<8x200xf32>, vector<200x8xf32>, vector<8x8xf32> -> vector<8x8xf32>
    %419 = vector.broadcast %24 : vector<1x8xf32> to vector<8x8xf32>
    %420 = arith.addf %418, %419 : vector<8x8xf32>
    %421 = vector.broadcast %14 : vector<8x1xf32> to vector<8x8xf32>
    %422 = arith.mulf %420, %421 : vector<8x8xf32>
    %423 = vector.broadcast %4 : vector<8x1xf32> to vector<8x8xf32>
    %424 = arith.addf %422, %423 : vector<8x8xf32>
    %c0_269 = arith.constant 0 : index
    %c0_270 = arith.constant 0 : index
    %425 = vector.load %arg9[%c0_269, %c0_270] : memref<8x8xf32, #tpu.memory_space<vmem>>, vector<8x8xf32>
    tpu.vector_store %arg9[%c0_269, %c0_270], %424 {strides = array<i32>} : memref<8x8xf32, #tpu.memory_space<vmem>>, vector<8x8xf32>,
    return
  }
}

</mosaic_0001>

<bundles_post_ra>
// kernel: _lambda_.1
= control target key start
LH: loop header
LB: loop body
LE: loop exit
PB: predicated region body
PF: predicated region fallthrough
CT: control target
= control target key end

     0   :  { %vm34_vm0 = vcmask 64512   ;;  %s14482_s0 = inlined_call_operand.vmem [shape: f32[8,8], index: 0, kind: input, shape index: {}]   ;;  %s14483_s1 = inlined_call_operand.vmem [shape: f32[72,144], index: 1, kind: input, shape index: {}]   ;;  %s14484_s2 = inlined_call_operand.vmem [shape: f32[1,400], index: 2, kind: input, shape index: {}]   ;;  %s14485_s3 = inlined_call_operand.vmem [shape: bf16[2,64,512], index: 3, kind: input, shape index: {}]   ;;  %s14486_s4 = inlined_call_operand.vmem [shape: bf16[2,256,64], index: 4, kind: input, shape index: {}]   ;;  %s14487_s5 = inlined_call_operand.vmem [shape: f32[2,1,832], index: 5, kind: input, shape index: {}]   ;;  %s14488_s6 = inlined_call_operand.vmem [shape: bf16[576,200], index: 6, kind: input, shape index: {}]   ;;  %s14489_s7 = inlined_call_operand.vmem [shape: f32[200,8], index: 7, kind: input, shape index: {}]   ;;  %s14490_s8 = inlined_call_operand.hbm [shape: f32[8,200], index: 8, kind: output, shape index: {0}]   ;;  %s14491_s9 = inlined_call_operand.vmem [shape: f32[8,8], index: 9, kind: output, shape index: {1}]  }
   0x1   :  { %v33_v0 = vld [vmem:[%s14482_s0] sm:$0xff] }
   0x2   :  { %v35_v1 = vsel %vm34_vm0, %v33_v0, 0.0 }
   0x3   :  { %36 = vadd.xlane.f32.xlu0 %v35_v1 }
   0x4   :  { %15 = vsyncpa [#allocation7], 0  ;;  %v56_v7 = vld [vmem:[%s14483_s1] sm:$0xff]  ;;  %s10521_s13 = smov 56   ;;  %v66_v8 = vld [vmem:[%s14483_s1 + $0x18] sm:$0xff]  ;;  %s10522_s21 = smov 8  }
   0x5   :  { %v58_v9 = vld [vmem:[%s14483_s1 + $0x20] sm:$0xff]  ;;  %v68_v10 = vld [vmem:[%s14483_s1 + $0x38] sm:$0xff]  ;;  %v65_v22 = vld [vmem:[%s14483_s1 + $0x8] sm:$0xff]  ;;  %s10523_s0 = smov 120   ;;  %vm223_vm3 = vcmask 457728   ;;  %vm257_vm4 = vcmask 523264  }
   0x6   :  { %v60_v11 = vld [vmem:[%s14483_s1 + $0x40] sm:$0xff]  ;;  %v57_v23 = vld [vmem:[%s14483_s1 + $0x10] sm:$0xff]  ;;  %v67_v24 = vld [vmem:[%s14483_s1 + $0x28] sm:$0xff]  ;;  %s10525_s27 = smov 64   ;;  %vm10528_vm5 = vmmov 0   ;;  %s10530_s30 = smov 80  }
   0x7   :  { %v59_v25 = vld [vmem:[%s14483_s1 + $0x30] sm:$0xff]  ;;  %v69_v26 = vld [vmem:[%s14483_s1 + $0x48] sm:$0xff]  ;;  %v70_v35 = vld [vmem:[%s14483_s1 + $0x58] sm:$0xff]  ;;  %s10531_s10 = smov 16   ;;  %s10532_s11 = smov 32   ;;  %vm617_vm6 = vcmask 130048  }
   0x8   :  { %v10640_v30 = vld [vmem:[%s14483_s1 + $0x88] sm:$0xff]  ;;  %v72_v39 = vld [vmem:[%s14483_s1 + $0x78] sm:$0xff]  ;;  %v61_v1 = vld [vmem:[%s14483_s1 + $0x50] sm:$0xff]  ;;  %s10533_s12 = smov 96   ;;  %s10534_s14 = smov 48   ;;  %vm782_vm8 = vcmask 588800  }
   0x9   :  { %v71_v37 = vld [vmem:[%s14483_s1 + $0x68] sm:$0xff]  ;;  %vm11014_vm7 = vmpackc.low %vm617_vm6, %vm617_vm6  ;;  %vm1572_vm9 = vcmask 261248   ;;  %vm2081_vm10 = vcmask 392448   ;;  %vm2608_vm11 = vcmask 523648   ;;  %vm6857_vm12 = vcmask 1048064  }
  0x90   :  { %v37_v2 = vpop.xlane.xlu0 %36 }
  0x91   :  { %v10590_v3 = vmul.f32 0.125, %v37_v2 }
  0x93   :  { %14518 = vst [vmem:[#allocation9_spill] sm:$0xff] %v10590_v3  ;;  %v40_v4 = vsub.f32 %v33_v0, %v10590_v3 }
  0x95   :  { %v41_v5 = vmul.f32 %v40_v4, %v40_v4 }
  0x97   :  { %v42_v6 = vsel %vm34_vm0, %v41_v5, 0.0 }
  0x98   :  { %43 = vadd.xlane.f32.xlu0 %v42_v6 }
  0xae   :  { %187 = vrot.lane.b32.xlu0 %v56_v7, %s10521_s13  ;;  %v62_v7 = vld [vmem:[%s14483_s1 + $0x60] sm:$0xff] }
  0xb2   :  { %193 = vrot.lane.b32.xlu0 %v66_v8, %s10521_s13 }
  0xb6   :  { %195 = vrot.lane.b32.xlu0 %v58_v9, %s10521_s13  ;;  %v64_v9 = vld [vmem:[%s14483_s1 + $0x80] sm:$0xff] }
  0xba   :  { %201 = vrot.lane.b32.xlu0 %v68_v10, %s10521_s13 }
  0xbe   :  { %203 = vrot.lane.b32.xlu0 %v60_v11, %s10521_s13 }
 0x125   :  { %v44_v12 = vpop.xlane.xlu0 %43 }
 0x126   :  { %v45_v13 = vmul.f32 0.125, %v44_v12 }
 0x128   :  { %v46_v14 = vadd.f32 1e-05, %v45_v13 }
 0x129   :  { %v188_v42 = vpop.permute.xlu0 %187 }
 0x12a   :  { %10005 = vrsqrt.f32 %v46_v14  ;;  %vm49_vm1 = vcmp.eq.f32.partialorder %v46_v14, inf  ;;  %v52_v17 = vand.u32 2147483648, %v46_v14  ;;  %vm51_vm2 = vcmp.eq.f32.partialorder %v46_v14, 0.0 }
 0x12d   :  { %v194_v44 = vpop.permute.xlu0 %193 }
 0x131   :  { %v196_v46 = vpop.permute.xlu0 %195 }
 0x134   :  { %v10006_v15 = vpop.eup %10005 }
 0x135   :  { %v48_v16 = vmul.f32 %v10006_v15, %v46_v14  ;;  %v10663_v48 = vpop.permute.xlu0 %201 }
 0x137   :  { %v50_v18 = vsel %vm49_vm1, %v46_v14, %v48_v16 }
 0x138   :  { %v10614_v19 = vsel %vm51_vm2, %v52_v17, %v50_v18 }
 0x139   :  { %14519 = vst [vmem:[#allocation10_spill] sm:$0xff] %v10614_v19  ;;  %10007 = vrcp.f32 %v10614_v19  ;;  %v10667_v50 = vpop.permute.xlu0 %203 }
 0x143   :  { %v10008_v20 = vpop.eup %10007 }
 0x144   :  { %v55_v21 = vmul.f32 %v10008_v20, %v40_v4 }
 0x146   :  { %79 = vrot.lane.b32.xlu1 %v55_v21, %s10522_s21 }
 0x14a   :  { %189 = vrot.lane.b32.xlu1 %v65_v22, %s10521_s13 }
 0x14e   :  { %191 = vrot.lane.b32.xlu1 %v57_v23, %s10521_s13 }
 0x152   :  { %197 = vrot.lane.b32.xlu1 %v67_v24, %s10521_s13 }
 0x156   :  { %199 = vrot.lane.b32.xlu1 %v59_v25, %s10521_s13 }
 0x15a   :  { %205 = vrot.lane.b32.xlu1 %v69_v26, %s10521_s13 }
 0x1b8   :  { %v80_v27 = vpop.permute.xlu1 %79 }
 0x1b9   :  { %v83_v28 = vmul.f32 %v80_v27, %v66_v8  ;;  %v82_v29 = vmul.f32 %v80_v27, %v65_v22  ;;  %v90_v31 = vmul.f32 %v80_v27, %v10640_v30  ;;  %v84_v32 = vmul.f32 %v80_v27, %v67_v24  ;;  %v63_v8 = vld [vmem:[%s14483_s1 + $0x70] sm:$0xff] }
 0x1ba   :  { %v85_v33 = vmul.f32 %v80_v27, %v68_v10  ;;  %v86_v34 = vmul.f32 %v80_v27, %v69_v26  ;;  %v87_v36 = vmul.f32 %v80_v27, %v70_v35  ;;  %v88_v38 = vmul.f32 %v80_v27, %v71_v37  ;;  %v7605_v10 = vld [vmem:[%s14484_s2] ss:$0 sm:$0xff] }
 0x1bb   :  { %102 = vrot.lane.b32.xlu0 %v83_v28, %s10523_s0  ;;  %100 = vrot.lane.b32.xlu1 %v82_v29, %s10523_s0  ;;  %v89_v40 = vmul.f32 %v80_v27, %v72_v39 }
 0x1bc   :  { %v190_v41 = vpop.permute.xlu1 %189 }
 0x1bd   :  { %v224_v15 = vsel %vm223_vm3, %v188_v42, %v190_v41 }
 0x1bf   :  { %116 = vrot.lane.b32.xlu0 %v90_v31, %s10523_s0  ;;  %104 = vrot.lane.b32.xlu1 %v84_v32, %s10523_s0 }
 0x1c0   :  { %v192_v43 = vpop.permute.xlu1 %191 }
 0x1c1   :  { %v225_v16 = vsel %vm223_vm3, %v192_v43, %v194_v44 }
 0x1c3   :  { %106 = vrot.lane.b32.xlu1 %v85_v33, %s10523_s0 }
 0x1c4   :  { %v198_v45 = vpop.permute.xlu1 %197 }
 0x1c5   :  { %v226_v24 = vsel %vm223_vm3, %v196_v46, %v198_v45 }
 0x1c7   :  { %108 = vrot.lane.b32.xlu1 %v86_v34, %s10523_s0 }
 0x1c8   :  { %v10661_v47 = vpop.permute.xlu1 %199 }
 0x1c9   :  { %v227_v29 = vsel %vm223_vm3, %v10661_v47, %v10663_v48 }
 0x1cb   :  { %110 = vrot.lane.b32.xlu1 %v87_v36, %s10523_s0 }
 0x1cc   :  { %v10665_v49 = vpop.permute.xlu1 %205 }
 0x1cd   :  { %v228_v34 = vsel %vm223_vm3, %v10667_v50, %v10665_v49 }
 0x1cf   :  { %112 = vrot.lane.b32.xlu1 %v88_v38, %s10523_s0 }
 0x1d3   :  { %114 = vrot.lane.b32.xlu1 %v89_v40, %s10523_s0 }
 0x22d   :  { %v101_v51 = vpop.permute.xlu1 %100  ;;  %v103_v52 = vpop.permute.xlu0 %102 }
 0x22e   :  { %v127_v53 = vsel %vm34_vm0, %v101_v51, 0.0  ;;  %v130_v54 = vsel %vm34_vm0, %v103_v52, 0.0 }
 0x22f   :  { %128 = vadd.xlane.f32.xlu1 %v127_v53  ;;  %131 = vadd.xlane.f32.xlu0 %v130_v54 }
 0x231   :  { %v105_v55 = vpop.permute.xlu1 %104  ;;  %v117_v5 = vpop.permute.xlu0 %116 }
 0x232   :  { %v133_v56 = vsel %vm34_vm0, %v105_v55, 0.0  ;;  %v151_v6 = vsel %vm34_vm0, %v117_v5, 0.0 }
 0x233   :  { %134 = vadd.xlane.f32.xlu0 %v133_v56 }
 0x235   :  { %v107_v57 = vpop.permute.xlu1 %106 }
 0x236   :  { %v136_v58 = vsel %vm34_vm0, %v107_v57, 0.0 }
 0x237   :  { %137 = vadd.xlane.f32.xlu1 %v136_v58 }
 0x239   :  { %v109_v59 = vpop.permute.xlu1 %108 }
 0x23a   :  { %v139_v60 = vsel %vm34_vm0, %v109_v59, 0.0 }
 0x23b   :  { %140 = vadd.xlane.f32.xlu1 %v139_v60 }
 0x23d   :  { %v111_v61 = vpop.permute.xlu1 %110 }
 0x23e   :  { %v142_v62 = vsel %vm34_vm0, %v111_v61, 0.0 }
 0x23f   :  { %143 = vadd.xlane.f32.xlu0 %v142_v62 }
 0x241   :  { %v113_v63 = vpop.permute.xlu1 %112 }
 0x242   :  { %v145_v0 = vsel %vm34_vm0, %v113_v63, 0.0 }
 0x243   :  { %146 = vadd.xlane.f32.xlu1 %v145_v0 }
 0x245   :  { %v115_v2 = vpop.permute.xlu1 %114 }
 0x246   :  { %v148_v4 = vsel %vm34_vm0, %v115_v2, 0.0 }
 0x254   :  { %207 = vrot.lane.b32.xlu1 %v61_v1, %s10521_s13 }
 0x255   :  { %209 = vrot.lane.b32.xlu0 %v70_v35, %s10521_s13 }
 0x274   :  { %149 = vadd.xlane.f32.xlu0 %v148_v4 }
 0x278   :  { %152 = vadd.xlane.f32.xlu1 %v151_v6 }
 0x28a   :  { %211 = vrot.lane.b32.xlu0 %v62_v7, %s10521_s13 }
 0x28e   :  { %213 = vrot.lane.b32.xlu0 %v71_v37, %s10521_s13 }
 0x292   :  { %215 = vrot.lane.b32.xlu0 %v63_v8, %s10521_s13 }
 0x296   :  { %217 = vrot.lane.b32.xlu0 %v72_v39, %s10521_s13 }
 0x29a   :  { %219 = vrot.lane.b32.xlu0 %v64_v9, %s10521_s13 }
 0x29e   :  { %221 = vrot.lane.b32.xlu0 %v10640_v30, %s10521_s13  ;;  %s10527_s13 = smov 112  }
 0x2bc   :  { %v129_v11 = vpop.xlane.xlu1 %128  ;;  %v132_v12 = vpop.xlane.xlu0 %131 }
 0x2bd   :  { %v160_v13 = vmul.f32 %v7605_v10, %v129_v11  ;;  %v161_v14 = vmul.f32 %v7605_v10, %v132_v12 }
 0x2bf   :  { %v10704_v17 = vadd.f32 %v224_v15, %v160_v13  ;;  %v10706_v18 = vadd.f32 %v225_v16, %v161_v14 }
 0x2c0   :  { %v135_v20 = vpop.xlane.xlu0 %134 }
 0x2c1   :  { %v162_v21 = vmul.f32 %v7605_v10, %v135_v20  ;;  %v258_v22 = vsel %vm257_vm4, %v10704_v17, 0.0  ;;  %v261_v23 = vsel %vm257_vm4, %v10706_v18, 0.0 }
 0x2c2   :  { %259 = vadd.xlane.f32.xlu0 %v258_v22  ;;  %262 = vadd.xlane.f32.xlu1 %v261_v23 }
 0x2c3   :  { %v10713_v25 = vadd.f32 %v226_v24, %v162_v21 }
 0x2c4   :  { %v138_v26 = vpop.xlane.xlu1 %137 }
 0x2c5   :  { %v163_v27 = vmul.f32 %v7605_v10, %v138_v26  ;;  %v264_v28 = vsel %vm257_vm4, %v10713_v25, 0.0 }
 0x2c6   :  { %265 = vadd.xlane.f32.xlu1 %v264_v28 }
 0x2c7   :  { %v10720_v30 = vadd.f32 %v227_v29, %v163_v27 }
 0x2c8   :  { %v141_v31 = vpop.xlane.xlu1 %140 }
 0x2c9   :  { %v164_v32 = vmul.f32 %v7605_v10, %v141_v31  ;;  %v267_v33 = vsel %vm257_vm4, %v10720_v30, 0.0 }
 0x2ca   :  { %268 = vadd.xlane.f32.xlu1 %v267_v33 }
 0x2cb   :  { %v10727_v35 = vadd.f32 %v228_v34, %v164_v32 }
 0x2cc   :  { %v144_v37 = vpop.xlane.xlu0 %143 }
 0x2cd   :  { %v270_v36 = vsel %vm257_vm4, %v10727_v35, 0.0  ;;  %v165_v39 = vmul.f32 %v7605_v10, %v144_v37 }
 0x2ce   :  { %271 = vadd.xlane.f32.xlu1 %v270_v36 }
 0x2d0   :  { %v147_v38 = vpop.xlane.xlu1 %146  ;;  %v210_v40 = vpop.permute.xlu0 %209 }
 0x2d1   :  { %v166_v47 = vmul.f32 %v7605_v10, %v147_v38  ;;  %v9809_v38 = vld [vmem:[%s14485_s3 + $0x4] ss:$16 sps:$4 sm:$0xff]  }
 0x2d2   :  { %482 = vmatprep.subr.bf16.mxu1 %v9809_v38 }
 0x2d4   :  { %v208_v41 = vpop.permute.xlu1 %207 }
 0x2d5   :  { %v229_v42 = vsel %vm223_vm3, %v208_v41, %v210_v40  ;;  %v9812_v40 = vld [vmem:[%s14485_s3 + $0x24] ss:$16 sps:$4 sm:$0xff]   ;;  %v9814_v41 = vld [vmem:[%s14485_s3 + $0x20] ss:$16 sps:$4 sm:$0xff]  }
 0x2d6   :  { %v10732_v43 = vadd.f32 %v229_v42, %v165_v39  ;;  %v9811_v39 = vld [vmem:[%s14485_s3] ss:$16 sps:$4 sm:$0xff]  }
 0x2d7   :  { %483 = vmatpush1.bf16.msra.mxu1 %v9811_v39 }
 0x2d8   :  { %14520 = vst [vmem:[#allocation11_spill] sm:$0xff] %v10732_v43  ;;  %v273_v44 = vsel %vm257_vm4, %v10732_v43, 0.0  ;;  %484 = vmatprep.subr.bf16.mxu1 %v9812_v40 }
 0x2d9   :  { %274 = vadd.xlane.f32.xlu1 %v273_v44 }
 0x2db   :  { %485 = vmatpush1.bf16.msra.mxu1 %v9814_v41 }
 0x301   :  { %v150_v45 = vpop.xlane.xlu0 %149 }
 0x302   :  { %v167_v53 = vmul.f32 %v7605_v10, %v150_v45 }
 0x305   :  { %v212_v46 = vpop.permute.xlu0 %211  ;;  %v153_v59 = vpop.xlane.xlu1 %152 }
 0x306   :  { %v168_v60 = vmul.f32 %v7605_v10, %v153_v59  ;;  %v9815_v59 = vld [vmem:[%s14485_s3 + $0x44] ss:$16 sps:$4 sm:$0xff]  }
 0x307   :  { %486 = vmatprep.subr.bf16.mxu1 %v9815_v59 }
 0x309   :  { %v214_v48 = vpop.permute.xlu0 %213 }
 0x30a   :  { %v230_v49 = vsel %vm223_vm3, %v212_v46, %v214_v48 }
 0x30b   :  { %v10737_v50 = vadd.f32 %v230_v49, %v166_v47 }
 0x30d   :  { %14521 = vst [vmem:[#allocation12_spill] sm:$0xff] %v10737_v50  ;;  %v216_v51 = vpop.permute.xlu0 %215  ;;  %v276_v52 = vsel %vm257_vm4, %v10737_v50, 0.0 }
 0x30e   :  { %277 = vadd.xlane.f32.xlu1 %v276_v52 }
 0x311   :  { %v218_v54 = vpop.permute.xlu0 %217 }
 0x312   :  { %v231_v55 = vsel %vm223_vm3, %v216_v51, %v218_v54 }
 0x313   :  { %v10742_v56 = vadd.f32 %v231_v55, %v167_v53 }
 0x315   :  { %14522 = vst [vmem:[#allocation13_spill] sm:$0xff] %v10742_v56  ;;  %v220_v57 = vpop.permute.xlu0 %219  ;;  %v279_v58 = vsel %vm257_vm4, %v10742_v56, 0.0 }
 0x316   :  { %280 = vadd.xlane.f32.xlu0 %v279_v58 }
 0x319   :  { %v222_v61 = vpop.permute.xlu0 %221 }
 0x31a   :  { %v232_v62 = vsel %vm223_vm3, %v220_v57, %v222_v61  ;;  %v9817_v61 = vld [vmem:[%s14485_s3 + $0x40] ss:$16 sps:$4 sm:$0xff]  }
 0x31b   :  { %v10747_v63 = vadd.f32 %v232_v62, %v168_v60  ;;  %487 = vmatpush1.bf16.msra.mxu1 %v9817_v61  ;;  %v9818_v62 = vld [vmem:[%s14485_s3 + $0x64] ss:$16 sps:$4 sm:$0xff]  }
 0x31c   :  { %488 = vmatprep.subr.bf16.mxu1 %v9818_v62 }
 0x31d   :  { %14523 = vst [vmem:[#allocation14_spill] sm:$0xff] %v10747_v63  ;;  %v282_v0 = vsel %vm257_vm4, %v10747_v63, 0.0 }
 0x31e   :  { %283 = vadd.xlane.f32.xlu1 %v282_v0  ;;  %v9820_v0 = vld [vmem:[%s14485_s3 + $0x60] ss:$16 sps:$4 sm:$0xff]  }
 0x31f   :  { %489 = vmatpush1.bf16.msra.mxu1 %v9820_v0 }
 0x34f   :  { %v263_v1 = vpop.xlane.xlu1 %262  ;;  %v260_v2 = vpop.xlane.xlu0 %259 }
 0x350   :  { %v287_v4 = vmul.f32 0.015625, %v263_v1  ;;  %v286_v5 = vmul.f32 0.015625, %v260_v2  ;;  %v10832_v1 = vld [vmem:[%s14487_s5] ss:$0 sm:$0xff]  ;;  %v14492_v2 = vmov 0  }
 0x351   :  { %514 = vmatprep.mubr.bf16.mxu1 %v14492_v2 }
 0x352   :  { %v10752_v6 = vsub.f32 %v10706_v18, %v287_v4  ;;  %v10755_v7 = vsub.f32 %v10704_v17, %v286_v5 }
 0x353   :  { %v266_v8 = vpop.xlane.xlu1 %265 }
 0x354   :  { %v288_v9 = vmul.f32 0.015625, %v266_v8  ;;  %v305_v10 = vmul.f32 %v10752_v6, %v10752_v6  ;;  %v304_v11 = vmul.f32 %v10755_v7, %v10755_v7 }
 0x356   :  { %v10762_v12 = vsub.f32 %v10713_v25, %v288_v9  ;;  %v316_v13 = vsel %vm257_vm4, %v305_v10, 0.0  ;;  %v313_v14 = vsel %vm257_vm4, %v304_v11, 0.0 }
 0x357   :  { %v269_v15 = vpop.xlane.xlu1 %268  ;;  %317 = vadd.xlane.f32.xlu1 %v316_v13  ;;  %314 = vadd.xlane.f32.xlu0 %v313_v14 }
 0x358   :  { %v289_v16 = vmul.f32 0.015625, %v269_v15  ;;  %v306_v20 = vmul.f32 %v10762_v12, %v10762_v12 }
 0x35a   :  { %v10769_v21 = vsub.f32 %v10720_v30, %v289_v16  ;;  %v319_v22 = vsel %vm257_vm4, %v306_v20, 0.0 }
 0x35b   :  { %v272_v23 = vpop.xlane.xlu1 %271  ;;  %320 = vadd.xlane.f32.xlu0 %v319_v22 }
 0x35c   :  { %v290_v24 = vmul.f32 0.015625, %v272_v23  ;;  %v307_v26 = vmul.f32 %v10769_v21, %v10769_v21 }
 0x35e   :  { %v10775_v27 = vsub.f32 %v10727_v35, %v290_v24  ;;  %v322_v28 = vsel %vm257_vm4, %v307_v26, 0.0 }
 0x35f   :  { %323 = vadd.xlane.f32.xlu1 %v322_v28 }
 0x360   :  { %v308_v29 = vmul.f32 %v10775_v27, %v10775_v27 }
 0x362   :  { %v325_v31 = vsel %vm257_vm4, %v308_v29, 0.0 }
 0x363   :  { %326 = vadd.xlane.f32.xlu0 %v325_v31 }
 0x366   :  { %v275_v32 = vpop.xlane.xlu1 %274 }
 0x367   :  { %v291_v33 = vmul.f32 0.015625, %v275_v32 }
 0x369   :  { %v10782_v34 = vsub.f32 %v10732_v43, %v291_v33 }
 0x36b   :  { %v309_v36 = vmul.f32 %v10782_v34, %v10782_v34 }
 0x36d   :  { %v328_v37 = vsel %vm257_vm4, %v309_v36, 0.0 }
 0x36e   :  { %329 = vadd.xlane.f32.xlu1 %v328_v37 }
 0x39b   :  { %v278_v42 = vpop.xlane.xlu1 %277 }
 0x39c   :  { %v292_v44 = vmul.f32 0.015625, %v278_v42 }
 0x39e   :  { %v10800_v45 = vsub.f32 %v10737_v50, %v292_v44 }
 0x3a0   :  { %v310_v46 = vmul.f32 %v10800_v45, %v10800_v45 }
 0x3a2   :  { %v331_v47 = vsel %vm257_vm4, %v310_v46, 0.0 }
 0x3a3   :  { %332 = vadd.xlane.f32.xlu0 %v331_v47  ;;  %v281_v48 = vpop.xlane.xlu0 %280 }
 0x3a4   :  { %v293_v49 = vmul.f32 0.015625, %v281_v48 }
 0x3a6   :  { %v10806_v51 = vsub.f32 %v10742_v56, %v293_v49 }
 0x3a8   :  { %v311_v52 = vmul.f32 %v10806_v51, %v10806_v51 }
 0x3aa   :  { %v334_v53 = vsel %vm257_vm4, %v311_v52, 0.0 }
 0x3ab   :  { %v284_v54 = vpop.xlane.xlu1 %283  ;;  %335 = vadd.xlane.f32.xlu1 %v334_v53 }
 0x3ac   :  { %v294_v55 = vmul.f32 0.015625, %v284_v54 }
 0x3ae   :  { %v10812_v57 = vsub.f32 %v10747_v63, %v294_v55 }
 0x3b0   :  { %v312_v58 = vmul.f32 %v10812_v57, %v10812_v57 }
 0x3b2   :  { %v337_v60 = vsel %vm257_vm4, %v312_v58, 0.0 }
 0x3b3   :  { %338 = vadd.xlane.f32.xlu1 %v337_v60 }
 0x3b9   :  { %391 = vrot.lane.b32.xlu0 %v10832_v1, %s10525_s27 }
 0x3e4   :  { %v318_v4 = vpop.xlane.xlu1 %317  ;;  %v315_v5 = vpop.xlane.xlu0 %314 }
 0x3e5   :  { %v341_v8 = vmul.f32 0.015625, %v318_v4  ;;  %v340_v9 = vmul.f32 0.015625, %v315_v5 }
 0x3e7   :  { %v350_v11 = vadd.f32 1e-05, %v341_v8  ;;  %v349_v14 = vadd.f32 1e-05, %v340_v9 }
 0x3e8   :  { %v321_v10 = vpop.xlane.xlu0 %320 }
 0x3e9   :  { %v342_v15 = vmul.f32 0.015625, %v321_v10  ;;  %10009 = vrsqrt.f32 %v350_v11 }
 0x3ea   :  { %10011 = vrsqrt.f32 %v349_v14 }
 0x3eb   :  { %v351_v20 = vadd.f32 1e-05, %v342_v15 }
 0x3ec   :  { %v324_v13 = vpop.xlane.xlu1 %323 }
 0x3ed   :  { %v343_v16 = vmul.f32 0.015625, %v324_v13  ;;  %10013 = vrsqrt.f32 %v351_v20 }
 0x3ef   :  { %v352_v22 = vadd.f32 1e-05, %v343_v16 }
 0x3f0   :  { %v327_v23 = vpop.xlane.xlu0 %326 }
 0x3f1   :  { %v344_v26 = vmul.f32 0.015625, %v327_v23  ;;  %10015 = vrsqrt.f32 %v352_v22 }
 0x3f3   :  { %v10010_v29 = vpop.eup %10009  ;;  %v353_v31 = vadd.f32 1e-05, %v344_v26 }
 0x3f4   :  { %v10012_v32 = vpop.eup %10011  ;;  %v368_v37 = vmul.f32 %v10010_v29, %v10752_v6 }
 0x3f5   :  { %10017 = vrsqrt.f32 %v353_v31  ;;  %v367_v36 = vmul.f32 %v10012_v32, %v10755_v7 }
 0x3f6   :  { %v383_v46 = vmul.f32 %v10832_v1, %v368_v37 }
 0x3f7   :  { %v10014_v39 = vpop.eup %10013  ;;  %v382_v44 = vmul.f32 %v10832_v1, %v367_v36 }
 0x3f8   :  { %v369_v52 = vmul.f32 %v10014_v39, %v10762_v12  ;;  %v14494_v39 = vmov 0.0|0.0  }
 0x3f9   :  { %9244 = vmatprep.subr.bf16.mxu1 %v14494_v39  ;;  %9260 = vmatprep.subr.bf16.mxu0 %v14494_v39 }
 0x3fa   :  { %v384_v58 = vmul.f32 %v10832_v1, %v369_v52 }
 0x3fb   :  { %v330_v24 = vpop.xlane.xlu1 %329  ;;  %v10016_v41 = vpop.eup %10015 }
 0x3fc   :  { %v345_v28 = vmul.f32 0.015625, %v330_v24  ;;  %v370_v53 = vmul.f32 %v10016_v41, %v10769_v21 }
 0x3fe   :  { %v354_v33 = vadd.f32 1e-05, %v345_v28  ;;  %v385_v59 = vmul.f32 %v10832_v1, %v370_v53 }
 0x3ff   :  { %v10018_v54 = vpop.eup %10017 }
 0x400   :  { %10019 = vrsqrt.f32 %v354_v33  ;;  %v371_v12 = vmul.f32 %v10018_v54, %v10775_v27  ;;  %v417_v33 = vlaneseq }
 0x402   :  { %v386_v10 = vmul.f32 %v10832_v1, %v371_v12  ;;  %v10864_v36 = vshrl.u32 %v417_v33, 7 }
 0x404   :  { %14524 = vst [vmem:[#allocation15_spill] sm:$0xff] %v10864_v36  ;;  %v10867_v37 = vsub.s32 1, %v10864_v36 }
 0x406   :  { %14525 = vst [vmem:[#allocation16_spill] sm:$0xff] %v10867_v37 }
 0x40a   :  { %v10020_v60 = vpop.eup %10019 }
 0x40b   :  { %v372_v21 = vmul.f32 %v10020_v60, %v10782_v34 }
 0x40d   :  { %v387_v11 = vmul.f32 %v10832_v1, %v372_v21 }
 0x430   :  { %v333_v38 = vpop.xlane.xlu0 %332 }
 0x431   :  { %v346_v40 = vmul.f32 0.015625, %v333_v38  ;;  %v10873_v38 = vsub.s32 0, %v10864_v36 }
 0x433   :  { %v355_v42 = vadd.f32 1e-05, %v346_v40  ;;  %14526 = vst [vmem:[#allocation17_spill] sm:$0xff] %v10873_v38 }
 0x434   :  { %v392_v47 = vpop.permute.xlu0 %391 }
 0x435   :  { %v394_v48 = vadd.f32 %v392_v47, %v382_v44  ;;  %v395_v49 = vadd.f32 %v392_v47, %v383_v46  ;;  %10021 = vrsqrt.f32 %v355_v42  ;;  %v396_v62 = vadd.f32 %v392_v47, %v384_v58 }
 0x436   :  { %v397_v0 = vadd.f32 %v392_v47, %v385_v59  ;;  %v398_v14 = vadd.f32 %v392_v47, %v386_v10  ;;  %v399_v15 = vadd.f32 %v392_v47, %v387_v11 }
 0x437   :  { %v403_v7 = vpack.c.bf16 %v395_v49, %v394_v48 }
 0x438   :  { %v336_v6 = vpop.xlane.xlu1 %335  ;;  %v404_v4 = vpack.c.bf16 %v397_v0, %v396_v62  ;;  %v405_v34 = vpack.c.bf16 %v399_v15, %v398_v14 }
 0x439   :  { %v347_v55 = vmul.f32 0.015625, %v336_v6  ;;  %7615 = vmatmul.mubr.msk.bf16.vlgmr.msra.gmra.mrb[0].mxu1 %vm257_vm4, %v403_v7 }
 0x43a   :  { %524 = vmatprep.mubr.bf16.mxu1 %v14492_v2 }
 0x43b   :  { %v356_v61 = vadd.f32 1e-05, %v347_v55 }
 0x43d   :  { %10023 = vrsqrt.f32 %v356_v61 }
 0x43f   :  { %v10022_v8 = vpop.eup %10021 }
 0x440   :  { %v339_v5 = vpop.xlane.xlu1 %338  ;;  %v373_v16 = vmul.f32 %v10022_v8, %v10800_v45 }
 0x441   :  { %v348_v9 = vmul.f32 0.015625, %v339_v5  ;;  %7616 = vmatmul.mubr.msk.bf16.gmra.mrb[4].mxu1 %vm257_vm4, %v404_v4 }
 0x442   :  { %534 = vmatprep.mubr.bf16.mxu1 %v14492_v2  ;;  %v388_v22 = vmul.f32 %v10832_v1, %v373_v16 }
 0x443   :  { %v357_v13 = vadd.f32 1e-05, %v348_v9 }
 0x444   :  { %v400_v24 = vadd.f32 %v392_v47, %v388_v22 }
 0x445   :  { %10025 = vrsqrt.f32 %v357_v13 }
 0x447   :  { %v10024_v27 = vpop.eup %10023 }
 0x448   :  { %v374_v20 = vmul.f32 %v10024_v27, %v10806_v51 }
 0x449   :  { %7617 = vmatmul.mubr.msk.bf16.gmra.mrb[8].mxu1 %vm257_vm4, %v405_v34 }
 0x44a   :  { %544 = vmatprep.mubr.bf16.mxu1 %v14492_v2  ;;  %v389_v23 = vmul.f32 %v10832_v1, %v374_v20 }
 0x44c   :  { %v401_v26 = vadd.f32 %v392_v47, %v389_v23 }
 0x44e   :  { %v406_v28 = vpack.c.bf16 %v401_v26, %v400_v24 }
 0x44f   :  { %v10026_v29 = vpop.eup %10025 }
 0x450   :  { %v375_v31 = vmul.f32 %v10026_v29, %v10812_v57  ;;  %v252_v57 = vld [vmem:[%s14487_s5 + $0x1] sm:$0x3]  ;;  %v14496_v29 = vmov 0.0  }
 0x451   :  { %7618 = vmatmul.mubr.msk.bf16.gmra.mrb[12].mxu1 %vm257_vm4, %v406_v28  ;;  %v420_v40 = vrot.slane %v252_v57, %v10873_v38  ;;  %8531 = vmatprep.mubr.msk.f32.mxu0 %vm10528_vm5, %v14496_v29 }
 0x452   :  { %554 = vmatprep.mubr.bf16.mxu1 %v14492_v2  ;;  %v390_v45 = vmul.f32 %v10832_v1, %v375_v31  ;;  %v424_v1 = vrot.slane %v252_v57, %v10867_v37 }
 0x454   :  { %v402_v51 = vadd.f32 %v392_v47, %v390_v45 }
 0x456   :  { %v407_v32 = vpack.c.bf16 %v402_v51, %v402_v51 }
 0x459   :  { %7619 = vmatmul.mubr.msk.bf16.gmra.mrb[16].mxu1 %vm257_vm4, %v407_v32 }
 0x45a   :  { %8486 = vmatprep.mubr.msk.f32.mxu1 %vm10528_vm5, %v14496_v29 }
 0x50c   :  { %v516_v41 = vpop.f32.mrb[0].mxu1 }
 0x50d   :  { %v518_v42 = vpop.f32.mrb[1].mxu1  ;;  %v10879_v47 = vadd.f32 %v516_v41, %v420_v40 }
 0x50e   :  { %v519_v44 = vadd.f32 %v518_v42, %v424_v1  ;;  %v520_v46 = vpop.f32.mrb[2].mxu1 }
 0x50f   :  { %v10881_v48 = vadd.f32 %v520_v46, %v420_v40  ;;  %v522_v49 = vpop.f32.mrb[3].mxu1 }
 0x510   :  { %564 = vst.msk [vmem:[#allocation2 + $0x8] sm:$0xff] %vm257_vm4, %v519_v44  ;;  %v523_v52 = vadd.f32 %v522_v49, %v424_v1 }
 0x511   :  { %v10886_v53 = vpack.i.bf16 %v10881_v48, %v10879_v47 }
 0x512   :  { %566 = vst.msk [vmem:[#allocation2 + $0x18] sm:$0xff] %vm257_vm4, %v523_v52 }
 0x513   :  { %9530 = vrot.lane.b32.xlu1 %v10886_v53, %s10527_s13 }
 0x514   :  { %v526_v7 = vpop.f32.mrb[4].mxu1 }
 0x515   :  { %v528_v6 = vpop.f32.mrb[5].mxu1  ;;  %v10891_v58 = vadd.f32 %v526_v7, %v420_v40 }
 0x516   :  { %v529_v54 = vadd.f32 %v528_v6, %v424_v1  ;;  %v530_v55 = vpop.f32.mrb[6].mxu1 }
 0x517   :  { %v10893_v59 = vadd.f32 %v530_v55, %v420_v40  ;;  %v532_v60 = vpop.f32.mrb[7].mxu1  ;;  %v2091_v33 = vld [vmem:[#allocation2 + $0x8] sm:$0xff] }
 0x518   :  { %568 = vst.msk [vmem:[#allocation2 + $0x28] sm:$0xff] %vm257_vm4, %v529_v54  ;;  %v533_v61 = vadd.f32 %v532_v60, %v424_v1 }
 0x519   :  { %v10898_v62 = vpack.i.bf16 %v10893_v59, %v10891_v58  ;;  %v2092_v32 = vld [vmem:[#allocation2 + $0x18] sm:$0xff] }
 0x51a   :  { %570 = vst.msk [vmem:[#allocation2 + $0x38] sm:$0xff] %vm257_vm4, %v533_v61  ;;  %v9589_v57 = vpack.i.bf16 %v2092_v32, %v2091_v33  ;;  %v14527_v61 = vmov 0 }
 0x51b   :  { %9535 = vrot.lane.b32.xlu0 %v10898_v62, %s10527_s13  ;;  %v14528_v61 = vsel %vm11014_vm7, 4294967295, %v14527_v61 }
 0x51c   :  { %v536_v0 = vpop.f32.mrb[8].mxu1  ;;  %14529 = vst [vmem:[#allocation18_spill] sm:$0xff] %v14528_v61 }
 0x51d   :  { %v538_v12 = vpop.f32.mrb[9].mxu1  ;;  %v10903_v5 = vadd.f32 %v536_v0, %v420_v40 }
 0x51e   :  { %v539_v21 = vadd.f32 %v538_v12, %v424_v1  ;;  %v540_v4 = vpop.f32.mrb[10].mxu1 }
 0x51f   :  { %v10905_v8 = vadd.f32 %v540_v4, %v420_v40  ;;  %v542_v9 = vpop.f32.mrb[11].mxu1 }
 0x520   :  { %572 = vst.msk [vmem:[#allocation2 + $0x48] sm:$0xff] %vm257_vm4, %v539_v21  ;;  %v543_v10 = vadd.f32 %v542_v9, %v424_v1 }
 0x521   :  { %v10910_v11 = vpack.i.bf16 %v10905_v8, %v10903_v5 }
 0x522   :  { %574 = vst.msk [vmem:[#allocation2 + $0x58] sm:$0xff] %vm257_vm4, %v543_v10 }
 0x523   :  { %9540 = vrot.lane.b32.xlu1 %v10910_v11, %s10527_s13 }
 0x524   :  { %v546_v13 = vpop.f32.mrb[12].mxu1 }
 0x525   :  { %v548_v14 = vpop.f32.mrb[13].mxu1  ;;  %v10915_v27 = vadd.f32 %v546_v13, %v420_v40 }
 0x526   :  { %v549_v15 = vadd.f32 %v548_v14, %v424_v1  ;;  %v550_v16 = vpop.f32.mrb[14].mxu1 }
 0x527   :  { %v10917_v34 = vadd.f32 %v550_v16, %v420_v40  ;;  %v552_v20 = vpop.f32.mrb[15].mxu1  ;;  %v2095_v44 = vld [vmem:[#allocation2 + $0x48] sm:$0xff] }
 0x528   :  { %576 = vst.msk [vmem:[#allocation2 + $0x68] sm:$0xff] %vm257_vm4, %v549_v15  ;;  %v553_v22 = vadd.f32 %v552_v20, %v424_v1 }
 0x529   :  { %v10922_v23 = vpack.i.bf16 %v10917_v34, %v10915_v27  ;;  %v2096_v42 = vld [vmem:[#allocation2 + $0x58] sm:$0xff] }
 0x52a   :  { %578 = vst.msk [vmem:[#allocation2 + $0x78] sm:$0xff] %vm257_vm4, %v553_v22  ;;  %v9599_v46 = vpack.i.bf16 %v2096_v42, %v2095_v44 }
 0x52b   :  { %9545 = vrot.lane.b32.xlu0 %v10922_v23, %s10527_s13 }
 0x52c   :  { %v556_v24 = vpop.f32.mrb[16].mxu1 }
 0x52d   :  { %v10927_v26 = vadd.f32 %v556_v24, %v420_v40  ;;  %v558_v28 = vpop.f32.mrb[17].mxu1  ;;  %v2093_v40 = vld [vmem:[#allocation2 + $0x28] sm:$0xff] }
 0x52e   :  { %v559_v31 = vadd.f32 %v558_v28, %v424_v1  ;;  %v560_v45 = vpop.f32.mrb[18].mxu1  ;;  %v2094_v1 = vld [vmem:[#allocation2 + $0x38] sm:$0xff] }
 0x52f   :  { %v561_v51 = vpop.f32.mrb[19].mxu1  ;;  %9550 = vrot.lane.b32.xlu0 %v10886_v53, %s10525_s27  ;;  %615 = vrot.lane.b32.xlu1 %v10927_v26, %s10527_s13  ;;  %v9594_v41 = vpack.i.bf16 %v2094_v1, %v2093_v40  ;;  %v2097_v52 = vld [vmem:[#allocation2 + $0x68] sm:$0xff] }
 0x530   :  { %580 = vst.msk [vmem:[#allocation2 + $0x88] sm:$0xff] %vm257_vm4, %v559_v31 }
 0x531   :  { %v2098_v49 = vld [vmem:[#allocation2 + $0x78] sm:$0xff] }
 0x532   :  { %v9604_v7 = vpack.i.bf16 %v2098_v49, %v2097_v52 }
 0x533   :  { %9560 = vrot.lane.b32.xlu0 %v10910_v11, %s10525_s27  ;;  %9555 = vrot.lane.b32.xlu1 %v10898_v62, %s10525_s27 }
 0x537   :  { %1107 = vrot.lane.b32.xlu0 %v10927_v26, %s10525_s27  ;;  %9565 = vrot.lane.b32.xlu1 %v10922_v23, %s10525_s27  ;;  %v2099_v6 = vld [vmem:[#allocation2 + $0x88] sm:$0xff] }
 0x53b   :  { %1073 = vrot.lane.b32.xlu0 %v10879_v47, %s10530_s30  ;;  %9570 = vrot.lane.b32.xlu1 %v10886_v53, %s10531_s10 }
 0x53f   :  { %9575 = vrot.lane.b32.xlu0 %v10898_v62, %s10531_s10  ;;  %1075 = vrot.lane.b32.xlu1 %v10881_v48, %s10530_s30 }
 0x543   :  { %1079 = vrot.lane.b32.xlu0 %v10893_v59, %s10530_s30  ;;  %1077 = vrot.lane.b32.xlu1 %v10891_v58, %s10530_s30 }
 0x547   :  { %1081 = vrot.lane.b32.xlu0 %v10903_v5, %s10530_s30  ;;  %9580 = vrot.lane.b32.xlu1 %v10910_v11, %s10531_s10 }
 0x54b   :  { %9585 = vrot.lane.b32.xlu0 %v10922_v23, %s10531_s10  ;;  %1083 = vrot.lane.b32.xlu1 %v10905_v8, %s10530_s30 }
 0x54f   :  { %1087 = vrot.lane.b32.xlu0 %v10917_v34, %s10530_s30  ;;  %1085 = vrot.lane.b32.xlu1 %v10915_v27, %s10530_s30 }
 0x553   :  { %1643 = vrot.lane.b32.xlu0 %v10927_v26, %s10531_s10  ;;  %1089 = vrot.lane.b32.xlu1 %v10927_v26, %s10530_s30 }
 0x557   :  { %1609 = vrot.lane.b32.xlu0 %v10879_v47, %s10532_s11  ;;  %9590 = vrot.lane.b32.xlu1 %v9589_v57, %s10533_s12 }
 0x55b   :  { %9595 = vrot.lane.b32.xlu0 %v9594_v41, %s10533_s12  ;;  %1611 = vrot.lane.b32.xlu1 %v10881_v48, %s10532_s11 }
 0x55f   :  { %1615 = vrot.lane.b32.xlu0 %v10893_v59, %s10532_s11  ;;  %1613 = vrot.lane.b32.xlu1 %v10891_v58, %s10532_s11 }
 0x563   :  { %1617 = vrot.lane.b32.xlu0 %v10903_v5, %s10532_s11  ;;  %9600 = vrot.lane.b32.xlu1 %v9599_v46, %s10533_s12 }
 0x567   :  { %9605 = vrot.lane.b32.xlu0 %v9604_v7, %s10533_s12  ;;  %1619 = vrot.lane.b32.xlu1 %v10905_v8, %s10532_s11 }
 0x56b   :  { %1623 = vrot.lane.b32.xlu0 %v10917_v34, %s10532_s11  ;;  %1621 = vrot.lane.b32.xlu1 %v10915_v27, %s10532_s11 }
 0x56f   :  { %2143 = vrot.lane.b32.xlu0 %v2099_v6, %s10533_s12  ;;  %1625 = vrot.lane.b32.xlu1 %v10927_v26, %s10532_s11 }
 0x573   :  { %2111 = vrot.lane.b32.xlu0 %v2092_v32, %s10527_s13  ;;  %2109 = vrot.lane.b32.xlu1 %v2091_v33, %s10527_s13 }
 0x577   :  { %2115 = vrot.lane.b32.xlu0 %v2094_v1, %s10527_s13  ;;  %2113 = vrot.lane.b32.xlu1 %v2093_v40, %s10527_s13 }
 0x57b   :  { %2119 = vrot.lane.b32.xlu0 %v2096_v42, %s10527_s13  ;;  %2117 = vrot.lane.b32.xlu1 %v2095_v44, %s10527_s13 }
 0x57f   :  { %2123 = vrot.lane.b32.xlu0 %v2098_v49, %s10527_s13  ;;  %2121 = vrot.lane.b32.xlu1 %v2097_v52, %s10527_s13 }
 0x583   :  { %9610 = vrot.lane.b32.xlu0 %v10886_v53, %s10533_s12  ;;  %2125 = vrot.lane.b32.xlu1 %v2099_v6, %s10527_s13 }
 0x585   :  { %v9531_v54 = vpop.permute.xlu1 %9530 }
 0x586   :  { %v9533_v55 = vunpack.i.h.bf16 %v9531_v54  ;;  %v9532_v60 = vunpack.i.l.bf16 %v9531_v54 }
 0x587   :  { %9620 = vrot.lane.b32.xlu0 %v10910_v11, %s10533_s12  ;;  %9615 = vrot.lane.b32.xlu1 %v10898_v62, %s10533_s12 }
 0x588   :  { %v9245_v0 = vpack.c.bf16 %v9533_v55, %v9532_v60 }
 0x58a   :  { %9247 = vmatpush3.bf16.xpose.msk.msra.mxu1 %vm11014_vm7, %v9245_v0 }
 0x58b   :  { %898 = vrot.lane.b32.xlu0 %v10927_v26, %s10533_s12  ;;  %9625 = vrot.lane.b32.xlu1 %v10922_v23, %s10533_s12 }
 0x58c   :  { %9248 = vmatprep.subr.bf16.mxu1 %v14494_v39 }
 0x58d   :  { %v9536_v12 = vpop.permute.xlu0 %9535 }
 0x58e   :  { %v9538_v21 = vunpack.i.h.bf16 %v9536_v12  ;;  %v9537_v4 = vunpack.i.l.bf16 %v9536_v12 }
 0x58f   :  { %9635 = vrot.lane.b32.xlu0 %v10898_v62, %s10534_s14  ;;  %9630 = vrot.lane.b32.xlu1 %v10886_v53, %s10534_s14 }
 0x590   :  { %v9249_v9 = vpack.c.bf16 %v9538_v21, %v9537_v4 }
 0x592   :  { %9251 = vmatpush3.bf16.xpose.msk.msra.mxu1 %vm11014_vm7, %v9249_v9 }
 0x593   :  { %9640 = vrot.lane.b32.xlu1 %v10910_v11, %s10534_s14  ;;  %9252 = vmatprep.subr.bf16.mxu1 %v14494_v39 }
 0x595   :  { %v9541_v10 = vpop.permute.xlu1 %9540 }
 0x596   :  { %v9543_v13 = vunpack.i.h.bf16 %v9541_v10  ;;  %v9542_v14 = vunpack.i.l.bf16 %v9541_v10 }
 0x597   :  { %9645 = vrot.lane.b32.xlu1 %v10922_v23, %s10534_s14 }
 0x598   :  { %v9253_v15 = vpack.c.bf16 %v9543_v13, %v9542_v14 }
 0x59a   :  { %9255 = vmatpush3.bf16.xpose.msk.msra.mxu1 %vm11014_vm7, %v9253_v15 }
 0x59b   :  { %1388 = vrot.lane.b32.xlu1 %v10927_v26, %s10534_s14  ;;  %9256 = vmatprep.subr.bf16.mxu1 %v14494_v39 }
 0x59d   :  { %v9546_v53 = vpop.permute.xlu0 %9545 }
 0x59e   :  { %v9548_v62 = vunpack.i.h.bf16 %v9546_v53  ;;  %v9547_v11 = vunpack.i.l.bf16 %v9546_v53 }
 0x5a0   :  { %v9257_v16 = vpack.c.bf16 %v9548_v62, %v9547_v11 }
 0x5a1   :  { %v9551_v20 = vpop.permute.xlu0 %9550  ;;  %v616_v22 = vpop.permute.xlu1 %615 }
 0x5a2   :  { %9259 = vmatpush3.bf16.xpose.msk.msra.mxu1 %vm11014_vm7, %v9257_v16  ;;  %v9553_v28 = vunpack.i.h.bf16 %v9551_v20  ;;  %v9552_v31 = vunpack.i.l.bf16 %v9551_v20 }
 0x5a3   :  { %8484 = vmatprep.subr.mxu1 %v14496_v29 }
 0x5a4   :  { %v9273_v32 = vpack.c.bf16 %v9553_v28, %v9552_v31 }
 0x5a5   :  { %v9561_v23 = vpop.permute.xlu0 %9560  ;;  %v9556_v24 = vpop.permute.xlu1 %9555 }
 0x5a6   :  { %v9558_v1 = vunpack.i.h.bf16 %v9556_v24  ;;  %v9557_v40 = vunpack.i.l.bf16 %v9556_v24  ;;  %v9563_v49 = vunpack.i.h.bf16 %v9561_v23 }
 0x5a9   :  { %v1108_v45 = vpop.permute.xlu0 %1107  ;;  %v9566_v51 = vpop.permute.xlu1 %9565 }
 0x5aa   :  { %8485 = vmatpush3.xpose.msk.msra.mxu1 %vm617_vm6, %v616_v22  ;;  %v9567_v55 = vunpack.i.l.bf16 %v9566_v51 }
 0x5ab   :  { %9272 = vmatprep.subr.bf16.mxu1 %v14494_v39 }
 0x5ad   :  { %v1074_v33 = vpop.permute.xlu0 %1073  ;;  %v9571_v57 = vpop.permute.xlu1 %9570  ;;  %8487 = vmatmul.mubr.msk.f32.vlgmr.msra.gmra.mrb[20].mxu1 %vm617_vm6, %v10879_v47  ;;  %v9277_v47 = vpack.c.bf16 %v9558_v1, %v9557_v40 }
 0x5ae   :  { %9275 = vmatpush3.bf16.xpose.msk.msra.mxu1 %vm11014_vm7, %v9273_v32  ;;  %8489 = vmatprep.mubr.msk.f32.mxu1 %vm10528_vm5, %v14496_v29  ;;  %v9573_v9 = vunpack.i.h.bf16 %v9571_v57 }
 0x5af   :  { %9276 = vmatprep.subr.bf16.mxu1 %v14494_v39 }
 0x5b1   :  { %v11053_v41 = vpop.permute.xlu0 %9575  ;;  %v1076_v42 = vpop.permute.xlu1 %1075  ;;  %8490 = vmatmul.mubr.msk.f32.gmra.mrb[22].mxu1 %vm617_vm6, %v10881_v48  ;;  %v9562_v48 = vunpack.i.l.bf16 %v9561_v23 }
 0x5b2   :  { %8492 = vmatprep.mubr.msk.f32.mxu1 %vm10528_vm5, %v14496_v29  ;;  %v9577_v53 = vunpack.i.l.bf16 %v11053_v41 }
 0x5b5   :  { %v11059_v44 = vpop.permute.xlu0 %1079  ;;  %v1078_v46 = vpop.permute.xlu1 %1077  ;;  %8493 = vmatmul.mubr.msk.f32.gmra.mrb[24].mxu1 %vm617_vm6, %v10891_v58  ;;  %v9281_v58 = vpack.c.bf16 %v9563_v49, %v9562_v48 }
 0x5b6   :  { %9279 = vmatpush3.bf16.xpose.msk.msra.mxu1 %vm11014_vm7, %v9277_v47  ;;  %8495 = vmatprep.mubr.msk.f32.mxu1 %vm10528_vm5, %v14496_v29 }
 0x5b7   :  { %9280 = vmatprep.subr.bf16.mxu1 %v14494_v39 }
 0x5b9   :  { %v11068_v52 = vpop.permute.xlu0 %1081  ;;  %v9581_v7 = vpop.permute.xlu1 %9580  ;;  %8496 = vmatmul.mubr.msk.f32.gmra.mrb[26].mxu1 %vm617_vm6, %v10893_v59  ;;  %v9568_v59 = vunpack.i.h.bf16 %v9566_v51 }
 0x5ba   :  { %8498 = vmatprep.mubr.msk.f32.mxu1 %vm10528_vm5, %v14496_v29  ;;  %v9583_v23 = vunpack.i.h.bf16 %v9581_v7  ;;  %v9582_v24 = vunpack.i.l.bf16 %v9581_v7 }
 0x5bd   :  { %v11074_v6 = vpop.permute.xlu0 %9585  ;;  %v11076_v54 = vpop.permute.xlu1 %1083  ;;  %8499 = vmatmul.mubr.msk.f32.gmra.mrb[28].mxu1 %vm617_vm6, %v10903_v5  ;;  %v9285_v5 = vpack.c.bf16 %v9568_v59, %v9567_v55 }
 0x5be   :  { %9283 = vmatpush3.bf16.xpose.msk.msra.mxu1 %vm11014_vm7, %v9281_v58  ;;  %8501 = vmatprep.mubr.msk.f32.mxu1 %vm10528_vm5, %v14496_v29 }
 0x5bf   :  { %9284 = vmatprep.subr.bf16.mxu1 %v14494_v39 }
 0x5c1   :  { %v11085_v60 = vpop.permute.xlu0 %1087  ;;  %v11087_v0 = vpop.permute.xlu1 %1085  ;;  %8502 = vmatmul.mubr.msk.f32.gmra.mrb[30].mxu1 %vm617_vm6, %v10905_v8 }
 0x5c2   :  { %8504 = vmatprep.mubr.msk.f32.mxu1 %vm10528_vm5, %v14496_v29 }
 0x5c5   :  { %v11093_v12 = vpop.permute.xlu0 %1643  ;;  %v11095_v21 = vpop.permute.xlu1 %1089  ;;  %8505 = vmatmul.mubr.msk.f32.gmra.mrb[32].mxu1 %vm617_vm6, %v10915_v27  ;;  %v9572_v27 = vunpack.i.l.bf16 %v9571_v57  ;;  %v9587_v57 = vunpack.i.l.bf16 %v11074_v6 }
 0x5c6   :  { %9287 = vmatpush3.bf16.xpose.msk.msra.mxu1 %vm11014_vm7, %v9285_v5  ;;  %8507 = vmatprep.mubr.msk.f32.mxu1 %vm10528_vm5, %v14496_v29 }
 0x5c7   :  { %8574 = vmatprep.subr.mxu1 %v14496_v29 }
 0x5c9   :  { %v11104_v8 = vpop.permute.xlu0 %1609  ;;  %v11106_v4 = vpop.permute.xlu1 %9590  ;;  %8508 = vmatmul.mubr.msk.f32.gmra.mrb[34].mxu1 %vm617_vm6, %v10917_v34  ;;  %v9301_v34 = vpack.c.bf16 %v9573_v9, %v9572_v27 }
 0x5ca   :  { %8510 = vmatprep.mubr.msk.f32.mxu1 %vm10528_vm5, %v14496_v29  ;;  %v9593_v49 = vunpack.i.h.bf16 %v11106_v4  ;;  %v9592_v48 = vunpack.i.l.bf16 %v11106_v4 }
 0x5cc   :  { %v9329_v58 = vpack.c.bf16 %v9593_v49, %v9592_v48  ;;  %v11335_v48 = vld [vmem:[%s14483_s1 + $0x20] sm:$0xff] }
 0x5cd   :  { %v11112_v10 = vpop.permute.xlu0 %9595  ;;  %v11114_v13 = vpop.permute.xlu1 %1611  ;;  %8511 = vmatmul.mubr.msk.f32.gmra.mrb[36].mxu1 %vm617_vm6, %v10927_v26  ;;  %v9578_v26 = vunpack.i.h.bf16 %v11053_v41 }
 0x5ce   :  { %8575 = vmatpush3.xpose.msk.msra.mxu1 %vm617_vm6, %v1108_v45  ;;  %8576 = vmatprep.mubr.msk.f32.mxu1 %vm10528_vm5, %v14496_v29  ;;  %v9309_v45 = vpack.c.bf16 %v9583_v23, %v9582_v24 }
 0x5cf   :  { %9300 = vmatprep.subr.bf16.mxu1 %v14494_v39  ;;  %v9305_v16 = vpack.c.bf16 %v9578_v26, %v9577_v53 }
 0x5d1   :  { %v11122_v14 = vpop.permute.xlu0 %1615  ;;  %v11124_v15 = vpop.permute.xlu1 %1613  ;;  %8577 = vmatmul.mubr.msk.f32.vlgmr.msra.gmra.mrb[38].mxu1 %vm617_vm6, %v1074_v33  ;;  %v9588_v33 = vunpack.i.h.bf16 %v11074_v6 }
 0x5d2   :  { %9303 = vmatpush3.bf16.xpose.msk.msra.mxu1 %vm11014_vm7, %v9301_v34  ;;  %8579 = vmatprep.mubr.msk.f32.mxu1 %vm10528_vm5, %v14496_v29 }
 0x5d3   :  { %9304 = vmatprep.subr.bf16.mxu1 %v14494_v39  ;;  %v9313_v41 = vpack.c.bf16 %v9588_v33, %v9587_v57 }
 0x5d5   :  { %v11134_v62 = vpop.permute.xlu0 %1617  ;;  %v11136_v11 = vpop.permute.xlu1 %9600  ;;  %8580 = vmatmul.mubr.msk.f32.gmra.mrb[40].mxu1 %vm617_vm6, %v1076_v42 }
 0x5d6   :  { %8582 = vmatprep.mubr.msk.f32.mxu1 %vm10528_vm5, %v14496_v29 }
 0x5d9   :  { %v11141_v20 = vpop.permute.xlu0 %9605  ;;  %v11143_v22 = vpop.permute.xlu1 %1619  ;;  %8583 = vmatmul.mubr.msk.f32.gmra.mrb[42].mxu1 %vm617_vm6, %v1078_v46 }
 0x5da   :  { %9307 = vmatpush3.bf16.xpose.msk.msra.mxu1 %vm11014_vm7, %v9305_v16  ;;  %8585 = vmatprep.mubr.msk.f32.mxu1 %vm10528_vm5, %v14496_v29 }
 0x5db   :  { %9308 = vmatprep.subr.bf16.mxu1 %v14494_v39 }
 0x5dd   :  { %v11151_v28 = vpop.permute.xlu0 %1623  ;;  %v11153_v31 = vpop.permute.xlu1 %1621  ;;  %8586 = vmatmul.mubr.msk.f32.gmra.mrb[44].mxu1 %vm617_vm6, %v11059_v44 }
 0x5de   :  { %8588 = vmatprep.mubr.msk.f32.mxu1 %vm10528_vm5, %v14496_v29 }
 0x5e1   :  { %v11159_v51 = vpop.permute.xlu0 %2143  ;;  %v11161_v32 = vpop.permute.xlu1 %1625  ;;  %8589 = vmatmul.mubr.msk.f32.gmra.mrb[46].mxu1 %vm617_vm6, %v11068_v52 }
 0x5e2   :  { %9311 = vmatpush3.bf16.xpose.msk.msra.mxu1 %vm11014_vm7, %v9309_v45  ;;  %8591 = vmatprep.mubr.msk.f32.mxu1 %vm10528_vm5, %v14496_v29 }
 0x5e3   :  { %9312 = vmatprep.subr.bf16.mxu1 %v14494_v39 }
 0x5e5   :  { %v11172_v1 = vpop.permute.xlu0 %2111  ;;  %v11174_v40 = vpop.permute.xlu1 %2109  ;;  %8592 = vmatmul.mubr.msk.f32.gmra.mrb[48].mxu1 %vm617_vm6, %v11076_v54 }
 0x5e6   :  { %8594 = vmatprep.mubr.msk.f32.mxu1 %vm10528_vm5, %v14496_v29 }
 0x5e9   :  { %v11180_v42 = vpop.permute.xlu0 %2115  ;;  %v11182_v47 = vpop.permute.xlu1 %2113  ;;  %8595 = vmatmul.mubr.msk.f32.gmra.mrb[50].mxu1 %vm617_vm6, %v11087_v0  ;;  %v9597_v0 = vunpack.i.l.bf16 %v11112_v10 }
 0x5ea   :  { %9315 = vmatpush3.bf16.xpose.msk.msra.mxu1 %vm11014_vm7, %v9313_v41  ;;  %8597 = vmatprep.mubr.msk.f32.mxu1 %vm10528_vm5, %v14496_v29  ;;  %v11325_v41 = vld [vmem:[%s14483_s1 + $0x10] sm:$0xff] }
 0x5eb   :  { %8664 = vmatprep.subr.mxu1 %v14496_v29 }
 0x5ed   :  { %v11191_v44 = vpop.permute.xlu0 %2119  ;;  %v11193_v46 = vpop.permute.xlu1 %2117  ;;  %8598 = vmatmul.mubr.msk.f32.gmra.mrb[52].mxu1 %vm617_vm6, %v11085_v60  ;;  %v9598_v60 = vunpack.i.h.bf16 %v11112_v10  ;;  %v9603_v10 = vunpack.i.h.bf16 %v11136_v11 }
 0x5ee   :  { %8600 = vmatprep.mubr.msk.f32.mxu1 %vm10528_vm5, %v14496_v29 }
 0x5ef   :  { %v9333_v9 = vpack.c.bf16 %v9598_v60, %v9597_v0 }
 0x5f1   :  { %v11201_v52 = vpop.permute.xlu0 %2123  ;;  %v11203_v7 = vpop.permute.xlu1 %2121  ;;  %8601 = vmatmul.mubr.msk.f32.gmra.mrb[54].mxu1 %vm617_vm6, %v11095_v21 }
 0x5f2   :  { %8665 = vmatpush3.xpose.msk.msra.mxu1 %vm617_vm6, %v11093_v12  ;;  %8666 = vmatprep.mubr.msk.f32.mxu1 %vm10528_vm5, %v14496_v29 }
 0x5f3   :  { %9328 = vmatprep.subr.bf16.mxu1 %v14494_v39 }
 0x5f5   :  { %v9611_v6 = vpop.permute.xlu0 %9610  ;;  %v11212_v54 = vpop.permute.xlu1 %2125  ;;  %8667 = vmatmul.mubr.msk.f32.vlgmr.msra.gmra.mrb[56].mxu1 %vm617_vm6, %v11104_v8 }
 0x5f6   :  { %9331 = vmatpush3.bf16.xpose.msk.msra.mxu1 %vm11014_vm7, %v9329_v58  ;;  %8669 = vmatprep.mubr.msk.f32.mxu1 %vm10528_vm5, %v14496_v29  ;;  %v9613_v59 = vunpack.i.h.bf16 %v9611_v6  ;;  %v9612_v55 = vunpack.i.l.bf16 %v9611_v6 }
 0x5f7   :  { %9332 = vmatprep.subr.bf16.mxu1 %v14494_v39 }
 0x5f8   :  { %v9261_v5 = vpack.c.bf16 %v9613_v59, %v9612_v55  ;;  %v11345_v59 = vld [vmem:[%s14483_s1 + $0x30] sm:$0xff] }
 0x5f9   :  { %v9621_v12 = vpop.permute.xlu0 %9620  ;;  %v9616_v21 = vpop.permute.xlu1 %9615  ;;  %8670 = vmatmul.mubr.msk.f32.gmra.mrb[58].mxu1 %vm617_vm6, %v11114_v13  ;;  %v9602_v13 = vunpack.i.l.bf16 %v11136_v11  ;;  %v9607_v11 = vunpack.i.l.bf16 %v11141_v20 }
 0x5fa   :  { %v9618_v8 = vunpack.i.h.bf16 %v9616_v21  ;;  %v9617_v4 = vunpack.i.l.bf16 %v9616_v21  ;;  %9262 = vmatpush3.bf16.msra.mxu0 %v9261_v5  ;;  %8672 = vmatprep.mubr.msk.f32.mxu1 %vm10528_vm5, %v14496_v29  ;;  %v9623_v27 = vunpack.i.h.bf16 %v9621_v12  ;;  %v9622_v34 = vunpack.i.l.bf16 %v9621_v12  ;;  %v11355_v21 = vld [vmem:[%s14483_s1 + $0x40] sm:$0xff] }
 0x5fb   :  { %9263 = vmatprep.subr.bf16.mxu0 %v14494_v39 }
 0x5fc   :  { %v9264_v26 = vpack.c.bf16 %v9618_v8, %v9617_v4  ;;  %v9267_v24 = vpack.c.bf16 %v9623_v27, %v9622_v34 }
 0x5fd   :  { %v9626_v53 = vpop.permute.xlu1 %9625  ;;  %8673 = vmatmul.mubr.msk.f32.gmra.mrb[60].mxu1 %vm617_vm6, %v11124_v15  ;;  %v9337_v15 = vpack.c.bf16 %v9603_v10, %v9602_v13  ;;  %v899_v33 = vpop.permute.xlu0 %898 }
 0x5fe   :  { %9265 = vmatpush3.bf16.msra.mxu0 %v9264_v26  ;;  %9335 = vmatpush3.bf16.xpose.msk.msra.mxu1 %vm11014_vm7, %v9333_v9  ;;  %v9628_v16 = vunpack.i.h.bf16 %v9626_v53  ;;  %v9627_v23 = vunpack.i.l.bf16 %v9626_v53  ;;  %v11365_v26 = vld [vmem:[%s14483_s1 + $0x50] sm:$0xff] }
 0x5ff   :  { %8675 = vmatprep.mubr.msk.f32.mxu1 %vm10528_vm5, %v14496_v29  ;;  %9266 = vmatprep.subr.bf16.mxu0 %v14494_v39 }
 0x600   :  { %9336 = vmatprep.subr.bf16.mxu1 %v14494_v39  ;;  %v9270_v45 = vpack.c.bf16 %v9628_v16, %v9627_v23 }
 0x601   :  { %8676 = vmatmul.mubr.msk.f32.gmra.mrb[62].mxu1 %vm617_vm6, %v11122_v14  ;;  %v9608_v14 = vunpack.i.h.bf16 %v11141_v20 }
 0x602   :  { %9268 = vmatpush3.bf16.msra.mxu0 %v9267_v24  ;;  %8678 = vmatprep.mubr.msk.f32.mxu1 %vm10528_vm5, %v14496_v29  ;;  %v11375_v24 = vld [vmem:[%s14483_s1 + $0x60] sm:$0xff] }
 0x603   :  { %9269 = vmatprep.subr.bf16.mxu0 %v14494_v39 }
 0x605   :  { %8679 = vmatmul.mubr.msk.f32.gmra.mrb[64].mxu1 %vm617_vm6, %v11134_v62  ;;  %v9341_v62 = vpack.c.bf16 %v9608_v14, %v9607_v11 }
 0x606   :  { %9271 = vmatpush3.bf16.msra.mxu0 %v9270_v45  ;;  %9339 = vmatpush3.bf16.xpose.msk.msra.mxu1 %vm11014_vm7, %v9337_v15 }
 0x607   :  { %8681 = vmatprep.mubr.msk.f32.mxu1 %vm10528_vm5, %v14496_v29  ;;  %8529 = vmatprep.subr.mxu0 %v14496_v29 }
 0x608   :  { %9340 = vmatprep.subr.bf16.mxu1 %v14494_v39 }
 0x609   :  { %8682 = vmatmul.mubr.msk.f32.gmra.mrb[66].mxu1 %vm617_vm6, %v11143_v22 }
 0x60a   :  { %8530 = vmatpush3.msra.mxu0 %v899_v33  ;;  %8684 = vmatprep.mubr.msk.f32.mxu1 %vm10528_vm5, %v14496_v29 }
 0x60b   :  { %9288 = vmatprep.subr.bf16.mxu0 %v14494_v39 }
 0x60d   :  { %8685 = vmatmul.mubr.msk.f32.gmra.mrb[68].mxu1 %vm617_vm6, %v11153_v31  ;;  %v11315_v31 = vld [vmem:[%s14483_s1] sm:$0xff] }
 0x60e   :  { %9343 = vmatpush3.bf16.xpose.msk.msra.mxu1 %vm11014_vm7, %v9341_v62  ;;  %8687 = vmatprep.mubr.msk.f32.mxu1 %vm10528_vm5, %v14496_v29  ;;  %v11385_v62 = vld [vmem:[%s14483_s1 + $0x70] sm:$0xff] }
 0x60f   :  { %8754 = vmatprep.subr.mxu1 %v14496_v29 }
 0x611   :  { %8688 = vmatmul.mubr.msk.f32.gmra.mrb[70].mxu1 %vm617_vm6, %v11151_v28 }
 0x612   :  { %8690 = vmatprep.mubr.msk.f32.mxu1 %vm10528_vm5, %v14496_v29 }
 0x615   :  { %8691 = vmatmul.mubr.msk.f32.gmra.mrb[72].mxu1 %vm617_vm6, %v11161_v32 }
 0x616   :  { %8755 = vmatpush3.xpose.msk.msra.mxu1 %vm617_vm6, %v11159_v51  ;;  %8756 = vmatprep.mubr.msk.f32.mxu1 %vm10528_vm5, %v14496_v29 }
 0x617   :  { %8828 = vmatprep.subr.bf16.mxu1 %v14496_v29 }
 0x619   :  { %8757 = vmatmul.mubr.msk.f32.vlgmr.msra.gmra.mrb[74].mxu1 %vm617_vm6, %v11174_v40 }
 0x61a   :  { %8759 = vmatprep.mubr.msk.f32.mxu1 %vm10528_vm5, %v14496_v29 }
 0x61d   :  { %8760 = vmatmul.mubr.msk.f32.gmra.mrb[76].mxu1 %vm617_vm6, %v11172_v1 }
 0x61e   :  { %8762 = vmatprep.mubr.msk.f32.mxu1 %vm10528_vm5, %v14496_v29 }
 0x621   :  { %8763 = vmatmul.mubr.msk.f32.gmra.mrb[78].mxu1 %vm617_vm6, %v11182_v47 }
 0x622   :  { %8765 = vmatprep.mubr.msk.f32.mxu1 %vm10528_vm5, %v14496_v29 }
 0x625   :  { %8766 = vmatmul.mubr.msk.f32.gmra.mrb[80].mxu1 %vm617_vm6, %v11180_v42 }
 0x626   :  { %8768 = vmatprep.mubr.msk.f32.mxu1 %vm10528_vm5, %v14496_v29 }
 0x629   :  { %8769 = vmatmul.mubr.msk.f32.gmra.mrb[82].mxu1 %vm617_vm6, %v11193_v46 }
 0x62a   :  { %8771 = vmatprep.mubr.msk.f32.mxu1 %vm10528_vm5, %v14496_v29 }
 0x62d   :  { %8772 = vmatmul.mubr.msk.f32.gmra.mrb[84].mxu1 %vm617_vm6, %v11191_v44 }
 0x62e   :  { %8774 = vmatprep.mubr.msk.f32.mxu1 %vm10528_vm5, %v14496_v29 }
 0x631   :  { %8775 = vmatmul.mubr.msk.f32.gmra.mrb[86].mxu1 %vm617_vm6, %v11203_v7 }
 0x632   :  { %8777 = vmatprep.mubr.msk.f32.mxu1 %vm10528_vm5, %v14496_v29 }
 0x635   :  { %8778 = vmatmul.mubr.msk.f32.gmra.mrb[88].mxu1 %vm617_vm6, %v11201_v52 }
 0x636   :  { %8780 = vmatprep.mubr.msk.f32.mxu1 %vm10528_vm5, %v14496_v29 }
 0x639   :  { %8781 = vmatmul.mubr.msk.f32.gmra.mrb[90].mxu1 %vm617_vm6, %v11212_v54 }
 0x63a   :  { %8836 = vmatprep.mubr.msk.bf16.mxu1 %vm10528_vm5, %v14496_v29 }
 0x680   :  { %v720_v20 = vpop.f32.mrb[20].mxu1 }
 0x681   :  { %v764_v22 = vmul.f32 0.25, %v720_v20  ;;  %v8488_v28 = vpop.f32.mrb[21].mxu1 }
 0x683   :  { %v11318_v51 = vadd.f32 %v11315_v31, %v764_v22 }
 0x684   :  { %v725_v32 = vpop.f32.mrb[22].mxu1 }
 0x685   :  { %v765_v57 = vmul.f32 0.25, %v725_v32  ;;  %v8491_v1 = vpop.f32.mrb[23].mxu1  ;;  %v783_v40 = vsel %vm782_vm8, %v11318_v51, -inf }
 0x686   :  { %784 = vmax.xlane.f32.xlu0 %v783_v40  ;;  %v11395_v1 = vld [vmem:[%s14483_s1 + $0x80] sm:$0xff] }
 0x687   :  { %v11328_v42 = vadd.f32 %v11325_v41, %v765_v57 }
 0x688   :  { %v730_v47 = vpop.f32.mrb[24].mxu1 }
 0x689   :  { %v766_v44 = vmul.f32 0.25, %v730_v47  ;;  %v8494_v46 = vpop.f32.mrb[25].mxu1  ;;  %v786_v49 = vsel %vm782_vm8, %v11328_v42, -inf }
 0x68a   :  { %787 = vmax.xlane.f32.xlu1 %v786_v49 }
 0x68b   :  { %v11338_v52 = vadd.f32 %v11335_v48, %v766_v44 }
 0x68c   :  { %v735_v7 = vpop.f32.mrb[26].mxu1 }
 0x68d   :  { %v767_v58 = vmul.f32 0.25, %v735_v7  ;;  %v8497_v6 = vpop.f32.mrb[27].mxu1  ;;  %v789_v54 = vsel %vm782_vm8, %v11338_v52, -inf }
 0x68e   :  { %790 = vmax.xlane.f32.xlu0 %v789_v54 }
 0x68f   :  { %v11348_v55 = vadd.f32 %v11345_v59, %v767_v58 }
 0x690   :  { %v740_v60 = vpop.f32.mrb[28].mxu1 }
 0x691   :  { %v768_v0 = vmul.f32 0.25, %v740_v60  ;;  %v8500_v5 = vpop.f32.mrb[29].mxu1  ;;  %v792_v12 = vsel %vm782_vm8, %v11348_v55, -inf }
 0x692   :  { %793 = vmax.xlane.f32.xlu0 %v792_v12 }
 0x693   :  { %v11358_v8 = vadd.f32 %v11355_v21, %v768_v0 }
 0x694   :  { %v745_v4 = vpop.f32.mrb[30].mxu1 }
 0x695   :  { %v769_v9 = vmul.f32 0.25, %v745_v4  ;;  %v8503_v27 = vpop.f32.mrb[31].mxu1  ;;  %v795_v34 = vsel %vm782_vm8, %v11358_v8, -inf }
 0x696   :  { %796 = vmax.xlane.f32.xlu1 %v795_v34 }
 0x697   :  { %v11368_v53 = vadd.f32 %v11365_v26, %v769_v9 }
 0x698   :  { %v750_v10 = vpop.f32.mrb[32].mxu1 }
 0x699   :  { %v770_v13 = vmul.f32 0.25, %v750_v10  ;;  %v8506_v16 = vpop.f32.mrb[33].mxu1  ;;  %v798_v23 = vsel %vm782_vm8, %v11368_v53, -inf }
 0x69a   :  { %799 = vmax.xlane.f32.xlu0 %v798_v23 }
 0x69b   :  { %v11378_v15 = vadd.f32 %v11375_v24, %v770_v13 }
 0x69c   :  { %v755_v45 = vpop.f32.mrb[34].mxu1 }
 0x69d   :  { %v771_v14 = vmul.f32 0.25, %v755_v45  ;;  %v8509_v11 = vpop.f32.mrb[35].mxu1  ;;  %v801_v33 = vsel %vm782_vm8, %v11378_v15, -inf }
 0x69e   :  { %802 = vmax.xlane.f32.xlu1 %v801_v33 }
 0x69f   :  { %v11388_v20 = vadd.f32 %v11385_v62, %v771_v14 }
 0x6a0   :  { %v760_v22 = vpop.f32.mrb[36].mxu1 }
 0x6a1   :  { %v772_v28 = vmul.f32 0.25, %v760_v22  ;;  %v8512_v32 = vpop.f32.mrb[37].mxu1  ;;  %v804_v57 = vsel %vm782_vm8, %v11388_v20, -inf }
 0x6a2   :  { %805 = vmax.xlane.f32.xlu0 %v804_v57 }
 0x6a3   :  { %v11398_v40 = vadd.f32 %v11395_v1, %v772_v28 }
 0x6a4   :  { %v1211_v47 = vpop.f32.mrb[38].mxu1 }
 0x6a5   :  { %v1255_v44 = vmul.f32 0.25, %v1211_v47  ;;  %v8578_v46 = vpop.f32.mrb[39].mxu1  ;;  %v807_v49 = vsel %vm782_vm8, %v11398_v40, -inf }
 0x6a6   :  { %808 = vmax.xlane.f32.xlu1 %v807_v49 }
 0x6a7   :  { %v11403_v7 = vadd.f32 %v11315_v31, %v1255_v44 }
 0x6a8   :  { %v1216_v58 = vpop.f32.mrb[40].mxu1 }
 0x6a9   :  { %v1256_v6 = vmul.f32 0.25, %v1216_v58  ;;  %v8581_v54 = vpop.f32.mrb[41].mxu1  ;;  %v1273_v60 = vsel %vm782_vm8, %v11403_v7, -inf }
 0x6aa   :  { %1274 = vmax.xlane.f32.xlu0 %v1273_v60 }
 0x6ab   :  { %v11408_v0 = vadd.f32 %v11325_v41, %v1256_v6 }
 0x6ac   :  { %v1221_v5 = vpop.f32.mrb[42].mxu1 }
 0x6ad   :  { %v1257_v12 = vmul.f32 0.25, %v1221_v5  ;;  %v8584_v4 = vpop.f32.mrb[43].mxu1  ;;  %v1276_v9 = vsel %vm782_vm8, %v11408_v0, -inf }
 0x6ae   :  { %1277 = vmax.xlane.f32.xlu1 %v1276_v9 }
 0x6af   :  { %v11413_v27 = vadd.f32 %v11335_v48, %v1257_v12 }
 0x6b0   :  { %v1226_v34 = vpop.f32.mrb[44].mxu1 }
 0x6b1   :  { %v1258_v10 = vmul.f32 0.25, %v1226_v34  ;;  %v8587_v13 = vpop.f32.mrb[45].mxu1  ;;  %v1279_v16 = vsel %vm782_vm8, %v11413_v27, -inf }
 0x6b2   :  { %1280 = vmax.xlane.f32.xlu0 %v1279_v16 }
 0x6b3   :  { %v11418_v23 = vadd.f32 %v11345_v59, %v1258_v10 }
 0x6b4   :  { %v1231_v45 = vpop.f32.mrb[46].mxu1 }
 0x6b5   :  { %v1259_v14 = vmul.f32 0.25, %v1231_v45  ;;  %v8590_v11 = vpop.f32.mrb[47].mxu1  ;;  %v1282_v33 = vsel %vm782_vm8, %v11418_v23, -inf }
 0x6b6   :  { %1283 = vmax.xlane.f32.xlu1 %v1282_v33 }
 0x6b7   :  { %v11423_v22 = vadd.f32 %v11355_v21, %v1259_v14 }
 0x6b8   :  { %v1236_v28 = vpop.f32.mrb[48].mxu1 }
 0x6b9   :  { %v1260_v32 = vmul.f32 0.25, %v1236_v28  ;;  %v8593_v57 = vpop.f32.mrb[49].mxu1  ;;  %v1285_v47 = vsel %vm782_vm8, %v11423_v22, -inf }
 0x6ba   :  { %1286 = vmax.xlane.f32.xlu0 %v1285_v47 }
 0x6bb   :  { %v11428_v44 = vadd.f32 %v11365_v26, %v1260_v32 }
 0x6bc   :  { %v1241_v46 = vpop.f32.mrb[50].mxu1 }
 0x6bd   :  { %v1261_v49 = vmul.f32 0.25, %v1241_v46  ;;  %v8596_v58 = vpop.f32.mrb[51].mxu1  ;;  %v1288_v6 = vsel %vm782_vm8, %v11428_v44, -inf }
 0x6be   :  { %1289 = vmax.xlane.f32.xlu1 %v1288_v6 }
 0x6bf   :  { %v11433_v54 = vadd.f32 %v11375_v24, %v1261_v49 }
 0x6c0   :  { %v1246_v60 = vpop.f32.mrb[52].mxu1 }
 0x6c1   :  { %v1262_v5 = vmul.f32 0.25, %v1246_v60  ;;  %v8599_v12 = vpop.f32.mrb[53].mxu1  ;;  %v1291_v4 = vsel %vm782_vm8, %v11433_v54, -inf }
 0x6c2   :  { %1292 = vmax.xlane.f32.xlu0 %v1291_v4 }
 0x6c3   :  { %v11438_v9 = vadd.f32 %v11385_v62, %v1262_v5 }
 0x6c4   :  { %v1251_v34 = vpop.f32.mrb[54].mxu1 }
 0x6c5   :  { %v1263_v10 = vmul.f32 0.25, %v1251_v34  ;;  %v8602_v13 = vpop.f32.mrb[55].mxu1  ;;  %v1294_v16 = vsel %vm782_vm8, %v11438_v9, -inf }
 0x6c6   :  { %1295 = vmax.xlane.f32.xlu1 %v1294_v16 }
 0x6c7   :  { %v11443_v45 = vadd.f32 %v11395_v1, %v1263_v10 }
 0x6c8   :  { %v1747_v14 = vpop.f32.mrb[56].mxu1 }
 0x6c9   :  { %v1791_v11 = vmul.f32 0.25, %v1747_v14  ;;  %v8668_v33 = vpop.f32.mrb[57].mxu1  ;;  %v1297_v28 = vsel %vm782_vm8, %v11443_v45, -inf }
 0x6ca   :  { %1298 = vmax.xlane.f32.xlu0 %v1297_v28 }
 0x6cb   :  { %v11448_v32 = vadd.f32 %v11315_v31, %v1791_v11 }
 0x6cc   :  { %v1752_v57 = vpop.f32.mrb[58].mxu1 }
 0x6cd   :  { %v1792_v47 = vmul.f32 0.25, %v1752_v57  ;;  %v8671_v46 = vpop.f32.mrb[59].mxu1  ;;  %v1809_v49 = vsel %vm782_vm8, %v11448_v32, -inf }
 0x6ce   :  { %1810 = vmax.xlane.f32.xlu1 %v1809_v49 }
 0x6cf   :  { %v11453_v58 = vadd.f32 %v11325_v41, %v1792_v47 }
 0x6d0   :  { %v1757_v6 = vpop.f32.mrb[60].mxu1 }
 0x6d1   :  { %v1793_v60 = vmul.f32 0.25, %v1757_v6  ;;  %v8674_v5 = vpop.f32.mrb[61].mxu1  ;;  %v1812_v12 = vsel %vm782_vm8, %v11453_v58, -inf }
 0x6d2   :  { %1813 = vmax.xlane.f32.xlu0 %v1812_v12 }
 0x6d3   :  { %v11458_v4 = vadd.f32 %v11335_v48, %v1793_v60 }
 0x6d4   :  { %v1762_v34 = vpop.f32.mrb[62].mxu1 }
 0x6d5   :  { %v1794_v10 = vmul.f32 0.25, %v1762_v34  ;;  %v8677_v13 = vpop.f32.mrb[63].mxu1  ;;  %v1815_v16 = vsel %vm782_vm8, %v11458_v4, -inf }
 0x6d6   :  { %1816 = vmax.xlane.f32.xlu1 %v1815_v16 }
 0x6d7   :  { %v11463_v14 = vadd.f32 %v11345_v59, %v1794_v10 }
 0x6d8   :  { %v1767_v11 = vpop.f32.mrb[64].mxu1 }
 0x6d9   :  { %v1795_v33 = vmul.f32 0.25, %v1767_v11  ;;  %v8680_v28 = vpop.f32.mrb[65].mxu1  ;;  %v1818_v57 = vsel %vm782_vm8, %v11463_v14, -inf }
 0x6da   :  { %1819 = vmax.xlane.f32.xlu0 %v1818_v57 }
 0x6db   :  { %v11468_v47 = vadd.f32 %v11355_v21, %v1795_v33 }
 0x6dc   :  { %v1772_v46 = vpop.f32.mrb[66].mxu1 }
 0x6dd   :  { %v1796_v49 = vmul.f32 0.25, %v1772_v46  ;;  %v8683_v6 = vpop.f32.mrb[67].mxu1  ;;  %v1821_v60 = vsel %vm782_vm8, %v11468_v47, -inf }
 0x6de   :  { %1822 = vmax.xlane.f32.xlu0 %v1821_v60 }
 0x6df   :  { %v11473_v5 = vadd.f32 %v11365_v26, %v1796_v49 }
 0x6e0   :  { %v1777_v12 = vpop.f32.mrb[68].mxu1 }
 0x6e1   :  { %v1797_v34 = vmul.f32 0.25, %v1777_v12  ;;  %v8686_v10 = vpop.f32.mrb[69].mxu1  ;;  %v1824_v13 = vsel %vm782_vm8, %v11473_v5, -inf }
 0x6e2   :  { %1825 = vmax.xlane.f32.xlu0 %v1824_v13 }
 0x6e3   :  { %v11478_v16 = vadd.f32 %v11375_v24, %v1797_v34 }
 0x6e4   :  { %v1782_v11 = vpop.f32.mrb[70].mxu1 }
 0x6e5   :  { %v1798_v33 = vmul.f32 0.25, %v1782_v11  ;;  %v8689_v28 = vpop.f32.mrb[71].mxu1  ;;  %v1827_v57 = vsel %vm782_vm8, %v11478_v16, -inf }
 0x6e6   :  { %1828 = vmax.xlane.f32.xlu1 %v1827_v57 }
 0x6e7   :  { %v11483_v46 = vadd.f32 %v11385_v62, %v1798_v33 }
 0x6e8   :  { %v1787_v49 = vpop.f32.mrb[72].mxu1 }
 0x6e9   :  { %v1799_v6 = vmul.f32 0.25, %v1787_v49  ;;  %v8692_v60 = vpop.f32.mrb[73].mxu1  ;;  %v1830_v12 = vsel %vm782_vm8, %v11483_v46, -inf }
 0x6ea   :  { %1831 = vmax.xlane.f32.xlu0 %v1830_v12 }
 0x6eb   :  { %v11488_v34 = vadd.f32 %v11395_v1, %v1799_v6 }
 0x6ec   :  { %v2247_v10 = vpop.f32.mrb[74].mxu1 }
 0x6ed   :  { %v2291_v13 = vmul.f32 0.25, %v2247_v10  ;;  %v8758_v11 = vpop.f32.mrb[75].mxu1  ;;  %v1833_v28 = vsel %vm782_vm8, %v11488_v34, -inf }
 0x6ee   :  { %1834 = vmax.xlane.f32.xlu1 %v1833_v28 }
 0x6ef   :  { %v11493_v33 = vadd.f32 %v11315_v31, %v2291_v13 }
 0x6f0   :  { %v2252_v57 = vpop.f32.mrb[76].mxu1 }
 0x6f1   :  { %v2292_v49 = vmul.f32 0.25, %v2252_v57  ;;  %v8761_v60 = vpop.f32.mrb[77].mxu1  ;;  %v2309_v2 = vsel %vm782_vm8, %v11493_v33, -inf }
 0x6f2   :  { %2310 = vmax.xlane.f32.xlu0 %v2309_v2 }
 0x6f3   :  { %v11498_v6 = vadd.f32 %v11325_v41, %v2292_v49 }
 0x6f4   :  { %v2257_v12 = vpop.f32.mrb[78].mxu1 }
 0x6f5   :  { %v2293_v10 = vmul.f32 0.25, %v2257_v12  ;;  %v8764_v11 = vpop.f32.mrb[79].mxu1  ;;  %v2312_v39 = vsel %vm782_vm8, %v11498_v6, -inf }
 0x6f6   :  { %2313 = vmax.xlane.f32.xlu0 %v2312_v39 }
 0x6f7   :  { %v11503_v31 = vadd.f32 %v11335_v48, %v2293_v10  ;;  %v11515_v10 = vpop.permute.xlu1 %9630 }
 0x6f8   :  { %v2262_v13 = vpop.f32.mrb[80].mxu1 }
 0x6f9   :  { %v2294_v28 = vmul.f32 0.25, %v2262_v13  ;;  %v8767_v57 = vpop.f32.mrb[81].mxu1  ;;  %v2315_v60 = vsel %vm782_vm8, %v11503_v31, -inf }
 0x6fa   :  { %2316 = vmax.xlane.f32.xlu1 %v2315_v60 }
 0x6fb   :  { %v11508_v2 = vadd.f32 %v11345_v59, %v2294_v28 }
 0x6fc   :  { %v2267_v41 = vpop.f32.mrb[82].mxu1 }
 0x6fd   :  { %v2295_v49 = vmul.f32 0.25, %v2267_v41  ;;  %v8770_v12 = vpop.f32.mrb[83].mxu1  ;;  %v2318_v11 = vsel %vm782_vm8, %v11508_v2, -inf }
 0x6fe   :  { %2319 = vmax.xlane.f32.xlu1 %v2318_v11 }
 0x6ff   :  { %v11513_v39 = vadd.f32 %v11355_v21, %v2295_v49  ;;  %v11524_v21 = vpop.permute.xlu1 %9640 }
 0x700   :  { %v2272_v48 = vpop.f32.mrb[84].mxu1 }
 0x701   :  { %v2296_v13 = vmul.f32 0.25, %v2272_v48  ;;  %v8773_v57 = vpop.f32.mrb[85].mxu1  ;;  %v2321_v60 = vsel %vm782_vm8, %v11513_v39, -inf }
 0x702   :  { %2322 = vmax.xlane.f32.xlu1 %v2321_v60 }
 0x703   :  { %v11520_v59 = vadd.f32 %v11365_v26, %v2296_v13 }
 0x704   :  { %v2277_v28 = vpop.f32.mrb[86].mxu1 }
 0x705   :  { %v2297_v41 = vmul.f32 0.25, %v2277_v28  ;;  %v8776_v12 = vpop.f32.mrb[87].mxu1  ;;  %v2324_v11 = vsel %vm782_vm8, %v11520_v59, -inf  ;;  %v11534_v28 = vpop.permute.xlu1 %9645 }
 0x706   :  { %2325 = vmax.xlane.f32.xlu1 %v2324_v11 }
 0x707   :  { %v11527_v49 = vadd.f32 %v11375_v24, %v2297_v41  ;;  %v11538_v24 = vpop.permute.xlu0 %9635 }
 0x708   :  { %v2282_v48 = vpop.f32.mrb[88].mxu1 }
 0x709   :  { %v2298_v57 = vmul.f32 0.25, %v2282_v48  ;;  %v8779_v29 = vpop.f32.mrb[89].mxu1  ;;  %v2327_v60 = vsel %vm782_vm8, %v11527_v49, -inf }
 0x70a   :  { %2328 = vmax.xlane.f32.xlu0 %v2327_v60 }
 0x70b   :  { %v11532_v26 = vadd.f32 %v11385_v62, %v2298_v57  ;;  %v11545_v62 = vpop.permute.xlu1 %1388 }
 0x70c   :  { %v2287_v13 = vpop.f32.mrb[90].mxu1 }
 0x70d   :  { %v2299_v12 = vmul.f32 0.25, %v2287_v13  ;;  %v8782_v11 = vpop.f32.mrb[91].mxu1  ;;  %v2330_v3 = vsel %vm782_vm8, %v11532_v26, -inf }
 0x70e   :  { %2331 = vmax.xlane.f32.xlu1 %v2330_v3 }
 0x70f   :  { %v11541_v29 = vadd.f32 %v11395_v1, %v2299_v12 }
 0x711   :  { %v2333_v41 = vsel %vm782_vm8, %v11541_v29, -inf }
 0x712   :  { %2334 = vmax.xlane.f32.xlu1 %v2333_v41 }
 0x713   :  { %v785_v48 = vpop.xlane.xlu0 %784 }
 0x714   :  { %v810_v57 = vsub.f32 %v11318_v51, %v785_v48 }
 0x716   :  { %v819_v60 = vmul.f32 1.442695, %v810_v57 }
 0x717   :  { %v788_v13 = vpop.xlane.xlu1 %787 }
 0x718   :  { %10027 = vpow2.f32 %v819_v60  ;;  %v811_v11 = vsub.f32 %v11328_v42, %v788_v13 }
 0x71a   :  { %v821_v3 = vmul.f32 1.442695, %v811_v11 }
 0x71b   :  { %v791_v19 = vpop.xlane.xlu0 %790 }
 0x71c   :  { %10029 = vpow2.f32 %v821_v3  ;;  %v812_v1 = vsub.f32 %v11338_v52, %v791_v19 }
 0x71e   :  { %v823_v12 = vmul.f32 1.442695, %v812_v1 }
 0x71f   :  { %v794_v36 = vpop.xlane.xlu0 %793 }
 0x720   :  { %10031 = vpow2.f32 %v823_v12  ;;  %v813_v41 = vsub.f32 %v11348_v55, %v794_v36 }
 0x722   :  { %v11551_v61 = vpop.eup %10027  ;;  %v825_v37 = vmul.f32 1.442695, %v813_v41 }
 0x723   :  { %v797_v38 = vpop.xlane.xlu1 %796  ;;  %v837_v51 = vsel %vm782_vm8, %v11551_v61, 0.0 }
 0x724   :  { %10033 = vpow2.f32 %v825_v37  ;;  %v814_v42 = vsub.f32 %v11358_v8, %v797_v38  ;;  %838 = vadd.xlane.f32.xlu1 %v837_v51 }
 0x726   :  { %v11556_v48 = vpop.eup %10029  ;;  %v827_v57 = vmul.f32 1.442695, %v814_v42 }
 0x727   :  { %v800_v19 = vpop.xlane.xlu0 %799  ;;  %v840_v52 = vsel %vm782_vm8, %v11556_v48, 0.0 }
 0x728   :  { %10035 = vpow2.f32 %v827_v57  ;;  %v815_v36 = vsub.f32 %v11368_v53, %v800_v19  ;;  %841 = vadd.xlane.f32.xlu1 %v840_v52 }
 0x72a   :  { %v11561_v55 = vpop.eup %10031  ;;  %v829_v60 = vmul.f32 1.442695, %v815_v36 }
 0x72b   :  { %v803_v13 = vpop.xlane.xlu1 %802  ;;  %v843_v37 = vsel %vm782_vm8, %v11561_v55, 0.0 }
 0x72c   :  { %10037 = vpow2.f32 %v829_v60  ;;  %v816_v38 = vsub.f32 %v11378_v15, %v803_v13  ;;  %844 = vadd.xlane.f32.xlu1 %v843_v37 }
 0x72e   :  { %v11566_v8 = vpop.eup %10033  ;;  %v831_v11 = vmul.f32 1.442695, %v816_v38 }
 0x72f   :  { %v806_v3 = vpop.xlane.xlu0 %805  ;;  %v846_v1 = vsel %vm782_vm8, %v11566_v8, 0.0 }
 0x730   :  { %10039 = vpow2.f32 %v831_v11  ;;  %v817_v53 = vsub.f32 %v11388_v20, %v806_v3  ;;  %847 = vadd.xlane.f32.xlu1 %v846_v1 }
 0x732   :  { %v11571_v12 = vpop.eup %10035  ;;  %v833_v41 = vmul.f32 1.442695, %v817_v53 }
 0x733   :  { %v809_v51 = vpop.xlane.xlu1 %808  ;;  %v849_v42 = vsel %vm782_vm8, %v11571_v12, 0.0 }
 0x734   :  { %10041 = vpow2.f32 %v833_v41  ;;  %v818_v15 = vsub.f32 %v11398_v40, %v809_v51  ;;  %850 = vadd.xlane.f32.xlu1 %v849_v42 }
 0x736   :  { %v11576_v57 = vpop.eup %10037  ;;  %v835_v19 = vmul.f32 1.442695, %v818_v15 }
 0x737   :  { %v1275_v52 = vpop.xlane.xlu0 %1274  ;;  %v852_v36 = vsel %vm782_vm8, %v11576_v57, 0.0 }
 0x738   :  { %10043 = vpow2.f32 %v835_v19  ;;  %v1300_v20 = vsub.f32 %v11403_v7, %v1275_v52  ;;  %853 = vadd.xlane.f32.xlu1 %v852_v36 }
 0x73a   :  { %v11581_v60 = vpop.eup %10039  ;;  %v1309_v13 = vmul.f32 1.442695, %v1300_v20  ;;  %v10468_v20 = vld [vmem:[#allocation2 + $0x38] sm:$0xff] }
 0x73b   :  { %v1278_v37 = vpop.xlane.xlu1 %1277  ;;  %v855_v38 = vsel %vm782_vm8, %v11581_v60, 0.0 }
 0x73c   :  { %10045 = vpow2.f32 %v1309_v13  ;;  %v1301_v40 = vsub.f32 %v11408_v0, %v1278_v37  ;;  %856 = vadd.xlane.f32.xlu1 %v855_v38  ;;  %v10469_v13 = vld [vmem:[#allocation2 + $0x28] sm:$0xff] }
 0x73d   :  { %v9654_v37 = vpack.i.bf16 %v10468_v20, %v10469_v13 }
 0x73e   :  { %v11586_v11 = vpop.eup %10041  ;;  %v1311_v3 = vmul.f32 1.442695, %v1301_v40  ;;  %v10470_v40 = vld [vmem:[#allocation2 + $0x58] sm:$0xff] }
 0x73f   :  { %v1281_v1 = vpop.xlane.xlu0 %1280  ;;  %v858_v53 = vsel %vm782_vm8, %v11586_v11, 0.0 }
 0x740   :  { %10047 = vpow2.f32 %v1311_v3  ;;  %v1302_v7 = vsub.f32 %v11413_v27, %v1281_v1  ;;  %859 = vadd.xlane.f32.xlu1 %v858_v53  ;;  %v10471_v3 = vld [vmem:[#allocation2 + $0x48] sm:$0xff] }
 0x741   :  { %v9659_v1 = vpack.i.bf16 %v10470_v40, %v10471_v3 }
 0x742   :  { %v11591_v41 = vpop.eup %10043  ;;  %v1313_v51 = vmul.f32 1.442695, %v1302_v7  ;;  %v10472_v7 = vld [vmem:[#allocation2 + $0x18] sm:$0xff] }
 0x743   :  { %v861_v42 = vsel %vm782_vm8, %v11591_v41, 0.0 }
 0x744   :  { %10049 = vpow2.f32 %v1313_v51  ;;  %862 = vadd.xlane.f32.xlu0 %v861_v42  ;;  %v10473_v51 = vld [vmem:[#allocation2 + $0x8] sm:$0xff] }
 0x745   :  { %v9649_v42 = vpack.i.bf16 %v10472_v7, %v10473_v51 }
 0x746   :  { %v11595_v0 = vpop.eup %10045 }
 0x747   :  { %v1327_v15 = vsel %vm782_vm8, %v11595_v0, 0.0  ;;  %v1287_v38 = vpop.xlane.xlu0 %1286 }
 0x748   :  { %1328 = vadd.xlane.f32.xlu1 %v1327_v15  ;;  %v1284_v15 = vpop.xlane.xlu1 %1283 }
 0x74a   :  { %v11599_v19 = vpop.eup %10047 }
 0x74b   :  { %v1330_v27 = vsel %vm782_vm8, %v11599_v19, 0.0 }
 0x74c   :  { %1331 = vadd.xlane.f32.xlu1 %v1330_v27  ;;  %v1290_v63 = vpop.xlane.xlu1 %1289 }
 0x74d   :  { %v1305_v3 = vsub.f32 %v11428_v44, %v1290_v63 }
 0x74e   :  { %v11603_v52 = vpop.eup %10049 }
 0x74f   :  { %v1333_v36 = vsel %vm782_vm8, %v11603_v52, 0.0  ;;  %v1293_v53 = vpop.xlane.xlu0 %1292  ;;  %v1319_v7 = vmul.f32 1.442695, %v1305_v3 }
 0x750   :  { %1334 = vadd.xlane.f32.xlu1 %v1333_v36  ;;  %v1303_v36 = vsub.f32 %v11418_v23, %v1284_v15  ;;  %v1306_v51 = vsub.f32 %v11433_v54, %v1293_v53 }
 0x752   :  { %v1315_v13 = vmul.f32 1.442695, %v1303_v36  ;;  %v1321_v23 = vmul.f32 1.442695, %v1306_v51 }
 0x753   :  { %v1296_v56 = vpop.xlane.xlu1 %1295 }
 0x754   :  { %10051 = vpow2.f32 %v1315_v13  ;;  %v1307_v15 = vsub.f32 %v11438_v9, %v1296_v56 }
 0x756   :  { %v1323_v63 = vmul.f32 1.442695, %v1307_v15 }
 0x757   :  { %v1299_v27 = vpop.xlane.xlu0 %1298 }
 0x758   :  { %v1308_v44 = vsub.f32 %v11443_v45, %v1299_v27 }
 0x75a   :  { %9655 = vrot.lane.b32.xlu0 %v9654_v37, %s10530_s30  ;;  %v1304_v37 = vsub.f32 %v11423_v22, %v1287_v38  ;;  %v1325_v9 = vmul.f32 1.442695, %v1308_v44 }
 0x75c   :  { %v1317_v40 = vmul.f32 1.442695, %v1304_v37 }
 0x75e   :  { %9660 = vrot.lane.b32.xlu0 %v9659_v1, %s10530_s30  ;;  %v1811_v1 = vpop.xlane.xlu1 %1810  ;;  %10053 = vpow2.f32 %v1317_v40  ;;  %v11621_v38 = vpop.eup %10051 }
 0x75f   :  { %v1814_v20 = vpop.xlane.xlu0 %1813  ;;  %10055 = vpow2.f32 %v1319_v7  ;;  %v1336_v53 = vsel %vm782_vm8, %v11621_v38, 0.0  ;;  %v1836_v3 = vsub.f32 %v11448_v32, %v1811_v1 }
 0x760   :  { %10057 = vpow2.f32 %v1321_v23  ;;  %v1837_v51 = vsub.f32 %v11453_v58, %v1814_v20 }
 0x761   :  { %9650 = vrot.lane.b32.xlu1 %v9649_v42, %s10530_s30  ;;  %10059 = vpow2.f32 %v1323_v63 }
 0x762   :  { %v1847_v44 = vmul.f32 1.442695, %v1837_v51 }
 0x763   :  { %v1817_v42 = vpop.xlane.xlu1 %1816 }
 0x767   :  { %v1820_v50 = vpop.xlane.xlu0 %1819 }
 0x768   :  { %v11629_v40 = vpop.eup %10053 }
 0x769   :  { %v1339_v45 = vsel %vm782_vm8, %v11629_v40, 0.0  ;;  %v11636_v27 = vpop.eup %10055 }
 0x76a   :  { %v1342_v63 = vsel %vm782_vm8, %v11636_v27, 0.0  ;;  %v11642_v32 = vpop.eup %10057 }
 0x76b   :  { %v11613_v43 = vpop.xlane.xlu0 %1822  ;;  %v1345_v58 = vsel %vm782_vm8, %v11642_v32, 0.0  ;;  %v11649_v20 = vpop.eup %10059 }
 0x76f   :  { %v11617_v36 = vpop.xlane.xlu0 %1825 }
 0x773   :  { %v11619_v22 = vpop.xlane.xlu1 %1828 }
 0x777   :  { %v11624_v13 = vpop.xlane.xlu0 %1831 }
 0x77b   :  { %v1835_v37 = vpop.xlane.xlu1 %1834 }
 0x77c   :  { %v1844_v54 = vsub.f32 %v11488_v34, %v1835_v37  ;;  %v1845_v34 = vmul.f32 1.442695, %v1836_v3  ;;  %v1838_v37 = vsub.f32 %v11458_v4, %v1817_v42  ;;  %v1348_v4 = vsel %vm782_vm8, %v11649_v20, 0.0 }
 0x77d   :  { %1337 = vadd.xlane.f32.xlu0 %v1336_v53 }
 0x77e   :  { %v1861_v56 = vmul.f32 1.442695, %v1844_v54  ;;  %v1849_v53 = vmul.f32 1.442695, %v1838_v37 }
 0x77f   :  { %v11632_v7 = vpop.xlane.xlu0 %2310 }
 0x780   :  { %10061 = vpow2.f32 %v1861_v56  ;;  %v1839_v56 = vsub.f32 %v11463_v14, %v1820_v50 }
 0x781   :  { %1340 = vadd.xlane.f32.xlu0 %v1339_v45  ;;  %10063 = vpow2.f32 %v1325_v9 }
 0x782   :  { %10065 = vpow2.f32 %v1845_v34  ;;  %v1851_v45 = vmul.f32 1.442695, %v1839_v56  ;;  %v1840_v34 = vsub.f32 %v11468_v47, %v11613_v43  ;;  %v1843_v56 = vsub.f32 %v11483_v46, %v11624_v13 }
 0x783   :  { %v2314_v23 = vpop.xlane.xlu0 %2313 }
 0x784   :  { %v2337_v15 = vsub.f32 %v11498_v6, %v2314_v23 }
 0x785   :  { %1343 = vadd.xlane.f32.xlu0 %v1342_v63 }
 0x786   :  { %v2347_v1 = vmul.f32 1.442695, %v2337_v15 }
 0x787   :  { %v11645_v54 = vpop.xlane.xlu1 %2316 }
 0x788   :  { %10067 = vpow2.f32 %v2347_v1  ;;  %v1853_v1 = vmul.f32 1.442695, %v1840_v34 }
 0x789   :  { %1346 = vadd.xlane.f32.xlu0 %v1345_v58  ;;  %10069 = vpow2.f32 %v1847_v44  ;;  %v1841_v44 = vsub.f32 %v11473_v5, %v11617_v36  ;;  %v1842_v58 = vsub.f32 %v11478_v16, %v11619_v22  ;;  %v1859_v16 = vmul.f32 1.442695, %v1843_v56  ;;  %v10474_v56 = vld [vmem:[#allocation2 + $0x78] sm:$0xff] }
 0x78a   :  { %v11651_v6 = vpop.eup %10061  ;;  %10071 = vpow2.f32 %v1849_v53  ;;  %v2336_v22 = vsub.f32 %v11493_v33, %v11632_v7 }
 0x78b   :  { %v2320_v9 = vpop.xlane.xlu1 %2319  ;;  %v1887_v3 = vsel %vm782_vm8, %v11651_v6, 0.0  ;;  %v11658_v42 = vpop.eup %10063  ;;  %10073 = vpow2.f32 %v1851_v45  ;;  %v1855_v37 = vmul.f32 1.442695, %v1841_v44  ;;  %v1857_v36 = vmul.f32 1.442695, %v1842_v58 }
 0x78c   :  { %1888 = vadd.xlane.f32.xlu1 %v1887_v3  ;;  %v1351_v50 = vsel %vm782_vm8, %v11658_v42, 0.0  ;;  %v11665_v14 = vpop.eup %10065 }
 0x78d   :  { %1349 = vadd.xlane.f32.xlu0 %v1348_v4  ;;  %v1863_v47 = vsel %vm782_vm8, %v11665_v14, 0.0 }
 0x78f   :  { %v2323_v51 = vpop.xlane.xlu1 %2322 }
 0x790   :  { %v2340_v23 = vsub.f32 %v11513_v39, %v2323_v51  ;;  %v2345_v51 = vmul.f32 1.442695, %v2336_v22 }
 0x791   :  { %1352 = vadd.xlane.f32.xlu0 %v1351_v50 }
 0x792   :  { %v11667_v15 = vpop.eup %10067  ;;  %v2353_v63 = vmul.f32 1.442695, %v2340_v23  ;;  %v2338_v23 = vsub.f32 %v11503_v31, %v11645_v54 }
 0x793   :  { %v2366_v43 = vsel %vm782_vm8, %v11667_v15, 0.0  ;;  %v11675_v39 = vpop.eup %10069  ;;  %v2326_v50 = vpop.xlane.xlu1 %2325 }
 0x794   :  { %10075 = vpow2.f32 %v2353_v63  ;;  %2367 = vadd.xlane.f32.xlu1 %v2366_v43  ;;  %v1866_v53 = vsel %vm782_vm8, %v11675_v39, 0.0  ;;  %v11681_v5 = vpop.eup %10071  ;;  %v2349_v7 = vmul.f32 1.442695, %v2338_v23  ;;  %v2341_v54 = vsub.f32 %v11520_v59, %v2326_v50 }
 0x795   :  { %1864 = vadd.xlane.f32.xlu0 %v1863_v47  ;;  %10077 = vpow2.f32 %v1853_v1  ;;  %v1869_v3 = vsel %vm782_vm8, %v11681_v5, 0.0  ;;  %v11687_v4 = vpop.eup %10073  ;;  %v2339_v1 = vsub.f32 %v11508_v2, %v2320_v9 }
 0x796   :  { %10079 = vpow2.f32 %v1855_v37  ;;  %v1872_v46 = vsel %vm782_vm8, %v11687_v4, 0.0  ;;  %v2355_v2 = vmul.f32 1.442695, %v2341_v54 }
 0x797   :  { %10081 = vpow2.f32 %v1857_v36  ;;  %v2351_v31 = vmul.f32 1.442695, %v2339_v1  ;;  %v2329_v37 = vpop.xlane.xlu0 %2328  ;;  %v9633_v1 = vunpack.i.h.bf16 %v11515_v10 }
 0x798   :  { %10083 = vpow2.f32 %v1859_v16  ;;  %v2342_v9 = vsub.f32 %v11527_v49, %v2329_v37 }
 0x799   :  { %1867 = vadd.xlane.f32.xlu0 %v1866_v53  ;;  %10085 = vpow2.f32 %v2345_v51 }
 0x79a   :  { %10087 = vpow2.f32 %v2349_v7 }
 0x79b   :  { %v11706_v44 = vpop.xlane.xlu1 %2331  ;;  %10089 = vpow2.f32 %v2351_v31 }
 0x79d   :  { %1870 = vadd.xlane.f32.xlu0 %v1869_v3  ;;  %v10475_v3 = vld [vmem:[#allocation2 + $0x68] sm:$0xff] }
 0x79e   :  { %v11689_v45 = vpop.eup %10075  ;;  %v9664_v16 = vpack.i.bf16 %v10474_v56, %v10475_v3  ;;  %v9637_v56 = vunpack.i.l.bf16 %v11538_v24 }
 0x79f   :  { %v2375_v34 = vsel %vm782_vm8, %v11689_v45, 0.0  ;;  %v11697_v13 = vpop.eup %10077  ;;  %v11717_v36 = vpop.xlane.xlu1 %2334 }
 0x7a0   :  { %2376 = vadd.xlane.f32.xlu1 %v2375_v34  ;;  %v1875_v63 = vsel %vm782_vm8, %v11697_v13, 0.0  ;;  %v11703_v33 = vpop.eup %10079 }
 0x7a1   :  { %1873 = vadd.xlane.f32.xlu0 %v1872_v46  ;;  %v1878_v43 = vsel %vm782_vm8, %v11703_v33, 0.0  ;;  %v11710_v47 = vpop.eup %10081  ;;  %v2357_v46 = vmul.f32 1.442695, %v2342_v9  ;;  %v9638_v9 = vunpack.i.h.bf16 %v11538_v24  ;;  %v14531_v24 = vmov 0.0|0.0  }
 0x7a2   :  { %v1881_v58 = vsel %vm782_vm8, %v11710_v47, 0.0  ;;  %v11715_v53 = vpop.eup %10083 }
 0x7a3   :  { %v1884_v22 = vsel %vm782_vm8, %v11715_v53, 0.0  ;;  %v11722_v59 = vpop.eup %10085 }
 0x7a4   :  { %v2363_v51 = vsel %vm782_vm8, %v11722_v59, 0.0  ;;  %v11727_v23 = vpop.eup %10087 }
 0x7a5   :  { %1876 = vadd.xlane.f32.xlu0 %v1875_v63  ;;  %v2369_v50 = vsel %vm782_vm8, %v11727_v23, 0.0  ;;  %v11731_v63 = vpop.eup %10089 }
 0x7a6   :  { %v2372_v54 = vsel %vm782_vm8, %v11731_v63, 0.0 }
 0x7a9   :  { %1879 = vadd.xlane.f32.xlu0 %v1878_v43  ;;  %v9632_v43 = vunpack.i.l.bf16 %v11515_v10  ;;  %v2343_v10 = vsub.f32 %v11532_v26, %v11706_v44  ;;  %v9643_v26 = vunpack.i.h.bf16 %v11524_v21  ;;  %v9642_v44 = vunpack.i.l.bf16 %v11524_v21 }
 0x7aa   :  { %v9648_v21 = vunpack.i.h.bf16 %v11534_v28 }
 0x7ab   :  { %v9289_v3 = vpack.c.bf16 %v9633_v1, %v9632_v43 }
 0x7ad   :  { %1882 = vadd.xlane.f32.xlu0 %v1881_v58 }
 0x7b1   :  { %1885 = vadd.xlane.f32.xlu0 %v1884_v22  ;;  %9665 = vrot.lane.b32.xlu1 %v9664_v16, %s10530_s30  ;;  %v839_v34 = vpop.xlane.xlu1 %838 }
 0x7b2   :  { %10091 = vrcp.f32 %v839_v34  ;;  %v14530_v34 = vmov 0.0  }
 0x7b3   :  { %10093 = vpow2.f32 %v2355_v2 }
 0x7b5   :  { %2364 = vadd.xlane.f32.xlu0 %v2363_v51  ;;  %v842_v49 = vpop.xlane.xlu1 %841 }
 0x7b6   :  { %10095 = vrcp.f32 %v842_v49  ;;  %v9292_v49 = vpack.c.bf16 %v9638_v9, %v9637_v56 }
 0x7b7   :  { %10097 = vpow2.f32 %v2357_v46 }
 0x7b9   :  { %2370 = vadd.xlane.f32.xlu0 %v2369_v50  ;;  %v845_v7 = vpop.xlane.xlu1 %844  ;;  %v2359_v50 = vmul.f32 1.442695, %v2343_v10 }
 0x7ba   :  { %10099 = vrcp.f32 %v845_v7 }
 0x7bc   :  { %v10092_v31 = vpop.eup %10091 }
 0x7bd   :  { %v11737_v37 = vpop.eup %10093  ;;  %2373 = vadd.xlane.f32.xlu0 %v2372_v54  ;;  %v848_v58 = vpop.xlane.xlu1 %847  ;;  %v865_v2 = vmul.f32 %v10092_v31, %v11551_v61  ;;  %v9295_v31 = vpack.c.bf16 %v9643_v26, %v9642_v44  ;;  %v9647_v54 = vunpack.i.l.bf16 %v11534_v28  ;;  %v10476_v44 = vld [vmem:[#allocation2 + $0x88] sm:$0xff] }
 0x7be   :  { %10101 = vrcp.f32 %v848_v58  ;;  %v2378_v22 = vsel %vm782_vm8, %v11737_v37, 0.0 }
 0x7bf   :  { %8532 = vmatmul.mubr.msk.f32.vlgmr.msra.gmra.mrb[0].mxu0 %vm782_vm8, %v865_v2 }
 0x7c0   :  { %v10096_v16 = vpop.eup %10095  ;;  %9290 = vmatpush3.bf16.msra.mxu0 %v9289_v3  ;;  %8534 = vmatprep.mubr.msk.f32.mxu0 %vm10528_vm5, %v14530_v34 }
 0x7c1   :  { %v11749_v61 = vpop.eup %10097  ;;  %2379 = vadd.xlane.f32.xlu0 %v2378_v22  ;;  %v851_v46 = vpop.xlane.xlu1 %850  ;;  %9291 = vmatprep.subr.bf16.mxu0 %v14531_v24  ;;  %v867_v51 = vmul.f32 %v10096_v16, %v11556_v48 }
 0x7c2   :  { %10103 = vrcp.f32 %v851_v46  ;;  %v2381_v1 = vsel %vm782_vm8, %v11749_v61, 0.0 }
 0x7c3   :  { %8535 = vmatmul.mubr.msk.f32.gmra.mrb[2].mxu0 %vm782_vm8, %v867_v51 }
 0x7c4   :  { %v10100_v7 = vpop.eup %10099  ;;  %9293 = vmatpush3.bf16.msra.mxu0 %v9292_v49  ;;  %8537 = vmatprep.mubr.msk.f32.mxu0 %vm10528_vm5, %v14530_v34 }
 0x7c5   :  { %2382 = vadd.xlane.f32.xlu0 %v2381_v1  ;;  %v854_v43 = vpop.xlane.xlu1 %853  ;;  %9294 = vmatprep.subr.bf16.mxu0 %v14531_v24  ;;  %v869_v48 = vmul.f32 %v10100_v7, %v11561_v55  ;;  %v9298_v55 = vpack.c.bf16 %v9648_v21, %v9647_v54  ;;  %v1592_v1 = vld [vmem:[#allocation2 + $0x18] sm:$0xff] }
 0x7c6   :  { %10105 = vrcp.f32 %v854_v43  ;;  %v1594_v21 = vld [vmem:[#allocation2 + $0x38] sm:$0xff] }
 0x7c7   :  { %10107 = vpow2.f32 %v2359_v50  ;;  %8538 = vmatmul.mubr.msk.f32.gmra.mrb[4].mxu0 %vm782_vm8, %v869_v48  ;;  %v1591_v48 = vld [vmem:[#allocation2 + $0x8] sm:$0xff] }
 0x7c8   :  { %v10102_v58 = vpop.eup %10101  ;;  %9296 = vmatpush3.bf16.msra.mxu0 %v9295_v31  ;;  %8540 = vmatprep.mubr.msk.f32.mxu0 %vm10528_vm5, %v14530_v34  ;;  %v9317_v31 = vpack.c.bf16 %v1592_v1, %v1591_v48 }
 0x7c9   :  { %v857_v2 = vpop.xlane.xlu1 %856  ;;  %9297 = vmatprep.subr.bf16.mxu0 %v14531_v24  ;;  %v871_v9 = vmul.f32 %v10102_v58, %v11566_v8  ;;  %v2344_v58 = vsub.f32 %v11541_v29, %v11717_v36  ;;  %v1595_v36 = vld [vmem:[#allocation2 + $0x48] sm:$0xff] }
 0x7ca   :  { %10109 = vrcp.f32 %v857_v2  ;;  %v1593_v2 = vld [vmem:[#allocation2 + $0x28] sm:$0xff] }
 0x7cb   :  { %8541 = vmatmul.mubr.msk.f32.gmra.mrb[6].mxu0 %vm782_vm8, %v871_v9  ;;  %v9320_v9 = vpack.c.bf16 %v1594_v21, %v1593_v2 }
 0x7cc   :  { %v10104_v56 = vpop.eup %10103  ;;  %9299 = vmatpush3.bf16.msra.mxu0 %v9298_v55  ;;  %8543 = vmatprep.mubr.msk.f32.mxu0 %vm10528_vm5, %v14530_v34 }
 0x7cd   :  { %v860_v28 = vpop.xlane.xlu1 %859  ;;  %8619 = vmatprep.subr.mxu0 %v14530_v34  ;;  %v873_v3 = vmul.f32 %v10104_v56, %v11571_v12  ;;  %v2361_v56 = vmul.f32 1.442695, %v2344_v58 }
 0x7ce   :  { %10111 = vrcp.f32 %v860_v28 }
 0x7cf   :  { %8544 = vmatmul.mubr.msk.f32.gmra.mrb[8].mxu0 %vm782_vm8, %v873_v3  ;;  %v1597_v3 = vld [vmem:[#allocation2 + $0x68] sm:$0xff] }
 0x7d0   :  { %v10106_v10 = vpop.eup %10105  ;;  %8620 = vmatpush3.msra.mxu0 %v11545_v62  ;;  %8546 = vmatprep.mubr.msk.f32.mxu0 %vm10528_vm5, %v14530_v34 }
 0x7d1   :  { %v11778_v8 = vpop.eup %10107  ;;  %v863_v16 = vpop.xlane.xlu0 %862  ;;  %v875_v22 = vmul.f32 %v10106_v10, %v11576_v57  ;;  %9316 = vmatprep.subr.bf16.mxu0 %v14531_v24 }
 0x7d2   :  { %10113 = vrcp.f32 %v863_v16  ;;  %v2384_v46 = vsel %vm782_vm8, %v11778_v8, 0.0  ;;  %v1599_v16 = vld [vmem:[#allocation2 + $0x88] sm:$0xff] }
 0x7d3   :  { %8547 = vmatmul.mubr.msk.f32.gmra.mrb[10].mxu0 %vm782_vm8, %v875_v22 }
 0x7d4   :  { %v10110_v12 = vpop.eup %10109  ;;  %8549 = vmatprep.mubr.msk.f32.mxu0 %vm10528_vm5, %v14530_v34 }
 0x7d5   :  { %2385 = vadd.xlane.f32.xlu1 %v2384_v46  ;;  %v1329_v62 = vpop.xlane.xlu1 %1328  ;;  %v877_v51 = vmul.f32 %v10110_v12, %v11581_v60  ;;  %v11823_v12 = vpop.permute.xlu0 %9655 }
 0x7d6   :  { %10115 = vrcp.f32 %v1329_v62 }
 0x7d7   :  { %8550 = vmatmul.mubr.msk.f32.gmra.mrb[12].mxu0 %vm782_vm8, %v877_v51 }
 0x7d8   :  { %v10112_v57 = vpop.eup %10111  ;;  %8552 = vmatprep.mubr.msk.f32.mxu0 %vm10528_vm5, %v14530_v34 }
 0x7d9   :  { %v1332_v49 = vpop.xlane.xlu1 %1331  ;;  %v879_v26 = vmul.f32 %v10112_v57, %v11586_v11  ;;  %v11825_v46 = vpop.permute.xlu0 %9660 }
 0x7da   :  { %10117 = vrcp.f32 %v1332_v49 }
 0x7db   :  { %2424 = vrot.lane.b32.xlu0 %v10476_v44, %s10530_s30  ;;  %8553 = vmatmul.mubr.msk.f32.gmra.mrb[14].mxu0 %vm782_vm8, %v879_v26 }
 0x7dc   :  { %v10114_v50 = vpop.eup %10113  ;;  %8555 = vmatprep.mubr.msk.f32.mxu0 %vm10528_vm5, %v14530_v34 }
 0x7dd   :  { %v1335_v60 = vpop.xlane.xlu1 %1334  ;;  %v881_v7 = vmul.f32 %v10114_v50, %v11591_v41 }
 0x7de   :  { %10119 = vrcp.f32 %v1335_v60 }
 0x7df   :  { %8556 = vmatmul.mubr.msk.f32.gmra.mrb[16].mxu0 %vm782_vm8, %v881_v7  ;;  %10121 = vpow2.f32 %v2361_v56 }
 0x7e0   :  { %v10116_v43 = vpop.eup %10115  ;;  %8621 = vmatprep.mubr.msk.f32.mxu0 %vm10528_vm5, %v14530_v34 }
 0x7e1   :  { %v1355_v11 = vmul.f32 %v10116_v43, %v11595_v0  ;;  %v1596_v0 = vld [vmem:[#allocation2 + $0x58] sm:$0xff]  ;;  %v9651_v48 = vpop.permute.xlu1 %9650 }
 0x7e2   :  { %v9323_v28 = vpack.c.bf16 %v1596_v0, %v1595_v36  ;;  %v9653_v0 = vunpack.i.h.bf16 %v9651_v48 }
 0x7e3   :  { %8622 = vmatmul.mubr.msk.f32.vlgmr.msra.gmra.mrb[18].mxu0 %vm782_vm8, %v1355_v11 }
 0x7e4   :  { %v10118_v54 = vpop.eup %10117  ;;  %9318 = vmatpush3.bf16.msra.mxu0 %v9317_v31  ;;  %8624 = vmatprep.mubr.msk.f32.mxu0 %vm10528_vm5, %v14530_v34 }
 0x7e5   :  { %9319 = vmatprep.subr.bf16.mxu0 %v14531_v24  ;;  %v1357_v41 = vmul.f32 %v10118_v54, %v11599_v19  ;;  %v1598_v19 = vld [vmem:[#allocation2 + $0x78] sm:$0xff] }
 0x7e6   :  { %v9326_v10 = vpack.c.bf16 %v1598_v19, %v1597_v3  ;;  %v9657_v19 = vunpack.i.l.bf16 %v11823_v12 }
 0x7e7   :  { %8625 = vmatmul.mubr.msk.f32.gmra.mrb[20].mxu0 %vm782_vm8, %v1357_v41 }
 0x7e8   :  { %v10120_v55 = vpop.eup %10119  ;;  %9321 = vmatpush3.bf16.msra.mxu0 %v9320_v9  ;;  %8627 = vmatprep.mubr.msk.f32.mxu0 %vm10528_vm5, %v14530_v34 }
 0x7e9   :  { %9322 = vmatprep.subr.bf16.mxu0 %v14531_v24  ;;  %v1359_v29 = vmul.f32 %v10120_v55, %v11603_v52  ;;  %v11819_v52 = vpop.eup %10121  ;;  %v9652_v55 = vunpack.i.l.bf16 %v9651_v48 }
 0x7ea   :  { %v2387_v22 = vsel %vm782_vm8, %v11819_v52, 0.0 }
 0x7eb   :  { %8628 = vmatmul.mubr.msk.f32.gmra.mrb[22].mxu0 %vm782_vm8, %v1359_v29  ;;  %v9345_v3 = vpack.c.bf16 %v9653_v0, %v9652_v55 }
 0x7ec   :  { %9324 = vmatpush3.bf16.msra.mxu0 %v9323_v28  ;;  %8630 = vmatprep.mubr.msk.f32.mxu0 %vm10528_vm5, %v14530_v34  ;;  %v9658_v28 = vunpack.i.h.bf16 %v11823_v12  ;;  %v9663_v12 = vunpack.i.h.bf16 %v11825_v46 }
 0x7ed   :  { %9325 = vmatprep.subr.bf16.mxu0 %v14531_v24 }
 0x7f0   :  { %9327 = vmatpush3.bf16.msra.mxu0 %v9326_v10 }
 0x7f1   :  { %8709 = vmatprep.subr.mxu0 %v14530_v34 }
 0x7f4   :  { %8710 = vmatpush3.msra.mxu0 %v1599_v16 }
 0x7f5   :  { %9344 = vmatprep.subr.bf16.mxu0 %v14531_v24 }
 0x7fa   :  { %2388 = vadd.xlane.f32.xlu0 %v2387_v22  ;;  %v9348_v22 = vpack.c.bf16 %v9658_v28, %v9657_v19 }
 0x80a   :  { %v1338_v62 = vpop.xlane.xlu0 %1337 }
 0x80b   :  { %10123 = vrcp.f32 %v1338_v62  ;;  %v9662_v62 = vunpack.i.l.bf16 %v11825_v46 }
 0x80e   :  { %v1341_v51 = vpop.xlane.xlu0 %1340 }
 0x80f   :  { %10125 = vrcp.f32 %v1341_v51  ;;  %v9822_v51 = vld [vmem:[%s14485_s3 + $0x24] ss:$16 sps:$4 sm:$0xff]  }
 0x812   :  { %v1344_v57 = vpop.xlane.xlu0 %1343 }
 0x813   :  { %10127 = vrcp.f32 %v1344_v57  ;;  %v9823_v57 = vld [vmem:[%s14485_s3 + $0x64] ss:$16 sps:$4 sm:$0xff]  }
 0x814   :  { %2671 = vrot.lane.b32.xlu0 %v9823_v57, %s10525_s27 }
 0x815   :  { %v10124_v49 = vpop.eup %10123 }
 0x816   :  { %v1347_v26 = vpop.xlane.xlu0 %1346  ;;  %v1361_v44 = vmul.f32 %v10124_v49, %v11621_v38 }
 0x817   :  { %10129 = vrcp.f32 %v1347_v26 }
 0x818   :  { %8631 = vmatmul.mubr.msk.f32.gmra.mrb[24].mxu0 %vm782_vm8, %v1361_v44  ;;  %v9824_v44 = vld [vmem:[%s14485_s3 + $0x44] ss:$16 sps:$4 sm:$0xff]  }
 0x819   :  { %v10126_v50 = vpop.eup %10125  ;;  %8633 = vmatprep.mubr.msk.f32.mxu0 %vm10528_vm5, %v14530_v34  ;;  %v11843_v54 = vpop.xlane.xlu1 %1888 }
 0x81a   :  { %v1350_v60 = vpop.xlane.xlu0 %1349  ;;  %v1363_v7 = vmul.f32 %v10126_v50, %v11629_v40  ;;  %v9351_v50 = vpack.c.bf16 %v9663_v12, %v9662_v62  ;;  %v14532_v62 = vmov 0  }
 0x81b   :  { %10131 = vrcp.f32 %v1350_v60 }
 0x81c   :  { %8634 = vmatmul.mubr.msk.f32.gmra.mrb[26].mxu0 %vm782_vm8, %v1363_v7 }
 0x81d   :  { %v10128_v1 = vpop.eup %10127  ;;  %8636 = vmatprep.mubr.msk.f32.mxu0 %vm10528_vm5, %v14530_v34 }
 0x81e   :  { %v1353_v43 = vpop.xlane.xlu0 %1352  ;;  %v1365_v38 = vmul.f32 %v10128_v1, %v11636_v27 }
 0x81f   :  { %10133 = vrcp.f32 %v1353_v43 }
 0x820   :  { %8637 = vmatmul.mubr.msk.f32.gmra.mrb[28].mxu0 %vm782_vm8, %v1365_v38 }
 0x821   :  { %v10130_v11 = vpop.eup %10129  ;;  %8639 = vmatprep.mubr.msk.f32.mxu0 %vm10528_vm5, %v14530_v34 }
 0x822   :  { %v1865_v31 = vpop.xlane.xlu0 %1864  ;;  %v1367_v40 = vmul.f32 %v10130_v11, %v11642_v32  ;;  %v11849_v32 = vpop.xlane.xlu1 %2367 }
 0x823   :  { %10135 = vrcp.f32 %v1865_v31 }
 0x824   :  { %8640 = vmatmul.mubr.msk.f32.gmra.mrb[30].mxu0 %vm782_vm8, %v1367_v40 }
 0x825   :  { %v10132_v21 = vpop.eup %10131  ;;  %8642 = vmatprep.mubr.msk.f32.mxu0 %vm10528_vm5, %v14530_v34 }
 0x826   :  { %v1868_v27 = vpop.xlane.xlu0 %1867  ;;  %v1369_v58 = vmul.f32 %v10132_v21, %v11649_v20 }
 0x827   :  { %10137 = vrcp.f32 %v1868_v27 }
 0x828   :  { %8643 = vmatmul.mubr.msk.f32.gmra.mrb[32].mxu0 %vm782_vm8, %v1369_v58 }
 0x829   :  { %v10134_v41 = vpop.eup %10133  ;;  %8645 = vmatprep.mubr.msk.f32.mxu0 %vm10528_vm5, %v14530_v34 }
 0x82a   :  { %v1871_v2 = vpop.xlane.xlu0 %1870  ;;  %v1371_v9 = vmul.f32 %v10134_v41, %v11658_v42  ;;  %v9821_v42 = vld [vmem:[%s14485_s3 + $0x4] ss:$16 sps:$4 sm:$0xff]  }
 0x82b   :  { %10139 = vrcp.f32 %v1871_v2  ;;  %2665 = vrot.lane.b32.xlu1 %v9821_v42, %s10525_s27 }
 0x82c   :  { %8646 = vmatmul.mubr.msk.f32.gmra.mrb[34].mxu0 %vm782_vm8, %v1371_v9 }
 0x82d   :  { %v10136_v56 = vpop.eup %10135  ;;  %8711 = vmatprep.mubr.msk.f32.mxu0 %vm10528_vm5, %v14530_v34  ;;  %v11856_v29 = vpop.xlane.xlu1 %2376 }
 0x82e   :  { %v1891_v20 = vmul.f32 %v10136_v56, %v11665_v14  ;;  %v1874_v36 = vpop.xlane.xlu0 %1873 }
 0x82f   :  { %10141 = vrcp.f32 %v1874_v36  ;;  %2667 = vrot.lane.b32.xlu1 %v9822_v51, %s10525_s27 }
 0x830   :  { %8712 = vmatmul.mubr.msk.f32.vlgmr.msra.gmra.mrb[36].mxu0 %vm782_vm8, %v1891_v20 }
 0x831   :  { %v10138_v10 = vpop.eup %10137  ;;  %9346 = vmatpush3.bf16.msra.mxu0 %v9345_v3  ;;  %8714 = vmatprep.mubr.msk.f32.mxu0 %vm10528_vm5, %v14530_v34  ;;  %v9666_v49 = vpop.permute.xlu1 %9665 }
 0x832   :  { %v1877_v14 = vpop.xlane.xlu0 %1876  ;;  %9347 = vmatprep.subr.bf16.mxu0 %v14531_v24  ;;  %v1893_v16 = vmul.f32 %v10138_v10, %v11675_v39  ;;  %v9668_v60 = vunpack.i.h.bf16 %v9666_v49  ;;  %v9667_v7 = vunpack.i.l.bf16 %v9666_v49 }
 0x833   :  { %10143 = vrcp.f32 %v1877_v14  ;;  %2669 = vrot.lane.b32.xlu1 %v9824_v44, %s10525_s27 }
 0x834   :  { %8715 = vmatmul.mubr.msk.f32.gmra.mrb[38].mxu0 %vm782_vm8, %v1893_v16  ;;  %v9354_v38 = vpack.c.bf16 %v9668_v60, %v9667_v7 }
 0x835   :  { %v10140_v39 = vpop.eup %10139  ;;  %9349 = vmatpush3.bf16.msra.mxu0 %v9348_v22  ;;  %8717 = vmatprep.mubr.msk.f32.mxu0 %vm10528_vm5, %v14530_v34 }
 0x836   :  { %v1880_v26 = vpop.xlane.xlu0 %1879  ;;  %9350 = vmatprep.subr.bf16.mxu0 %v14531_v24  ;;  %v1895_v46 = vmul.f32 %v10140_v39, %v11681_v5 }
 0x837   :  { %10145 = vrcp.f32 %v1880_v26 }
 0x838   :  { %8718 = vmatmul.mubr.msk.f32.gmra.mrb[40].mxu0 %vm782_vm8, %v1895_v46 }
 0x839   :  { %v10142_v1 = vpop.eup %10141  ;;  %9352 = vmatpush3.bf16.msra.mxu0 %v9351_v50  ;;  %8720 = vmatprep.mubr.msk.f32.mxu0 %vm10528_vm5, %v14530_v34 }
 0x83a   :  { %v1883_v5 = vpop.xlane.xlu0 %1882  ;;  %9353 = vmatprep.subr.bf16.mxu0 %v14531_v24  ;;  %v1897_v43 = vmul.f32 %v10142_v1, %v11687_v4 }
 0x83b   :  { %10147 = vrcp.f32 %v1883_v5 }
 0x83c   :  { %8721 = vmatmul.mubr.msk.f32.gmra.mrb[42].mxu0 %vm782_vm8, %v1897_v43 }
 0x83d   :  { %v10144_v11 = vpop.eup %10143  ;;  %9355 = vmatpush3.bf16.msra.mxu0 %v9354_v38  ;;  %8723 = vmatprep.mubr.msk.f32.mxu0 %vm10528_vm5, %v14530_v34 }
 0x83e   :  { %v1886_v48 = vpop.xlane.xlu0 %1885  ;;  %v1899_v31 = vmul.f32 %v10144_v11, %v11697_v13  ;;  %8799 = vmatprep.subr.mxu0 %v14530_v34 }
 0x83f   :  { %10149 = vrcp.f32 %v1886_v48 }
 0x840   :  { %8724 = vmatmul.mubr.msk.f32.gmra.mrb[44].mxu0 %vm782_vm8, %v1899_v31  ;;  %10151 = vrcp.f32 %v11843_v54 }
 0x841   :  { %v10146_v4 = vpop.eup %10145  ;;  %8726 = vmatprep.mubr.msk.f32.mxu0 %vm10528_vm5, %v14530_v34 }
 0x842   :  { %v2365_v40 = vpop.xlane.xlu0 %2364  ;;  %v1901_v21 = vmul.f32 %v10146_v4, %v11703_v33 }
 0x843   :  { %10153 = vrcp.f32 %v2365_v40 }
 0x844   :  { %8727 = vmatmul.mubr.msk.f32.gmra.mrb[46].mxu0 %vm782_vm8, %v1901_v21  ;;  %10155 = vrcp.f32 %v11849_v32 }
 0x845   :  { %v10148_v27 = vpop.eup %10147  ;;  %8729 = vmatprep.mubr.msk.f32.mxu0 %vm10528_vm5, %v14530_v34 }
 0x846   :  { %v2371_v13 = vpop.xlane.xlu0 %2370  ;;  %v1903_v58 = vmul.f32 %v10148_v27, %v11710_v47 }
 0x847   :  { %10157 = vrcp.f32 %v2371_v13 }
 0x848   :  { %8730 = vmatmul.mubr.msk.f32.gmra.mrb[48].mxu0 %vm782_vm8, %v1903_v58 }
 0x849   :  { %v10150_v41 = vpop.eup %10149  ;;  %8732 = vmatprep.mubr.msk.f32.mxu0 %vm10528_vm5, %v14530_v34 }
 0x84a   :  { %v2374_v54 = vpop.xlane.xlu0 %2373  ;;  %v1905_v2 = vmul.f32 %v10150_v41, %v11715_v53  ;;  %v10152_v33 = vpop.eup %10151 }
 0x84b   :  { %v1907_v47 = vmul.f32 %v10152_v33, %v11651_v6  ;;  %10159 = vrcp.f32 %v2374_v54 }
 0x84c   :  { %8733 = vmatmul.mubr.msk.f32.gmra.mrb[50].mxu0 %vm782_vm8, %v1905_v2  ;;  %10161 = vrcp.f32 %v11856_v29 }
 0x84d   :  { %8735 = vmatprep.mubr.msk.f32.mxu0 %vm10528_vm5, %v14530_v34  ;;  %v10154_v55 = vpop.eup %10153 }
 0x84e   :  { %v2380_v9 = vpop.xlane.xlu0 %2379  ;;  %v2391_v53 = vmul.f32 %v10154_v55, %v11722_v59  ;;  %v10156_v20 = vpop.eup %10155 }
 0x84f   :  { %v2393_v6 = vmul.f32 %v10156_v20, %v11667_v15  ;;  %10163 = vrcp.f32 %v2380_v9 }
 0x850   :  { %8736 = vmatmul.mubr.msk.f32.gmra.mrb[52].mxu0 %vm782_vm8, %v1907_v47 }
 0x851   :  { %8801 = vmatprep.mubr.msk.f32.mxu0 %vm10528_vm5, %v14530_v34  ;;  %v10158_v32 = vpop.eup %10157 }
 0x852   :  { %v2383_v0 = vpop.xlane.xlu0 %2382  ;;  %v2395_v59 = vmul.f32 %v10158_v32, %v11727_v23 }
 0x853   :  { %10165 = vrcp.f32 %v2383_v0 }
 0x855   :  { %v10160_v36 = vpop.eup %10159 }
 0x856   :  { %v2425_v56 = vpop.permute.xlu0 %2424  ;;  %v2397_v28 = vmul.f32 %v10160_v36, %v11731_v63  ;;  %v10162_v15 = vpop.eup %10161 }
 0x857   :  { %8800 = vmatpush3.msra.mxu0 %v2425_v56  ;;  %v2399_v19 = vmul.f32 %v10162_v15, %v11689_v45 }
 0x858   :  { %8802 = vmatmul.mubr.msk.f32.vlgmr.msra.gmra.mrb[54].mxu0 %vm782_vm8, %v2391_v53 }
 0x859   :  { %8804 = vmatprep.mubr.msk.f32.mxu0 %vm10528_vm5, %v14530_v34  ;;  %v10164_v23 = vpop.eup %10163 }
 0x85a   :  { %v2401_v3 = vmul.f32 %v10164_v23, %v11737_v37 }
 0x85c   :  { %8805 = vmatmul.mubr.msk.f32.gmra.mrb[56].mxu0 %vm782_vm8, %v2393_v6 }
 0x85d   :  { %8807 = vmatprep.mubr.msk.f32.mxu0 %vm10528_vm5, %v14530_v34  ;;  %v10166_v42 = vpop.eup %10165 }
 0x85e   :  { %v2403_v63 = vmul.f32 %v10166_v42, %v11749_v61 }
 0x860   :  { %8808 = vmatmul.mubr.msk.f32.gmra.mrb[58].mxu0 %vm782_vm8, %v2395_v59 }
 0x861   :  { %8810 = vmatprep.mubr.msk.f32.mxu0 %vm10528_vm5, %v14530_v34 }
 0x862   :  { %v2386_v29 = vpop.xlane.xlu1 %2385 }
 0x863   :  { %10167 = vrcp.f32 %v2386_v29 }
 0x864   :  { %8811 = vmatmul.mubr.msk.f32.gmra.mrb[60].mxu0 %vm782_vm8, %v2397_v28 }
 0x865   :  { %8813 = vmatprep.mubr.msk.f32.mxu0 %vm10528_vm5, %v14530_v34 }
 0x868   :  { %8814 = vmatmul.mubr.msk.f32.gmra.mrb[62].mxu0 %vm782_vm8, %v2399_v19 }
 0x869   :  { %8816 = vmatprep.mubr.msk.f32.mxu0 %vm10528_vm5, %v14530_v34 }
 0x86c   :  { %8817 = vmatmul.mubr.msk.f32.gmra.mrb[64].mxu0 %vm782_vm8, %v2401_v3 }
 0x86d   :  { %8819 = vmatprep.mubr.msk.f32.mxu0 %vm10528_vm5, %v14530_v34  ;;  %v10168_v10 = vpop.eup %10167 }
 0x86e   :  { %v2405_v45 = vmul.f32 %v10168_v10, %v11778_v8 }
 0x870   :  { %8820 = vmatmul.mubr.msk.f32.gmra.mrb[66].mxu0 %vm782_vm8, %v2403_v63 }
 0x871   :  { %8822 = vmatprep.mubr.msk.f32.mxu0 %vm10528_vm5, %v14530_v34 }
 0x874   :  { %8823 = vmatmul.mubr.msk.f32.gmra.mrb[68].mxu0 %vm782_vm8, %v2405_v45 }
 0x875   :  { %8825 = vmatprep.mubr.msk.f32.mxu0 %vm10528_vm5, %v14530_v34 }
 0x887   :  { %v2389_v37 = vpop.xlane.xlu0 %2388 }
 0x888   :  { %10169 = vrcp.f32 %v2389_v37 }
 0x88b   :  { %v2672_v11 = vpop.permute.xlu0 %2671 }
 0x892   :  { %v10170_v14 = vpop.eup %10169  ;;  %v1002_v16 = vpop.f32.mrb[0].mxu0 }
 0x893   :  { %1046 = vst.msk [vmem:[#allocation3] sm:$0xff] %vm617_vm6, %v1002_v16  ;;  %v8533_v61 = vpop.f32.mrb[1].mxu0  ;;  %v2407_v22 = vmul.f32 %v10170_v14, %v11819_v52 }
 0x895   :  { %8826 = vmatmul.mubr.msk.f32.gmra.mrb[70].mxu0 %vm782_vm8, %v2407_v22 }
 0x896   :  { %v1007_v12 = vpop.f32.mrb[2].mxu0  ;;  %3031 = vmatprep.mubr.bf16.mxu0 %v14532_v62 }
 0x897   :  { %1047 = vst.msk [vmem:[#allocation3 + $0x8] sm:$0xff] %vm617_vm6, %v1007_v12  ;;  %v8536_v8 = vpop.f32.mrb[3].mxu0 }
 0x89a   :  { %v1012_v51 = vpop.f32.mrb[4].mxu0 }
 0x89b   :  { %1048 = vst.msk [vmem:[#allocation3 + $0x10] sm:$0xff] %vm617_vm6, %v1012_v51  ;;  %v8539_v57 = vpop.f32.mrb[5].mxu0 }
 0x89d   :  { %v2666_v46 = vpop.permute.xlu1 %2665 }
 0x89e   :  { %v1017_v49 = vpop.f32.mrb[6].mxu0  ;;  %8829 = vmatpush3.bf16.msra.mxu1 %v2666_v46 }
 0x89f   :  { %1049 = vst.msk [vmem:[#allocation3 + $0x18] sm:$0xff] %vm617_vm6, %v1017_v49  ;;  %v8542_v39 = vpop.f32.mrb[7].mxu0  ;;  %8830 = vmatprep.subr.bf16.mxu1 %v14530_v34 }
 0x8a1   :  { %v2668_v60 = vpop.permute.xlu1 %2667 }
 0x8a2   :  { %v1022_v26 = vpop.f32.mrb[8].mxu0  ;;  %8831 = vmatpush3.bf16.msra.mxu1 %v2668_v60 }
 0x8a3   :  { %1050 = vst.msk [vmem:[#allocation3 + $0x20] sm:$0xff] %vm617_vm6, %v1022_v26  ;;  %v8545_v52 = vpop.f32.mrb[9].mxu0  ;;  %8832 = vmatprep.subr.bf16.mxu1 %v14530_v34 }
 0x8a5   :  { %v2670_v5 = vpop.permute.xlu1 %2669 }
 0x8a6   :  { %v1027_v44 = vpop.f32.mrb[10].mxu0  ;;  %8833 = vmatpush3.bf16.msra.mxu1 %v2670_v5 }
 0x8a7   :  { %1051 = vst.msk [vmem:[#allocation3 + $0x28] sm:$0xff] %vm617_vm6, %v1027_v44  ;;  %v8548_v50 = vpop.f32.mrb[11].mxu0  ;;  %8834 = vmatprep.subr.bf16.mxu1 %v14530_v34 }
 0x8aa   :  { %v1032_v7 = vpop.f32.mrb[12].mxu0  ;;  %8835 = vmatpush3.bf16.msra.mxu1 %v2672_v11 }
 0x8ab   :  { %1052 = vst.msk [vmem:[#allocation3 + $0x30] sm:$0xff] %vm617_vm6, %v1032_v7  ;;  %v8551_v1 = vpop.f32.mrb[13].mxu0 }
 0x8ae   :  { %v1037_v43 = vpop.f32.mrb[14].mxu0 }
 0x8af   :  { %1053 = vst.msk [vmem:[#allocation3 + $0x38] sm:$0xff] %vm617_vm6, %v1037_v43  ;;  %v8554_v38 = vpop.f32.mrb[15].mxu0 }
 0x8b2   :  { %v1042_v48 = vpop.f32.mrb[16].mxu0 }
 0x8b3   :  { %1054 = vst.msk [vmem:[#allocation3 + $0x40] sm:$0xff] %vm617_vm6, %v1042_v48  ;;  %v8557_v31 = vpop.f32.mrb[17].mxu0 }
 0x8b6   :  { %v1492_v4 = vpop.f32.mrb[18].mxu0 }
 0x8b7   :  { %1545 = vrot.lane.b32.xlu0 %v1492_v4, %s10531_s10  ;;  %v8623_v40 = vpop.f32.mrb[19].mxu0 }
 0x8ba   :  { %v1497_v21 = vpop.f32.mrb[20].mxu0 }
 0x8bb   :  { %1547 = vrot.lane.b32.xlu1 %v1497_v21, %s10531_s10  ;;  %v8626_v27 = vpop.f32.mrb[21].mxu0  ;;  %v7728_v21 = vld [vmem:[%s14487_s5 + $0x2] ss:$0 sm:$0xff] }
 0x8be   :  { %v1502_v13 = vpop.f32.mrb[22].mxu0 }
 0x8bf   :  { %1549 = vrot.lane.b32.xlu0 %v1502_v13, %s10531_s10  ;;  %v8629_v58 = vpop.f32.mrb[23].mxu0 }
 0x8eb   :  { %v1507_v41 = vpop.f32.mrb[24].mxu0 }
 0x8ec   :  { %1551 = vrot.lane.b32.xlu1 %v1507_v41, %s10531_s10  ;;  %v8632_v54 = vpop.f32.mrb[25].mxu0 }
 0x8ef   :  { %v1512_v2 = vpop.f32.mrb[26].mxu0 }
 0x8f0   :  { %1553 = vrot.lane.b32.xlu1 %v1512_v2, %s10531_s10  ;;  %v8635_v33 = vpop.f32.mrb[27].mxu0 }
 0x8f3   :  { %v1517_v9 = vpop.f32.mrb[28].mxu0 }
 0x8f4   :  { %1555 = vrot.lane.b32.xlu0 %v1517_v9, %s10531_s10  ;;  %v8638_v47 = vpop.f32.mrb[29].mxu0 }
 0x8f7   :  { %v1522_v0 = vpop.f32.mrb[30].mxu0 }
 0x8f8   :  { %v8641_v55 = vpop.f32.mrb[31].mxu0 }
 0x8fb   :  { %v1527_v53 = vpop.f32.mrb[32].mxu0 }
 0x8fc   :  { %v8644_v56 = vpop.f32.mrb[33].mxu0 }
 0x8ff   :  { %v1532_v20 = vpop.f32.mrb[34].mxu0 }
 0x900   :  { %v8647_v6 = vpop.f32.mrb[35].mxu0 }
 0x903   :  { %v2001_v32 = vpop.f32.mrb[36].mxu0 }
 0x904   :  { %2054 = vrot.lane.b32.xlu1 %v2001_v32, %s10532_s11  ;;  %v8713_v59 = vpop.f32.mrb[37].mxu0 }
 0x907   :  { %v2006_v36 = vpop.f32.mrb[38].mxu0 }
 0x908   :  { %2056 = vrot.lane.b32.xlu1 %v2006_v36, %s10532_s11  ;;  %v8716_v29 = vpop.f32.mrb[39].mxu0 }
 0x90b   :  { %v2011_v28 = vpop.f32.mrb[40].mxu0 }
 0x90c   :  { %2058 = vrot.lane.b32.xlu0 %v2011_v28, %s10532_s11  ;;  %v8719_v15 = vpop.f32.mrb[41].mxu0 }
 0x90f   :  { %v2016_v19 = vpop.f32.mrb[42].mxu0 }
 0x910   :  { %2060 = vrot.lane.b32.xlu1 %v2016_v19, %s10532_s11  ;;  %v8722_v23 = vpop.f32.mrb[43].mxu0 }
 0x913   :  { %v2021_v3 = vpop.f32.mrb[44].mxu0 }
 0x914   :  { %v8725_v42 = vpop.f32.mrb[45].mxu0 }
 0x917   :  { %v2026_v63 = vpop.f32.mrb[46].mxu0 }
 0x918   :  { %v8728_v10 = vpop.f32.mrb[47].mxu0 }
 0x91b   :  { %v2031_v45 = vpop.f32.mrb[48].mxu0 }
 0x91c   :  { %v8731_v37 = vpop.f32.mrb[49].mxu0 }
 0x91f   :  { %v2036_v14 = vpop.f32.mrb[50].mxu0 }
 0x920   :  { %v8734_v16 = vpop.f32.mrb[51].mxu0 }
 0x923   :  { %v2041_v61 = vpop.f32.mrb[52].mxu0 }
 0x924   :  { %v8737_v22 = vpop.f32.mrb[53].mxu0 }
 0x929   :  { %v1546_v12 = vpop.permute.xlu0 %1545 }
 0x92a   :  { %1573 = vst.msk [vmem:[#allocation3] sm:$0xff] %vm1572_vm9, %v1546_v12 }
 0x92b   :  { %v2528_v8 = vpop.f32.mrb[54].mxu0 }
 0x92c   :  { %2581 = vrot.lane.b32.xlu1 %v2528_v8, %s10534_s14  ;;  %v8803_v51 = vpop.f32.mrb[55].mxu0 }
 0x92d   :  { %v1548_v57 = vpop.permute.xlu1 %1547 }
 0x92e   :  { %1574 = vst.msk [vmem:[#allocation3 + $0x8] sm:$0xff] %vm1572_vm9, %v1548_v57 }
 0x92f   :  { %v2533_v49 = vpop.f32.mrb[56].mxu0 }
 0x930   :  { %2062 = vrot.lane.b32.xlu1 %v2021_v3, %s10532_s11  ;;  %2583 = vrot.lane.b32.xlu0 %v2533_v49, %s10534_s14  ;;  %v8806_v39 = vpop.f32.mrb[57].mxu0 }
 0x931   :  { %v1550_v26 = vpop.permute.xlu0 %1549 }
 0x932   :  { %1575 = vst.msk [vmem:[#allocation3 + $0x10] sm:$0xff] %vm1572_vm9, %v1550_v26 }
 0x933   :  { %v2538_v52 = vpop.f32.mrb[58].mxu0 }
 0x934   :  { %2064 = vrot.lane.b32.xlu0 %v2026_v63, %s10532_s11  ;;  %2585 = vrot.lane.b32.xlu1 %v2538_v52, %s10534_s14  ;;  %v8809_v46 = vpop.f32.mrb[59].mxu0 }
 0x937   :  { %v2543_v44 = vpop.f32.mrb[60].mxu0 }
 0x938   :  { %1557 = vrot.lane.b32.xlu1 %v1522_v0, %s10531_s10  ;;  %2587 = vrot.lane.b32.xlu0 %v2543_v44, %s10534_s14  ;;  %v8812_v50 = vpop.f32.mrb[61].mxu0 }
 0x93b   :  { %v2548_v60 = vpop.f32.mrb[62].mxu0 }
 0x93c   :  { %1559 = vrot.lane.b32.xlu0 %v1527_v53, %s10531_s10  ;;  %2589 = vrot.lane.b32.xlu1 %v2548_v60, %s10534_s14  ;;  %v8815_v7 = vpop.f32.mrb[63].mxu0 }
 0x93f   :  { %v2553_v1 = vpop.f32.mrb[64].mxu0 }
 0x940   :  { %2066 = vrot.lane.b32.xlu1 %v2031_v45, %s10532_s11  ;;  %2591 = vrot.lane.b32.xlu0 %v2553_v1, %s10534_s14  ;;  %v8818_v5 = vpop.f32.mrb[65].mxu0 }
 0x943   :  { %v2558_v43 = vpop.f32.mrb[66].mxu0 }
 0x944   :  { %2068 = vrot.lane.b32.xlu0 %v2036_v14, %s10532_s11  ;;  %2593 = vrot.lane.b32.xlu1 %v2558_v43, %s10534_s14  ;;  %v8821_v38 = vpop.f32.mrb[67].mxu0 }
 0x947   :  { %v2563_v11 = vpop.f32.mrb[68].mxu0 }
 0x948   :  { %1561 = vrot.lane.b32.xlu1 %v1532_v20, %s10531_s10  ;;  %2595 = vrot.lane.b32.xlu0 %v2563_v11, %s10534_s14  ;;  %v8824_v48 = vpop.f32.mrb[69].mxu0 }
 0x94c   :  { %2070 = vrot.lane.b32.xlu0 %v2041_v61, %s10532_s11 }
 0x950   :  { %2677 = vrot.lane.b32.xlu0 %v7728_v21, %s10525_s27 }
 0x95e   :  { %v1552_v31 = vpop.permute.xlu1 %1551 }
 0x95f   :  { %1576 = vst.msk [vmem:[#allocation3 + $0x18] sm:$0xff] %vm1572_vm9, %v1552_v31 }
 0x962   :  { %v1554_v4 = vpop.permute.xlu1 %1553 }
 0x963   :  { %1577 = vst.msk [vmem:[#allocation3 + $0x20] sm:$0xff] %vm1572_vm9, %v1554_v4 }
 0x966   :  { %v1556_v40 = vpop.permute.xlu0 %1555 }
 0x967   :  { %1578 = vst.msk [vmem:[#allocation3 + $0x28] sm:$0xff] %vm1572_vm9, %v1556_v40 }
 0x968   :  { %v2568_v27 = vpop.f32.mrb[70].mxu0 }
 0x969   :  { %2597 = vrot.lane.b32.xlu1 %v2568_v27, %s10534_s14  ;;  %v8827_v13 = vpop.f32.mrb[71].mxu0 }
 0x976   :  { %v2055_v58 = vpop.permute.xlu1 %2054 }
 0x977   :  { %2082 = vst.msk [vmem:[#allocation3] sm:$0xff] %vm2081_vm10, %v2055_v58 }
 0x97a   :  { %v2057_v41 = vpop.permute.xlu1 %2056 }
 0x97b   :  { %2083 = vst.msk [vmem:[#allocation3 + $0x8] sm:$0xff] %vm2081_vm10, %v2057_v41 }
 0x97e   :  { %v2059_v54 = vpop.permute.xlu0 %2058 }
 0x97f   :  { %2084 = vst.msk [vmem:[#allocation3 + $0x10] sm:$0xff] %vm2081_vm10, %v2059_v54 }
 0x982   :  { %v2061_v2 = vpop.permute.xlu1 %2060 }
 0x983   :  { %2085 = vst.msk [vmem:[#allocation3 + $0x18] sm:$0xff] %vm2081_vm10, %v2061_v2 }
 0x99e   :  { %v2582_v33 = vpop.permute.xlu1 %2581 }
 0x99f   :  { %2609 = vst.msk [vmem:[#allocation3] sm:$0xff] %vm2608_vm11, %v2582_v33  ;;  %v14533_v33 = vld [vmem:[#allocation11_spill] sm:$0xff] }
 0x9a2   :  { %v2063_v9 = vpop.permute.xlu1 %2062  ;;  %v2584_v47 = vpop.permute.xlu0 %2583 }
 0x9a3   :  { %2086 = vst.msk [vmem:[#allocation3 + $0x20] sm:$0xff] %vm2081_vm10, %v2063_v9 }
 0x9a4   :  { %2610 = vst.msk [vmem:[#allocation3 + $0x8] sm:$0xff] %vm2608_vm11, %v2584_v47 }
 0x9a6   :  { %v2065_v0 = vpop.permute.xlu0 %2064  ;;  %v2586_v55 = vpop.permute.xlu1 %2585  ;;  %v2618_v20 = vld [vmem:[#allocation3] sm:$0xff] }
 0x9a7   :  { %2087 = vst.msk [vmem:[#allocation3 + $0x28] sm:$0xff] %vm2081_vm10, %v2065_v0 }
 0x9a8   :  { %2611 = vst.msk [vmem:[#allocation3 + $0x10] sm:$0xff] %vm2608_vm11, %v2586_v55 }
 0x9aa   :  { %v1558_v53 = vpop.permute.xlu1 %1557  ;;  %v2588_v56 = vpop.permute.xlu0 %2587 }
 0x9ab   :  { %v2619_v6 = vld [vmem:[#allocation3 + $0x8] sm:$0xff]  ;;  %1579 = vst.msk [vmem:[#allocation3 + $0x30] sm:$0xff] %vm1572_vm9, %v1558_v53 }
 0x9ac   :  { %2612 = vst.msk [vmem:[#allocation3 + $0x18] sm:$0xff] %vm2608_vm11, %v2588_v56  ;;  %v2627_v32 = vpack.c.bf16 %v2619_v6, %v2618_v20  ;;  %v14534_v20 = vld [vmem:[#allocation12_spill] sm:$0xff] }
 0x9ae   :  { %8837 = vmatmul.mubr.msk.bf16.vlgmr.msra.gmra.mrb[92].mxu1 %vm257_vm4, %v2627_v32  ;;  %v1560_v59 = vpop.permute.xlu0 %1559  ;;  %v2590_v36 = vpop.permute.xlu1 %2589 }
 0x9af   :  { %8840 = vmatprep.mubr.msk.bf16.mxu1 %vm10528_vm5, %v14530_v34  ;;  %1580 = vst.msk [vmem:[#allocation3 + $0x38] sm:$0xff] %vm1572_vm9, %v1560_v59  ;;  %v2620_v15 = vld [vmem:[#allocation3 + $0x10] sm:$0xff]  ;;  %v14535_v59 = vld [vmem:[#allocation13_spill] sm:$0xff] }
 0x9b0   :  { %2613 = vst.msk [vmem:[#allocation3 + $0x20] sm:$0xff] %vm2608_vm11, %v2590_v36 }
 0x9b2   :  { %v2067_v29 = vpop.permute.xlu1 %2066  ;;  %v2592_v28 = vpop.permute.xlu0 %2591 }
 0x9b3   :  { %v2621_v19 = vld [vmem:[#allocation3 + $0x18] sm:$0xff]  ;;  %2088 = vst.msk [vmem:[#allocation3 + $0x30] sm:$0xff] %vm2081_vm10, %v2067_v29 }
 0x9b4   :  { %2614 = vst.msk [vmem:[#allocation3 + $0x28] sm:$0xff] %vm2608_vm11, %v2592_v28  ;;  %v2628_v23 = vpack.c.bf16 %v2621_v19, %v2620_v15 }
 0x9b6   :  { %8841 = vmatmul.mubr.msk.bf16.gmra.mrb[96].mxu1 %vm257_vm4, %v2628_v23  ;;  %v2069_v3 = vpop.permute.xlu0 %2068  ;;  %v2594_v42 = vpop.permute.xlu1 %2593 }
 0x9b7   :  { %8844 = vmatprep.mubr.msk.bf16.mxu1 %vm10528_vm5, %v14530_v34  ;;  %2089 = vst.msk [vmem:[#allocation3 + $0x38] sm:$0xff] %vm2081_vm10, %v2069_v3  ;;  %v2622_v45 = vld [vmem:[#allocation3 + $0x20] sm:$0xff] }
 0x9b8   :  { %2615 = vst.msk [vmem:[#allocation3 + $0x30] sm:$0xff] %vm2608_vm11, %v2594_v42  ;;  %v14536_v42 = vld [vmem:[#allocation14_spill] sm:$0xff] }
 0x9ba   :  { %v1562_v63 = vpop.permute.xlu1 %1561  ;;  %v2596_v10 = vpop.permute.xlu0 %2595 }
 0x9bb   :  { %v2623_v37 = vld [vmem:[#allocation3 + $0x28] sm:$0xff]  ;;  %1581 = vst.msk [vmem:[#allocation3 + $0x40] sm:$0xff] %vm1572_vm9, %v1562_v63 }
 0x9bc   :  { %2616 = vst.msk [vmem:[#allocation3 + $0x38] sm:$0xff] %vm2608_vm11, %v2596_v10  ;;  %v2629_v14 = vpack.c.bf16 %v2623_v37, %v2622_v45 }
 0x9be   :  { %8845 = vmatmul.mubr.msk.bf16.gmra.mrb[100].mxu1 %vm257_vm4, %v2629_v14  ;;  %v2071_v16 = vpop.permute.xlu0 %2070 }
 0x9bf   :  { %8848 = vmatprep.mubr.msk.bf16.mxu1 %vm10528_vm5, %v14530_v34  ;;  %2090 = vst.msk [vmem:[#allocation3 + $0x40] sm:$0xff] %vm2081_vm10, %v2071_v16  ;;  %v2624_v61 = vld [vmem:[#allocation3 + $0x30] sm:$0xff] }
 0x9c2   :  { %v2678_v49 = vpop.permute.xlu0 %2677 }
 0x9c3   :  { %v2625_v22 = vld [vmem:[#allocation3 + $0x38] sm:$0xff] }
 0x9c4   :  { %v2630_v12 = vpack.c.bf16 %v2625_v22, %v2624_v61 }
 0x9c6   :  { %8849 = vmatmul.mubr.msk.bf16.gmra.mrb[104].mxu1 %vm257_vm4, %v2630_v12 }
 0x9c7   :  { %8852 = vmatprep.mubr.msk.bf16.mxu1 %vm10528_vm5, %v14530_v34 }
 0x9db   :  { %v2598_v8 = vpop.permute.xlu1 %2597 }
 0x9dc   :  { %2617 = vst.msk [vmem:[#allocation3 + $0x40] sm:$0xff] %vm2608_vm11, %v2598_v8 }
 0x9e3   :  { %v2626_v51 = vld [vmem:[#allocation3 + $0x40] sm:$0xff] }
 0x9e4   :  { %v2631_v57 = vpack.c.bf16 %v2626_v51, %v2626_v51 }
 0x9e6   :  { %8853 = vmatmul.mubr.msk.bf16.gmra.mrb[108].mxu1 %vm257_vm4, %v2631_v57 }
 0xa81   :  { %v2729_v39 = vpop.f32.mrb[92].mxu1 }
 0xa82   :  { %v2730_v26 = vadd.f32 %v2729_v39, %v2678_v49  ;;  %v8838_v52 = vpop.f32.mrb[93].mxu1 }
 0xa83   :  { %v2732_v46 = vpop.f32.mrb[94].mxu1 }
 0xa84   :  { %v12039_v44 = vadd.f32 %v2730_v26, %v10704_v17  ;;  %v2733_v50 = vadd.f32 %v2732_v46, %v2678_v49  ;;  %v8839_v60 = vpop.f32.mrb[95].mxu1 }
 0xa86   :  { %v12042_v7 = vadd.f32 %v2733_v50, %v10706_v18  ;;  %v2776_v1 = vsel %vm257_vm4, %v12039_v44, 0.0 }
 0xa87   :  { %2777 = vadd.xlane.f32.xlu1 %v2776_v1 }
 0xa88   :  { %v2779_v5 = vsel %vm257_vm4, %v12042_v7, 0.0 }
 0xa89   :  { %2780 = vadd.xlane.f32.xlu0 %v2779_v5  ;;  %v2737_v43 = vpop.f32.mrb[96].mxu1 }
 0xa8a   :  { %v2738_v38 = vadd.f32 %v2737_v43, %v2678_v49  ;;  %v8842_v11 = vpop.f32.mrb[97].mxu1 }
 0xa8b   :  { %v2740_v48 = vpop.f32.mrb[98].mxu1 }
 0xa8c   :  { %v12049_v17 = vadd.f32 %v2738_v38, %v10713_v25  ;;  %v2741_v31 = vadd.f32 %v2740_v48, %v2678_v49  ;;  %v8843_v4 = vpop.f32.mrb[99].mxu1 }
 0xa8e   :  { %v12052_v18 = vadd.f32 %v2741_v31, %v10720_v30  ;;  %v2782_v40 = vsel %vm257_vm4, %v12049_v17, 0.0 }
 0xa8f   :  { %2783 = vadd.xlane.f32.xlu0 %v2782_v40 }
 0xa90   :  { %v2785_v21 = vsel %vm257_vm4, %v12052_v18, 0.0 }
 0xa91   :  { %2786 = vadd.xlane.f32.xlu1 %v2785_v21  ;;  %v2745_v27 = vpop.f32.mrb[100].mxu1 }
 0xa92   :  { %v2746_v13 = vadd.f32 %v2745_v27, %v2678_v49  ;;  %v8846_v58 = vpop.f32.mrb[101].mxu1 }
 0xa93   :  { %v2748_v41 = vpop.f32.mrb[102].mxu1 }
 0xa94   :  { %v12059_v25 = vadd.f32 %v2746_v13, %v10727_v35  ;;  %v2749_v54 = vadd.f32 %v2748_v41, %v2678_v49  ;;  %v8847_v2 = vpop.f32.mrb[103].mxu1 }
 0xa96   :  { %v12062_v30 = vadd.f32 %v2749_v54, %v14533_v33  ;;  %v2788_v9 = vsel %vm257_vm4, %v12059_v25, 0.0 }
 0xa97   :  { %2789 = vadd.xlane.f32.xlu0 %v2788_v9 }
 0xa98   :  { %v2791_v47 = vsel %vm257_vm4, %v12062_v30, 0.0 }
 0xa99   :  { %2792 = vadd.xlane.f32.xlu1 %v2791_v47  ;;  %v2753_v0 = vpop.f32.mrb[104].mxu1 }
 0xa9a   :  { %v2754_v55 = vadd.f32 %v2753_v0, %v2678_v49  ;;  %v8850_v53 = vpop.f32.mrb[105].mxu1 }
 0xa9b   :  { %v2756_v56 = vpop.f32.mrb[106].mxu1 }
 0xa9c   :  { %v12069_v35 = vadd.f32 %v2754_v55, %v14534_v20  ;;  %v2757_v6 = vadd.f32 %v2756_v56, %v2678_v49  ;;  %v8851_v32 = vpop.f32.mrb[107].mxu1 }
 0xa9d   :  { %v9825_v32 = vld [vmem:[%s14485_s3 + $0x8] ss:$16 sps:$4 sm:$0xff]  }
 0xa9e   :  { %v12072_v36 = vadd.f32 %v2757_v6, %v14535_v59  ;;  %v2794_v29 = vsel %vm257_vm4, %v12069_v35, 0.0  ;;  %v9827_v6 = vld [vmem:[%s14485_s3 + $0xc] ss:$16 sps:$4 sm:$0xff]   ;;  %v9828_v59 = vld [vmem:[%s14485_s3 + $0x28] ss:$16 sps:$4 sm:$0xff]  }
 0xa9f   :  { %2795 = vadd.xlane.f32.xlu0 %v2794_v29  ;;  %2999 = vmatprep.subr.bf16.mxu0 %v9827_v6  ;;  %v9830_v29 = vld [vmem:[%s14485_s3 + $0x2c] ss:$16 sps:$4 sm:$0xff]  }
 0xaa0   :  { %v2797_v28 = vsel %vm257_vm4, %v12072_v36, 0.0  ;;  %3000 = vmatpush1.bf16.msra.mxu0 %v9825_v32 }
 0xaa1   :  { %2798 = vadd.xlane.f32.xlu1 %v2797_v28  ;;  %3001 = vmatprep.subr.bf16.mxu0 %v9830_v29  ;;  %v9833_v28 = vld [vmem:[%s14485_s3 + $0x4c] ss:$16 sps:$4 sm:$0xff]  }
 0xaa4   :  { %3002 = vmatpush1.bf16.msra.mxu0 %v9828_v59 }
 0xaa5   :  { %3003 = vmatprep.subr.bf16.mxu0 %v9833_v28 }
 0xab9   :  { %v2761_v15 = vpop.f32.mrb[108].mxu1 }
 0xaba   :  { %v2762_v19 = vadd.f32 %v2761_v15, %v2678_v49  ;;  %v8854_v23 = vpop.f32.mrb[109].mxu1  ;;  %v9831_v15 = vld [vmem:[%s14485_s3 + $0x48] ss:$16 sps:$4 sm:$0xff]  }
 0xabb   :  { %v2764_v3 = vpop.f32.mrb[110].mxu1  ;;  %3004 = vmatpush1.bf16.msra.mxu0 %v9831_v15  ;;  %v9836_v23 = vld [vmem:[%s14485_s3 + $0x6c] ss:$16 sps:$4 sm:$0xff]  }
 0xabc   :  { %v12079_v63 = vadd.f32 %v2762_v19, %v14536_v42  ;;  %v8855_v10 = vpop.f32.mrb[111].mxu1  ;;  %v12152_v19 = vld [vmem:[%s14487_s5 + $0x3] ss:$0 sm:$0xff]  ;;  %v9834_v3 = vld [vmem:[%s14485_s3 + $0x68] ss:$16 sps:$4 sm:$0xff]   ;;  %3005 = vmatprep.subr.bf16.mxu0 %v9836_v23 }
 0xabe   :  { %v2800_v45 = vsel %vm257_vm4, %v12079_v63, 0.0 }
 0xabf   :  { %2801 = vadd.xlane.f32.xlu0 %v2800_v45  ;;  %3006 = vmatpush1.bf16.msra.mxu0 %v9834_v3 }
 0xb14   :  { %v2778_v37 = vpop.xlane.xlu1 %2777 }
 0xb15   :  { %v2803_v14 = vmul.f32 0.015625, %v2778_v37 }
 0xb16   :  { %v2781_v16 = vpop.xlane.xlu0 %2780 }
 0xb17   :  { %v12084_v61 = vsub.f32 %v12039_v44, %v2803_v14  ;;  %v2804_v22 = vmul.f32 0.015625, %v2781_v16  ;;  %v9837_v16 = vld [vmem:[%s14486_s4 + $0x40] sm:$0xff]  }
 0xb18   :  { %8223 = vmatprep.subr.bf16.mxu1 %v9837_v16 }
 0xb19   :  { %v12087_v12 = vsub.f32 %v12042_v7, %v2804_v22  ;;  %v2821_v8 = vmul.f32 %v12084_v61, %v12084_v61 }
 0xb1b   :  { %v2830_v51 = vsel %vm257_vm4, %v2821_v8, 0.0  ;;  %v2822_v57 = vmul.f32 %v12087_v12, %v12087_v12 }
 0xb1c   :  { %v2784_v49 = vpop.xlane.xlu0 %2783  ;;  %2831 = vadd.xlane.f32.xlu1 %v2830_v51 }
 0xb1d   :  { %v2805_v39 = vmul.f32 0.015625, %v2784_v49  ;;  %v2833_v26 = vsel %vm257_vm4, %v2822_v57, 0.0 }
 0xb1e   :  { %v2787_v52 = vpop.xlane.xlu1 %2786  ;;  %2834 = vadd.xlane.f32.xlu0 %v2833_v26 }
 0xb1f   :  { %v12096_v46 = vsub.f32 %v12049_v17, %v2805_v39  ;;  %v2806_v50 = vmul.f32 0.015625, %v2787_v52 }
 0xb21   :  { %v12099_v60 = vsub.f32 %v12052_v18, %v2806_v50  ;;  %v2823_v1 = vmul.f32 %v12096_v46, %v12096_v46 }
 0xb23   :  { %v2836_v5 = vsel %vm257_vm4, %v2823_v1, 0.0  ;;  %v2824_v43 = vmul.f32 %v12099_v60, %v12099_v60 }
 0xb24   :  { %v2790_v38 = vpop.xlane.xlu0 %2789  ;;  %2837 = vadd.xlane.f32.xlu1 %v2836_v5 }
 0xb25   :  { %v2807_v11 = vmul.f32 0.015625, %v2790_v38  ;;  %v2839_v48 = vsel %vm257_vm4, %v2824_v43, 0.0 }
 0xb26   :  { %v2793_v31 = vpop.xlane.xlu1 %2792  ;;  %2840 = vadd.xlane.f32.xlu0 %v2839_v48 }
 0xb27   :  { %v12108_v4 = vsub.f32 %v12059_v25, %v2807_v11  ;;  %v2808_v40 = vmul.f32 0.015625, %v2793_v31 }
 0xb29   :  { %v12111_v21 = vsub.f32 %v12062_v30, %v2808_v40  ;;  %v2825_v27 = vmul.f32 %v12108_v4, %v12108_v4 }
 0xb2b   :  { %v2842_v13 = vsel %vm257_vm4, %v2825_v27, 0.0  ;;  %v2826_v58 = vmul.f32 %v12111_v21, %v12111_v21 }
 0xb2c   :  { %v2796_v41 = vpop.xlane.xlu0 %2795  ;;  %2843 = vadd.xlane.f32.xlu1 %v2842_v13 }
 0xb2d   :  { %v2809_v54 = vmul.f32 0.015625, %v2796_v41  ;;  %v2845_v2 = vsel %vm257_vm4, %v2826_v58, 0.0 }
 0xb2e   :  { %v2799_v33 = vpop.xlane.xlu1 %2798  ;;  %2846 = vadd.xlane.f32.xlu0 %v2845_v2 }
 0xb2f   :  { %v12120_v9 = vsub.f32 %v12069_v35, %v2809_v54  ;;  %v2810_v47 = vmul.f32 0.015625, %v2799_v33 }
 0xb31   :  { %v12123_v0 = vsub.f32 %v12072_v36, %v2810_v47  ;;  %v2827_v55 = vmul.f32 %v12120_v9, %v12120_v9 }
 0xb33   :  { %v2848_v53 = vsel %vm257_vm4, %v2827_v55, 0.0  ;;  %v2828_v56 = vmul.f32 %v12123_v0, %v12123_v0 }
 0xb34   :  { %2849 = vadd.xlane.f32.xlu1 %v2848_v53 }
 0xb35   :  { %v2851_v20 = vsel %vm257_vm4, %v2828_v56, 0.0 }
 0xb36   :  { %2852 = vadd.xlane.f32.xlu0 %v2851_v20 }
 0xb45   :  { %2908 = vrot.lane.b32.xlu1 %v12152_v19, %s10525_s27 }
 0xb4c   :  { %v2802_v42 = vpop.xlane.xlu0 %2801 }
 0xb4d   :  { %v2811_v10 = vmul.f32 0.015625, %v2802_v42 }
 0xb4f   :  { %v12163_v45 = vsub.f32 %v12079_v63, %v2811_v10 }
 0xb51   :  { %v2829_v37 = vmul.f32 %v12163_v45, %v12163_v45 }
 0xb53   :  { %v2854_v14 = vsel %vm257_vm4, %v2829_v37, 0.0 }
 0xb54   :  { %2855 = vadd.xlane.f32.xlu0 %v2854_v14 }
 0xba9   :  { %v2832_v22 = vpop.xlane.xlu1 %2831 }
 0xbaa   :  { %v2857_v8 = vmul.f32 0.015625, %v2832_v22 }
 0xbab   :  { %v2835_v51 = vpop.xlane.xlu0 %2834 }
 0xbac   :  { %v2858_v57 = vmul.f32 0.015625, %v2835_v51  ;;  %v2866_v49 = vadd.f32 1e-05, %v2857_v8 }
 0xbae   :  { %v2867_v39 = vadd.f32 1e-05, %v2858_v57  ;;  %10171 = vrsqrt.f32 %v2866_v49 }
 0xbb0   :  { %10173 = vrsqrt.f32 %v2867_v39 }
 0xbb1   :  { %v2838_v26 = vpop.xlane.xlu1 %2837 }
 0xbb2   :  { %v2859_v52 = vmul.f32 0.015625, %v2838_v26 }
 0xbb3   :  { %v2841_v50 = vpop.xlane.xlu0 %2840 }
 0xbb4   :  { %v2868_v1 = vadd.f32 1e-05, %v2859_v52  ;;  %v2860_v5 = vmul.f32 0.015625, %v2841_v50 }
 0xbb6   :  { %v2869_v43 = vadd.f32 1e-05, %v2860_v5  ;;  %10175 = vrsqrt.f32 %v2868_v1 }
 0xbb8   :  { %10177 = vrsqrt.f32 %v2869_v43  ;;  %v10172_v31 = vpop.eup %10171 }
 0xbb9   :  { %v2844_v38 = vpop.xlane.xlu1 %2843  ;;  %v2884_v41 = vmul.f32 %v10172_v31, %v12084_v61 }
 0xbba   :  { %v2861_v11 = vmul.f32 0.015625, %v2844_v38  ;;  %v10174_v27 = vpop.eup %10173 }
 0xbbb   :  { %v2847_v48 = vpop.xlane.xlu0 %2846  ;;  %v2885_v54 = vmul.f32 %v10174_v27, %v12087_v12  ;;  %v2899_v53 = vmul.f32 %v12152_v19, %v2884_v41  ;;  %v9839_v41 = vld [vmem:[%s14486_s4 + $0x48] sm:$0xff]  }
 0xbbc   :  { %v2862_v40 = vmul.f32 0.015625, %v2847_v48  ;;  %v2870_v13 = vadd.f32 1e-05, %v2861_v11 }
 0xbbd   :  { %v2900_v20 = vmul.f32 %v12152_v19, %v2885_v54  ;;  %v9842_v54 = vld [vmem:[%s14486_s4 + $0x10] sm:$0xff]  }
 0xbbe   :  { %v2871_v58 = vadd.f32 1e-05, %v2862_v40 }
 0xbc0   :  { %10179 = vrsqrt.f32 %v2871_v58  ;;  %v10176_v2 = vpop.eup %10175  ;;  %v9838_v58 = vld [vmem:[%s14486_s4] sm:$0xff]  }
 0xbc1   :  { %10181 = vrsqrt.f32 %v2870_v13  ;;  %v2850_v33 = vpop.xlane.xlu1 %2849  ;;  %v2886_v32 = vmul.f32 %v10176_v2, %v12096_v46  ;;  %8224 = vmatpush3.bf16.msra.mxu1 %v9838_v58  ;;  %v9843_v2 = vld [vmem:[%s14486_s4 + $0x58] sm:$0xff]  }
 0xbc2   :  { %v10178_v47 = vpop.eup %10177  ;;  %v2863_v55 = vmul.f32 0.015625, %v2850_v33  ;;  %8225 = vmatprep.subr.bf16.mxu1 %v9839_v41  ;;  %v9844_v33 = vld [vmem:[%s14486_s4 + $0x18] sm:$0xff]  }
 0xbc3   :  { %v2853_v56 = vpop.xlane.xlu0 %2852  ;;  %v2887_v59 = vmul.f32 %v10178_v47, %v12099_v60  ;;  %v2901_v3 = vmul.f32 %v12152_v19, %v2886_v32  ;;  %v9845_v47 = vld [vmem:[%s14486_s4 + $0x60] sm:$0xff]   ;;  %v9851_v32 = vld [vmem:[%s14486_s4 + $0x78] sm:$0xff]  }
 0xbc4   :  { %v2864_v6 = vmul.f32 0.015625, %v2853_v56  ;;  %v2872_v29 = vadd.f32 1e-05, %v2863_v55  ;;  %v9846_v55 = vld [vmem:[%s14486_s4 + $0x20] sm:$0xff]   ;;  %v9848_v56 = vld [vmem:[%s14486_s4 + $0x28] sm:$0xff]  }
 0xbc5   :  { %v2909_v61 = vpop.permute.xlu1 %2908  ;;  %v2902_v42 = vmul.f32 %v12152_v19, %v2887_v59  ;;  %v9852_v59 = vld [vmem:[%s14486_s4 + $0x38] sm:$0xff]  }
 0xbc6   :  { %v2873_v28 = vadd.f32 1e-05, %v2864_v6  ;;  %v2911_v12 = vadd.f32 %v2909_v61, %v2899_v53  ;;  %v2912_v15 = vadd.f32 %v2909_v61, %v2900_v20  ;;  %v2913_v46 = vadd.f32 %v2909_v61, %v2901_v3  ;;  %v9847_v53 = vld [vmem:[%s14486_s4 + $0x68] sm:$0xff]   ;;  %v9849_v20 = vld [vmem:[%s14486_s4 + $0x70] sm:$0xff]  }
 0xbc7   :  { %v2914_v60 = vadd.f32 %v2909_v61, %v2902_v42  ;;  %v9850_v6 = vld [vmem:[%s14486_s4 + $0x30] sm:$0xff]  }
 0xbc8   :  { %10183 = vrsqrt.f32 %v2873_v28  ;;  %v2920_v23 = vpack.c.bf16 %v2912_v15, %v2911_v12  ;;  %v14538_v12 = vld [vmem:[#allocation16_spill] sm:$0xff] }
 0xbc9   :  { %10185 = vrsqrt.f32 %v2872_v29  ;;  %v2921_v22 = vpack.c.bf16 %v2914_v60, %v2913_v46  ;;  %v255_v29 = vld [vmem:[%s14487_s5 + $0x4] sm:$0x3] }
 0xbca   :  { %v10180_v10 = vpop.eup %10179  ;;  %7747 = vmatmul.mubr.msk.bf16.vlgmr.msra.gmra.mrb[72].mxu0 %vm257_vm4, %v2920_v23  ;;  %v12252_v15 = vrot.slane %v255_v29, %v14538_v12 }
 0xbcb   :  { %v10182_v37 = vpop.eup %10181  ;;  %3041 = vmatprep.mubr.bf16.mxu0 %v14532_v62  ;;  %v2889_v14 = vmul.f32 %v10180_v10, %v12111_v21 }
 0xbcc   :  { %v2888_v16 = vmul.f32 %v10182_v37, %v12108_v4 }
 0xbcd   :  { %v2904_v8 = vmul.f32 %v12152_v19, %v2889_v14 }
 0xbce   :  { %v2903_v57 = vmul.f32 %v12152_v19, %v2888_v16 }
 0xbcf   :  { %v2916_v39 = vadd.f32 %v2909_v61, %v2904_v8 }
 0xbd0   :  { %v2915_v52 = vadd.f32 %v2909_v61, %v2903_v57 }
 0xbd2   :  { %v10184_v51 = vpop.eup %10183  ;;  %7748 = vmatmul.mubr.msk.bf16.gmra.mrb[76].mxu0 %vm257_vm4, %v2921_v22  ;;  %v2922_v21 = vpack.c.bf16 %v2916_v39, %v2915_v52 }
 0xbd3   :  { %v10186_v49 = vpop.eup %10185  ;;  %3051 = vmatprep.mubr.bf16.mxu0 %v14532_v62  ;;  %v2891_v26 = vmul.f32 %v10184_v51, %v12123_v0 }
 0xbd4   :  { %v2890_v50 = vmul.f32 %v10186_v49, %v12120_v9 }
 0xbd5   :  { %v2906_v4 = vmul.f32 %v12152_v19, %v2891_v26 }
 0xbd6   :  { %v2905_v1 = vmul.f32 %v12152_v19, %v2890_v50 }
 0xbd7   :  { %v2918_v5 = vadd.f32 %v2909_v61, %v2906_v4 }
 0xbd8   :  { %v2917_v43 = vadd.f32 %v2909_v61, %v2905_v1 }
 0xbda   :  { %7749 = vmatmul.mubr.msk.bf16.gmra.mrb[80].mxu0 %vm257_vm4, %v2922_v21  ;;  %v2923_v38 = vpack.c.bf16 %v2918_v5, %v2917_v43 }
 0xbdb   :  { %3061 = vmatprep.mubr.bf16.mxu0 %v14532_v62 }
 0xbe1   :  { %v2856_v11 = vpop.xlane.xlu0 %2855 }
 0xbe2   :  { %7750 = vmatmul.mubr.msk.bf16.gmra.mrb[84].mxu0 %vm257_vm4, %v2923_v38  ;;  %v2865_v48 = vmul.f32 0.015625, %v2856_v11 }
 0xbe3   :  { %3071 = vmatprep.mubr.bf16.mxu0 %v14532_v62 }
 0xbe4   :  { %v2874_v0 = vadd.f32 1e-05, %v2865_v48 }
 0xbe6   :  { %10187 = vrsqrt.f32 %v2874_v0 }
 0xbf0   :  { %v10188_v9 = vpop.eup %10187 }
 0xbf1   :  { %v2892_v31 = vmul.f32 %v10188_v9, %v12163_v45  ;;  %v9840_v45 = vld [vmem:[%s14486_s4 + $0x8] sm:$0xff]  }
 0xbf2   :  { %8226 = vmatpush3.bf16.msra.mxu1 %v9840_v45 }
 0xbf3   :  { %v2907_v40 = vmul.f32 %v12152_v19, %v2892_v31  ;;  %v9841_v19 = vld [vmem:[%s14486_s4 + $0x50] sm:$0xff]  }
 0xbf4   :  { %8227 = vmatprep.subr.bf16.mxu1 %v9841_v19 }
 0xbf5   :  { %v2919_v27 = vadd.f32 %v2909_v61, %v2907_v40  ;;  %v14537_v61 = vld [vmem:[#allocation17_spill] sm:$0xff] }
 0xbf6   :  { %8228 = vmatpush3.bf16.msra.mxu1 %v9842_v54  ;;  %v12249_v28 = vrot.slane %v255_v29, %v14537_v61 }
 0xbf7   :  { %v2924_v13 = vpack.c.bf16 %v2919_v27, %v2919_v27  ;;  %8229 = vmatprep.subr.bf16.mxu1 %v9843_v2 }
 0xbf9   :  { %7751 = vmatmul.mubr.msk.bf16.gmra.mrb[88].mxu0 %vm257_vm4, %v2924_v13 }
 0xbfa   :  { %3739 = vmatprep.mubr.bf16.mxu0 %v14532_v62  ;;  %8230 = vmatpush3.bf16.msra.mxu1 %v9844_v33 }
 0xbfb   :  { %8231 = vmatprep.subr.bf16.mxu1 %v9845_v47 }
 0xbfe   :  { %8232 = vmatpush3.bf16.msra.mxu1 %v9846_v55 }
 0xbff   :  { %8233 = vmatprep.subr.bf16.mxu1 %v9847_v53 }
 0xc02   :  { %8234 = vmatpush3.bf16.msra.mxu1 %v9848_v56 }
 0xc03   :  { %8235 = vmatprep.subr.bf16.mxu1 %v9849_v20 }
 0xc06   :  { %8236 = vmatpush3.bf16.msra.mxu1 %v9850_v6 }
 0xc07   :  { %8237 = vmatprep.subr.bf16.mxu1 %v9851_v32 }
 0xc0a   :  { %8238 = vmatpush3.bf16.msra.mxu1 %v9852_v59 }
 0xc0b   :  { %9356 = vmatprep.subr.bf16.mxu1 %v14531_v24 }
 0xc9d   :  { %v3033_v23 = vpop.f32.mrb[72].mxu0 }
 0xc9e   :  { %v3034_v3 = vadd.f32 %v3033_v23, %v12249_v28  ;;  %v3035_v42 = vpop.f32.mrb[73].mxu0 }
 0xc9f   :  { %v3036_v10 = vadd.f32 %v3035_v42, %v12252_v15  ;;  %v3037_v37 = vpop.f32.mrb[74].mxu0 }
 0xca0   :  { %v3098_v46 = vmul.f32 0.044715, %v3034_v3  ;;  %v12257_v60 = vadd.f32 %v3037_v37, %v12249_v28  ;;  %v3039_v14 = vpop.f32.mrb[75].mxu0  ;;  %v3080_v29 = vmul.f32 0.5, %v3034_v3 }
 0xca1   :  { %v3099_v16 = vmul.f32 0.044715, %v3036_v10  ;;  %v12260_v22 = vadd.f32 %v3039_v14, %v12252_v15 }
 0xca2   :  { %v3116_v8 = vmul.f32 %v3098_v46, %v3034_v3  ;;  %v3100_v51 = vmul.f32 0.044715, %v12257_v60 }
 0xca3   :  { %v3117_v57 = vmul.f32 %v3099_v16, %v3036_v10  ;;  %v3101_v49 = vmul.f32 0.044715, %v12260_v22 }
 0xca4   :  { %v3134_v39 = vmul.f32 %v3116_v8, %v3034_v3  ;;  %v3118_v26 = vmul.f32 %v3100_v51, %v12257_v60 }
 0xca5   :  { %v3135_v52 = vmul.f32 %v3117_v57, %v3036_v10  ;;  %v3119_v50 = vmul.f32 %v3101_v49, %v12260_v22  ;;  %v3043_v21 = vpop.f32.mrb[76].mxu0 }
 0xca6   :  { %v3152_v4 = vadd.f32 %v3134_v39, %v3034_v3  ;;  %v3136_v1 = vmul.f32 %v3118_v26, %v12257_v60  ;;  %v12268_v5 = vadd.f32 %v3043_v21, %v12249_v28  ;;  %v3045_v43 = vpop.f32.mrb[77].mxu0  ;;  %v3081_v39 = vmul.f32 0.5, %v3036_v10 }
 0xca7   :  { %v3137_v38 = vmul.f32 %v3119_v50, %v12260_v22  ;;  %v3046_v11 = vadd.f32 %v3045_v43, %v12252_v15  ;;  %v3047_v48 = vpop.f32.mrb[78].mxu0  ;;  %v3153_v0 = vadd.f32 %v3135_v52, %v3036_v10 }
 0xca8   :  { %v3170_v9 = vmul.f32 0.7978846, %v3152_v4  ;;  %v3154_v31 = vadd.f32 %v3136_v1, %v12257_v60  ;;  %v3102_v40 = vmul.f32 0.044715, %v12268_v5  ;;  %v12275_v27 = vadd.f32 %v3047_v48, %v12249_v28  ;;  %v3049_v13 = vpop.f32.mrb[79].mxu0 }
 0xca9   :  { %v3103_v58 = vmul.f32 0.044715, %v3046_v11  ;;  %v12278_v41 = vadd.f32 %v3049_v13, %v12252_v15  ;;  %v3155_v45 = vadd.f32 %v3137_v38, %v12260_v22  ;;  %v3171_v19 = vmul.f32 0.7978846, %v3153_v0 }
 0xcaa   :  { %10189 = vtanh.f32 %v3170_v9  ;;  %v3172_v54 = vmul.f32 0.7978846, %v3154_v31  ;;  %v3120_v2 = vmul.f32 %v3102_v40, %v12268_v5  ;;  %v3104_v33 = vmul.f32 0.044715, %v12275_v27 }
 0xcab   :  { %v3121_v47 = vmul.f32 %v3103_v58, %v3046_v11  ;;  %v3105_v55 = vmul.f32 0.044715, %v12278_v41  ;;  %v3173_v53 = vmul.f32 0.7978846, %v3155_v45  ;;  %10191 = vtanh.f32 %v3171_v19 }
 0xcac   :  { %10193 = vtanh.f32 %v3172_v54  ;;  %v3138_v56 = vmul.f32 %v3120_v2, %v12268_v5  ;;  %v3122_v20 = vmul.f32 %v3104_v33, %v12275_v27  ;;  %v3082_v40 = vmul.f32 0.5, %v12257_v60 }
 0xcad   :  { %v3139_v6 = vmul.f32 %v3121_v47, %v3046_v11  ;;  %v3123_v32 = vmul.f32 %v3105_v55, %v12278_v41  ;;  %v3053_v59 = vpop.f32.mrb[80].mxu0  ;;  %10195 = vtanh.f32 %v3173_v53  ;;  %v3083_v58 = vmul.f32 0.5, %v12260_v22 }
 0xcae   :  { %v3140_v23 = vmul.f32 %v3122_v20, %v12275_v27  ;;  %v12289_v42 = vadd.f32 %v3053_v59, %v12249_v28  ;;  %v3055_v37 = vpop.f32.mrb[81].mxu0  ;;  %v3156_v51 = vadd.f32 %v3138_v56, %v12268_v5  ;;  %v3085_v33 = vmul.f32 0.5, %v3046_v11 }
 0xcaf   :  { %v3141_v46 = vmul.f32 %v3123_v32, %v12278_v41  ;;  %v12293_v14 = vadd.f32 %v3055_v37, %v12252_v15  ;;  %v3057_v16 = vpop.f32.mrb[82].mxu0  ;;  %v3157_v8 = vadd.f32 %v3139_v6, %v3046_v11 }
 0xcb0   :  { %v3106_v57 = vmul.f32 0.044715, %v12289_v42  ;;  %v12298_v49 = vadd.f32 %v3057_v16, %v12249_v28  ;;  %v3059_v3 = vpop.f32.mrb[83].mxu0  ;;  %v3158_v26 = vadd.f32 %v3140_v23, %v12275_v27  ;;  %v3174_v38 = vmul.f32 0.7978846, %v3156_v51 }
 0xcb1   :  { %v3107_v52 = vmul.f32 0.044715, %v12293_v14  ;;  %v12303_v50 = vadd.f32 %v3059_v3, %v12252_v15  ;;  %v3159_v21 = vadd.f32 %v3141_v46, %v12278_v41  ;;  %v3175_v4 = vmul.f32 0.7978846, %v3157_v8 }
 0xcb2   :  { %v3124_v1 = vmul.f32 %v3106_v57, %v12289_v42  ;;  %v3108_v43 = vmul.f32 0.044715, %v12298_v49  ;;  %v3176_v48 = vmul.f32 0.7978846, %v3158_v26 }
 0xcb3   :  { %v3125_v0 = vmul.f32 %v3107_v52, %v12293_v14  ;;  %v3109_v10 = vmul.f32 0.044715, %v12303_v50  ;;  %v3177_v9 = vmul.f32 0.7978846, %v3159_v21  ;;  %10197 = vtanh.f32 %v3175_v4 }
 0xcb4   :  { %v10190_v31 = vpop.eup %10189  ;;  %v3126_v13 = vmul.f32 %v3108_v43, %v12298_v49  ;;  %10199 = vtanh.f32 %v3174_v38  ;;  %v3142_v22 = vmul.f32 %v3124_v1, %v12289_v42 }
 0xcb5   :  { %v10192_v45 = vpop.eup %10191  ;;  %v3127_v19 = vmul.f32 %v3109_v10, %v12303_v50  ;;  %v3063_v54 = vpop.f32.mrb[84].mxu0  ;;  %v3206_v2 = vadd.f32 1.0, %v10190_v31  ;;  %10201 = vtanh.f32 %v3177_v9  ;;  %v3143_v55 = vmul.f32 %v3125_v0, %v12293_v14 }
 0xcb6   :  { %v10194_v47 = vpop.eup %10193  ;;  %v12316_v53 = vadd.f32 %v3063_v54, %v12249_v28  ;;  %v3065_v56 = vpop.f32.mrb[85].mxu0  ;;  %v3207_v60 = vadd.f32 1.0, %v10192_v45  ;;  %10203 = vtanh.f32 %v3176_v48  ;;  %v3144_v23 = vmul.f32 %v3126_v13, %v12298_v49 }
 0xcb7   :  { %v10196_v20 = vpop.eup %10195  ;;  %v3145_v6 = vmul.f32 %v3127_v19, %v12303_v50  ;;  %v12321_v32 = vadd.f32 %v3065_v56, %v12252_v15  ;;  %v3067_v59 = vpop.f32.mrb[86].mxu0  ;;  %v3208_v11 = vadd.f32 1.0, %v10194_v47  ;;  %v3224_v3 = vmul.f32 %v3206_v2, %v3080_v29 }
 0xcb8   :  { %v3110_v37 = vmul.f32 0.044715, %v12316_v53  ;;  %v12326_v46 = vadd.f32 %v3067_v59, %v12249_v28  ;;  %v3069_v16 = vpop.f32.mrb[87].mxu0  ;;  %v3209_v8 = vadd.f32 1.0, %v10196_v20  ;;  %v3225_v21 = vmul.f32 %v3207_v60, %v3081_v39 }
 0xcb9   :  { %v3111_v51 = vmul.f32 0.044715, %v12321_v32  ;;  %v12330_v57 = vadd.f32 %v3069_v16, %v12252_v15  ;;  %v3226_v26 = vmul.f32 %v3208_v11, %v3082_v40  ;;  %v3161_v1 = vadd.f32 %v3143_v55, %v12293_v14 }
 0xcba   :  { %v3112_v52 = vmul.f32 0.044715, %v12326_v46  ;;  %v3227_v4 = vmul.f32 %v3209_v8, %v3083_v58  ;;  %v3163_v0 = vadd.f32 %v3145_v6, %v12303_v50  ;;  %v3128_v10 = vmul.f32 %v3110_v37, %v12316_v53 }
 0xcbb   :  { %v3129_v43 = vmul.f32 %v3111_v51, %v12321_v32  ;;  %v3113_v38 = vmul.f32 0.044715, %v12330_v57  ;;  %v3242_v48 = vpack.c.bf16 %v3226_v26, %v3224_v3  ;;  %v3087_v31 = vmul.f32 0.5, %v12278_v41 }
 0xcbc   :  { %v3243_v9 = vpack.c.bf16 %v3227_v4, %v3225_v21  ;;  %v3179_v29 = vmul.f32 0.7978846, %v3161_v1  ;;  %v3130_v13 = vmul.f32 %v3112_v52, %v12326_v46  ;;  %v3084_v58 = vmul.f32 0.5, %v12268_v5 }
 0xcbd   :  { %v10198_v40 = vpop.eup %10197  ;;  %v3131_v39 = vmul.f32 %v3113_v38, %v12330_v57  ;;  %v3181_v45 = vmul.f32 0.7978846, %v3163_v0  ;;  %v3147_v54 = vmul.f32 %v3129_v43, %v12321_v32  ;;  %v3160_v47 = vadd.f32 %v3142_v22, %v12289_v42 }
 0xcbe   :  { %v10200_v19 = vpop.eup %10199  ;;  %3412 = vmatprep.mubr.bf16.mxu1 %v3243_v9  ;;  %v3211_v2 = vadd.f32 1.0, %v10198_v40  ;;  %10205 = vtanh.f32 %v3179_v29  ;;  %v3162_v60 = vadd.f32 %v3144_v23, %v12298_v49  ;;  %v3146_v5 = vmul.f32 %v3128_v10, %v12316_v53 }
 0xcbf   :  { %v10202_v55 = vpop.eup %10201  ;;  %v3149_v41 = vmul.f32 %v3131_v39, %v12330_v57  ;;  %3413 = vmatmul.mubr.bf16.vlgmr.msra.gmra.mrb[112].mxu1 %v3242_v48  ;;  %v3210_v56 = vadd.f32 1.0, %v10200_v19  ;;  %10207 = vtanh.f32 %v3181_v45  ;;  %v3086_v59 = vmul.f32 0.5, %v12275_v27 }
 0xcc0   :  { %v10204_v20 = vpop.eup %10203  ;;  %v3213_v6 = vadd.f32 1.0, %v10202_v55  ;;  %v3178_v11 = vmul.f32 0.7978846, %v3160_v47  ;;  %v3148_v37 = vmul.f32 %v3130_v13, %v12326_v46  ;;  %v3229_v16 = vmul.f32 %v3211_v2, %v3085_v33 }
 0xcc1   :  { %v3212_v8 = vadd.f32 1.0, %v10204_v20  ;;  %v3180_v22 = vmul.f32 0.7978846, %v3162_v60  ;;  %v3165_v3 = vadd.f32 %v3147_v54, %v12321_v32  ;;  %v3167_v26 = vadd.f32 %v3149_v41, %v12330_v57 }
 0xcc2   :  { %v3231_v51 = vmul.f32 %v3213_v6, %v3087_v31  ;;  %10209 = vtanh.f32 %v3178_v11  ;;  %v3228_v52 = vmul.f32 %v3210_v56, %v3084_v58  ;;  %v3164_v27 = vadd.f32 %v3146_v5, %v12316_v53 }
 0xcc3   :  { %v3230_v23 = vmul.f32 %v3212_v8, %v3086_v59  ;;  %10211 = vtanh.f32 %v3180_v22  ;;  %v3183_v4 = vmul.f32 0.7978846, %v3165_v3  ;;  %v3185_v1 = vmul.f32 0.7978846, %v3167_v26 }
 0xcc4   :  { %v3245_v21 = vpack.c.bf16 %v3231_v51, %v3229_v16  ;;  %v3166_v38 = vadd.f32 %v3148_v37, %v12326_v46  ;;  %v3182_v33 = vmul.f32 0.7978846, %v3164_v27  ;;  %v3089_v31 = vmul.f32 0.5, %v12293_v14 }
 0xcc5   :  { %v3244_v43 = vpack.c.bf16 %v3230_v23, %v3228_v52  ;;  %10213 = vtanh.f32 %v3183_v4  ;;  %v3091_v29 = vmul.f32 0.5, %v12303_v50  ;;  %v3088_v54 = vmul.f32 0.5, %v12289_v42 }
 0xcc6   :  { %3420 = vmatprep.mubr.bf16.mxu1 %v3245_v21  ;;  %10215 = vtanh.f32 %v3185_v1  ;;  %v3184_v48 = vmul.f32 0.7978846, %v3166_v38  ;;  %v3090_v56 = vmul.f32 0.5, %v12298_v49  ;;  %v3093_v42 = vmul.f32 0.5, %v12321_v32 }
 0xcc7   :  { %3421 = vmatmul.mubr.bf16.gmra.mrb[116].mxu1 %v3244_v43  ;;  %10217 = vtanh.f32 %v3182_v33  ;;  %v3095_v49 = vmul.f32 0.5, %v12330_v57  ;;  %v3092_v52 = vmul.f32 0.5, %v12316_v53  ;;  %v3094_v23 = vmul.f32 0.5, %v12326_v46 }
 0xcc8   :  { %v10206_v0 = vpop.eup %10205  ;;  %10219 = vtanh.f32 %v3184_v48 }
 0xcc9   :  { %v10208_v10 = vpop.eup %10207  ;;  %v3215_v9 = vadd.f32 1.0, %v10206_v0 }
 0xcca   :  { %v3217_v40 = vadd.f32 1.0, %v10208_v10 }
 0xccb   :  { %v3233_v39 = vmul.f32 %v3215_v9, %v3089_v31 }
 0xccc   :  { %v10210_v13 = vpop.eup %10209  ;;  %v3235_v58 = vmul.f32 %v3217_v40, %v3091_v29  ;;  %v3073_v19 = vpop.f32.mrb[88].mxu0 }
 0xccd   :  { %v10212_v45 = vpop.eup %10211  ;;  %v3214_v2 = vadd.f32 1.0, %v10210_v13  ;;  %v3074_v47 = vadd.f32 %v3073_v19, %v12249_v28  ;;  %v3075_v55 = vpop.f32.mrb[89].mxu0 }
 0xcce   :  { %v3247_v41 = vpack.c.bf16 %v3235_v58, %v3233_v39  ;;  %v3216_v60 = vadd.f32 1.0, %v10212_v45  ;;  %v3076_v14 = vadd.f32 %v3075_v55, %v12252_v15  ;;  %v3077_v20 = vpop.f32.mrb[90].mxu0 }
 0xccf   :  { %v10214_v50 = vpop.eup %10213  ;;  %v3114_v5 = vmul.f32 0.044715, %v3074_v47  ;;  %v3232_v6 = vmul.f32 %v3214_v2, %v3088_v54  ;;  %v3078_v11 = vpop.f32.mrb[91].mxu0  ;;  %v3096_v29 = vmul.f32 0.5, %v3074_v47 }
 0xcd0   :  { %3428 = vmatprep.mubr.bf16.mxu1 %v3247_v41  ;;  %v3234_v59 = vmul.f32 %v3216_v60, %v3090_v56  ;;  %v10216_v37 = vpop.eup %10215  ;;  %v3115_v16 = vmul.f32 0.044715, %v3076_v14  ;;  %v3219_v8 = vadd.f32 1.0, %v10214_v50  ;;  %v3097_v13 = vmul.f32 0.5, %v3076_v14 }
 0xcd1   :  { %v10218_v28 = vpop.eup %10217  ;;  %v3132_v22 = vmul.f32 %v3114_v5, %v3074_v47  ;;  %v3221_v3 = vadd.f32 1.0, %v10216_v37 }
 0xcd2   :  { %v3246_v51 = vpack.c.bf16 %v3234_v59, %v3232_v6  ;;  %v10220_v26 = vpop.eup %10219  ;;  %v3133_v15 = vmul.f32 %v3115_v16, %v3076_v14  ;;  %v3218_v21 = vadd.f32 1.0, %v10218_v28  ;;  %v3237_v4 = vmul.f32 %v3219_v8, %v3093_v42 }
 0xcd3   :  { %v3239_v1 = vmul.f32 %v3221_v3, %v3095_v49  ;;  %v3220_v27 = vadd.f32 1.0, %v10220_v26  ;;  %v3150_v43 = vmul.f32 %v3132_v22, %v3074_v47 }
 0xcd4   :  { %3429 = vmatmul.mubr.bf16.gmra.mrb[120].mxu1 %v3246_v51  ;;  %v3151_v32 = vmul.f32 %v3133_v15, %v3076_v14  ;;  %v3236_v33 = vmul.f32 %v3218_v21, %v3092_v52 }
 0xcd5   :  { %v3249_v38 = vpack.c.bf16 %v3239_v1, %v3237_v4  ;;  %v3238_v48 = vmul.f32 %v3220_v27, %v3094_v23  ;;  %v3168_v0 = vadd.f32 %v3150_v43, %v3074_v47  ;;  %v7768_v47 = vld [vmem:[%s14487_s5 + $0x6] ss:$0 sm:$0xff] }
 0xcd6   :  { %v3169_v10 = vadd.f32 %v3151_v32, %v3076_v14 }
 0xcd7   :  { %3436 = vmatprep.mubr.bf16.mxu1 %v3249_v38  ;;  %v3248_v57 = vpack.c.bf16 %v3238_v48, %v3236_v33  ;;  %v3186_v9 = vmul.f32 0.7978846, %v3168_v0 }
 0xcd8   :  { %v3187_v31 = vmul.f32 0.7978846, %v3169_v10 }
 0xcd9   :  { %10221 = vtanh.f32 %v3186_v9 }
 0xcda   :  { %10223 = vtanh.f32 %v3187_v31 }
 0xcdc   :  { %3437 = vmatmul.mubr.bf16.gmra.mrb[124].mxu1 %v3248_v57 }
 0xce3   :  { %v10222_v53 = vpop.eup %10221 }
 0xce4   :  { %v10224_v46 = vpop.eup %10223  ;;  %v3222_v40 = vadd.f32 1.0, %v10222_v53 }
 0xce5   :  { %v3223_v39 = vadd.f32 1.0, %v10224_v46 }
 0xce6   :  { %v3240_v58 = vmul.f32 %v3222_v40, %v3096_v29 }
 0xce7   :  { %v3241_v45 = vmul.f32 %v3223_v39, %v3097_v13 }
 0xce8   :  { %v3250_v54 = vpack.c.bf16 %v3240_v58, %v3240_v58 }
 0xce9   :  { %v3251_v19 = vpack.c.bf16 %v3241_v45, %v3241_v45 }
 0xceb   :  { %3444 = vmatprep.mubr.bf16.mxu1 %v3251_v19 }
 0xcec   :  { %3445 = vmatmul.mubr.bf16.gmra.mrb[128].mxu1 %v3250_v54  ;;  %v9853_v54 = vld [vmem:[%s14485_s3 + $0x80] ss:$16 sps:$4 sm:$0xff]  }
 0xced   :  { %8874 = vmatprep.mubr.msk.f32.mxu1 %vm10528_vm5, %v14530_v34 }
 0xd92   :  { %v8239_v2 = vpop.f32.mrb[112].mxu1 }
 0xd93   :  { %v8240_v55 = vpop.f32.mrb[113].mxu1 }
 0xd94   :  { %v8241_v41 = vadd.f32 %v8240_v55, %v8239_v2  ;;  %v8242_v56 = vpop.f32.mrb[114].mxu1  ;;  %v9855_v2 = vld [vmem:[%s14485_s3 + $0x84] ss:$16 sps:$4 sm:$0xff]  }
 0xd95   :  { %v8243_v60 = vpop.f32.mrb[115].mxu1  ;;  %3707 = vmatprep.subr.bf16.mxu0 %v9855_v2  ;;  %v9862_v2 = vld [vmem:[%s14485_s3 + $0xe0] ss:$16 sps:$4 sm:$0xff]  }
 0xd96   :  { %v3452_v14 = vadd.f32 %v8241_v41, %v12039_v44  ;;  %v8244_v20 = vadd.f32 %v8243_v60, %v8242_v56  ;;  %3708 = vmatpush1.bf16.msra.mxu0 %v9853_v54 }
 0xd98   :  { %v12369_v50 = vadd.f32 %v7768_v47, %v3452_v14  ;;  %v3453_v5 = vadd.f32 %v8244_v20, %v12042_v7 }
 0xd9a   :  { %v12372_v6 = vadd.f32 %v7768_v47, %v3453_v5  ;;  %v8245_v59 = vpop.f32.mrb[116].mxu1  ;;  %v3483_v11 = vsel %vm257_vm4, %v12369_v50, 0.0 }
 0xd9b   :  { %v8246_v37 = vpop.f32.mrb[117].mxu1  ;;  %3484 = vadd.xlane.f32.xlu0 %v3483_v11 }
 0xd9c   :  { %v8247_v16 = vadd.f32 %v8246_v37, %v8245_v59  ;;  %v8248_v42 = vpop.f32.mrb[118].mxu1  ;;  %v3486_v44 = vsel %vm257_vm4, %v12372_v6, 0.0 }
 0xd9d   :  { %v8249_v8 = vpop.f32.mrb[119].mxu1 }
 0xd9e   :  { %v3454_v28 = vadd.f32 %v8247_v16, %v12049_v17  ;;  %v8250_v22 = vadd.f32 %v8249_v8, %v8248_v42 }
 0xd9f   :  { %3487 = vadd.xlane.f32.xlu0 %v3486_v44 }
 0xda0   :  { %v12379_v51 = vadd.f32 %v7768_v47, %v3454_v28  ;;  %v3455_v7 = vadd.f32 %v8250_v22, %v12052_v18 }
 0xda2   :  { %v12382_v49 = vadd.f32 %v7768_v47, %v3455_v7  ;;  %v3489_v3 = vsel %vm257_vm4, %v12379_v51, 0.0 }
 0xda3   :  { %3490 = vadd.xlane.f32.xlu0 %v3489_v3 }
 0xda4   :  { %v3492_v26 = vsel %vm257_vm4, %v12382_v49, 0.0 }
 0xda7   :  { %v8251_v15 = vpop.f32.mrb[120].mxu1  ;;  %3493 = vadd.xlane.f32.xlu0 %v3492_v26 }
 0xda8   :  { %v8252_v17 = vpop.f32.mrb[121].mxu1 }
 0xda9   :  { %v8253_v52 = vadd.f32 %v8252_v17, %v8251_v15  ;;  %v8254_v23 = vpop.f32.mrb[122].mxu1 }
 0xdaa   :  { %v8255_v21 = vpop.f32.mrb[123].mxu1 }
 0xdab   :  { %v3456_v4 = vadd.f32 %v8253_v52, %v12059_v25  ;;  %v8256_v1 = vadd.f32 %v8255_v21, %v8254_v23 }
 0xdad   :  { %v12389_v27 = vadd.f32 %v7768_v47, %v3456_v4  ;;  %v3457_v18 = vadd.f32 %v8256_v1, %v12062_v30 }
 0xdaf   :  { %14539 = vst [vmem:[#allocation11_spill] sm:$0xff] %v12389_v27  ;;  %v12392_v43 = vadd.f32 %v7768_v47, %v3457_v18  ;;  %v8257_v32 = vpop.f32.mrb[124].mxu1  ;;  %v3495_v38 = vsel %vm257_vm4, %v12389_v27, 0.0 }
 0xdb0   :  { %v8258_v33 = vpop.f32.mrb[125].mxu1  ;;  %3496 = vadd.xlane.f32.xlu1 %v3495_v38 }
 0xdb1   :  { %14540 = vst [vmem:[#allocation12_spill] sm:$0xff] %v12392_v43  ;;  %v8259_v48 = vadd.f32 %v8258_v33, %v8257_v32  ;;  %v8260_v0 = vpop.f32.mrb[126].mxu1  ;;  %v3498_v10 = vsel %vm257_vm4, %v12392_v43, 0.0 }
 0xdb2   :  { %v8261_v57 = vpop.f32.mrb[127].mxu1  ;;  %3499 = vadd.xlane.f32.xlu0 %v3498_v10 }
 0xdb3   :  { %v3458_v25 = vadd.f32 %v8259_v48, %v12069_v35  ;;  %v8262_v9 = vadd.f32 %v8261_v57, %v8260_v0 }
 0xdb5   :  { %v12399_v31 = vadd.f32 %v7768_v47, %v3458_v25  ;;  %v3459_v30 = vadd.f32 %v8262_v9, %v12072_v36 }
 0xdb7   :  { %14541 = vst [vmem:[#allocation13_spill] sm:$0xff] %v12399_v31  ;;  %v12402_v53 = vadd.f32 %v7768_v47, %v3459_v30  ;;  %v3501_v46 = vsel %vm257_vm4, %v12399_v31, 0.0 }
 0xdb8   :  { %3502 = vadd.xlane.f32.xlu0 %v3501_v46 }
 0xdb9   :  { %14542 = vst [vmem:[#allocation14_spill] sm:$0xff] %v12402_v53  ;;  %v3504_v29 = vsel %vm257_vm4, %v12402_v53, 0.0 }
 0xdbc   :  { %3505 = vadd.xlane.f32.xlu0 %v3504_v29  ;;  %v9856_v29 = vld [vmem:[%s14485_s3 + $0xa0] ss:$16 sps:$4 sm:$0xff]  }
 0xdbf   :  { %v8263_v40 = vpop.f32.mrb[128].mxu1 }
 0xdc0   :  { %v8264_v13 = vpop.f32.mrb[129].mxu1 }
 0xdc1   :  { %v8265_v39 = vadd.f32 %v8264_v13, %v8263_v40  ;;  %v8266_v58 = vpop.f32.mrb[130].mxu1  ;;  %v9858_v40 = vld [vmem:[%s14485_s3 + $0xa4] ss:$16 sps:$4 sm:$0xff]  }
 0xdc2   :  { %v8267_v35 = vpop.f32.mrb[131].mxu1  ;;  %3709 = vmatprep.subr.bf16.mxu0 %v9858_v40  ;;  %v9859_v58 = vld [vmem:[%s14485_s3 + $0xc0] ss:$16 sps:$4 sm:$0xff]  }
 0xdc3   :  { %v3460_v45 = vadd.f32 %v8265_v39, %v12079_v63  ;;  %3710 = vmatpush1.bf16.msra.mxu0 %v9856_v29  ;;  %v9861_v35 = vld [vmem:[%s14485_s3 + $0xc4] ss:$16 sps:$4 sm:$0xff]  }
 0xdc4   :  { %3711 = vmatprep.subr.bf16.mxu0 %v9861_v35 }
 0xdc5   :  { %v12409_v19 = vadd.f32 %v7768_v47, %v3460_v45 }
 0xdc7   :  { %14543 = vst [vmem:[#allocation19_spill] sm:$0xff] %v12409_v19  ;;  %v3507_v36 = vsel %vm257_vm4, %v12409_v19, 0.0  ;;  %3712 = vmatpush1.bf16.msra.mxu0 %v9859_v58 }
 0xdc8   :  { %3508 = vadd.xlane.f32.xlu0 %v3507_v36 }
 0xe28   :  { %v3485_v55 = vpop.xlane.xlu0 %3484 }
 0xe29   :  { %v3510_v41 = vmul.f32 0.015625, %v3485_v55  ;;  %v9864_v55 = vld [vmem:[%s14485_s3 + $0xe4] ss:$16 sps:$4 sm:$0xff]  }
 0xe2a   :  { %3713 = vmatprep.subr.bf16.mxu0 %v9864_v55 }
 0xe2b   :  { %v12420_v63 = vsub.f32 %v12369_v50, %v3510_v41  ;;  %v12494_v41 = vld [vmem:[%s14487_s5 + $0x7] ss:$0 sm:$0xff]  ;;  %3714 = vmatpush1.bf16.msra.mxu0 %v9862_v2 }
 0xe2c   :  { %v3488_v56 = vpop.xlane.xlu0 %3487  ;;  %9372 = vmatprep.subr.bf16.mxu0 %v14531_v24 }
 0xe2d   :  { %v3511_v47 = vmul.f32 0.015625, %v3488_v56  ;;  %v3528_v60 = vmul.f32 %v12420_v63, %v12420_v63 }
 0xe2f   :  { %v12425_v14 = vsub.f32 %v12372_v6, %v3511_v47  ;;  %v3537_v20 = vsel %vm257_vm4, %v3528_v60, 0.0 }
 0xe30   :  { %3538 = vadd.xlane.f32.xlu0 %v3537_v20  ;;  %v3491_v5 = vpop.xlane.xlu0 %3490 }
 0xe31   :  { %v3512_v59 = vmul.f32 0.015625, %v3491_v5  ;;  %v3529_v11 = vmul.f32 %v12425_v14, %v12425_v14 }
 0xe33   :  { %v12431_v37 = vsub.f32 %v12379_v51, %v3512_v59  ;;  %v3540_v16 = vsel %vm257_vm4, %v3529_v11, 0.0 }
 0xe34   :  { %3541 = vadd.xlane.f32.xlu0 %v3540_v16  ;;  %v3494_v42 = vpop.xlane.xlu0 %3493 }
 0xe35   :  { %v3513_v8 = vmul.f32 0.015625, %v3494_v42  ;;  %v3530_v28 = vmul.f32 %v12431_v37, %v12431_v37 }
 0xe37   :  { %v12437_v22 = vsub.f32 %v12382_v49, %v3513_v8  ;;  %v3543_v44 = vsel %vm257_vm4, %v3530_v28, 0.0 }
 0xe38   :  { %3544 = vadd.xlane.f32.xlu0 %v3543_v44 }
 0xe39   :  { %v3531_v7 = vmul.f32 %v12437_v22, %v12437_v22 }
 0xe3b   :  { %v3546_v3 = vsel %vm257_vm4, %v3531_v7, 0.0 }
 0xe3c   :  { %3547 = vadd.xlane.f32.xlu0 %v3546_v3 }
 0xe3d   :  { %v3497_v26 = vpop.xlane.xlu1 %3496 }
 0xe3e   :  { %v3514_v15 = vmul.f32 0.015625, %v3497_v26 }
 0xe3f   :  { %v3500_v17 = vpop.xlane.xlu0 %3499 }
 0xe40   :  { %v12444_v52 = vsub.f32 %v12389_v27, %v3514_v15  ;;  %v3515_v23 = vmul.f32 0.015625, %v3500_v17 }
 0xe42   :  { %v12447_v21 = vsub.f32 %v12392_v43, %v3515_v23  ;;  %v3532_v4 = vmul.f32 %v12444_v52, %v12444_v52 }
 0xe44   :  { %v3549_v1 = vsel %vm257_vm4, %v3532_v4, 0.0  ;;  %v3533_v18 = vmul.f32 %v12447_v21, %v12447_v21 }
 0xe45   :  { %3550 = vadd.xlane.f32.xlu0 %v3549_v1  ;;  %v3503_v32 = vpop.xlane.xlu0 %3502 }
 0xe46   :  { %v3516_v38 = vmul.f32 0.015625, %v3503_v32  ;;  %v3552_v33 = vsel %vm257_vm4, %v3533_v18, 0.0 }
 0xe47   :  { %3553 = vadd.xlane.f32.xlu1 %v3552_v33 }
 0xe48   :  { %v12456_v48 = vsub.f32 %v12399_v31, %v3516_v38 }
 0xe49   :  { %v3506_v0 = vpop.xlane.xlu0 %3505 }
 0xe4a   :  { %v3517_v10 = vmul.f32 0.015625, %v3506_v0  ;;  %v3534_v57 = vmul.f32 %v12456_v48, %v12456_v48 }
 0xe4c   :  { %v12461_v25 = vsub.f32 %v12402_v53, %v3517_v10  ;;  %v3555_v9 = vsel %vm257_vm4, %v3534_v57, 0.0 }
 0xe4d   :  { %3556 = vadd.xlane.f32.xlu0 %v3555_v9 }
 0xe4e   :  { %v3535_v30 = vmul.f32 %v12461_v25, %v12461_v25 }
 0xe50   :  { %v3558_v46 = vsel %vm257_vm4, %v3535_v30, 0.0 }
 0xe51   :  { %3559 = vadd.xlane.f32.xlu1 %v3558_v46 }
 0xe55   :  { %v3509_v13 = vpop.xlane.xlu0 %3508 }
 0xe56   :  { %v3518_v39 = vmul.f32 0.015625, %v3509_v13 }
 0xe58   :  { %v12480_v45 = vsub.f32 %v12409_v19, %v3518_v39 }
 0xe5a   :  { %v3536_v36 = vmul.f32 %v12480_v45, %v12480_v45 }
 0xe5c   :  { %v3561_v54 = vsel %vm257_vm4, %v3536_v36, 0.0 }
 0xe5d   :  { %3562 = vadd.xlane.f32.xlu1 %v3561_v54 }
 0xe63   :  { %3615 = vrot.lane.b32.xlu0 %v12494_v41, %s10525_s27 }
 0xebd   :  { %v3539_v56 = vpop.xlane.xlu0 %3538 }
 0xebe   :  { %v3564_v60 = vmul.f32 0.015625, %v3539_v56 }
 0xec0   :  { %v3573_v59 = vadd.f32 1e-05, %v3564_v60 }
 0xec1   :  { %v3542_v47 = vpop.xlane.xlu0 %3541 }
 0xec2   :  { %v3565_v20 = vmul.f32 0.015625, %v3542_v47  ;;  %10225 = vrsqrt.f32 %v3573_v59 }
 0xec4   :  { %v3574_v11 = vadd.f32 1e-05, %v3565_v20 }
 0xec5   :  { %v3545_v5 = vpop.xlane.xlu0 %3544 }
 0xec6   :  { %v3566_v42 = vmul.f32 0.015625, %v3545_v5  ;;  %10227 = vrsqrt.f32 %v3574_v11 }
 0xec8   :  { %v3575_v44 = vadd.f32 1e-05, %v3566_v42 }
 0xec9   :  { %v3548_v16 = vpop.xlane.xlu0 %3547 }
 0xeca   :  { %v3567_v8 = vmul.f32 0.015625, %v3548_v16 }
 0xecc   :  { %v3576_v28 = vadd.f32 1e-05, %v3567_v8  ;;  %v10226_v15 = vpop.eup %10225 }
 0xecd   :  { %v3591_v18 = vmul.f32 %v10226_v15, %v12420_v63 }
 0xece   :  { %10229 = vrsqrt.f32 %v3576_v28 }
 0xecf   :  { %10231 = vrsqrt.f32 %v3575_v44  ;;  %v3606_v57 = vmul.f32 %v12494_v41, %v3591_v18 }
 0xed0   :  { %v10228_v23 = vpop.eup %10227 }
 0xed1   :  { %v3592_v32 = vmul.f32 %v10228_v23, %v12425_v14 }
 0xed2   :  { %v3551_v7 = vpop.xlane.xlu0 %3550 }
 0xed3   :  { %v3568_v3 = vmul.f32 0.015625, %v3551_v7  ;;  %v3607_v9 = vmul.f32 %v12494_v41, %v3592_v32  ;;  %v7770_v32 = vld [vmem:[%s14487_s5 + $0x8] sm:$0x3] }
 0xed4   :  { %v3554_v26 = vpop.xlane.xlu1 %3553 }
 0xed5   :  { %v3569_v17 = vmul.f32 0.015625, %v3554_v26  ;;  %v3577_v4 = vadd.f32 1e-05, %v3568_v3 }
 0xed7   :  { %v3578_v1 = vadd.f32 1e-05, %v3569_v17 }
 0xed8   :  { %v10230_v38 = vpop.eup %10229 }
 0xed9   :  { %10233 = vrsqrt.f32 %v3578_v1  ;;  %v10232_v10 = vpop.eup %10231  ;;  %v3594_v30 = vmul.f32 %v10230_v38, %v12437_v22  ;;  %v3645_v38 = vrot.slane %v7770_v32, %v14537_v61 }
 0xeda   :  { %10235 = vrsqrt.f32 %v3577_v4  ;;  %v3557_v33 = vpop.xlane.xlu0 %3556  ;;  %v3593_v14 = vmul.f32 %v10232_v10, %v12431_v37 }
 0xedb   :  { %v3570_v0 = vmul.f32 0.015625, %v3557_v33  ;;  %v3609_v36 = vmul.f32 %v12494_v41, %v3594_v30  ;;  %v3649_v33 = vrot.slane %v7770_v32, %v14538_v12 }
 0xedc   :  { %v3608_v2 = vmul.f32 %v12494_v41, %v3593_v14 }
 0xedd   :  { %v3579_v46 = vadd.f32 1e-05, %v3570_v0 }
 0xede   :  { %v3560_v29 = vpop.xlane.xlu1 %3559  ;;  %v3616_v40 = vpop.permute.xlu0 %3615 }
 0xedf   :  { %v3571_v13 = vmul.f32 0.015625, %v3560_v29  ;;  %v3618_v39 = vadd.f32 %v3616_v40, %v3606_v57  ;;  %v3619_v63 = vadd.f32 %v3616_v40, %v3607_v9  ;;  %10237 = vrsqrt.f32 %v3579_v46 }
 0xee0   :  { %v3621_v55 = vadd.f32 %v3616_v40, %v3609_v36  ;;  %v3620_v47 = vadd.f32 %v3616_v40, %v3608_v2 }
 0xee1   :  { %v3580_v58 = vadd.f32 1e-05, %v3571_v13  ;;  %v3627_v35 = vpack.c.bf16 %v3619_v63, %v3618_v39 }
 0xee2   :  { %v3628_v60 = vpack.c.bf16 %v3621_v55, %v3620_v47 }
 0xee3   :  { %v10234_v54 = vpop.eup %10233  ;;  %10239 = vrsqrt.f32 %v3580_v58  ;;  %7792 = vmatmul.mubr.msk.bf16.vlgmr.msra.gmra.mrb[92].mxu0 %vm257_vm4, %v3627_v35 }
 0xee4   :  { %v10236_v22 = vpop.eup %10235  ;;  %3749 = vmatprep.mubr.bf16.mxu0 %v14532_v62  ;;  %v3596_v56 = vmul.f32 %v10234_v54, %v12447_v21 }
 0xee5   :  { %v3595_v37 = vmul.f32 %v10236_v22, %v12444_v52 }
 0xee6   :  { %v3611_v20 = vmul.f32 %v12494_v41, %v3596_v56 }
 0xee7   :  { %v3610_v59 = vmul.f32 %v12494_v41, %v3595_v37 }
 0xee8   :  { %v3623_v8 = vadd.f32 %v3616_v40, %v3611_v20 }
 0xee9   :  { %v10238_v11 = vpop.eup %10237  ;;  %v3622_v44 = vadd.f32 %v3616_v40, %v3610_v59 }
 0xeea   :  { %v3563_v5 = vpop.xlane.xlu1 %3562  ;;  %v3597_v52 = vmul.f32 %v10238_v11, %v12456_v48 }
 0xeeb   :  { %7793 = vmatmul.mubr.msk.bf16.gmra.mrb[96].mxu0 %vm257_vm4, %v3628_v60  ;;  %v3572_v16 = vmul.f32 0.015625, %v3563_v5  ;;  %v3629_v7 = vpack.c.bf16 %v3623_v8, %v3622_v44 }
 0xeec   :  { %3759 = vmatprep.mubr.bf16.mxu0 %v14532_v62  ;;  %v3612_v26 = vmul.f32 %v12494_v41, %v3597_v52 }
 0xeed   :  { %v10240_v42 = vpop.eup %10239  ;;  %v3581_v28 = vadd.f32 1e-05, %v3572_v16 }
 0xeee   :  { %v3598_v21 = vmul.f32 %v10240_v42, %v12461_v25  ;;  %v3624_v17 = vadd.f32 %v3616_v40, %v3612_v26 }
 0xeef   :  { %10241 = vrsqrt.f32 %v3581_v28 }
 0xef0   :  { %v3613_v3 = vmul.f32 %v12494_v41, %v3598_v21 }
 0xef2   :  { %v3625_v15 = vadd.f32 %v3616_v40, %v3613_v3 }
 0xef3   :  { %7794 = vmatmul.mubr.msk.bf16.gmra.mrb[100].mxu0 %vm257_vm4, %v3629_v7 }
 0xef4   :  { %3769 = vmatprep.mubr.bf16.mxu0 %v14532_v62  ;;  %v3630_v23 = vpack.c.bf16 %v3625_v15, %v3624_v17 }
 0xef9   :  { %v10242_v4 = vpop.eup %10241 }
 0xefa   :  { %v3599_v25 = vmul.f32 %v10242_v4, %v12480_v45 }
 0xefb   :  { %7795 = vmatmul.mubr.msk.bf16.gmra.mrb[104].mxu0 %vm257_vm4, %v3630_v23 }
 0xefc   :  { %3779 = vmatprep.mubr.bf16.mxu0 %v14532_v62  ;;  %v3614_v48 = vmul.f32 %v12494_v41, %v3599_v25 }
 0xefe   :  { %v3626_v1 = vadd.f32 %v3616_v40, %v3614_v48 }
 0xf00   :  { %v3631_v18 = vpack.c.bf16 %v3626_v1, %v3626_v1 }
 0xf03   :  { %7796 = vmatmul.mubr.msk.bf16.gmra.mrb[108].mxu0 %vm257_vm4, %v3631_v18 }
 0xf04   :  { %8919 = vmatprep.mubr.msk.f32.mxu0 %vm10528_vm5, %v14530_v34 }
 0xfb6   :  { %v3741_v45 = vpop.f32.mrb[92].mxu0 }
 0xfb7   :  { %v12533_v0 = vadd.f32 %v3741_v45, %v3645_v38  ;;  %v3743_v10 = vpop.f32.mrb[93].mxu0 }
 0xfb8   :  { %v3744_v41 = vadd.f32 %v3743_v10, %v3649_v33  ;;  %v3745_v57 = vpop.f32.mrb[94].mxu0 }
 0xfb9   :  { %v12535_v9 = vadd.f32 %v3745_v57, %v3645_v38  ;;  %v3747_v30 = vpop.f32.mrb[95].mxu0 }
 0xfba   :  { %3789 = vst.msk [vmem:[#allocation2 + $0x8] sm:$0xff] %vm257_vm4, %v3744_v41  ;;  %v3748_v46 = vadd.f32 %v3747_v30, %v3649_v33 }
 0xfbb   :  { %v12540_v29 = vpack.i.bf16 %v12535_v9, %v12533_v0 }
 0xfbc   :  { %3791 = vst.msk [vmem:[#allocation2 + $0x18] sm:$0xff] %vm257_vm4, %v3748_v46 }
 0xfbd   :  { %9670 = vrot.lane.b32.xlu1 %v12540_v29, %s10527_s13 }
 0xfbe   :  { %v3751_v40 = vpop.f32.mrb[96].mxu0 }
 0xfbf   :  { %v12545_v13 = vadd.f32 %v3751_v40, %v3645_v38  ;;  %v3753_v39 = vpop.f32.mrb[97].mxu0 }
 0xfc0   :  { %v3754_v63 = vadd.f32 %v3753_v39, %v3649_v33  ;;  %v3755_v14 = vpop.f32.mrb[98].mxu0 }
 0xfc1   :  { %v12547_v58 = vadd.f32 %v3755_v14, %v3645_v38  ;;  %v3757_v35 = vpop.f32.mrb[99].mxu0  ;;  %v5312_v25 = vld [vmem:[#allocation2 + $0x8] sm:$0xff] }
 0xfc2   :  { %3793 = vst.msk [vmem:[#allocation2 + $0x28] sm:$0xff] %vm257_vm4, %v3754_v63  ;;  %v3758_v36 = vadd.f32 %v3757_v35, %v3649_v33 }
 0xfc3   :  { %v12552_v54 = vpack.i.bf16 %v12547_v58, %v12545_v13  ;;  %v5313_v4 = vld [vmem:[#allocation2 + $0x18] sm:$0xff] }
 0xfc4   :  { %3795 = vst.msk [vmem:[#allocation2 + $0x38] sm:$0xff] %vm257_vm4, %v3758_v36  ;;  %v9729_v48 = vpack.i.bf16 %v5313_v4, %v5312_v25 }
 0xfc5   :  { %9675 = vrot.lane.b32.xlu1 %v12552_v54, %s10527_s13 }
 0xfc6   :  { %v3761_v2 = vpop.f32.mrb[100].mxu0 }
 0xfc7   :  { %v12557_v22 = vadd.f32 %v3761_v2, %v3645_v38  ;;  %v3763_v55 = vpop.f32.mrb[101].mxu0 }
 0xfc8   :  { %v3764_v56 = vadd.f32 %v3763_v55, %v3649_v33  ;;  %v3765_v47 = vpop.f32.mrb[102].mxu0 }
 0xfc9   :  { %v12559_v37 = vadd.f32 %v3765_v47, %v3645_v38  ;;  %v3767_v60 = vpop.f32.mrb[103].mxu0  ;;  %v5314_v18 = vld [vmem:[#allocation2 + $0x28] sm:$0xff] }
 0xfca   :  { %3797 = vst.msk [vmem:[#allocation2 + $0x48] sm:$0xff] %vm257_vm4, %v3764_v56  ;;  %v3768_v20 = vadd.f32 %v3767_v60, %v3649_v33 }
 0xfcb   :  { %v12564_v5 = vpack.i.bf16 %v12559_v37, %v12557_v22  ;;  %v5315_v1 = vld [vmem:[#allocation2 + $0x38] sm:$0xff] }
 0xfcc   :  { %3799 = vst.msk [vmem:[#allocation2 + $0x58] sm:$0xff] %vm257_vm4, %v3768_v20  ;;  %v9734_v32 = vpack.i.bf16 %v5315_v1, %v5314_v18 }
 0xfcd   :  { %9680 = vrot.lane.b32.xlu0 %v12564_v5, %s10527_s13 }
 0xfce   :  { %v3771_v59 = vpop.f32.mrb[104].mxu0 }
 0xfcf   :  { %v12569_v11 = vadd.f32 %v3771_v59, %v3645_v38  ;;  %v3773_v16 = vpop.f32.mrb[105].mxu0 }
 0xfd0   :  { %v3774_v42 = vadd.f32 %v3773_v16, %v3649_v33  ;;  %v3775_v8 = vpop.f32.mrb[106].mxu0 }
 0xfd1   :  { %v12571_v28 = vadd.f32 %v3775_v8, %v3645_v38  ;;  %v3777_v21 = vpop.f32.mrb[107].mxu0  ;;  %v10491_v27 = vld [vmem:[#allocation2 + $0x48] sm:$0xff] }
 0xfd2   :  { %3801 = vst.msk [vmem:[#allocation2 + $0x68] sm:$0xff] %vm257_vm4, %v3774_v42  ;;  %v3778_v44 = vadd.f32 %v3777_v21, %v3649_v33 }
 0xfd3   :  { %v12576_v52 = vpack.i.bf16 %v12571_v28, %v12569_v11 }
 0xfd4   :  { %3803 = vst.msk [vmem:[#allocation2 + $0x78] sm:$0xff] %vm257_vm4, %v3778_v44 }
 0xfd5   :  { %9685 = vrot.lane.b32.xlu1 %v12576_v52, %s10527_s13 }
 0xfd6   :  { %v3781_v7 = vpop.f32.mrb[108].mxu0 }
 0xfd7   :  { %v12581_v3 = vadd.f32 %v3781_v7, %v3645_v38  ;;  %v3783_v26 = vpop.f32.mrb[109].mxu0  ;;  %v5317_v38 = vld [vmem:[#allocation2 + $0x58] sm:$0xff] }
 0xfd8   :  { %v3784_v15 = vadd.f32 %v3783_v26, %v3649_v33  ;;  %v3785_v17 = vpop.f32.mrb[110].mxu0  ;;  %v5316_v33 = vld [vmem:[#allocation2 + $0x48] sm:$0xff] }
 0xfd9   :  { %v3786_v23 = vpop.f32.mrb[111].mxu0  ;;  %9690 = vrot.lane.b32.xlu1 %v12540_v29, %s10525_s27  ;;  %3840 = vrot.lane.b32.xlu0 %v12581_v3, %s10527_s13  ;;  %v9739_v45 = vpack.i.bf16 %v5317_v38, %v5316_v33  ;;  %v5318_v41 = vld [vmem:[#allocation2 + $0x68] sm:$0xff] }
 0xfda   :  { %3805 = vst.msk [vmem:[#allocation2 + $0x88] sm:$0xff] %vm257_vm4, %v3784_v15 }
 0xfdb   :  { %v5319_v10 = vld [vmem:[#allocation2 + $0x78] sm:$0xff] }
 0xfdc   :  { %v9744_v57 = vpack.i.bf16 %v5319_v10, %v5318_v41 }
 0xfdd   :  { %9700 = vrot.lane.b32.xlu1 %v12564_v5, %s10525_s27  ;;  %9695 = vrot.lane.b32.xlu0 %v12552_v54, %s10525_s27 }
 0xfe1   :  { %4330 = vrot.lane.b32.xlu1 %v12581_v3, %s10525_s27  ;;  %9705 = vrot.lane.b32.xlu0 %v12576_v52, %s10525_s27  ;;  %v5320_v30 = vld [vmem:[#allocation2 + $0x88] sm:$0xff] }
 0xfe5   :  { %4296 = vrot.lane.b32.xlu1 %v12533_v0, %s10530_s30  ;;  %9710 = vrot.lane.b32.xlu0 %v12540_v29, %s10531_s10 }
 0xfe9   :  { %9715 = vrot.lane.b32.xlu1 %v12552_v54, %s10531_s10  ;;  %4298 = vrot.lane.b32.xlu0 %v12535_v9, %s10530_s30 }
 0xfed   :  { %4302 = vrot.lane.b32.xlu1 %v12547_v58, %s10530_s30  ;;  %4300 = vrot.lane.b32.xlu0 %v12545_v13, %s10530_s30 }
 0xff1   :  { %4304 = vrot.lane.b32.xlu1 %v12557_v22, %s10530_s30  ;;  %9720 = vrot.lane.b32.xlu0 %v12564_v5, %s10531_s10 }
 0xff5   :  { %9725 = vrot.lane.b32.xlu1 %v12576_v52, %s10531_s10  ;;  %4306 = vrot.lane.b32.xlu0 %v12559_v37, %s10530_s30 }
 0xff9   :  { %4310 = vrot.lane.b32.xlu1 %v12571_v28, %s10530_s30  ;;  %4308 = vrot.lane.b32.xlu0 %v12569_v11, %s10530_s30 }
 0xffd   :  { %4865 = vrot.lane.b32.xlu1 %v12581_v3, %s10531_s10  ;;  %4312 = vrot.lane.b32.xlu0 %v12581_v3, %s10530_s30 }
0x1001   :  { %4831 = vrot.lane.b32.xlu1 %v12533_v0, %s10532_s11  ;;  %9730 = vrot.lane.b32.xlu0 %v9729_v48, %s10533_s12 }
0x1005   :  { %9735 = vrot.lane.b32.xlu1 %v9734_v32, %s10533_s12  ;;  %4833 = vrot.lane.b32.xlu0 %v12535_v9, %s10532_s11 }
0x1009   :  { %4837 = vrot.lane.b32.xlu1 %v12547_v58, %s10532_s11  ;;  %4835 = vrot.lane.b32.xlu0 %v12545_v13, %s10532_s11 }
0x100d   :  { %4839 = vrot.lane.b32.xlu1 %v12557_v22, %s10532_s11  ;;  %9740 = vrot.lane.b32.xlu0 %v9739_v45, %s10533_s12 }
0x1011   :  { %9745 = vrot.lane.b32.xlu1 %v9744_v57, %s10533_s12  ;;  %4841 = vrot.lane.b32.xlu0 %v12559_v37, %s10532_s11 }
0x1015   :  { %4845 = vrot.lane.b32.xlu1 %v12571_v28, %s10532_s11  ;;  %4843 = vrot.lane.b32.xlu0 %v12569_v11, %s10532_s11 }
0x1019   :  { %5364 = vrot.lane.b32.xlu1 %v5320_v30, %s10533_s12  ;;  %4847 = vrot.lane.b32.xlu0 %v12581_v3, %s10532_s11 }
0x101d   :  { %5332 = vrot.lane.b32.xlu1 %v5313_v4, %s10527_s13  ;;  %5330 = vrot.lane.b32.xlu0 %v5312_v25, %s10527_s13 }
0x1021   :  { %5336 = vrot.lane.b32.xlu1 %v5315_v1, %s10527_s13  ;;  %5334 = vrot.lane.b32.xlu0 %v5314_v18, %s10527_s13 }
0x1025   :  { %5340 = vrot.lane.b32.xlu1 %v5317_v38, %s10527_s13  ;;  %5338 = vrot.lane.b32.xlu0 %v5316_v33, %s10527_s13 }
0x1029   :  { %5344 = vrot.lane.b32.xlu1 %v5319_v10, %s10527_s13  ;;  %5342 = vrot.lane.b32.xlu0 %v5318_v41, %s10527_s13 }
0x102d   :  { %9755 = vrot.lane.b32.xlu1 %v12552_v54, %s10533_s12  ;;  %9750 = vrot.lane.b32.xlu0 %v12540_v29, %s10533_s12 }
0x102f   :  { %v9671_v46 = vpop.permute.xlu1 %9670 }
0x1030   :  { %v9673_v40 = vunpack.i.h.bf16 %v9671_v46  ;;  %v9672_v39 = vunpack.i.l.bf16 %v9671_v46 }
0x1031   :  { %9765 = vrot.lane.b32.xlu1 %v12576_v52, %s10533_s12  ;;  %9760 = vrot.lane.b32.xlu0 %v12564_v5, %s10533_s12 }
0x1032   :  { %v9357_v63 = vpack.c.bf16 %v9673_v40, %v9672_v39 }
0x1034   :  { %9359 = vmatpush3.bf16.xpose.msk.msra.mxu1 %vm11014_vm7, %v9357_v63 }
0x1035   :  { %9770 = vrot.lane.b32.xlu1 %v12540_v29, %s10534_s14  ;;  %4121 = vrot.lane.b32.xlu0 %v12581_v3, %s10533_s12 }
0x1036   :  { %9360 = vmatprep.subr.bf16.mxu1 %v14531_v24 }
0x1037   :  { %v9676_v35 = vpop.permute.xlu1 %9675 }
0x1038   :  { %v9678_v36 = vunpack.i.h.bf16 %v9676_v35  ;;  %v9677_v2 = vunpack.i.l.bf16 %v9676_v35 }
0x1039   :  { %9775 = vrot.lane.b32.xlu1 %v12552_v54, %s10534_s14  ;;  %5346 = vrot.lane.b32.xlu0 %v5320_v30, %s10527_s13 }
0x103a   :  { %v9361_v55 = vpack.c.bf16 %v9678_v36, %v9677_v2 }
0x103c   :  { %9363 = vmatpush3.bf16.xpose.msk.msra.mxu1 %vm11014_vm7, %v9361_v55 }
0x103d   :  { %9780 = vrot.lane.b32.xlu1 %v12564_v5, %s10534_s14  ;;  %9364 = vmatprep.subr.bf16.mxu1 %v14531_v24 }
0x103f   :  { %v9681_v29 = vpop.permute.xlu0 %9680 }
0x1040   :  { %v9683_v56 = vunpack.i.h.bf16 %v9681_v29  ;;  %v9682_v47 = vunpack.i.l.bf16 %v9681_v29 }
0x1041   :  { %9785 = vrot.lane.b32.xlu1 %v12576_v52, %s10534_s14 }
0x1042   :  { %v9365_v60 = vpack.c.bf16 %v9683_v56, %v9682_v47 }
0x1044   :  { %9367 = vmatpush3.bf16.xpose.msk.msra.mxu1 %vm11014_vm7, %v9365_v60 }
0x1045   :  { %4611 = vrot.lane.b32.xlu1 %v12581_v3, %s10534_s14  ;;  %9368 = vmatprep.subr.bf16.mxu1 %v14531_v24 }
0x1047   :  { %v9686_v54 = vpop.permute.xlu1 %9685 }
0x1048   :  { %v9688_v20 = vunpack.i.h.bf16 %v9686_v54  ;;  %v9687_v5 = vunpack.i.l.bf16 %v9686_v54 }
0x104a   :  { %v9369_v59 = vpack.c.bf16 %v9688_v20, %v9687_v5 }
0x104b   :  { %v9691_v16 = vpop.permute.xlu1 %9690  ;;  %v3841_v42 = vpop.permute.xlu0 %3840 }
0x104c   :  { %9371 = vmatpush3.bf16.xpose.msk.msra.mxu1 %vm11014_vm7, %v9369_v59  ;;  %v9693_v44 = vunpack.i.h.bf16 %v9691_v16  ;;  %v9692_v52 = vunpack.i.l.bf16 %v9691_v16 }
0x104d   :  { %8872 = vmatprep.subr.mxu1 %v14530_v34 }
0x104e   :  { %v9385_v15 = vpack.c.bf16 %v9693_v44, %v9692_v52 }
0x104f   :  { %v9701_v8 = vpop.permute.xlu1 %9700  ;;  %v9696_v21 = vpop.permute.xlu0 %9695 }
0x1050   :  { %v9698_v4 = vunpack.i.h.bf16 %v9696_v21  ;;  %v9697_v25 = vunpack.i.l.bf16 %v9696_v21  ;;  %v9702_v38 = vunpack.i.l.bf16 %v9701_v8 }
0x1053   :  { %v4331_v7 = vpop.permute.xlu1 %4330  ;;  %v9706_v26 = vpop.permute.xlu0 %9705 }
0x1054   :  { %8873 = vmatpush3.xpose.msk.msra.mxu1 %vm617_vm6, %v3841_v42  ;;  %v9707_v57 = vunpack.i.l.bf16 %v9706_v26 }
0x1055   :  { %9384 = vmatprep.subr.bf16.mxu1 %v14531_v24 }
0x1057   :  { %v4297_v17 = vpop.permute.xlu1 %4296  ;;  %8875 = vmatmul.mubr.msk.f32.vlgmr.msra.gmra.mrb[132].mxu1 %vm617_vm6, %v12533_v0  ;;  %v9711_v23 = vpop.permute.xlu0 %9710  ;;  %v9389_v0 = vpack.c.bf16 %v9698_v4, %v9697_v25 }
0x1058   :  { %9387 = vmatpush3.bf16.xpose.msk.msra.mxu1 %vm11014_vm7, %v9385_v15  ;;  %8877 = vmatprep.mubr.msk.f32.mxu1 %vm10528_vm5, %v14530_v34  ;;  %v9712_v35 = vunpack.i.l.bf16 %v9711_v23 }
0x1059   :  { %9388 = vmatprep.subr.bf16.mxu1 %v14531_v24 }
0x105b   :  { %v12697_v48 = vpop.permute.xlu1 %9715  ;;  %8878 = vmatmul.mubr.msk.f32.gmra.mrb[134].mxu1 %vm617_vm6, %v12535_v9  ;;  %v4299_v1 = vpop.permute.xlu0 %4298  ;;  %v9703_v9 = vunpack.i.h.bf16 %v9701_v8 }
0x105c   :  { %8880 = vmatprep.mubr.msk.f32.mxu1 %vm10528_vm5, %v14530_v34  ;;  %v9717_v56 = vunpack.i.l.bf16 %v12697_v48 }
0x105f   :  { %v12703_v18 = vpop.permute.xlu1 %4302  ;;  %8881 = vmatmul.mubr.msk.f32.gmra.mrb[136].mxu1 %vm617_vm6, %v12545_v13  ;;  %v4301_v32 = vpop.permute.xlu0 %4300  ;;  %v9393_v13 = vpack.c.bf16 %v9703_v9, %v9702_v38 }
0x1060   :  { %9391 = vmatpush3.bf16.xpose.msk.msra.mxu1 %vm11014_vm7, %v9389_v0  ;;  %8883 = vmatprep.mubr.msk.f32.mxu1 %vm10528_vm5, %v14530_v34 }
0x1061   :  { %9392 = vmatprep.subr.bf16.mxu1 %v14531_v24 }
0x1063   :  { %v12712_v33 = vpop.permute.xlu1 %4304  ;;  %8884 = vmatmul.mubr.msk.f32.gmra.mrb[138].mxu1 %vm617_vm6, %v12547_v58  ;;  %v9721_v45 = vpop.permute.xlu0 %9720  ;;  %v9708_v58 = vunpack.i.h.bf16 %v9706_v26 }
0x1064   :  { %8886 = vmatprep.mubr.msk.f32.mxu1 %vm10528_vm5, %v14530_v34  ;;  %v9723_v59 = vunpack.i.h.bf16 %v9721_v45  ;;  %v9722_v16 = vunpack.i.l.bf16 %v9721_v45 }
0x1066   :  { %v9421_v21 = vpack.c.bf16 %v9723_v59, %v9722_v16  ;;  %v12953_v16 = vld [vmem:[%s14483_s1] sm:$0xff] }
0x1067   :  { %v12718_v10 = vpop.permute.xlu1 %9725  ;;  %8887 = vmatmul.mubr.msk.f32.gmra.mrb[140].mxu1 %vm617_vm6, %v12557_v22  ;;  %v12722_v41 = vpop.permute.xlu0 %4306  ;;  %v9397_v22 = vpack.c.bf16 %v9708_v58, %v9707_v57 }
0x1068   :  { %9395 = vmatpush3.bf16.xpose.msk.msra.mxu1 %vm11014_vm7, %v9393_v13  ;;  %8889 = vmatprep.mubr.msk.f32.mxu1 %vm10528_vm5, %v14530_v34  ;;  %v9727_v26 = vunpack.i.l.bf16 %v12718_v10 }
0x1069   :  { %9396 = vmatprep.subr.bf16.mxu1 %v14531_v24 }
0x106b   :  { %v12729_v30 = vpop.permute.xlu1 %4310  ;;  %8890 = vmatmul.mubr.msk.f32.gmra.mrb[142].mxu1 %vm617_vm6, %v12559_v37  ;;  %v4309_v46 = vpop.permute.xlu0 %4308 }
0x106c   :  { %8892 = vmatprep.mubr.msk.f32.mxu1 %vm10528_vm5, %v14530_v34 }
0x106f   :  { %v12735_v40 = vpop.permute.xlu1 %4865  ;;  %8893 = vmatmul.mubr.msk.f32.gmra.mrb[144].mxu1 %vm617_vm6, %v12569_v11  ;;  %v12739_v39 = vpop.permute.xlu0 %4312  ;;  %v9713_v11 = vunpack.i.h.bf16 %v9711_v23 }
0x1070   :  { %9399 = vmatpush3.bf16.xpose.msk.msra.mxu1 %vm11014_vm7, %v9397_v22  ;;  %8895 = vmatprep.mubr.msk.f32.mxu1 %vm10528_vm5, %v14530_v34 }
0x1071   :  { %8962 = vmatprep.subr.mxu1 %v14530_v34 }
0x1073   :  { %v12746_v37 = vpop.permute.xlu1 %4831  ;;  %8896 = vmatmul.mubr.msk.f32.gmra.mrb[146].mxu1 %vm617_vm6, %v12571_v28  ;;  %v12750_v63 = vpop.permute.xlu0 %9730  ;;  %v9413_v28 = vpack.c.bf16 %v9713_v11, %v9712_v35 }
0x1074   :  { %8898 = vmatprep.mubr.msk.f32.mxu1 %vm10528_vm5, %v14530_v34  ;;  %v9733_v0 = vunpack.i.h.bf16 %v12750_v63 }
0x1077   :  { %v12754_v36 = vpop.permute.xlu1 %9735  ;;  %8899 = vmatmul.mubr.msk.f32.gmra.mrb[148].mxu1 %vm617_vm6, %v12581_v3  ;;  %v12758_v2 = vpop.permute.xlu0 %4833  ;;  %v9718_v3 = vunpack.i.h.bf16 %v12697_v48 }
0x1078   :  { %8963 = vmatpush3.xpose.msk.msra.mxu1 %vm617_vm6, %v4331_v7  ;;  %8964 = vmatprep.mubr.msk.f32.mxu1 %vm10528_vm5, %v14530_v34  ;;  %v9728_v7 = vunpack.i.h.bf16 %v12718_v10  ;;  %v9737_v58 = vunpack.i.l.bf16 %v12754_v36 }
0x1079   :  { %9412 = vmatprep.subr.bf16.mxu1 %v14531_v24  ;;  %v9417_v54 = vpack.c.bf16 %v9718_v3, %v9717_v56 }
0x107a   :  { %v9425_v23 = vpack.c.bf16 %v9728_v7, %v9727_v26  ;;  %v12963_v7 = vld [vmem:[%s14483_s1 + $0x10] sm:$0xff] }
0x107b   :  { %v12764_v55 = vpop.permute.xlu1 %4837  ;;  %8965 = vmatmul.mubr.msk.f32.vlgmr.msra.gmra.mrb[150].mxu1 %vm617_vm6, %v4297_v17  ;;  %v12767_v29 = vpop.permute.xlu0 %4835 }
0x107c   :  { %9415 = vmatpush3.bf16.xpose.msk.msra.mxu1 %vm11014_vm7, %v9413_v28  ;;  %8967 = vmatprep.mubr.msk.f32.mxu1 %vm10528_vm5, %v14530_v34 }
0x107d   :  { %9416 = vmatprep.subr.bf16.mxu1 %v14531_v24 }
0x107f   :  { %v12776_v47 = vpop.permute.xlu1 %4839  ;;  %8968 = vmatmul.mubr.msk.f32.gmra.mrb[152].mxu1 %vm617_vm6, %v4299_v1  ;;  %v12779_v60 = vpop.permute.xlu0 %9740 }
0x1080   :  { %8970 = vmatprep.mubr.msk.f32.mxu1 %vm10528_vm5, %v14530_v34  ;;  %v9743_v35 = vunpack.i.h.bf16 %v12779_v60 }
0x1083   :  { %v12783_v20 = vpop.permute.xlu1 %9745  ;;  %8971 = vmatmul.mubr.msk.f32.gmra.mrb[154].mxu1 %vm617_vm6, %v4301_v32  ;;  %v12786_v5 = vpop.permute.xlu0 %4841 }
0x1084   :  { %9419 = vmatpush3.bf16.xpose.msk.msra.mxu1 %vm11014_vm7, %v9417_v54  ;;  %8973 = vmatprep.mubr.msk.f32.mxu1 %vm10528_vm5, %v14530_v34 }
0x1085   :  { %9420 = vmatprep.subr.bf16.mxu1 %v14531_v24 }
0x1087   :  { %v12793_v42 = vpop.permute.xlu1 %4845  ;;  %8974 = vmatmul.mubr.msk.f32.gmra.mrb[156].mxu1 %vm617_vm6, %v12703_v18  ;;  %v12797_v8 = vpop.permute.xlu0 %4843  ;;  %v9732_v18 = vunpack.i.l.bf16 %v12750_v63 }
0x1088   :  { %8976 = vmatprep.mubr.msk.f32.mxu1 %vm10528_vm5, %v14530_v34 }
0x1089   :  { %v9441_v38 = vpack.c.bf16 %v9733_v0, %v9732_v18 }
0x108b   :  { %v12801_v44 = vpop.permute.xlu1 %5364  ;;  %8977 = vmatmul.mubr.msk.f32.gmra.mrb[158].mxu1 %vm617_vm6, %v12712_v33  ;;  %v12805_v52 = vpop.permute.xlu0 %4847 }
0x108c   :  { %9423 = vmatpush3.bf16.xpose.msk.msra.mxu1 %vm11014_vm7, %v9421_v21  ;;  %8979 = vmatprep.mubr.msk.f32.mxu1 %vm10528_vm5, %v14530_v34 }
0x108d   :  { %9424 = vmatprep.subr.bf16.mxu1 %v14531_v24 }
0x108f   :  { %v12814_v15 = vpop.permute.xlu1 %5332  ;;  %8980 = vmatmul.mubr.msk.f32.gmra.mrb[160].mxu1 %vm617_vm6, %v12722_v41  ;;  %v12818_v17 = vpop.permute.xlu0 %5330  ;;  %v9738_v41 = vunpack.i.h.bf16 %v12754_v36  ;;  %v9742_v36 = vunpack.i.l.bf16 %v12779_v60  ;;  %v9747_v60 = vunpack.i.l.bf16 %v12783_v20 }
0x1090   :  { %8982 = vmatprep.mubr.msk.f32.mxu1 %vm10528_vm5, %v14530_v34 }
0x1091   :  { %v9449_v3 = vpack.c.bf16 %v9743_v35, %v9742_v36  ;;  %v13013_v36 = vld [vmem:[%s14483_s1 + $0x60] sm:$0xff] }
0x1093   :  { %v12822_v4 = vpop.permute.xlu1 %5336  ;;  %8983 = vmatmul.mubr.msk.f32.gmra.mrb[162].mxu1 %vm617_vm6, %v4309_v46  ;;  %v12825_v25 = vpop.permute.xlu0 %5334 }
0x1094   :  { %9427 = vmatpush3.bf16.xpose.msk.msra.mxu1 %vm11014_vm7, %v9425_v23  ;;  %8985 = vmatprep.mubr.msk.f32.mxu1 %vm10528_vm5, %v14530_v34 }
0x1095   :  { %9052 = vmatprep.subr.mxu1 %v14530_v34 }
0x1097   :  { %v12832_v48 = vpop.permute.xlu1 %5340  ;;  %8986 = vmatmul.mubr.msk.f32.gmra.mrb[164].mxu1 %vm617_vm6, %v12729_v30  ;;  %v12836_v1 = vpop.permute.xlu0 %5338 }
0x1098   :  { %8988 = vmatprep.mubr.msk.f32.mxu1 %vm10528_vm5, %v14530_v34 }
0x109b   :  { %v12842_v32 = vpop.permute.xlu1 %5344  ;;  %8989 = vmatmul.mubr.msk.f32.gmra.mrb[166].mxu1 %vm617_vm6, %v12739_v39  ;;  %v12846_v9 = vpop.permute.xlu0 %5342 }
0x109c   :  { %9053 = vmatpush3.xpose.msk.msra.mxu1 %vm617_vm6, %v12735_v40  ;;  %9054 = vmatprep.mubr.msk.f32.mxu1 %vm10528_vm5, %v14530_v34  ;;  %v9445_v40 = vpack.c.bf16 %v9738_v41, %v9737_v58  ;;  %v12993_v41 = vld [vmem:[%s14483_s1 + $0x40] sm:$0xff] }
0x109d   :  { %9440 = vmatprep.subr.bf16.mxu1 %v14531_v24 }
0x109f   :  { %9055 = vmatmul.mubr.msk.f32.vlgmr.msra.gmra.mrb[168].mxu1 %vm617_vm6, %v12746_v37  ;;  %v9751_v33 = vpop.permute.xlu0 %9750  ;;  %v9756_v45 = vpop.permute.xlu1 %9755 }
0x10a0   :  { %9443 = vmatpush3.bf16.xpose.msk.msra.mxu1 %vm11014_vm7, %v9441_v38  ;;  %9057 = vmatprep.mubr.msk.f32.mxu1 %vm10528_vm5, %v14530_v34  ;;  %v9753_v13 = vunpack.i.h.bf16 %v9751_v33  ;;  %v9752_v10 = vunpack.i.l.bf16 %v9751_v33  ;;  %v9758_v30 = vunpack.i.h.bf16 %v9756_v45  ;;  %v9757_v46 = vunpack.i.l.bf16 %v9756_v45 }
0x10a1   :  { %9444 = vmatprep.subr.bf16.mxu1 %v14531_v24 }
0x10a2   :  { %v9373_v57 = vpack.c.bf16 %v9753_v13, %v9752_v10  ;;  %v9376_v39 = vpack.c.bf16 %v9758_v30, %v9757_v46 }
0x10a3   :  { %9058 = vmatmul.mubr.msk.f32.gmra.mrb[170].mxu1 %vm617_vm6, %v12758_v2  ;;  %v9761_v22 = vpop.permute.xlu0 %9760  ;;  %v9766_v11 = vpop.permute.xlu1 %9765 }
0x10a4   :  { %9060 = vmatprep.mubr.msk.f32.mxu1 %vm10528_vm5, %v14530_v34  ;;  %9374 = vmatpush3.bf16.msra.mxu0 %v9373_v57  ;;  %v9763_v37 = vunpack.i.h.bf16 %v9761_v22  ;;  %v9762_v63 = vunpack.i.l.bf16 %v9761_v22  ;;  %v9768_v2 = vunpack.i.h.bf16 %v9766_v11  ;;  %v9767_v28 = vunpack.i.l.bf16 %v9766_v11 }
0x10a5   :  { %9375 = vmatprep.subr.bf16.mxu0 %v14531_v24 }
0x10a6   :  { %v9382_v56 = vpack.c.bf16 %v9768_v2, %v9767_v28 }
0x10a7   :  { %9061 = vmatmul.mubr.msk.f32.gmra.mrb[172].mxu1 %vm617_vm6, %v12767_v29  ;;  %v9379_v29 = vpack.c.bf16 %v9763_v37, %v9762_v63  ;;  %v4122_v54 = vpop.permute.xlu0 %4121 }
0x10a8   :  { %9447 = vmatpush3.bf16.xpose.msk.msra.mxu1 %vm11014_vm7, %v9445_v40  ;;  %9063 = vmatprep.mubr.msk.f32.mxu1 %vm10528_vm5, %v14530_v34  ;;  %v13003_v40 = vld [vmem:[%s14483_s1 + $0x50] sm:$0xff] }
0x10a9   :  { %9377 = vmatpush3.bf16.msra.mxu0 %v9376_v39  ;;  %9448 = vmatprep.subr.bf16.mxu1 %v14531_v24 }
0x10aa   :  { %9378 = vmatprep.subr.bf16.mxu0 %v14531_v24 }
0x10ab   :  { %9064 = vmatmul.mubr.msk.f32.gmra.mrb[174].mxu1 %vm617_vm6, %v12764_v55  ;;  %v9748_v55 = vunpack.i.h.bf16 %v12783_v20  ;;  %v5347_v14 = vpop.permute.xlu0 %5346 }
0x10ac   :  { %9066 = vmatprep.mubr.msk.f32.mxu1 %vm10528_vm5, %v14530_v34 }
0x10ad   :  { %9380 = vmatpush3.bf16.msra.mxu0 %v9379_v29 }
0x10ae   :  { %9381 = vmatprep.subr.bf16.mxu0 %v14531_v24 }
0x10af   :  { %9067 = vmatmul.mubr.msk.f32.gmra.mrb[176].mxu1 %vm617_vm6, %v12776_v47  ;;  %v9453_v47 = vpack.c.bf16 %v9748_v55, %v9747_v60  ;;  %v13023_v55 = vld [vmem:[%s14483_s1 + $0x70] sm:$0xff] }
0x10b0   :  { %9451 = vmatpush3.bf16.xpose.msk.msra.mxu1 %vm11014_vm7, %v9449_v3  ;;  %9069 = vmatprep.mubr.msk.f32.mxu1 %vm10528_vm5, %v14530_v34 }
0x10b1   :  { %9383 = vmatpush3.bf16.msra.mxu0 %v9382_v56  ;;  %9452 = vmatprep.subr.bf16.mxu1 %v14531_v24 }
0x10b2   :  { %8917 = vmatprep.subr.mxu0 %v14530_v34 }
0x10b3   :  { %9070 = vmatmul.mubr.msk.f32.gmra.mrb[178].mxu1 %vm617_vm6, %v12786_v5 }
0x10b4   :  { %9072 = vmatprep.mubr.msk.f32.mxu1 %vm10528_vm5, %v14530_v34 }
0x10b5   :  { %8918 = vmatpush3.msra.mxu0 %v4122_v54 }
0x10b6   :  { %9400 = vmatprep.subr.bf16.mxu0 %v14531_v24 }
0x10b7   :  { %9073 = vmatmul.mubr.msk.f32.gmra.mrb[180].mxu1 %vm617_vm6, %v12797_v8 }
0x10b8   :  { %9455 = vmatpush3.bf16.xpose.msk.msra.mxu1 %vm11014_vm7, %v9453_v47  ;;  %9075 = vmatprep.mubr.msk.f32.mxu1 %vm10528_vm5, %v14530_v34 }
0x10b9   :  { %9142 = vmatprep.subr.mxu1 %v14530_v34 }
0x10bb   :  { %9076 = vmatmul.mubr.msk.f32.gmra.mrb[182].mxu1 %vm617_vm6, %v12793_v42 }
0x10bc   :  { %9078 = vmatprep.mubr.msk.f32.mxu1 %vm10528_vm5, %v14530_v34 }
0x10bf   :  { %9079 = vmatmul.mubr.msk.f32.gmra.mrb[184].mxu1 %vm617_vm6, %v12805_v52 }
0x10c0   :  { %9143 = vmatpush3.xpose.msk.msra.mxu1 %vm617_vm6, %v12801_v44  ;;  %9144 = vmatprep.mubr.msk.f32.mxu1 %vm10528_vm5, %v14530_v34 }
0x10c1   :  { %9216 = vmatprep.subr.bf16.mxu1 %v14530_v34 }
0x10c3   :  { %9145 = vmatmul.mubr.msk.f32.vlgmr.msra.gmra.mrb[186].mxu1 %vm617_vm6, %v12818_v17 }
0x10c4   :  { %9147 = vmatprep.mubr.msk.f32.mxu1 %vm10528_vm5, %v14530_v34 }
0x10c7   :  { %9148 = vmatmul.mubr.msk.f32.gmra.mrb[188].mxu1 %vm617_vm6, %v12814_v15 }
0x10c8   :  { %9150 = vmatprep.mubr.msk.f32.mxu1 %vm10528_vm5, %v14530_v34 }
0x10cb   :  { %9151 = vmatmul.mubr.msk.f32.gmra.mrb[190].mxu1 %vm617_vm6, %v12825_v25  ;;  %v12973_v25 = vld [vmem:[%s14483_s1 + $0x20] sm:$0xff] }
0x10cc   :  { %9153 = vmatprep.mubr.msk.f32.mxu1 %vm10528_vm5, %v14530_v34 }
0x10cf   :  { %9154 = vmatmul.mubr.msk.f32.gmra.mrb[192].mxu1 %vm617_vm6, %v12822_v4 }
0x10d0   :  { %9156 = vmatprep.mubr.msk.f32.mxu1 %vm10528_vm5, %v14530_v34 }
0x10d3   :  { %9157 = vmatmul.mubr.msk.f32.gmra.mrb[194].mxu1 %vm617_vm6, %v12836_v1 }
0x10d4   :  { %9159 = vmatprep.mubr.msk.f32.mxu1 %vm10528_vm5, %v14530_v34 }
0x10d7   :  { %9160 = vmatmul.mubr.msk.f32.gmra.mrb[196].mxu1 %vm617_vm6, %v12832_v48 }
0x10d8   :  { %9162 = vmatprep.mubr.msk.f32.mxu1 %vm10528_vm5, %v14530_v34 }
0x10db   :  { %9163 = vmatmul.mubr.msk.f32.gmra.mrb[198].mxu1 %vm617_vm6, %v12846_v9  ;;  %v12983_v9 = vld [vmem:[%s14483_s1 + $0x30] sm:$0xff] }
0x10dc   :  { %9165 = vmatprep.mubr.msk.f32.mxu1 %vm10528_vm5, %v14530_v34 }
0x10df   :  { %9166 = vmatmul.mubr.msk.f32.gmra.mrb[200].mxu1 %vm617_vm6, %v12842_v32 }
0x10e0   :  { %9168 = vmatprep.mubr.msk.f32.mxu1 %vm10528_vm5, %v14530_v34 }
0x10e3   :  { %9169 = vmatmul.mubr.msk.f32.gmra.mrb[202].mxu1 %vm617_vm6, %v5347_v14 }
0x10e4   :  { %9224 = vmatprep.mubr.msk.bf16.mxu1 %vm10528_vm5, %v14530_v34 }
0x112a   :  { %v3944_v20 = vpop.f32.mrb[132].mxu1 }
0x112b   :  { %v3988_v5 = vmul.f32 0.25, %v3944_v20  ;;  %v8876_v59 = vpop.f32.mrb[133].mxu1 }
0x112d   :  { %v12956_v42 = vadd.f32 %v12953_v16, %v3988_v5  ;;  %v13033_v5 = vld [vmem:[%s14483_s1 + $0x80] sm:$0xff] }
0x112e   :  { %v3949_v8 = vpop.f32.mrb[134].mxu1 }
0x112f   :  { %v3989_v21 = vmul.f32 0.25, %v3949_v8  ;;  %v8879_v44 = vpop.f32.mrb[135].mxu1  ;;  %v4006_v52 = vsel %vm782_vm8, %v12956_v42, -inf }
0x1130   :  { %4007 = vmax.xlane.f32.xlu1 %v4006_v52 }
0x1131   :  { %v12966_v26 = vadd.f32 %v12963_v7, %v3989_v21 }
0x1132   :  { %v3954_v15 = vpop.f32.mrb[136].mxu1 }
0x1133   :  { %v3990_v17 = vmul.f32 0.25, %v3954_v15  ;;  %v8882_v23 = vpop.f32.mrb[137].mxu1  ;;  %v4009_v4 = vsel %vm782_vm8, %v12966_v26, -inf }
0x1134   :  { %4010 = vmax.xlane.f32.xlu0 %v4009_v4 }
0x1135   :  { %v12976_v48 = vadd.f32 %v12973_v25, %v3990_v17 }
0x1136   :  { %v3959_v1 = vpop.f32.mrb[138].mxu1 }
0x1137   :  { %v3991_v0 = vmul.f32 0.25, %v3959_v1  ;;  %v8885_v18 = vpop.f32.mrb[139].mxu1  ;;  %v4012_v32 = vsel %vm782_vm8, %v12976_v48, -inf }
0x1138   :  { %4013 = vmax.xlane.f32.xlu0 %v4012_v32 }
0x1139   :  { %v12986_v38 = vadd.f32 %v12983_v9, %v3991_v0 }
0x113a   :  { %v3964_v33 = vpop.f32.mrb[140].mxu1 }
0x113b   :  { %v3992_v45 = vmul.f32 0.25, %v3964_v33  ;;  %v8888_v13 = vpop.f32.mrb[141].mxu1  ;;  %v4015_v10 = vsel %vm782_vm8, %v12986_v38, -inf }
0x113c   :  { %4016 = vmax.xlane.f32.xlu0 %v4015_v10 }
0x113d   :  { %v12996_v58 = vadd.f32 %v12993_v41, %v3992_v45 }
0x113e   :  { %v3969_v57 = vpop.f32.mrb[142].mxu1 }
0x113f   :  { %v3993_v30 = vmul.f32 0.25, %v3969_v57  ;;  %v8891_v46 = vpop.f32.mrb[143].mxu1  ;;  %v4018_v22 = vsel %vm782_vm8, %v12996_v58, -inf }
0x1140   :  { %4019 = vmax.xlane.f32.xlu1 %v4018_v22 }
0x1141   :  { %v13006_v39 = vadd.f32 %v13003_v40, %v3993_v30 }
0x1142   :  { %v3974_v37 = vpop.f32.mrb[144].mxu1 }
0x1143   :  { %v3994_v63 = vmul.f32 0.25, %v3974_v37  ;;  %v8894_v11 = vpop.f32.mrb[145].mxu1  ;;  %v4021_v35 = vsel %vm782_vm8, %v13006_v39, -inf }
0x1144   :  { %4022 = vmax.xlane.f32.xlu0 %v4021_v35 }
0x1145   :  { %v13016_v2 = vadd.f32 %v13013_v36, %v3994_v63 }
0x1146   :  { %v3979_v28 = vpop.f32.mrb[146].mxu1 }
0x1147   :  { %v3995_v29 = vmul.f32 0.25, %v3979_v28  ;;  %v8897_v3 = vpop.f32.mrb[147].mxu1  ;;  %v4024_v56 = vsel %vm782_vm8, %v13016_v2, -inf }
0x1148   :  { %4025 = vmax.xlane.f32.xlu1 %v4024_v56 }
0x1149   :  { %v13026_v60 = vadd.f32 %v13023_v55, %v3995_v29 }
0x114a   :  { %v3984_v54 = vpop.f32.mrb[148].mxu1 }
0x114b   :  { %v3996_v47 = vmul.f32 0.25, %v3984_v54  ;;  %v8900_v14 = vpop.f32.mrb[149].mxu1  ;;  %v4027_v20 = vsel %vm782_vm8, %v13026_v60, -inf }
0x114c   :  { %4028 = vmax.xlane.f32.xlu0 %v4027_v20 }
0x114d   :  { %v13036_v59 = vadd.f32 %v13033_v5, %v3996_v47 }
0x114e   :  { %v4434_v8 = vpop.f32.mrb[150].mxu1 }
0x114f   :  { %v4478_v21 = vmul.f32 0.25, %v4434_v8  ;;  %v8966_v44 = vpop.f32.mrb[151].mxu1  ;;  %v4030_v52 = vsel %vm782_vm8, %v13036_v59, -inf }
0x1150   :  { %4031 = vmax.xlane.f32.xlu1 %v4030_v52 }
0x1151   :  { %v13041_v15 = vadd.f32 %v12953_v16, %v4478_v21 }
0x1152   :  { %v4439_v17 = vpop.f32.mrb[152].mxu1 }
0x1153   :  { %v4479_v23 = vmul.f32 0.25, %v4439_v17  ;;  %v8969_v4 = vpop.f32.mrb[153].mxu1  ;;  %v4496_v1 = vsel %vm782_vm8, %v13041_v15, -inf }
0x1154   :  { %4497 = vmax.xlane.f32.xlu0 %v4496_v1 }
0x1155   :  { %v13046_v0 = vadd.f32 %v12963_v7, %v4479_v23 }
0x1156   :  { %v4444_v18 = vpop.f32.mrb[154].mxu1 }
0x1157   :  { %v4480_v32 = vmul.f32 0.25, %v4444_v18  ;;  %v8972_v33 = vpop.f32.mrb[155].mxu1  ;;  %v4499_v45 = vsel %vm782_vm8, %v13046_v0, -inf }
0x1158   :  { %4500 = vmax.xlane.f32.xlu1 %v4499_v45 }
0x1159   :  { %v13051_v13 = vadd.f32 %v12973_v25, %v4480_v32 }
0x115a   :  { %v4449_v10 = vpop.f32.mrb[156].mxu1 }
0x115b   :  { %v4481_v57 = vmul.f32 0.25, %v4449_v10  ;;  %v8975_v30 = vpop.f32.mrb[157].mxu1  ;;  %v4502_v46 = vsel %vm782_vm8, %v13051_v13, -inf }
0x115c   :  { %4503 = vmax.xlane.f32.xlu0 %v4502_v46 }
0x115d   :  { %v13056_v22 = vadd.f32 %v12983_v9, %v4481_v57 }
0x115e   :  { %v4454_v37 = vpop.f32.mrb[158].mxu1 }
0x115f   :  { %v4482_v63 = vmul.f32 0.25, %v4454_v37  ;;  %v8978_v11 = vpop.f32.mrb[159].mxu1  ;;  %v4505_v35 = vsel %vm782_vm8, %v13056_v22, -inf }
0x1160   :  { %4506 = vmax.xlane.f32.xlu1 %v4505_v35 }
0x1161   :  { %v13061_v28 = vadd.f32 %v12993_v41, %v4482_v63 }
0x1162   :  { %v4459_v29 = vpop.f32.mrb[160].mxu1 }
0x1163   :  { %v4483_v3 = vmul.f32 0.25, %v4459_v29  ;;  %v8981_v56 = vpop.f32.mrb[161].mxu1  ;;  %v4508_v54 = vsel %vm782_vm8, %v13061_v28, -inf }
0x1164   :  { %4509 = vmax.xlane.f32.xlu0 %v4508_v54 }
0x1165   :  { %v13066_v47 = vadd.f32 %v13003_v40, %v4483_v3 }
0x1166   :  { %v4464_v14 = vpop.f32.mrb[162].mxu1 }
0x1167   :  { %v4484_v20 = vmul.f32 0.25, %v4464_v14  ;;  %v8984_v8 = vpop.f32.mrb[163].mxu1  ;;  %v4511_v21 = vsel %vm782_vm8, %v13066_v47, -inf }
0x1168   :  { %4512 = vmax.xlane.f32.xlu1 %v4511_v21 }
0x1169   :  { %v13071_v44 = vadd.f32 %v13013_v36, %v4484_v20 }
0x116a   :  { %v4469_v52 = vpop.f32.mrb[164].mxu1 }
0x116b   :  { %v4485_v17 = vmul.f32 0.25, %v4469_v52  ;;  %v8987_v23 = vpop.f32.mrb[165].mxu1  ;;  %v4514_v4 = vsel %vm782_vm8, %v13071_v44, -inf }
0x116c   :  { %4515 = vmax.xlane.f32.xlu0 %v4514_v4 }
0x116d   :  { %v13076_v1 = vadd.f32 %v13023_v55, %v4485_v17 }
0x116e   :  { %v4474_v18 = vpop.f32.mrb[166].mxu1 }
0x116f   :  { %v4486_v32 = vmul.f32 0.25, %v4474_v18  ;;  %v8990_v33 = vpop.f32.mrb[167].mxu1  ;;  %v4517_v45 = vsel %vm782_vm8, %v13076_v1, -inf }
0x1170   :  { %4518 = vmax.xlane.f32.xlu1 %v4517_v45 }
0x1171   :  { %v13081_v10 = vadd.f32 %v13033_v5, %v4486_v32 }
0x1172   :  { %v4969_v57 = vpop.f32.mrb[168].mxu1 }
0x1173   :  { %v5013_v30 = vmul.f32 0.25, %v4969_v57  ;;  %v9056_v46 = vpop.f32.mrb[169].mxu1  ;;  %v4520_v37 = vsel %vm782_vm8, %v13081_v10, -inf }
0x1174   :  { %4521 = vmax.xlane.f32.xlu0 %v4520_v37 }
0x1175   :  { %v13086_v63 = vadd.f32 %v12953_v16, %v5013_v30 }
0x1176   :  { %v4974_v11 = vpop.f32.mrb[170].mxu1 }
0x1177   :  { %v5014_v35 = vmul.f32 0.25, %v4974_v11  ;;  %v9059_v29 = vpop.f32.mrb[171].mxu1  ;;  %v5031_v3 = vsel %vm782_vm8, %v13086_v63, -inf }
0x1178   :  { %5032 = vmax.xlane.f32.xlu1 %v5031_v3 }
0x1179   :  { %v13091_v56 = vadd.f32 %v12963_v7, %v5014_v35 }
0x117a   :  { %v4979_v54 = vpop.f32.mrb[172].mxu1 }
0x117b   :  { %v5015_v14 = vmul.f32 0.25, %v4979_v54  ;;  %v9062_v20 = vpop.f32.mrb[173].mxu1  ;;  %v5034_v8 = vsel %vm782_vm8, %v13091_v56, -inf }
0x117c   :  { %5035 = vmax.xlane.f32.xlu0 %v5034_v8 }
0x117d   :  { %v13096_v21 = vadd.f32 %v12973_v25, %v5015_v14 }
0x117e   :  { %v4984_v52 = vpop.f32.mrb[174].mxu1 }
0x117f   :  { %v5016_v17 = vmul.f32 0.25, %v4984_v52  ;;  %v9065_v23 = vpop.f32.mrb[175].mxu1  ;;  %v5037_v4 = vsel %vm782_vm8, %v13096_v21, -inf }
0x1180   :  { %5038 = vmax.xlane.f32.xlu1 %v5037_v4 }
0x1181   :  { %v13101_v18 = vadd.f32 %v12983_v9, %v5016_v17 }
0x1182   :  { %v4989_v32 = vpop.f32.mrb[176].mxu1 }
0x1183   :  { %v5017_v33 = vmul.f32 0.25, %v4989_v32  ;;  %v9068_v45 = vpop.f32.mrb[177].mxu1  ;;  %v5040_v57 = vsel %vm782_vm8, %v13101_v18, -inf }
0x1184   :  { %5041 = vmax.xlane.f32.xlu0 %v5040_v57 }
0x1185   :  { %v13106_v30 = vadd.f32 %v12993_v41, %v5017_v33 }
0x1186   :  { %v4994_v46 = vpop.f32.mrb[178].mxu1 }
0x1187   :  { %v5018_v37 = vmul.f32 0.25, %v4994_v46  ;;  %v9071_v11 = vpop.f32.mrb[179].mxu1  ;;  %v5043_v35 = vsel %vm782_vm8, %v13106_v30, -inf }
0x1188   :  { %5044 = vmax.xlane.f32.xlu0 %v5043_v35 }
0x1189   :  { %v13111_v29 = vadd.f32 %v13003_v40, %v5018_v37 }
0x118a   :  { %v4999_v3 = vpop.f32.mrb[180].mxu1 }
0x118b   :  { %v5019_v54 = vmul.f32 0.25, %v4999_v3  ;;  %v9074_v14 = vpop.f32.mrb[181].mxu1  ;;  %v5046_v20 = vsel %vm782_vm8, %v13111_v29, -inf }
0x118c   :  { %5047 = vmax.xlane.f32.xlu0 %v5046_v20 }
0x118d   :  { %v13116_v8 = vadd.f32 %v13013_v36, %v5019_v54 }
0x118e   :  { %v5004_v52 = vpop.f32.mrb[182].mxu1 }
0x118f   :  { %v5020_v17 = vmul.f32 0.25, %v5004_v52  ;;  %v9077_v23 = vpop.f32.mrb[183].mxu1  ;;  %v5049_v4 = vsel %vm782_vm8, %v13116_v8, -inf }
0x1190   :  { %5050 = vmax.xlane.f32.xlu1 %v5049_v4 }
0x1191   :  { %v13121_v32 = vadd.f32 %v13023_v55, %v5020_v17 }
0x1192   :  { %v5009_v33 = vpop.f32.mrb[184].mxu1 }
0x1193   :  { %v5021_v45 = vmul.f32 0.25, %v5009_v33  ;;  %v9080_v57 = vpop.f32.mrb[185].mxu1  ;;  %v5052_v46 = vsel %vm782_vm8, %v13121_v32, -inf }
0x1194   :  { %5053 = vmax.xlane.f32.xlu0 %v5052_v46  ;;  %v13140_v46 = vpop.permute.xlu1 %9770 }
0x1195   :  { %v13126_v37 = vadd.f32 %v13033_v5, %v5021_v45 }
0x1196   :  { %v5468_v11 = vpop.f32.mrb[186].mxu1 }
0x1197   :  { %v5512_v35 = vmul.f32 0.25, %v5468_v11  ;;  %v9146_v3 = vpop.f32.mrb[187].mxu1  ;;  %v5055_v54 = vsel %vm782_vm8, %v13126_v37, -inf }
0x1198   :  { %5056 = vmax.xlane.f32.xlu1 %v5055_v54 }
0x1199   :  { %v13131_v14 = vadd.f32 %v12953_v16, %v5512_v35 }
0x119a   :  { %v5473_v20 = vpop.f32.mrb[188].mxu1 }
0x119b   :  { %v5513_v52 = vmul.f32 0.25, %v5473_v20  ;;  %v9149_v17 = vpop.f32.mrb[189].mxu1  ;;  %v5530_v23 = vsel %vm782_vm8, %v13131_v14, -inf }
0x119c   :  { %5531 = vmax.xlane.f32.xlu0 %v5530_v23 }
0x119d   :  { %v13136_v5 = vadd.f32 %v12963_v7, %v5513_v52  ;;  %v13150_v52 = vpop.permute.xlu1 %9775 }
0x119e   :  { %v5478_v4 = vpop.f32.mrb[190].mxu1 }
0x119f   :  { %v5514_v33 = vmul.f32 0.25, %v5478_v4  ;;  %v9152_v45 = vpop.f32.mrb[191].mxu1  ;;  %v5533_v57 = vsel %vm782_vm8, %v13136_v5, -inf }
0x11a0   :  { %5534 = vmax.xlane.f32.xlu0 %v5533_v57 }
0x11a1   :  { %v13143_v16 = vadd.f32 %v12973_v25, %v5514_v33 }
0x11a2   :  { %v5483_v11 = vpop.f32.mrb[192].mxu1 }
0x11a3   :  { %v5515_v35 = vmul.f32 0.25, %v5483_v11  ;;  %v9155_v3 = vpop.f32.mrb[193].mxu1  ;;  %v5536_v54 = vsel %vm782_vm8, %v13143_v16, -inf }
0x11a4   :  { %5537 = vmax.xlane.f32.xlu1 %v5536_v54 }
0x11a5   :  { %v13148_v7 = vadd.f32 %v12983_v9, %v5515_v35  ;;  %v13159_v9 = vpop.permute.xlu1 %9780 }
0x11a6   :  { %v5488_v20 = vpop.f32.mrb[194].mxu1 }
0x11a7   :  { %v5516_v17 = vmul.f32 0.25, %v5488_v20  ;;  %v9158_v23 = vpop.f32.mrb[195].mxu1  ;;  %v5539_v4 = vsel %vm782_vm8, %v13148_v7, -inf }
0x11a8   :  { %5540 = vmax.xlane.f32.xlu0 %v5539_v4 }
0x11a9   :  { %v13155_v25 = vadd.f32 %v12993_v41, %v5516_v17  ;;  %v13169_v4 = vpop.permute.xlu1 %9785 }
0x11aa   :  { %v5493_v33 = vpop.f32.mrb[196].mxu1 }
0x11ab   :  { %v5517_v45 = vmul.f32 0.25, %v5493_v33  ;;  %v9161_v57 = vpop.f32.mrb[197].mxu1  ;;  %v5542_v11 = vsel %vm782_vm8, %v13155_v25, -inf }
0x11ac   :  { %5543 = vmax.xlane.f32.xlu0 %v5542_v11 }
0x11ad   :  { %v13162_v35 = vadd.f32 %v13003_v40, %v5517_v45 }
0x11ae   :  { %v5498_v3 = vpop.f32.mrb[198].mxu1 }
0x11af   :  { %v5518_v54 = vmul.f32 0.25, %v5498_v3  ;;  %v9164_v20 = vpop.f32.mrb[199].mxu1  ;;  %v5545_v23 = vsel %vm782_vm8, %v13162_v35, -inf }
0x11b0   :  { %5546 = vmax.xlane.f32.xlu0 %v5545_v23 }
0x11b1   :  { %v13167_v41 = vadd.f32 %v13013_v36, %v5518_v54  ;;  %v13180_v36 = vpop.permute.xlu1 %4611 }
0x11b2   :  { %v5503_v17 = vpop.f32.mrb[200].mxu1 }
0x11b3   :  { %v5519_v33 = vmul.f32 0.25, %v5503_v17  ;;  %v9167_v57 = vpop.f32.mrb[201].mxu1  ;;  %v5548_v11 = vsel %vm782_vm8, %v13167_v41, -inf }
0x11b4   :  { %5549 = vmax.xlane.f32.xlu0 %v5548_v11 }
0x11b5   :  { %v13174_v40 = vadd.f32 %v13023_v55, %v5519_v33 }
0x11b6   :  { %v13176_v45 = vpop.f32.mrb[202].mxu1 }
0x11b7   :  { %v9170_v3 = vpop.f32.mrb[203].mxu1  ;;  %v5551_v20 = vsel %vm782_vm8, %v13174_v40, -inf }
0x11b8   :  { %5552 = vmax.xlane.f32.xlu0 %v5551_v20 }
0x11bd   :  { %v4008_v54 = vpop.xlane.xlu1 %4007 }
0x11be   :  { %v4033_v23 = vsub.f32 %v12956_v42, %v4008_v54 }
0x11c0   :  { %v4042_v17 = vmul.f32 1.442695, %v4033_v23 }
0x11c1   :  { %v4011_v57 = vpop.xlane.xlu0 %4010 }
0x11c2   :  { %10243 = vpow2.f32 %v4042_v17  ;;  %v4034_v11 = vsub.f32 %v12966_v26, %v4011_v57 }
0x11c4   :  { %v4044_v12 = vmul.f32 1.442695, %v4034_v11 }
0x11c5   :  { %v4014_v55 = vpop.xlane.xlu0 %4013 }
0x11c6   :  { %10245 = vpow2.f32 %v4044_v12  ;;  %v4035_v33 = vsub.f32 %v12976_v48, %v4014_v55 }
0x11c8   :  { %v4046_v3 = vmul.f32 1.442695, %v4035_v33 }
0x11c9   :  { %v4017_v61 = vpop.xlane.xlu0 %4016 }
0x11ca   :  { %10247 = vpow2.f32 %v4046_v3  ;;  %v4036_v20 = vsub.f32 %v12986_v38, %v4017_v61 }
0x11cc   :  { %v13186_v19 = vpop.eup %10243  ;;  %v4048_v53 = vmul.f32 1.442695, %v4036_v20 }
0x11cd   :  { %v4020_v31 = vpop.xlane.xlu1 %4019  ;;  %v4060_v42 = vsel %vm782_vm8, %v13186_v19, 0.0 }
0x11ce   :  { %10249 = vpow2.f32 %v4048_v53  ;;  %v4037_v26 = vsub.f32 %v12996_v58, %v4020_v31  ;;  %4061 = vadd.xlane.f32.xlu1 %v4060_v42 }
0x11d0   :  { %v13191_v54 = vpop.eup %10245  ;;  %v4050_v12 = vmul.f32 1.442695, %v4037_v26 }
0x11d1   :  { %v4023_v48 = vpop.xlane.xlu0 %4022  ;;  %v4063_v23 = vsel %vm782_vm8, %v13191_v54, 0.0 }
0x11d2   :  { %10251 = vpow2.f32 %v4050_v12  ;;  %v4038_v61 = vsub.f32 %v13006_v39, %v4023_v48  ;;  %4064 = vadd.xlane.f32.xlu1 %v4063_v23 }
0x11d4   :  { %v13196_v38 = vpop.eup %10247  ;;  %v4052_v17 = vmul.f32 1.442695, %v4038_v61 }
0x11d5   :  { %v4026_v57 = vpop.xlane.xlu1 %4025  ;;  %v4066_v53 = vsel %vm782_vm8, %v13196_v38, 0.0 }
0x11d6   :  { %10253 = vpow2.f32 %v4052_v17  ;;  %v4039_v31 = vsub.f32 %v13016_v2, %v4026_v57  ;;  %4067 = vadd.xlane.f32.xlu1 %v4066_v53 }
0x11d8   :  { %v13201_v58 = vpop.eup %10249  ;;  %v4054_v11 = vmul.f32 1.442695, %v4039_v31 }
0x11d9   :  { %v4029_v55 = vpop.xlane.xlu0 %4028  ;;  %v4069_v33 = vsel %vm782_vm8, %v13201_v58, 0.0 }
0x11da   :  { %10255 = vpow2.f32 %v4054_v11  ;;  %v4040_v39 = vsub.f32 %v13026_v60, %v4029_v55  ;;  %4070 = vadd.xlane.f32.xlu1 %v4069_v33 }
0x11dc   :  { %v13206_v3 = vpop.eup %10251  ;;  %v4056_v20 = vmul.f32 1.442695, %v4040_v39 }
0x11dd   :  { %v4032_v42 = vpop.xlane.xlu1 %4031  ;;  %v4072_v26 = vsel %vm782_vm8, %v13206_v3, 0.0 }
0x11de   :  { %10257 = vpow2.f32 %v4056_v20  ;;  %v4041_v2 = vsub.f32 %v13036_v59, %v4032_v42  ;;  %4073 = vadd.xlane.f32.xlu1 %v4072_v26 }
0x11e0   :  { %v13211_v12 = vpop.eup %10253  ;;  %v4058_v48 = vmul.f32 1.442695, %v4041_v2 }
0x11e1   :  { %v4498_v23 = vpop.xlane.xlu0 %4497  ;;  %v4075_v61 = vsel %vm782_vm8, %v13211_v12, 0.0 }
0x11e2   :  { %10259 = vpow2.f32 %v4058_v48  ;;  %v4523_v60 = vsub.f32 %v13041_v15, %v4498_v23  ;;  %4076 = vadd.xlane.f32.xlu1 %v4075_v61 }
0x11e4   :  { %v13216_v17 = vpop.eup %10255  ;;  %v4532_v57 = vmul.f32 1.442695, %v4523_v60 }
0x11e5   :  { %v4501_v53 = vpop.xlane.xlu1 %4500  ;;  %v4078_v31 = vsel %vm782_vm8, %v13216_v17, 0.0 }
0x11e6   :  { %10261 = vpow2.f32 %v4532_v57  ;;  %v4524_v59 = vsub.f32 %v13046_v0, %v4501_v53  ;;  %4079 = vadd.xlane.f32.xlu1 %v4078_v31 }
0x11e8   :  { %v13221_v11 = vpop.eup %10257  ;;  %v4534_v55 = vmul.f32 1.442695, %v4524_v59 }
0x11e9   :  { %v4504_v33 = vpop.xlane.xlu0 %4503  ;;  %v4081_v39 = vsel %vm782_vm8, %v13221_v11, 0.0 }
0x11ea   :  { %10263 = vpow2.f32 %v4534_v55  ;;  %v4525_v15 = vsub.f32 %v13051_v13, %v4504_v33  ;;  %4082 = vadd.xlane.f32.xlu1 %v4081_v39 }
0x11ec   :  { %v13226_v20 = vpop.eup %10259  ;;  %v4536_v42 = vmul.f32 1.442695, %v4525_v15 }
0x11ed   :  { %v4507_v26 = vpop.xlane.xlu1 %4506  ;;  %v4084_v2 = vsel %vm782_vm8, %v13226_v20, 0.0 }
0x11ee   :  { %10265 = vpow2.f32 %v4536_v42  ;;  %v4526_v0 = vsub.f32 %v13056_v22, %v4507_v26  ;;  %4085 = vadd.xlane.f32.xlu1 %v4084_v2 }
0x11f0   :  { %v13231_v48 = vpop.eup %10261  ;;  %v4538_v23 = vmul.f32 1.442695, %v4526_v0 }
0x11f1   :  { %v4510_v61 = vpop.xlane.xlu0 %4509  ;;  %v4550_v60 = vsel %vm782_vm8, %v13231_v48, 0.0 }
0x11f2   :  { %10267 = vpow2.f32 %v4538_v23  ;;  %v4527_v13 = vsub.f32 %v13061_v28, %v4510_v61  ;;  %4551 = vadd.xlane.f32.xlu1 %v4550_v60 }
0x11f4   :  { %v13236_v57 = vpop.eup %10263  ;;  %v4540_v53 = vmul.f32 1.442695, %v4527_v13 }
0x11f5   :  { %v4513_v31 = vpop.xlane.xlu1 %4512  ;;  %v4553_v59 = vsel %vm782_vm8, %v13236_v57, 0.0 }
0x11f6   :  { %10269 = vpow2.f32 %v4540_v53  ;;  %v4528_v22 = vsub.f32 %v13066_v47, %v4513_v31  ;;  %4554 = vadd.xlane.f32.xlu1 %v4553_v59  ;;  %v10486_v31 = vld [vmem:[#allocation2 + $0x38] sm:$0xff]  ;;  %v10487_v59 = vld [vmem:[#allocation2 + $0x28] sm:$0xff] }
0x11f8   :  { %v13241_v55 = vpop.eup %10265  ;;  %v4542_v33 = vmul.f32 1.442695, %v4528_v22  ;;  %v9794_v22 = vpack.i.bf16 %v10486_v31, %v10487_v59 }
0x11f9   :  { %v4516_v39 = vpop.xlane.xlu0 %4515  ;;  %v4556_v15 = vsel %vm782_vm8, %v13241_v55, 0.0 }
0x11fa   :  { %10271 = vpow2.f32 %v4542_v33  ;;  %v4529_v28 = vsub.f32 %v13071_v44, %v4516_v39  ;;  %4557 = vadd.xlane.f32.xlu1 %v4556_v15 }
0x11fc   :  { %v13246_v42 = vpop.eup %10267  ;;  %v4544_v26 = vmul.f32 1.442695, %v4529_v28 }
0x11fd   :  { %v4519_v2 = vpop.xlane.xlu1 %4518  ;;  %v4559_v0 = vsel %vm782_vm8, %v13246_v42, 0.0 }
0x11fe   :  { %10273 = vpow2.f32 %v4544_v26  ;;  %v4530_v47 = vsub.f32 %v13076_v1, %v4519_v2  ;;  %4560 = vadd.xlane.f32.xlu0 %v4559_v0  ;;  %v10488_v2 = vld [vmem:[#allocation2 + $0x18] sm:$0xff]  ;;  %v10489_v0 = vld [vmem:[#allocation2 + $0x8] sm:$0xff] }
0x1200   :  { %v13251_v23 = vpop.eup %10269  ;;  %v4546_v61 = vmul.f32 1.442695, %v4530_v47  ;;  %v9789_v47 = vpack.i.bf16 %v10488_v2, %v10489_v0 }
0x1201   :  { %v4562_v60 = vsel %vm782_vm8, %v13251_v23, 0.0  ;;  %v4522_v15 = vpop.xlane.xlu0 %4521 }
0x1202   :  { %10275 = vpow2.f32 %v4546_v61  ;;  %4563 = vadd.xlane.f32.xlu0 %v4562_v60  ;;  %v4531_v28 = vsub.f32 %v13081_v10, %v4522_v15 }
0x1204   :  { %v13255_v44 = vpop.eup %10271  ;;  %v4548_v26 = vmul.f32 1.442695, %v4531_v28 }
0x1205   :  { %v4565_v13 = vsel %vm782_vm8, %v13255_v44, 0.0  ;;  %v5033_v60 = vpop.xlane.xlu1 %5032 }
0x1206   :  { %4566 = vadd.xlane.f32.xlu0 %v4565_v13  ;;  %10277 = vpow2.f32 %v4548_v26  ;;  %v5058_v31 = vsub.f32 %v13086_v63, %v5033_v60 }
0x1208   :  { %v13259_v53 = vpop.eup %10273 }
0x1209   :  { %v4568_v1 = vsel %vm782_vm8, %v13259_v53, 0.0  ;;  %v5036_v61 = vpop.xlane.xlu0 %5035 }
0x120a   :  { %4569 = vadd.xlane.f32.xlu0 %v4568_v1  ;;  %v5059_v10 = vsub.f32 %v13091_v56, %v5036_v61 }
0x120b   :  { %9795 = vrot.lane.b32.xlu1 %v9794_v22, %s10530_s30  ;;  %v5067_v22 = vmul.f32 1.442695, %v5058_v31  ;;  %v10490_v31 = vld [vmem:[#allocation2 + $0x58] sm:$0xff] }
0x120c   :  { %v13264_v33 = vpop.eup %10275  ;;  %v5069_v28 = vmul.f32 1.442695, %v5059_v10  ;;  %v9799_v56 = vpack.i.bf16 %v10490_v31, %v10491_v27 }
0x120d   :  { %v4571_v39 = vsel %vm782_vm8, %v13264_v33, 0.0  ;;  %10279 = vpow2.f32 %v5067_v22 }
0x120e   :  { %4572 = vadd.xlane.f32.xlu0 %v4571_v39  ;;  %v5039_v39 = vpop.xlane.xlu1 %5038  ;;  %10281 = vpow2.f32 %v5069_v28 }
0x120f   :  { %v5060_v26 = vsub.f32 %v13096_v21, %v5039_v39 }
0x1210   :  { %v13270_v13 = vpop.eup %10277 }
0x1211   :  { %v5042_v1 = vpop.xlane.xlu0 %5041  ;;  %v4574_v59 = vsel %vm782_vm8, %v13270_v13, 0.0  ;;  %v5071_v0 = vmul.f32 1.442695, %v5060_v26 }
0x1213   :  { %10283 = vpow2.f32 %v5071_v0 }
0x1215   :  { %v5045_v15 = vpop.xlane.xlu0 %5044 }
0x1216   :  { %v5062_v60 = vsub.f32 %v13106_v30, %v5045_v15 }
0x1217   :  { %v13279_v61 = vpop.eup %10279 }
0x1218   :  { %v5075_v21 = vmul.f32 1.442695, %v5062_v60 }
0x1219   :  { %v5048_v2 = vpop.xlane.xlu0 %5047 }
0x121a   :  { %v5063_v10 = vsub.f32 %v13111_v29, %v5048_v2 }
0x121c   :  { %v5077_v30 = vmul.f32 1.442695, %v5063_v10 }
0x1221   :  { %v5054_v43 = vpop.xlane.xlu0 %5053 }
0x1224   :  { %9790 = vrot.lane.b32.xlu0 %v9789_v47, %s10530_s30  ;;  %v5061_v47 = vsub.f32 %v13101_v18, %v5042_v1  ;;  %v5085_v18 = vsel %vm782_vm8, %v13279_v61, 0.0  ;;  %v13285_v1 = vpop.eup %10281 }
0x1225   :  { %v5088_v28 = vsel %vm782_vm8, %v13285_v1, 0.0  ;;  %v13290_v26 = vpop.eup %10283 }
0x1226   :  { %v5073_v63 = vmul.f32 1.442695, %v5061_v47  ;;  %v5091_v0 = vsel %vm782_vm8, %v13290_v26, 0.0 }
0x1228   :  { %10285 = vpow2.f32 %v5073_v63 }
0x1229   :  { %v5532_v22 = vpop.xlane.xlu0 %5531  ;;  %10287 = vpow2.f32 %v5075_v21 }
0x122a   :  { %10289 = vpow2.f32 %v5077_v30 }
0x122d   :  { %v5535_v15 = vpop.xlane.xlu0 %5534 }
0x122e   :  { %v5558_v2 = vsub.f32 %v13136_v5, %v5535_v15  ;;  %v5065_v5 = vsub.f32 %v13121_v32, %v5054_v43 }
0x122f   :  { %4575 = vadd.xlane.f32.xlu1 %v4574_v59  ;;  %v5051_v59 = vpop.xlane.xlu1 %5050 }
0x1230   :  { %v5568_v63 = vmul.f32 1.442695, %v5558_v2 }
0x1232   :  { %v13295_v47 = vpop.eup %10285 }
0x1233   :  { %v5057_v39 = vpop.xlane.xlu1 %5056  ;;  %v5094_v60 = vsel %vm782_vm8, %v13295_v47, 0.0  ;;  %v13300_v31 = vpop.eup %10287 }
0x1234   :  { %v5066_v27 = vsub.f32 %v13126_v37, %v5057_v39  ;;  %v5064_v37 = vsub.f32 %v13116_v8, %v5051_v59  ;;  %v5097_v21 = vsel %vm782_vm8, %v13300_v31, 0.0  ;;  %v13305_v10 = vpop.eup %10289  ;;  %v5081_v39 = vmul.f32 1.442695, %v5065_v5 }
0x1235   :  { %v5557_v8 = vsub.f32 %v13131_v14, %v5532_v22  ;;  %v5100_v59 = vsel %vm782_vm8, %v13305_v10, 0.0  ;;  %v9773_v5 = vunpack.i.h.bf16 %v13140_v46 }
0x1236   :  { %v5083_v29 = vmul.f32 1.442695, %v5066_v27 }
0x1237   :  { %v5538_v30 = vpop.xlane.xlu1 %5537  ;;  %v5566_v27 = vmul.f32 1.442695, %v5557_v8 }
0x1238   :  { %10291 = vpow2.f32 %v5083_v29  ;;  %v5559_v43 = vsub.f32 %v13143_v16, %v5538_v30 }
0x1239   :  { %10293 = vpow2.f32 %v5568_v63 }
0x123a   :  { %v5570_v14 = vmul.f32 1.442695, %v5559_v43  ;;  %v9778_v43 = vunpack.i.h.bf16 %v13150_v52 }
0x1240   :  { %9800 = vrot.lane.b32.xlu1 %v9799_v56, %s10530_s30  ;;  %v5079_v56 = vmul.f32 1.442695, %v5064_v37 }
0x1242   :  { %10295 = vpow2.f32 %v5079_v56 }
0x1243   :  { %5086 = vadd.xlane.f32.xlu0 %v5085_v18  ;;  %v13310_v18 = vpop.eup %10291  ;;  %10297 = vpow2.f32 %v5081_v39 }
0x1244   :  { %v5109_v32 = vsel %vm782_vm8, %v13310_v18, 0.0  ;;  %v13315_v15 = vpop.eup %10293 }
0x1245   :  { %v5587_v2 = vsel %vm782_vm8, %v13315_v15, 0.0 }
0x1247   :  { %5089 = vadd.xlane.f32.xlu0 %v5088_v28  ;;  %v5541_v28 = vpop.xlane.xlu0 %5540 }
0x1248   :  { %v5560_v22 = vsub.f32 %v13148_v7, %v5541_v28  ;;  %v9772_v7 = vunpack.i.l.bf16 %v13140_v46 }
0x124a   :  { %v5572_v16 = vmul.f32 1.442695, %v5560_v22  ;;  %v9783_v22 = vunpack.i.h.bf16 %v13159_v9 }
0x124b   :  { %5092 = vadd.xlane.f32.xlu0 %v5091_v0 }
0x124c   :  { %v13320_v63 = vpop.eup %10295 }
0x124d   :  { %v13324_v56 = vpop.eup %10297 }
0x124f   :  { %5095 = vadd.xlane.f32.xlu0 %v5094_v60  ;;  %v5103_v60 = vsel %vm782_vm8, %v13320_v63, 0.0 }
0x1253   :  { %5098 = vadd.xlane.f32.xlu0 %v5097_v21 }
0x1257   :  { %5101 = vadd.xlane.f32.xlu0 %v5100_v59  ;;  %v5106_v59 = vsel %vm782_vm8, %v13324_v56, 0.0 }
0x125b   :  { %v4062_v29 = vpop.xlane.xlu1 %4061  ;;  %5110 = vadd.xlane.f32.xlu0 %v5109_v32  ;;  %v9777_v32 = vunpack.i.l.bf16 %v13150_v52 }
0x125c   :  { %10299 = vrcp.f32 %v4062_v29 }
0x125d   :  { %10301 = vpow2.f32 %v5566_v27  ;;  %v9401_v27 = vpack.c.bf16 %v9773_v5, %v9772_v7  ;;  %v9404_v52 = vpack.c.bf16 %v9778_v43, %v9777_v32  ;;  %v9788_v5 = vunpack.i.h.bf16 %v13169_v4  ;;  %v5544_v32 = vpop.xlane.xlu0 %5543 }
0x125e   :  { %v9787_v7 = vunpack.i.l.bf16 %v13169_v4 }
0x125f   :  { %v4065_v0 = vpop.xlane.xlu1 %4064  ;;  %5588 = vadd.xlane.f32.xlu0 %v5587_v2  ;;  %v9782_v2 = vunpack.i.l.bf16 %v13159_v9 }
0x1260   :  { %10303 = vrcp.f32 %v4065_v0  ;;  %v9410_v43 = vpack.c.bf16 %v9788_v5, %v9787_v7  ;;  %v10494_v5 = vld [vmem:[#allocation2 + $0x88] sm:$0xff] }
0x1261   :  { %10305 = vpow2.f32 %v5570_v14  ;;  %v9407_v9 = vpack.c.bf16 %v9783_v22, %v9782_v2 }
0x1263   :  { %v4068_v37 = vpop.xlane.xlu1 %4067 }
0x1264   :  { %10307 = vrcp.f32 %v4068_v37  ;;  %5104 = vadd.xlane.f32.xlu1 %v5103_v60 }
0x1265   :  { %10309 = vpow2.f32 %v5572_v16 }
0x1266   :  { %v10300_v21 = vpop.eup %10299 }
0x1267   :  { %v4088_v39 = vmul.f32 %v10300_v21, %v13186_v19  ;;  %v4071_v8 = vpop.xlane.xlu1 %4070  ;;  %v13331_v30 = vpop.eup %10301 }
0x1268   :  { %10311 = vrcp.f32 %v4071_v8  ;;  %5107 = vadd.xlane.f32.xlu1 %v5106_v59  ;;  %v5584_v28 = vsel %vm782_vm8, %v13331_v30, 0.0  ;;  %v10492_v59 = vld [vmem:[#allocation2 + $0x78] sm:$0xff] }
0x1269   :  { %8920 = vmatmul.mubr.msk.f32.vlgmr.msra.gmra.mrb[112].mxu0 %vm782_vm8, %v4088_v39 }
0x126a   :  { %v10304_v46 = vpop.eup %10303  ;;  %9402 = vmatpush3.bf16.msra.mxu0 %v9401_v27  ;;  %8922 = vmatprep.mubr.msk.f32.mxu0 %vm10528_vm5, %v14530_v34  ;;  %v10493_v27 = vld [vmem:[#allocation2 + $0x68] sm:$0xff] }
0x126b   :  { %v4074_v19 = vpop.xlane.xlu1 %4073  ;;  %9403 = vmatprep.subr.bf16.mxu0 %v14531_v24  ;;  %v4090_v29 = vmul.f32 %v10304_v46, %v13191_v54  ;;  %v13342_v14 = vpop.eup %10305  ;;  %v9804_v4 = vpack.i.bf16 %v10492_v59, %v10493_v27 }
0x126c   :  { %10313 = vrcp.f32 %v4074_v19  ;;  %5585 = vadd.xlane.f32.xlu1 %v5584_v28  ;;  %v5590_v54 = vsel %vm782_vm8, %v13342_v14, 0.0 }
0x126d   :  { %8923 = vmatmul.mubr.msk.f32.gmra.mrb[114].mxu0 %vm782_vm8, %v4090_v29  ;;  %v5547_v29 = vpop.xlane.xlu0 %5546 }
0x126e   :  { %v10308_v0 = vpop.eup %10307  ;;  %9405 = vmatpush3.bf16.msra.mxu0 %v9404_v52  ;;  %8925 = vmatprep.mubr.msk.f32.mxu0 %vm10528_vm5, %v14530_v34 }
0x126f   :  { %v4077_v16 = vpop.xlane.xlu1 %4076  ;;  %9406 = vmatprep.subr.bf16.mxu0 %v14531_v24  ;;  %v4092_v37 = vmul.f32 %v10308_v0, %v13196_v38  ;;  %v13353_v60 = vpop.eup %10309 }
0x1270   :  { %10315 = vrcp.f32 %v4077_v16  ;;  %5591 = vadd.xlane.f32.xlu1 %v5590_v54  ;;  %v5593_v38 = vsel %vm782_vm8, %v13353_v60, 0.0 }
0x1271   :  { %8926 = vmatmul.mubr.msk.f32.gmra.mrb[116].mxu0 %vm782_vm8, %v4092_v37  ;;  %v5550_v16 = vpop.xlane.xlu0 %5549  ;;  %v5562_v37 = vsub.f32 %v13162_v35, %v5547_v29 }
0x1272   :  { %v10312_v21 = vpop.eup %10311  ;;  %9408 = vmatpush3.bf16.msra.mxu0 %v9407_v9  ;;  %8928 = vmatprep.mubr.msk.f32.mxu0 %vm10528_vm5, %v14530_v34 }
0x1273   :  { %v4080_v39 = vpop.xlane.xlu1 %4079  ;;  %9409 = vmatprep.subr.bf16.mxu0 %v14531_v24  ;;  %v4094_v8 = vmul.f32 %v10312_v21, %v13201_v58  ;;  %v5576_v7 = vmul.f32 1.442695, %v5562_v37  ;;  %v5563_v21 = vsub.f32 %v13167_v41, %v5550_v16 }
0x1274   :  { %10317 = vrcp.f32 %v4080_v39  ;;  %5594 = vadd.xlane.f32.xlu1 %v5593_v38 }
0x1275   :  { %8929 = vmatmul.mubr.msk.f32.gmra.mrb[118].mxu0 %vm782_vm8, %v4094_v8  ;;  %9805 = vrot.lane.b32.xlu0 %v9804_v4, %s10530_s30  ;;  %v5553_v35 = vpop.xlane.xlu0 %5552  ;;  %v5578_v59 = vmul.f32 1.442695, %v5563_v21 }
0x1276   :  { %v10314_v46 = vpop.eup %10313  ;;  %9411 = vmatpush3.bf16.msra.mxu0 %v9410_v43  ;;  %8931 = vmatprep.mubr.msk.f32.mxu0 %vm10528_vm5, %v14530_v34  ;;  %v5564_v27 = vsub.f32 %v13174_v40, %v5553_v35  ;;  %v4813_v43 = vld [vmem:[#allocation2 + $0x8] sm:$0xff] }
0x1277   :  { %v4083_v19 = vpop.xlane.xlu1 %4082  ;;  %9007 = vmatprep.subr.mxu0 %v14530_v34  ;;  %v4096_v58 = vmul.f32 %v10314_v46, %v13206_v3  ;;  %v5561_v3 = vsub.f32 %v13155_v25, %v5544_v32 }
0x1278   :  { %10319 = vrcp.f32 %v4083_v19  ;;  %v5580_v19 = vmul.f32 1.442695, %v5564_v27 }
0x1279   :  { %8932 = vmatmul.mubr.msk.f32.gmra.mrb[120].mxu0 %vm782_vm8, %v4096_v58 }
0x127a   :  { %v10316_v28 = vpop.eup %10315  ;;  %9008 = vmatpush3.msra.mxu0 %v13180_v36  ;;  %8934 = vmatprep.mubr.msk.f32.mxu0 %vm10528_vm5, %v14530_v34 }
0x127b   :  { %v4086_v52 = vpop.xlane.xlu1 %4085  ;;  %v4098_v22 = vmul.f32 %v10316_v28, %v13211_v12  ;;  %9428 = vmatprep.subr.bf16.mxu0 %v14531_v24  ;;  %v5574_v12 = vmul.f32 1.442695, %v5561_v3 }
0x127c   :  { %10321 = vrcp.f32 %v4086_v52  ;;  %v4818_v52 = vld [vmem:[#allocation2 + $0x58] sm:$0xff] }
0x127d   :  { %8935 = vmatmul.mubr.msk.f32.gmra.mrb[122].mxu0 %vm782_vm8, %v4098_v22 }
0x127e   :  { %v10318_v2 = vpop.eup %10317  ;;  %8937 = vmatprep.mubr.msk.f32.mxu0 %vm10528_vm5, %v14530_v34 }
0x127f   :  { %v4552_v0 = vpop.xlane.xlu1 %4551  ;;  %v4100_v36 = vmul.f32 %v10318_v2, %v13216_v17 }
0x1280   :  { %10323 = vrcp.f32 %v4552_v0  ;;  %v4817_v0 = vld [vmem:[#allocation2 + $0x48] sm:$0xff] }
0x1281   :  { %8938 = vmatmul.mubr.msk.f32.gmra.mrb[124].mxu0 %vm782_vm8, %v4100_v36  ;;  %v9435_v16 = vpack.c.bf16 %v4818_v52, %v4817_v0 }
0x1282   :  { %v10320_v54 = vpop.eup %10319  ;;  %8940 = vmatprep.mubr.msk.f32.mxu0 %vm10528_vm5, %v14530_v34 }
0x1283   :  { %v4555_v9 = vpop.xlane.xlu1 %4554  ;;  %v4102_v25 = vmul.f32 %v10320_v54, %v13221_v11  ;;  %v4814_v11 = vld [vmem:[#allocation2 + $0x18] sm:$0xff] }
0x1284   :  { %10325 = vrcp.f32 %v4555_v9  ;;  %v9429_v32 = vpack.c.bf16 %v4814_v11, %v4813_v43  ;;  %v4820_v54 = vld [vmem:[#allocation2 + $0x78] sm:$0xff] }
0x1285   :  { %8941 = vmatmul.mubr.msk.f32.gmra.mrb[126].mxu0 %vm782_vm8, %v4102_v25  ;;  %5645 = vrot.lane.b32.xlu1 %v10494_v5, %s10530_s30  ;;  %10327 = vpow2.f32 %v5574_v12  ;;  %v4819_v25 = vld [vmem:[#allocation2 + $0x68] sm:$0xff] }
0x1286   :  { %v10322_v17 = vpop.eup %10321  ;;  %8943 = vmatprep.mubr.msk.f32.mxu0 %vm10528_vm5, %v14530_v34 }
0x1287   :  { %v4558_v39 = vpop.xlane.xlu1 %4557  ;;  %v4104_v38 = vmul.f32 %v10322_v17, %v13226_v20  ;;  %v4816_v20 = vld [vmem:[#allocation2 + $0x38] sm:$0xff]  ;;  %v9438_v17 = vpack.c.bf16 %v4820_v54, %v4819_v25 }
0x1288   :  { %10329 = vrcp.f32 %v4558_v39 }
0x1289   :  { %8944 = vmatmul.mubr.msk.f32.gmra.mrb[128].mxu0 %vm782_vm8, %v4104_v38  ;;  %10331 = vpow2.f32 %v5576_v7  ;;  %v4821_v38 = vld [vmem:[#allocation2 + $0x88] sm:$0xff] }
0x128a   :  { %v10324_v8 = vpop.eup %10323  ;;  %9009 = vmatprep.mubr.msk.f32.mxu0 %vm10528_vm5, %v14530_v34 }
0x128b   :  { %v4578_v41 = vmul.f32 %v10324_v8, %v13231_v48  ;;  %v4561_v4 = vpop.xlane.xlu0 %4560  ;;  %v4815_v48 = vld [vmem:[#allocation2 + $0x28] sm:$0xff] }
0x128c   :  { %10333 = vrcp.f32 %v4561_v4  ;;  %v9432_v29 = vpack.c.bf16 %v4816_v20, %v4815_v48  ;;  %v10495_v4 = vld [vmem:[%s14483_s1 + $0x80] sm:$0xff] }
0x128d   :  { %9010 = vmatmul.mubr.msk.f32.vlgmr.msra.gmra.mrb[130].mxu0 %vm782_vm8, %v4578_v41  ;;  %10335 = vpow2.f32 %v5578_v59 }
0x128e   :  { %v10326_v46 = vpop.eup %10325  ;;  %9430 = vmatpush3.bf16.msra.mxu0 %v9429_v32  ;;  %9012 = vmatprep.mubr.msk.f32.mxu0 %vm10528_vm5, %v14530_v34 }
0x128f   :  { %v4564_v40 = vpop.xlane.xlu0 %4563  ;;  %9431 = vmatprep.subr.bf16.mxu0 %v14531_v24  ;;  %v4580_v58 = vmul.f32 %v10326_v46, %v13236_v57  ;;  %v13402_v28 = vpop.eup %10327 }
0x1290   :  { %10337 = vrcp.f32 %v4564_v40  ;;  %v5596_v57 = vsel %vm782_vm8, %v13402_v28, 0.0 }
0x1291   :  { %9013 = vmatmul.mubr.msk.f32.gmra.mrb[132].mxu0 %vm782_vm8, %v4580_v58  ;;  %10339 = vpow2.f32 %v5580_v19 }
0x1292   :  { %v10330_v22 = vpop.eup %10329  ;;  %9433 = vmatpush3.bf16.msra.mxu0 %v9432_v29  ;;  %9015 = vmatprep.mubr.msk.f32.mxu0 %vm10528_vm5, %v14530_v34 }
0x1293   :  { %v4567_v2 = vpop.xlane.xlu0 %4566  ;;  %9434 = vmatprep.subr.bf16.mxu0 %v14531_v24  ;;  %v4582_v3 = vmul.f32 %v10330_v22, %v13241_v55  ;;  %v13411_v36 = vpop.eup %10331 }
0x1294   :  { %10341 = vrcp.f32 %v4567_v2  ;;  %5597 = vadd.xlane.f32.xlu0 %v5596_v57  ;;  %v5599_v55 = vsel %vm782_vm8, %v13411_v36, 0.0 }
0x1295   :  { %9016 = vmatmul.mubr.msk.f32.gmra.mrb[134].mxu0 %vm782_vm8, %v4582_v3 }
0x1296   :  { %v10334_v12 = vpop.eup %10333  ;;  %9436 = vmatpush3.bf16.msra.mxu0 %v9435_v16  ;;  %9018 = vmatprep.mubr.msk.f32.mxu0 %vm10528_vm5, %v14530_v34 }
0x1297   :  { %v4570_v37 = vpop.xlane.xlu0 %4569  ;;  %9437 = vmatprep.subr.bf16.mxu0 %v14531_v24  ;;  %v4584_v9 = vmul.f32 %v10334_v12, %v13246_v42  ;;  %v13420_v5 = vpop.eup %10335 }
0x1298   :  { %10343 = vrcp.f32 %v4570_v37  ;;  %5600 = vadd.xlane.f32.xlu0 %v5599_v55  ;;  %v5602_v35 = vsel %vm782_vm8, %v13420_v5, 0.0 }
0x1299   :  { %9019 = vmatmul.mubr.msk.f32.gmra.mrb[136].mxu0 %vm782_vm8, %v4584_v9 }
0x129a   :  { %v10338_v7 = vpop.eup %10337  ;;  %9439 = vmatpush3.bf16.msra.mxu0 %v9438_v17  ;;  %9021 = vmatprep.mubr.msk.f32.mxu0 %vm10528_vm5, %v14530_v34 }
0x129b   :  { %v4573_v21 = vpop.xlane.xlu0 %4572  ;;  %9097 = vmatprep.subr.mxu0 %v14530_v34  ;;  %v4586_v42 = vmul.f32 %v10338_v7, %v13251_v23  ;;  %v13429_v39 = vpop.eup %10339  ;;  %v5520_v23 = vmul.f32 0.25, %v13176_v45 }
0x129c   :  { %10345 = vrcp.f32 %v4573_v21  ;;  %5603 = vadd.xlane.f32.xlu0 %v5602_v35  ;;  %v5605_v8 = vsel %vm782_vm8, %v13429_v39, 0.0 }
0x129d   :  { %9022 = vmatmul.mubr.msk.f32.gmra.mrb[138].mxu0 %vm782_vm8, %v4586_v42  ;;  %v13446_v43 = vadd.f32 %v10495_v4, %v5520_v23 }
0x129e   :  { %v10342_v11 = vpop.eup %10341  ;;  %9098 = vmatpush3.msra.mxu0 %v4821_v38  ;;  %9024 = vmatprep.mubr.msk.f32.mxu0 %vm10528_vm5, %v14530_v34 }
0x129f   :  { %v4588_v59 = vmul.f32 %v10342_v11, %v13255_v44  ;;  %9456 = vmatprep.subr.bf16.mxu0 %v14531_v24  ;;  %v5554_v32 = vsel %vm782_vm8, %v13446_v43, -inf }
0x12a0   :  { %5606 = vadd.xlane.f32.xlu0 %v5605_v8 }
0x12a1   :  { %9025 = vmatmul.mubr.msk.f32.gmra.mrb[140].mxu0 %vm782_vm8, %v4588_v59 }
0x12a2   :  { %v10344_v27 = vpop.eup %10343  ;;  %9027 = vmatprep.mubr.msk.f32.mxu0 %vm10528_vm5, %v14530_v34 }
0x12a3   :  { %v4590_v41 = vmul.f32 %v10344_v27, %v13259_v53  ;;  %v9796_v53 = vpop.permute.xlu1 %9795 }
0x12a4   :  { %v9798_v3 = vunpack.i.h.bf16 %v9796_v53 }
0x12a5   :  { %9028 = vmatmul.mubr.msk.f32.gmra.mrb[142].mxu0 %vm782_vm8, %v4590_v41 }
0x12a6   :  { %v10346_v44 = vpop.eup %10345  ;;  %9030 = vmatprep.mubr.msk.f32.mxu0 %vm10528_vm5, %v14530_v34 }
0x12a7   :  { %v4592_v45 = vmul.f32 %v10346_v44, %v13264_v33  ;;  %v9791_v33 = vpop.permute.xlu0 %9790 }
0x12a8   :  { %v9793_v29 = vunpack.i.h.bf16 %v9791_v33  ;;  %v9792_v52 = vunpack.i.l.bf16 %v9791_v33 }
0x12a9   :  { %9031 = vmatmul.mubr.msk.f32.gmra.mrb[144].mxu0 %vm782_vm8, %v4592_v45  ;;  %5555 = vmax.xlane.f32.xlu1 %v5554_v32 }
0x12aa   :  { %9033 = vmatprep.mubr.msk.f32.mxu0 %vm10528_vm5, %v14530_v34  ;;  %v9457_v0 = vpack.c.bf16 %v9793_v29, %v9792_v52 }
0x12bc   :  { %v4576_v20 = vpop.xlane.xlu1 %4575 }
0x12bd   :  { %10347 = vrcp.f32 %v4576_v20 }
0x12c0   :  { %v9801_v16 = vpop.permute.xlu1 %9800 }
0x12c1   :  { %v9802_v9 = vunpack.i.l.bf16 %v9801_v16 }
0x12c7   :  { %v10348_v46 = vpop.eup %10347 }
0x12c8   :  { %v4594_v19 = vmul.f32 %v10348_v46, %v13270_v13  ;;  %v9797_v13 = vunpack.i.l.bf16 %v9796_v53 }
0x12ca   :  { %9034 = vmatmul.mubr.msk.f32.gmra.mrb[146].mxu0 %vm782_vm8, %v4594_v19  ;;  %v9460_v55 = vpack.c.bf16 %v9798_v3, %v9797_v13 }
0x12cb   :  { %9099 = vmatprep.mubr.msk.f32.mxu0 %vm10528_vm5, %v14530_v34 }
0x12d0   :  { %v5087_v40 = vpop.xlane.xlu0 %5086 }
0x12d1   :  { %10349 = vrcp.f32 %v5087_v40 }
0x12d4   :  { %v5090_v58 = vpop.xlane.xlu0 %5089 }
0x12d5   :  { %10351 = vrcp.f32 %v5090_v58 }
0x12d8   :  { %v5093_v48 = vpop.xlane.xlu0 %5092 }
0x12d9   :  { %10353 = vrcp.f32 %v5093_v48 }
0x12db   :  { %v10350_v22 = vpop.eup %10349 }
0x12dc   :  { %v5113_v2 = vmul.f32 %v10350_v22, %v13279_v61  ;;  %v5096_v57 = vpop.xlane.xlu0 %5095  ;;  %v9803_v61 = vunpack.i.h.bf16 %v9801_v16 }
0x12dd   :  { %10355 = vrcp.f32 %v5096_v57 }
0x12de   :  { %9100 = vmatmul.mubr.msk.f32.vlgmr.msra.gmra.mrb[148].mxu0 %vm782_vm8, %v5113_v2  ;;  %v9463_v21 = vpack.c.bf16 %v9803_v61, %v9802_v9 }
0x12df   :  { %v10352_v54 = vpop.eup %10351  ;;  %9458 = vmatpush3.bf16.msra.mxu0 %v9457_v0  ;;  %9102 = vmatprep.mubr.msk.f32.mxu0 %vm10528_vm5, %v14530_v34 }
0x12e0   :  { %v5099_v12 = vpop.xlane.xlu0 %5098  ;;  %9459 = vmatprep.subr.bf16.mxu0 %v14531_v24  ;;  %v5115_v37 = vmul.f32 %v10352_v54, %v13285_v1  ;;  %v9866_v1 = vld [vmem:[%s14485_s3 + $0x84] ss:$16 sps:$4 sm:$0xff]  }
0x12e1   :  { %10357 = vrcp.f32 %v5099_v12  ;;  %5885 = vrot.lane.b32.xlu0 %v9866_v1, %s10525_s27 }
0x12e2   :  { %9103 = vmatmul.mubr.msk.f32.gmra.mrb[150].mxu0 %vm782_vm8, %v5115_v37 }
0x12e3   :  { %v10354_v25 = vpop.eup %10353  ;;  %9461 = vmatpush3.bf16.msra.mxu0 %v9460_v55  ;;  %9105 = vmatprep.mubr.msk.f32.mxu0 %vm10528_vm5, %v14530_v34 }
0x12e4   :  { %v5102_v17 = vpop.xlane.xlu0 %5101  ;;  %9462 = vmatprep.subr.bf16.mxu0 %v14531_v24  ;;  %v5117_v7 = vmul.f32 %v10354_v25, %v13290_v26  ;;  %v9867_v26 = vld [vmem:[%s14485_s3 + $0xc4] ss:$16 sps:$4 sm:$0xff]  }
0x12e5   :  { %10359 = vrcp.f32 %v5102_v17  ;;  %5889 = vrot.lane.b32.xlu0 %v9867_v26, %s10525_s27 }
0x12e6   :  { %9106 = vmatmul.mubr.msk.f32.gmra.mrb[152].mxu0 %vm782_vm8, %v5117_v7 }
0x12e7   :  { %v10356_v35 = vpop.eup %10355  ;;  %9464 = vmatpush3.bf16.msra.mxu0 %v9463_v21  ;;  %9108 = vmatprep.mubr.msk.f32.mxu0 %vm10528_vm5, %v14530_v34 }
0x12e8   :  { %v5111_v42 = vpop.xlane.xlu0 %5110  ;;  %v5119_v38 = vmul.f32 %v10356_v35, %v13295_v47  ;;  %9465 = vmatprep.subr.bf16.mxu0 %v14531_v24 }
0x12ea   :  { %9109 = vmatmul.mubr.msk.f32.gmra.mrb[154].mxu0 %vm782_vm8, %v5119_v38 }
0x12eb   :  { %v10358_v11 = vpop.eup %10357  ;;  %9111 = vmatprep.mubr.msk.f32.mxu0 %vm10528_vm5, %v14530_v34 }
0x12ec   :  { %v5589_v8 = vpop.xlane.xlu0 %5588  ;;  %v5121_v59 = vmul.f32 %v10358_v11, %v13300_v31 }
0x12ee   :  { %9112 = vmatmul.mubr.msk.f32.gmra.mrb[156].mxu0 %vm782_vm8, %v5121_v59  ;;  %v9865_v59 = vld [vmem:[%s14485_s3 + $0xa4] ss:$16 sps:$4 sm:$0xff]  }
0x12ef   :  { %v10360_v47 = vpop.eup %10359  ;;  %9114 = vmatprep.mubr.msk.f32.mxu0 %vm10528_vm5, %v14530_v34 }
0x12f0   :  { %v9806_v23 = vpop.permute.xlu0 %9805  ;;  %v5123_v27 = vmul.f32 %v10360_v47, %v13305_v10 }
0x12f1   :  { %v9808_v41 = vunpack.i.h.bf16 %v9806_v23  ;;  %v9807_v4 = vunpack.i.l.bf16 %v9806_v23  ;;  %v5105_v44 = vpop.xlane.xlu1 %5104 }
0x12f2   :  { %10361 = vrcp.f32 %v5105_v44  ;;  %9115 = vmatmul.mubr.msk.f32.gmra.mrb[158].mxu0 %vm782_vm8, %v5123_v27 }
0x12f3   :  { %v9466_v45 = vpack.c.bf16 %v9808_v41, %v9807_v4  ;;  %9117 = vmatprep.mubr.msk.f32.mxu0 %vm10528_vm5, %v14530_v34 }
0x12f5   :  { %v5108_v31 = vpop.xlane.xlu1 %5107  ;;  %9467 = vmatpush3.bf16.msra.mxu0 %v9466_v45 }
0x12f6   :  { %10363 = vrcp.f32 %v5108_v31  ;;  %9187 = vmatprep.subr.mxu0 %v14530_v34 }
0x12f7   :  { %10365 = vrcp.f32 %v5111_v42 }
0x12f9   :  { %v5586_v32 = vpop.xlane.xlu1 %5585 }
0x12fa   :  { %10367 = vrcp.f32 %v5586_v32 }
0x12fb   :  { %10369 = vrcp.f32 %v5589_v8 }
0x12fc   :  { %v10362_v53 = vpop.eup %10361 }
0x12fd   :  { %v5592_v10 = vpop.xlane.xlu1 %5591  ;;  %v5125_v20 = vmul.f32 %v10362_v53, %v13320_v63 }
0x12fe   :  { %10371 = vrcp.f32 %v5592_v10 }
0x12ff   :  { %9118 = vmatmul.mubr.msk.f32.gmra.mrb[160].mxu0 %vm782_vm8, %v5125_v20 }
0x1300   :  { %v10364_v46 = vpop.eup %10363  ;;  %9120 = vmatprep.mubr.msk.f32.mxu0 %vm10528_vm5, %v14530_v34 }
0x1301   :  { %v5595_v19 = vpop.xlane.xlu1 %5594  ;;  %v5127_v33 = vmul.f32 %v10364_v46, %v13324_v56  ;;  %v10366_v40 = vpop.eup %10365 }
0x1302   :  { %v5129_v63 = vmul.f32 %v10366_v40, %v13310_v18  ;;  %10373 = vrcp.f32 %v5595_v19 }
0x1303   :  { %9121 = vmatmul.mubr.msk.f32.gmra.mrb[162].mxu0 %vm782_vm8, %v5127_v33 }
0x1304   :  { %9123 = vmatprep.mubr.msk.f32.mxu0 %vm10528_vm5, %v14530_v34  ;;  %v10368_v48 = vpop.eup %10367 }
0x1305   :  { %v5646_v58 = vpop.permute.xlu1 %5645  ;;  %v5612_v56 = vmul.f32 %v10368_v48, %v13331_v30  ;;  %v10370_v29 = vpop.eup %10369 }
0x1306   :  { %9188 = vmatpush3.msra.mxu0 %v5646_v58  ;;  %v5614_v52 = vmul.f32 %v10370_v29, %v13315_v15 }
0x1307   :  { %9124 = vmatmul.mubr.msk.f32.gmra.mrb[164].mxu0 %vm782_vm8, %v5129_v63 }
0x1308   :  { %9189 = vmatprep.mubr.msk.f32.mxu0 %vm10528_vm5, %v14530_v34  ;;  %v10372_v22 = vpop.eup %10371 }
0x1309   :  { %v5616_v18 = vmul.f32 %v10372_v22, %v13342_v14 }
0x130b   :  { %9190 = vmatmul.mubr.msk.f32.vlgmr.msra.gmra.mrb[166].mxu0 %vm782_vm8, %v5612_v56 }
0x130c   :  { %9192 = vmatprep.mubr.msk.f32.mxu0 %vm10528_vm5, %v14530_v34  ;;  %v10374_v2 = vpop.eup %10373 }
0x130d   :  { %v5618_v30 = vmul.f32 %v10374_v2, %v13353_v60 }
0x130f   :  { %9193 = vmatmul.mubr.msk.f32.gmra.mrb[168].mxu0 %vm782_vm8, %v5614_v52 }
0x1310   :  { %9195 = vmatprep.mubr.msk.f32.mxu0 %vm10528_vm5, %v14530_v34 }
0x1313   :  { %9196 = vmatmul.mubr.msk.f32.gmra.mrb[170].mxu0 %vm782_vm8, %v5616_v18 }
0x1314   :  { %9198 = vmatprep.mubr.msk.f32.mxu0 %vm10528_vm5, %v14530_v34 }
0x1317   :  { %9199 = vmatmul.mubr.msk.f32.gmra.mrb[172].mxu0 %vm782_vm8, %v5618_v30 }
0x1318   :  { %9201 = vmatprep.mubr.msk.f32.mxu0 %vm10528_vm5, %v14530_v34 }
0x1321   :  { %v5598_v15 = vpop.xlane.xlu0 %5597 }
0x1322   :  { %10375 = vrcp.f32 %v5598_v15 }
0x1325   :  { %v5601_v57 = vpop.xlane.xlu0 %5600 }
0x1326   :  { %10377 = vrcp.f32 %v5601_v57 }
0x1329   :  { %v5604_v3 = vpop.xlane.xlu0 %5603 }
0x132a   :  { %10379 = vrcp.f32 %v5604_v3 }
0x132c   :  { %v10376_v14 = vpop.eup %10375 }
0x132d   :  { %v5607_v13 = vpop.xlane.xlu0 %5606  ;;  %v5620_v0 = vmul.f32 %v10376_v14, %v13402_v28 }
0x132e   :  { %10381 = vrcp.f32 %v5607_v13 }
0x132f   :  { %9202 = vmatmul.mubr.msk.f32.gmra.mrb[174].mxu0 %vm782_vm8, %v5620_v0 }
0x1330   :  { %v10378_v16 = vpop.eup %10377  ;;  %9204 = vmatprep.mubr.msk.f32.mxu0 %vm10528_vm5, %v14530_v34 }
0x1331   :  { %v5622_v60 = vmul.f32 %v10378_v16, %v13411_v36 }
0x1333   :  { %9205 = vmatmul.mubr.msk.f32.gmra.mrb[176].mxu0 %vm782_vm8, %v5622_v60 }
0x1334   :  { %v10380_v54 = vpop.eup %10379  ;;  %9207 = vmatprep.mubr.msk.f32.mxu0 %vm10528_vm5, %v14530_v34 }
0x1335   :  { %v5624_v12 = vmul.f32 %v10380_v54, %v13420_v5 }
0x1336   :  { %v5556_v37 = vpop.xlane.xlu1 %5555 }
0x1337   :  { %v5565_v28 = vsub.f32 %v13446_v43, %v5556_v37  ;;  %9208 = vmatmul.mubr.msk.f32.gmra.mrb[178].mxu0 %vm782_vm8, %v5624_v12 }
0x1338   :  { %v10382_v55 = vpop.eup %10381  ;;  %9210 = vmatprep.mubr.msk.f32.mxu0 %vm10528_vm5, %v14530_v34 }
0x1339   :  { %v5582_v61 = vmul.f32 1.442695, %v5565_v28  ;;  %v5626_v36 = vmul.f32 %v10382_v55, %v13429_v39 }
0x133b   :  { %10383 = vpow2.f32 %v5582_v61  ;;  %9211 = vmatmul.mubr.msk.f32.gmra.mrb[180].mxu0 %vm782_vm8, %v5626_v36 }
0x133c   :  { %v4225_v9 = vpop.f32.mrb[112].mxu0  ;;  %9213 = vmatprep.mubr.msk.f32.mxu0 %vm10528_vm5, %v14530_v34 }
0x133d   :  { %4269 = vst.msk [vmem:[#allocation3] sm:$0xff] %vm617_vm6, %v4225_v9  ;;  %v8921_v5 = vpop.f32.mrb[113].mxu0 }
0x1340   :  { %v4230_v43 = vpop.f32.mrb[114].mxu0 }
0x1341   :  { %4270 = vst.msk [vmem:[#allocation3 + $0x8] sm:$0xff] %vm617_vm6, %v4230_v43  ;;  %v8924_v25 = vpop.f32.mrb[115].mxu0 }
0x1344   :  { %v4235_v17 = vpop.f32.mrb[116].mxu0 }
0x1345   :  { %v13544_v7 = vpop.eup %10383  ;;  %4271 = vst.msk [vmem:[#allocation3 + $0x10] sm:$0xff] %vm617_vm6, %v4235_v17  ;;  %v8927_v39 = vpop.f32.mrb[117].mxu0 }
0x1346   :  { %v5608_v21 = vsel %vm782_vm8, %v13544_v7, 0.0 }
0x1347   :  { %5609 = vadd.xlane.f32.xlu1 %v5608_v21 }
0x1348   :  { %v4240_v1 = vpop.f32.mrb[118].mxu0 }
0x1349   :  { %4272 = vst.msk [vmem:[#allocation3 + $0x18] sm:$0xff] %vm617_vm6, %v4240_v1  ;;  %v8930_v35 = vpop.f32.mrb[119].mxu0 }
0x134c   :  { %v4245_v42 = vpop.f32.mrb[120].mxu0 }
0x134d   :  { %4273 = vst.msk [vmem:[#allocation3 + $0x20] sm:$0xff] %vm617_vm6, %v4245_v42  ;;  %v8933_v38 = vpop.f32.mrb[121].mxu0 }
0x1350   :  { %v4250_v26 = vpop.f32.mrb[122].mxu0 }
0x1351   :  { %4274 = vst.msk [vmem:[#allocation3 + $0x28] sm:$0xff] %vm617_vm6, %v4250_v26  ;;  %v8936_v11 = vpop.f32.mrb[123].mxu0 }
0x1353   :  { %v5886_v41 = vpop.permute.xlu0 %5885 }
0x1354   :  { %v4255_v8 = vpop.f32.mrb[124].mxu0  ;;  %9217 = vmatpush3.bf16.msra.mxu1 %v5886_v41 }
0x1355   :  { %4275 = vst.msk [vmem:[#allocation3 + $0x30] sm:$0xff] %vm617_vm6, %v4255_v8  ;;  %v8939_v47 = vpop.f32.mrb[125].mxu0  ;;  %9218 = vmatprep.subr.bf16.mxu1 %v14530_v34  ;;  %v9868_v8 = vld [vmem:[%s14485_s3 + $0xe4] ss:$16 sps:$4 sm:$0xff]  }
0x1357   :  { %v5890_v5 = vpop.permute.xlu0 %5889 }
0x1358   :  { %v4260_v23 = vpop.f32.mrb[126].mxu0  ;;  %5887 = vrot.lane.b32.xlu1 %v9865_v59, %s10525_s27 }
0x1359   :  { %4276 = vst.msk [vmem:[#allocation3 + $0x38] sm:$0xff] %vm617_vm6, %v4260_v23  ;;  %v8942_v27 = vpop.f32.mrb[127].mxu0 }
0x135c   :  { %v4265_v4 = vpop.f32.mrb[128].mxu0 }
0x135d   :  { %4277 = vst.msk [vmem:[#allocation3 + $0x40] sm:$0xff] %vm617_vm6, %v4265_v4  ;;  %v8945_v44 = vpop.f32.mrb[129].mxu0 }
0x1360   :  { %v4715_v45 = vpop.f32.mrb[130].mxu0 }
0x1361   :  { %v9011_v31 = vpop.f32.mrb[131].mxu0  ;;  %4768 = vrot.lane.b32.xlu1 %v4715_v45, %s10531_s10 }
0x1364   :  { %v4720_v32 = vpop.f32.mrb[132].mxu0 }
0x1365   :  { %v9014_v53 = vpop.f32.mrb[133].mxu0  ;;  %4770 = vrot.lane.b32.xlu1 %v4720_v32, %s10531_s10 }
0x1368   :  { %v4725_v10 = vpop.f32.mrb[134].mxu0 }
0x1369   :  { %v9017_v20 = vpop.f32.mrb[135].mxu0  ;;  %4772 = vrot.lane.b32.xlu1 %v4725_v10, %s10531_s10 }
0x136c   :  { %v4730_v46 = vpop.f32.mrb[136].mxu0 }
0x136d   :  { %4774 = vrot.lane.b32.xlu0 %v4730_v46, %s10531_s10  ;;  %v9020_v19 = vpop.f32.mrb[137].mxu0 }
0x1370   :  { %v13564_v33 = vpop.f32.mrb[138].mxu0 }
0x1371   :  { %v9023_v40 = vpop.f32.mrb[139].mxu0 }
0x1374   :  { %v13566_v58 = vpop.f32.mrb[140].mxu0 }
0x1375   :  { %v9026_v63 = vpop.f32.mrb[141].mxu0 }
0x1378   :  { %v13568_v48 = vpop.f32.mrb[142].mxu0 }
0x1379   :  { %v9029_v56 = vpop.f32.mrb[143].mxu0 }
0x137c   :  { %v13570_v29 = vpop.f32.mrb[144].mxu0 }
0x137d   :  { %v9032_v52 = vpop.f32.mrb[145].mxu0 }
0x139d   :  { %v13572_v22 = vpop.f32.mrb[146].mxu0 }
0x139e   :  { %v9035_v18 = vpop.f32.mrb[147].mxu0 }
0x13b1   :  { %v5223_v2 = vpop.f32.mrb[148].mxu0 }
0x13b2   :  { %v9101_v30 = vpop.f32.mrb[149].mxu0  ;;  %5276 = vrot.lane.b32.xlu1 %v5223_v2, %s10532_s11 }
0x13b5   :  { %v5228_v15 = vpop.f32.mrb[150].mxu0 }
0x13b6   :  { %5278 = vrot.lane.b32.xlu0 %v5228_v15, %s10532_s11  ;;  %v9104_v57 = vpop.f32.mrb[151].mxu0 }
0x13b9   :  { %v5233_v3 = vpop.f32.mrb[152].mxu0 }
0x13ba   :  { %v9107_v14 = vpop.f32.mrb[153].mxu0  ;;  %5280 = vrot.lane.b32.xlu1 %v5233_v3, %s10532_s11 }
0x13bd   :  { %v5238_v13 = vpop.f32.mrb[154].mxu0 }
0x13be   :  { %v9110_v0 = vpop.f32.mrb[155].mxu0 }
0x13c1   :  { %v5243_v16 = vpop.f32.mrb[156].mxu0 }
0x13c2   :  { %v9113_v60 = vpop.f32.mrb[157].mxu0 }
0x13c5   :  { %v5248_v54 = vpop.f32.mrb[158].mxu0 }
0x13c6   :  { %v9116_v12 = vpop.f32.mrb[159].mxu0 }
0x13d2   :  { %v5253_v37 = vpop.f32.mrb[160].mxu0 }
0x13d3   :  { %v9119_v28 = vpop.f32.mrb[161].mxu0 }
0x13d4   :  { %v5610_v55 = vpop.xlane.xlu1 %5609 }
0x13d5   :  { %10385 = vrcp.f32 %v5610_v55 }
0x13d6   :  { %v5258_v61 = vpop.f32.mrb[162].mxu0 }
0x13d7   :  { %v9122_v36 = vpop.f32.mrb[163].mxu0 }
0x13d8   :  { %v5888_v9 = vpop.permute.xlu1 %5887 }
0x13d9   :  { %9219 = vmatpush3.bf16.msra.mxu1 %v5888_v9 }
0x13da   :  { %v5263_v43 = vpop.f32.mrb[164].mxu0  ;;  %9220 = vmatprep.subr.bf16.mxu1 %v14530_v34 }
0x13db   :  { %v9125_v25 = vpop.f32.mrb[165].mxu0 }
0x13dc   :  { %v4769_v17 = vpop.permute.xlu1 %4768 }
0x13dd   :  { %4795 = vst.msk [vmem:[#allocation3] sm:$0xff] %vm1572_vm9, %v4769_v17  ;;  %9221 = vmatpush3.bf16.msra.mxu1 %v5890_v5 }
0x13de   :  { %v5749_v39 = vpop.f32.mrb[166].mxu0  ;;  %9222 = vmatprep.subr.bf16.mxu1 %v14530_v34 }
0x13df   :  { %v10386_v21 = vpop.eup %10385  ;;  %v4775_v1 = vpop.permute.xlu0 %4774  ;;  %5802 = vrot.lane.b32.xlu0 %v5749_v39, %s10534_s14 }
0x13e0   :  { %v9191_v35 = vpop.f32.mrb[167].mxu0  ;;  %4798 = vst.msk [vmem:[#allocation3 + $0x18] sm:$0xff] %vm1572_vm9, %v4775_v1  ;;  %v4771_v42 = vpop.permute.xlu1 %4770  ;;  %v5628_v38 = vmul.f32 %v10386_v21, %v13544_v7 }
0x13e1   :  { %4796 = vst.msk [vmem:[#allocation3 + $0x8] sm:$0xff] %vm1572_vm9, %v4771_v42 }
0x13e2   :  { %v5754_v26 = vpop.f32.mrb[168].mxu0  ;;  %9214 = vmatmul.mubr.msk.f32.gmra.mrb[182].mxu0 %vm782_vm8, %v5628_v38 }
0x13e3   :  { %5282 = vrot.lane.b32.xlu0 %v5238_v13, %s10532_s11  ;;  %v9194_v11 = vpop.f32.mrb[169].mxu0  ;;  %5804 = vrot.lane.b32.xlu1 %v5754_v26, %s10534_s14 }
0x13e4   :  { %v4773_v59 = vpop.permute.xlu1 %4772  ;;  %6251 = vmatprep.mubr.bf16.mxu0 %v14532_v62 }
0x13e5   :  { %4797 = vst.msk [vmem:[#allocation3 + $0x10] sm:$0xff] %vm1572_vm9, %v4773_v59 }
0x13e6   :  { %v5759_v7 = vpop.f32.mrb[170].mxu0 }
0x13e7   :  { %5806 = vrot.lane.b32.xlu0 %v5759_v7, %s10534_s14  ;;  %v9197_v47 = vpop.f32.mrb[171].mxu0  ;;  %5891 = vrot.lane.b32.xlu1 %v9868_v8, %s10525_s27 }
0x13ea   :  { %v5764_v23 = vpop.f32.mrb[172].mxu0 }
0x13eb   :  { %4776 = vrot.lane.b32.xlu0 %v13564_v33, %s10531_s10  ;;  %v9200_v27 = vpop.f32.mrb[173].mxu0  ;;  %5808 = vrot.lane.b32.xlu1 %v5764_v23, %s10534_s14  ;;  %v7913_v33 = vld [vmem:[%s14487_s5 + $0x9] ss:$0 sm:$0xff] }
0x13ef   :  { %5284 = vrot.lane.b32.xlu0 %v5243_v16, %s10532_s11  ;;  %4778 = vrot.lane.b32.xlu1 %v13566_v58, %s10531_s10 }
0x13f3   :  { %4780 = vrot.lane.b32.xlu0 %v13568_v48, %s10531_s10  ;;  %5286 = vrot.lane.b32.xlu1 %v5248_v54, %s10532_s11 }
0x13f7   :  { %4782 = vrot.lane.b32.xlu1 %v13570_v29, %s10531_s10 }
0x1402   :  { %v5769_v41 = vpop.f32.mrb[174].mxu0 }
0x1403   :  { %5810 = vrot.lane.b32.xlu0 %v5769_v41, %s10534_s14  ;;  %v9203_v4 = vpop.f32.mrb[175].mxu0 }
0x1406   :  { %v5774_v44 = vpop.f32.mrb[176].mxu0 }
0x1407   :  { %5288 = vrot.lane.b32.xlu0 %v5253_v37, %s10532_s11  ;;  %v9206_v45 = vpop.f32.mrb[177].mxu0  ;;  %5812 = vrot.lane.b32.xlu1 %v5774_v44, %s10534_s14 }
0x140a   :  { %v5779_v31 = vpop.f32.mrb[178].mxu0 }
0x140b   :  { %5814 = vrot.lane.b32.xlu0 %v5779_v31, %s10534_s14  ;;  %v9209_v32 = vpop.f32.mrb[179].mxu0  ;;  %5290 = vrot.lane.b32.xlu1 %v5258_v61, %s10532_s11 }
0x140e   :  { %v5784_v53 = vpop.f32.mrb[180].mxu0 }
0x140f   :  { %4784 = vrot.lane.b32.xlu0 %v13572_v22, %s10531_s10  ;;  %v9212_v10 = vpop.f32.mrb[181].mxu0  ;;  %5816 = vrot.lane.b32.xlu1 %v5784_v53, %s10534_s14 }
0x1413   :  { %5292 = vrot.lane.b32.xlu1 %v5263_v43, %s10532_s11 }
0x1417   :  { %5897 = vrot.lane.b32.xlu1 %v7913_v33, %s10525_s27 }
0x1424   :  { %v5277_v20 = vpop.permute.xlu1 %5276 }
0x1425   :  { %5303 = vst.msk [vmem:[#allocation3] sm:$0xff] %vm2081_vm10, %v5277_v20 }
0x1428   :  { %v5279_v46 = vpop.permute.xlu0 %5278 }
0x1429   :  { %5304 = vst.msk [vmem:[#allocation3 + $0x8] sm:$0xff] %vm2081_vm10, %v5279_v46 }
0x142c   :  { %v5281_v19 = vpop.permute.xlu1 %5280 }
0x142d   :  { %5305 = vst.msk [vmem:[#allocation3 + $0x10] sm:$0xff] %vm2081_vm10, %v5281_v19 }
0x1451   :  { %v5803_v40 = vpop.permute.xlu0 %5802 }
0x1452   :  { %5829 = vst.msk [vmem:[#allocation3] sm:$0xff] %vm2608_vm11, %v5803_v40 }
0x1455   :  { %v5283_v58 = vpop.permute.xlu0 %5282  ;;  %v5805_v63 = vpop.permute.xlu1 %5804 }
0x1456   :  { %5306 = vst.msk [vmem:[#allocation3 + $0x18] sm:$0xff] %vm2081_vm10, %v5283_v58 }
0x1457   :  { %5830 = vst.msk [vmem:[#allocation3 + $0x8] sm:$0xff] %vm2608_vm11, %v5805_v63  ;;  %v14545_v63 = vld [vmem:[#allocation11_spill] sm:$0xff] }
0x1459   :  { %v5807_v48 = vpop.permute.xlu0 %5806  ;;  %v5892_v56 = vpop.permute.xlu1 %5891  ;;  %v5838_v22 = vld [vmem:[#allocation3] sm:$0xff] }
0x145a   :  { %5831 = vst.msk [vmem:[#allocation3 + $0x10] sm:$0xff] %vm2608_vm11, %v5807_v48  ;;  %9223 = vmatpush3.bf16.msra.mxu1 %v5892_v56 }
0x145d   :  { %v4777_v29 = vpop.permute.xlu0 %4776  ;;  %v5809_v52 = vpop.permute.xlu1 %5808 }
0x145e   :  { %v5839_v18 = vld [vmem:[#allocation3 + $0x8] sm:$0xff]  ;;  %4799 = vst.msk [vmem:[#allocation3 + $0x20] sm:$0xff] %vm1572_vm9, %v4777_v29  ;;  %v14546_v29 = vld [vmem:[#allocation12_spill] sm:$0xff] }
0x145f   :  { %5832 = vst.msk [vmem:[#allocation3 + $0x18] sm:$0xff] %vm2608_vm11, %v5809_v52  ;;  %v5847_v2 = vpack.c.bf16 %v5839_v18, %v5838_v22 }
0x1461   :  { %9225 = vmatmul.mubr.msk.bf16.vlgmr.msra.gmra.mrb[204].mxu1 %vm257_vm4, %v5847_v2  ;;  %v5285_v30 = vpop.permute.xlu0 %5284  ;;  %v4779_v15 = vpop.permute.xlu1 %4778  ;;  %v5840_v14 = vld [vmem:[#allocation3 + $0x10] sm:$0xff] }
0x1462   :  { %9228 = vmatprep.mubr.msk.bf16.mxu1 %vm10528_vm5, %v14530_v34  ;;  %5307 = vst.msk [vmem:[#allocation3 + $0x20] sm:$0xff] %vm2081_vm10, %v5285_v30 }
0x1463   :  { %4800 = vst.msk [vmem:[#allocation3 + $0x28] sm:$0xff] %vm1572_vm9, %v4779_v15 }
0x1465   :  { %v4781_v57 = vpop.permute.xlu0 %4780  ;;  %v5287_v3 = vpop.permute.xlu1 %5286 }
0x1466   :  { %v5841_v13 = vld [vmem:[#allocation3 + $0x18] sm:$0xff]  ;;  %4801 = vst.msk [vmem:[#allocation3 + $0x30] sm:$0xff] %vm1572_vm9, %v4781_v57 }
0x1467   :  { %5308 = vst.msk [vmem:[#allocation3 + $0x28] sm:$0xff] %vm2081_vm10, %v5287_v3  ;;  %v5848_v0 = vpack.c.bf16 %v5841_v13, %v5840_v14  ;;  %v14547_v3 = vld [vmem:[#allocation13_spill] sm:$0xff] }
0x1469   :  { %9229 = vmatmul.mubr.msk.bf16.gmra.mrb[208].mxu1 %vm257_vm4, %v5848_v0  ;;  %v4783_v16 = vpop.permute.xlu1 %4782 }
0x146a   :  { %9232 = vmatprep.mubr.msk.bf16.mxu1 %vm10528_vm5, %v14530_v34  ;;  %4802 = vst.msk [vmem:[#allocation3 + $0x38] sm:$0xff] %vm1572_vm9, %v4783_v16  ;;  %v14548_v16 = vld [vmem:[#allocation14_spill] sm:$0xff] }
0x1475   :  { %v5811_v60 = vpop.permute.xlu0 %5810 }
0x1476   :  { %5833 = vst.msk [vmem:[#allocation3 + $0x20] sm:$0xff] %vm2608_vm11, %v5811_v60 }
0x1479   :  { %v5289_v54 = vpop.permute.xlu0 %5288  ;;  %v5813_v12 = vpop.permute.xlu1 %5812 }
0x147a   :  { %5309 = vst.msk [vmem:[#allocation3 + $0x30] sm:$0xff] %vm2081_vm10, %v5289_v54 }
0x147b   :  { %5834 = vst.msk [vmem:[#allocation3 + $0x28] sm:$0xff] %vm2608_vm11, %v5813_v12 }
0x147d   :  { %v5815_v37 = vpop.permute.xlu0 %5814  ;;  %v5291_v28 = vpop.permute.xlu1 %5290  ;;  %v5842_v36 = vld [vmem:[#allocation3 + $0x20] sm:$0xff] }
0x147e   :  { %5835 = vst.msk [vmem:[#allocation3 + $0x30] sm:$0xff] %vm2608_vm11, %v5815_v37  ;;  %v9869_v37 = vld [vmem:[%s14485_s3 + $0x88] ss:$16 sps:$4 sm:$0xff]  }
0x147f   :  { %5310 = vst.msk [vmem:[#allocation3 + $0x38] sm:$0xff] %vm2081_vm10, %v5291_v28  ;;  %v9871_v28 = vld [vmem:[%s14485_s3 + $0x8c] ss:$16 sps:$4 sm:$0xff]  }
0x1480   :  { %6219 = vmatprep.subr.bf16.mxu0 %v9871_v28 }
0x1481   :  { %v4785_v55 = vpop.permute.xlu0 %4784  ;;  %v5817_v61 = vpop.permute.xlu1 %5816  ;;  %6220 = vmatpush1.bf16.msra.mxu0 %v9869_v37 }
0x1482   :  { %v5843_v9 = vld [vmem:[#allocation3 + $0x28] sm:$0xff]  ;;  %4803 = vst.msk [vmem:[#allocation3 + $0x40] sm:$0xff] %vm1572_vm9, %v4785_v55 }
0x1483   :  { %5836 = vst.msk [vmem:[#allocation3 + $0x38] sm:$0xff] %vm2608_vm11, %v5817_v61  ;;  %v5849_v5 = vpack.c.bf16 %v5843_v9, %v5842_v36 }
0x1485   :  { %9233 = vmatmul.mubr.msk.bf16.gmra.mrb[212].mxu1 %vm257_vm4, %v5849_v5  ;;  %v5293_v43 = vpop.permute.xlu1 %5292  ;;  %v5844_v25 = vld [vmem:[#allocation3 + $0x30] sm:$0xff] }
0x1486   :  { %9236 = vmatprep.mubr.msk.bf16.mxu1 %vm10528_vm5, %v14530_v34  ;;  %5311 = vst.msk [vmem:[#allocation3 + $0x40] sm:$0xff] %vm2081_vm10, %v5293_v43 }
0x1489   :  { %v13654_v26 = vpop.permute.xlu1 %5897 }
0x148a   :  { %v5845_v17 = vld [vmem:[#allocation3 + $0x38] sm:$0xff] }
0x148b   :  { %v5850_v39 = vpack.c.bf16 %v5845_v17, %v5844_v25 }
0x148d   :  { %9237 = vmatmul.mubr.msk.bf16.gmra.mrb[216].mxu1 %vm257_vm4, %v5850_v39 }
0x148e   :  { %9240 = vmatprep.mubr.msk.bf16.mxu1 %vm10528_vm5, %v14530_v34 }
0x14b5   :  { %v5789_v21 = vpop.f32.mrb[182].mxu0 }
0x14b6   :  { %5818 = vrot.lane.b32.xlu0 %v5789_v21, %s10534_s14  ;;  %v9215_v1 = vpop.f32.mrb[183].mxu0 }
0x1528   :  { %v5819_v35 = vpop.permute.xlu0 %5818 }
0x1529   :  { %5837 = vst.msk [vmem:[#allocation3 + $0x40] sm:$0xff] %vm2608_vm11, %v5819_v35 }
0x1530   :  { %v5846_v42 = vld [vmem:[#allocation3 + $0x40] sm:$0xff] }
0x1531   :  { %v5851_v38 = vpack.c.bf16 %v5846_v42, %v5846_v42 }
0x1533   :  { %9241 = vmatmul.mubr.msk.bf16.gmra.mrb[220].mxu1 %vm257_vm4, %v5851_v38 }
0x1534   :  { %v5949_v11 = vpop.f32.mrb[204].mxu1 }
0x1535   :  { %v5950_v8 = vadd.f32 %v5949_v11, %v13654_v26  ;;  %v9226_v59 = vpop.f32.mrb[205].mxu1 }
0x1536   :  { %v5952_v7 = vpop.f32.mrb[206].mxu1 }
0x1537   :  { %v13659_v47 = vadd.f32 %v5950_v8, %v12369_v50  ;;  %v5953_v23 = vadd.f32 %v5952_v7, %v13654_v26  ;;  %v9227_v27 = vpop.f32.mrb[207].mxu1 }
0x1539   :  { %v13663_v41 = vadd.f32 %v5953_v23, %v12372_v6  ;;  %v5996_v4 = vsel %vm257_vm4, %v13659_v47, 0.0 }
0x153a   :  { %5997 = vadd.xlane.f32.xlu0 %v5996_v4  ;;  %v13738_v4 = vld [vmem:[%s14487_s5 + $0xa] ss:$0 sm:$0xff] }
0x153b   :  { %v5999_v44 = vsel %vm257_vm4, %v13663_v41, 0.0 }
0x153c   :  { %6000 = vadd.xlane.f32.xlu1 %v5999_v44  ;;  %v5957_v45 = vpop.f32.mrb[208].mxu1  ;;  %v9874_v44 = vld [vmem:[%s14485_s3 + $0xac] ss:$16 sps:$4 sm:$0xff]  }
0x153d   :  { %v5958_v31 = vadd.f32 %v5957_v45, %v13654_v26  ;;  %v9230_v32 = vpop.f32.mrb[209].mxu1  ;;  %v9872_v45 = vld [vmem:[%s14485_s3 + $0xa8] ss:$16 sps:$4 sm:$0xff]   ;;  %6221 = vmatprep.subr.bf16.mxu0 %v9874_v44 }
0x153e   :  { %v5960_v50 = vpop.f32.mrb[210].mxu1  ;;  %6222 = vmatpush1.bf16.msra.mxu0 %v9872_v45  ;;  %v9875_v32 = vld [vmem:[%s14485_s3 + $0xc8] ss:$16 sps:$4 sm:$0xff]  }
0x153f   :  { %v13671_v53 = vadd.f32 %v5958_v31, %v12379_v51  ;;  %v5961_v10 = vadd.f32 %v5960_v50, %v13654_v26  ;;  %v9231_v6 = vpop.f32.mrb[211].mxu1  ;;  %v9877_v31 = vld [vmem:[%s14485_s3 + $0xcc] ss:$16 sps:$4 sm:$0xff]  }
0x1540   :  { %6223 = vmatprep.subr.bf16.mxu0 %v9877_v31  ;;  %v9880_v50 = vld [vmem:[%s14485_s3 + $0xec] ss:$16 sps:$4 sm:$0xff]  }
0x1541   :  { %v13675_v20 = vadd.f32 %v5961_v10, %v12382_v49  ;;  %v6002_v46 = vsel %vm257_vm4, %v13671_v53, 0.0  ;;  %v9878_v10 = vld [vmem:[%s14485_s3 + $0xe8] ss:$16 sps:$4 sm:$0xff]  }
0x1542   :  { %6003 = vadd.xlane.f32.xlu0 %v6002_v46  ;;  %6224 = vmatpush1.bf16.msra.mxu0 %v9875_v32 }
0x1543   :  { %v6005_v19 = vsel %vm257_vm4, %v13675_v20, 0.0  ;;  %6225 = vmatprep.subr.bf16.mxu0 %v9880_v50 }
0x1546   :  { %6006 = vadd.xlane.f32.xlu0 %v6005_v19  ;;  %6226 = vmatpush1.bf16.msra.mxu0 %v9878_v10 }
0x1558   :  { %v5965_v33 = vpop.f32.mrb[212].mxu1 }
0x1559   :  { %v5966_v40 = vadd.f32 %v5965_v33, %v13654_v26  ;;  %v9234_v58 = vpop.f32.mrb[213].mxu1 }
0x155a   :  { %v5968_v51 = vpop.f32.mrb[214].mxu1 }
0x155b   :  { %v13683_v48 = vadd.f32 %v5966_v40, %v14545_v63  ;;  %v5969_v56 = vadd.f32 %v5968_v51, %v13654_v26  ;;  %v9235_v49 = vpop.f32.mrb[215].mxu1 }
0x155d   :  { %v13687_v52 = vadd.f32 %v5969_v56, %v14546_v29  ;;  %v6008_v22 = vsel %vm257_vm4, %v13683_v48, 0.0  ;;  %v14549_v29 = vld [vmem:[#allocation19_spill] sm:$0xff] }
0x155e   :  { %6009 = vadd.xlane.f32.xlu0 %v6008_v22 }
0x155f   :  { %v6011_v18 = vsel %vm257_vm4, %v13687_v52, 0.0 }
0x1560   :  { %6012 = vadd.xlane.f32.xlu1 %v6011_v18  ;;  %v5973_v2 = vpop.f32.mrb[216].mxu1 }
0x1561   :  { %v5974_v30 = vadd.f32 %v5973_v2, %v13654_v26  ;;  %v9238_v15 = vpop.f32.mrb[217].mxu1 }
0x1562   :  { %v5976_v57 = vpop.f32.mrb[218].mxu1 }
0x1563   :  { %v13695_v14 = vadd.f32 %v5974_v30, %v14547_v3  ;;  %v5977_v13 = vadd.f32 %v5976_v57, %v13654_v26  ;;  %v9239_v0 = vpop.f32.mrb[219].mxu1 }
0x1565   :  { %v13699_v60 = vadd.f32 %v5977_v13, %v14548_v16  ;;  %v6014_v54 = vsel %vm257_vm4, %v13695_v14, 0.0 }
0x1566   :  { %6015 = vadd.xlane.f32.xlu0 %v6014_v54 }
0x1567   :  { %v6017_v12 = vsel %vm257_vm4, %v13699_v60, 0.0 }
0x1568   :  { %6018 = vadd.xlane.f32.xlu1 %v6017_v12 }
0x15c7   :  { %v5998_v55 = vpop.xlane.xlu0 %5997 }
0x15c8   :  { %v6023_v61 = vmul.f32 0.015625, %v5998_v55 }
0x15c9   :  { %v6001_v36 = vpop.xlane.xlu1 %6000 }
0x15ca   :  { %v13712_v9 = vsub.f32 %v13659_v47, %v6023_v61  ;;  %v6024_v5 = vmul.f32 0.015625, %v6001_v36 }
0x15cc   :  { %v13715_v43 = vsub.f32 %v13663_v41, %v6024_v5  ;;  %v6041_v25 = vmul.f32 %v13712_v9, %v13712_v9 }
0x15ce   :  { %v6050_v17 = vsel %vm257_vm4, %v6041_v25, 0.0  ;;  %v6042_v39 = vmul.f32 %v13715_v43, %v13715_v43 }
0x15cf   :  { %v6004_v21 = vpop.xlane.xlu0 %6003  ;;  %6051 = vadd.xlane.f32.xlu0 %v6050_v17 }
0x15d0   :  { %v6025_v1 = vmul.f32 0.015625, %v6004_v21  ;;  %v6053_v35 = vsel %vm257_vm4, %v6042_v39, 0.0 }
0x15d1   :  { %6054 = vadd.xlane.f32.xlu1 %v6053_v35 }
0x15d2   :  { %v13724_v42 = vsub.f32 %v13671_v53, %v6025_v1 }
0x15d3   :  { %v6007_v38 = vpop.xlane.xlu0 %6006 }
0x15d4   :  { %v6026_v11 = vmul.f32 0.015625, %v6007_v38  ;;  %v6043_v8 = vmul.f32 %v13724_v42, %v13724_v42 }
0x15d6   :  { %v13729_v59 = vsub.f32 %v13675_v20, %v6026_v11  ;;  %v6056_v7 = vsel %vm257_vm4, %v6043_v8, 0.0 }
0x15d7   :  { %6057 = vadd.xlane.f32.xlu0 %v6056_v7 }
0x15d8   :  { %v6044_v23 = vmul.f32 %v13729_v59, %v13729_v59 }
0x15da   :  { %v6059_v27 = vsel %vm257_vm4, %v6044_v23, 0.0 }
0x15db   :  { %6060 = vadd.xlane.f32.xlu1 %v6059_v27 }
0x15eb   :  { %v6010_v6 = vpop.xlane.xlu0 %6009 }
0x15ec   :  { %v6027_v46 = vmul.f32 0.015625, %v6010_v6 }
0x15ed   :  { %6128 = vrot.lane.b32.xlu0 %v13738_v4, %s10525_s27  ;;  %v6013_v19 = vpop.xlane.xlu1 %6012 }
0x15ee   :  { %v13761_v40 = vsub.f32 %v13683_v48, %v6027_v46  ;;  %v6028_v58 = vmul.f32 0.015625, %v6013_v19 }
0x15f0   :  { %v13768_v2 = vsub.f32 %v13687_v52, %v6028_v58  ;;  %v6045_v57 = vmul.f32 %v13761_v40, %v13761_v40 }
0x15f2   :  { %v6062_v0 = vsel %vm257_vm4, %v6045_v57, 0.0  ;;  %v6046_v16 = vmul.f32 %v13768_v2, %v13768_v2 }
0x15f3   :  { %v6016_v56 = vpop.xlane.xlu0 %6015 }
0x15f4   :  { %v6029_v30 = vmul.f32 0.015625, %v6016_v56  ;;  %v6065_v12 = vsel %vm257_vm4, %v6046_v16, 0.0 }
0x15f5   :  { %v6019_v3 = vpop.xlane.xlu1 %6018 }
0x15f6   :  { %v6030_v13 = vmul.f32 0.015625, %v6019_v3 }
0x15f8   :  { %v13781_v54 = vsub.f32 %v13699_v60, %v6030_v13 }
0x15fa   :  { %v6048_v55 = vmul.f32 %v13781_v54, %v13781_v54 }
0x15fc   :  { %v6071_v61 = vsel %vm257_vm4, %v6048_v55, 0.0 }
0x1606   :  { %v5981_v33 = vpop.f32.mrb[220].mxu1 }
0x1607   :  { %v5982_v51 = vadd.f32 %v5981_v33, %v13654_v26  ;;  %v9242_v63 = vpop.f32.mrb[221].mxu1  ;;  %v13775_v26 = vsub.f32 %v13695_v14, %v6029_v30 }
0x1608   :  { %v5984_v49 = vpop.f32.mrb[222].mxu1 }
0x1609   :  { %v13765_v22 = vadd.f32 %v5982_v51, %v14549_v29  ;;  %v9243_v18 = vpop.f32.mrb[223].mxu1  ;;  %v6047_v37 = vmul.f32 %v13775_v26, %v13775_v26 }
0x160b   :  { %v6020_v15 = vsel %vm257_vm4, %v13765_v22, 0.0  ;;  %v6068_v28 = vsel %vm257_vm4, %v6047_v37, 0.0 }
0x160c   :  { %6021 = vadd.xlane.f32.xlu1 %v6020_v15 }
0x1610   :  { %6063 = vadd.xlane.f32.xlu1 %v6062_v0 }
0x1614   :  { %6066 = vadd.xlane.f32.xlu1 %v6065_v12 }
0x1618   :  { %6069 = vadd.xlane.f32.xlu1 %v6068_v28 }
0x161c   :  { %6072 = vadd.xlane.f32.xlu1 %v6071_v61 }
0x165c   :  { %v6052_v36 = vpop.xlane.xlu0 %6051 }
0x165d   :  { %v6077_v5 = vmul.f32 0.015625, %v6052_v36 }
0x165e   :  { %v6055_v25 = vpop.xlane.xlu1 %6054 }
0x165f   :  { %v6086_v17 = vadd.f32 1e-05, %v6077_v5  ;;  %v6078_v39 = vmul.f32 0.015625, %v6055_v25 }
0x1661   :  { %10387 = vrsqrt.f32 %v6086_v17  ;;  %v6087_v21 = vadd.f32 1e-05, %v6078_v39 }
0x1663   :  { %10389 = vrsqrt.f32 %v6087_v21 }
0x1664   :  { %v6058_v1 = vpop.xlane.xlu0 %6057 }
0x1665   :  { %v6079_v35 = vmul.f32 0.015625, %v6058_v1 }
0x1667   :  { %v6088_v38 = vadd.f32 1e-05, %v6079_v35 }
0x1668   :  { %v6061_v11 = vpop.xlane.xlu1 %6060  ;;  %v13793_v32 = vpop.permute.xlu0 %6128 }
0x1669   :  { %10391 = vrsqrt.f32 %v6088_v38  ;;  %v6080_v8 = vmul.f32 0.015625, %v6061_v11 }
0x166b   :  { %v10388_v7 = vpop.eup %10387  ;;  %v6089_v23 = vadd.f32 1e-05, %v6080_v8 }
0x166c   :  { %v6104_v27 = vmul.f32 %v10388_v7, %v13712_v9 }
0x166d   :  { %v10390_v44 = vpop.eup %10389  ;;  %10393 = vrsqrt.f32 %v6089_v23 }
0x166e   :  { %v6119_v45 = vmul.f32 %v13738_v4, %v6104_v27  ;;  %v6105_v31 = vmul.f32 %v10390_v44, %v13715_v43 }
0x1670   :  { %v6120_v50 = vmul.f32 %v13738_v4, %v6105_v31  ;;  %v6131_v10 = vadd.f32 %v13793_v32, %v6119_v45  ;;  %v9882_v31 = vld [vmem:[%s14486_s4 + $0x80] sm:$0xff]  }
0x1672   :  { %v6132_v6 = vadd.f32 %v13793_v32, %v6120_v50  ;;  %v9883_v50 = vld [vmem:[%s14486_s4 + $0xc8] sm:$0xff]  }
0x1673   :  { %v10392_v46 = vpop.eup %10391 }
0x1674   :  { %v6106_v19 = vmul.f32 %v10392_v46, %v13724_v42  ;;  %v6140_v33 = vpack.c.bf16 %v6132_v6, %v6131_v10  ;;  %v9884_v10 = vld [vmem:[%s14486_s4 + $0x88] sm:$0xff]   ;;  %v9885_v6 = vld [vmem:[%s14486_s4 + $0xd0] sm:$0xff]  }
0x1675   :  { %v9886_v46 = vld [vmem:[%s14486_s4 + $0x90] sm:$0xff]  }
0x1676   :  { %7940 = vmatmul.mubr.msk.bf16.vlgmr.msra.gmra.mrb[184].mxu0 %vm257_vm4, %v6140_v33  ;;  %v6121_v43 = vmul.f32 %v13738_v4, %v6106_v19  ;;  %v9887_v19 = vld [vmem:[%s14486_s4 + $0xd8] sm:$0xff]  }
0x1677   :  { %v10394_v9 = vpop.eup %10393  ;;  %6261 = vmatprep.mubr.bf16.mxu0 %v14532_v62  ;;  %v9888_v33 = vld [vmem:[%s14486_s4 + $0x98] sm:$0xff]  }
0x1678   :  { %v6107_v58 = vmul.f32 %v10394_v9, %v13729_v59  ;;  %v6133_v63 = vadd.f32 %v13793_v32, %v6121_v43  ;;  %v9889_v9 = vld [vmem:[%s14486_s4 + $0xe0] sm:$0xff]   ;;  %v9891_v43 = vld [vmem:[%s14486_s4 + $0xe8] sm:$0xff]  }
0x167a   :  { %v6122_v51 = vmul.f32 %v13738_v4, %v6107_v58  ;;  %v9890_v58 = vld [vmem:[%s14486_s4 + $0xa0] sm:$0xff]  }
0x167c   :  { %v6134_v56 = vadd.f32 %v13793_v32, %v6122_v51  ;;  %v9892_v51 = vld [vmem:[%s14486_s4 + $0xa8] sm:$0xff]  }
0x167e   :  { %v6141_v49 = vpack.c.bf16 %v6134_v56, %v6133_v63  ;;  %v9893_v63 = vld [vmem:[%s14486_s4 + $0xf0] sm:$0xff]  }
0x167f   :  { %v9894_v56 = vld [vmem:[%s14486_s4 + $0xb0] sm:$0xff]  }
0x1680   :  { %7941 = vmatmul.mubr.msk.bf16.gmra.mrb[188].mxu0 %vm257_vm4, %v6141_v49  ;;  %v9895_v49 = vld [vmem:[%s14486_s4 + $0xf8] sm:$0xff]  }
0x1681   :  { %6271 = vmatprep.mubr.bf16.mxu0 %v14532_v62 }
0x1699   :  { %v6022_v42 = vpop.xlane.xlu1 %6021 }
0x169a   :  { %v6031_v29 = vmul.f32 0.015625, %v6022_v42  ;;  %v9896_v42 = vld [vmem:[%s14486_s4 + $0xb8] sm:$0xff]  }
0x169c   :  { %v13809_v18 = vsub.f32 %v13765_v22, %v6031_v29 }
0x169d   :  { %v6064_v30 = vpop.xlane.xlu1 %6063 }
0x169e   :  { %v6081_v59 = vmul.f32 0.015625, %v6064_v30  ;;  %v6049_v15 = vmul.f32 %v13809_v18, %v13809_v18 }
0x16a0   :  { %v6090_v57 = vadd.f32 1e-05, %v6081_v59  ;;  %v6074_v3 = vsel %vm257_vm4, %v6049_v15, 0.0 }
0x16a1   :  { %6075 = vadd.xlane.f32.xlu1 %v6074_v3  ;;  %v6067_v13 = vpop.xlane.xlu1 %6066 }
0x16a2   :  { %10395 = vrsqrt.f32 %v6090_v57  ;;  %v6082_v0 = vmul.f32 0.015625, %v6067_v13 }
0x16a4   :  { %v6091_v16 = vadd.f32 1e-05, %v6082_v0  ;;  %v7773_v0 = vld [vmem:[%s14487_s5 + $0xb] sm:$0x3] }
0x16a5   :  { %v6070_v12 = vpop.xlane.xlu1 %6069 }
0x16a6   :  { %10397 = vrsqrt.f32 %v6091_v16  ;;  %v6083_v37 = vmul.f32 0.015625, %v6070_v12  ;;  %v14550_v12 = vld [vmem:[#allocation17_spill] sm:$0xff] }
0x16a8   :  { %v6092_v28 = vadd.f32 1e-05, %v6083_v37  ;;  %v13886_v37 = vrot.slane %v7773_v0, %v14550_v12 }
0x16a9   :  { %v6073_v55 = vpop.xlane.xlu1 %6072 }
0x16aa   :  { %10399 = vrsqrt.f32 %v6092_v28  ;;  %v6084_v61 = vmul.f32 0.015625, %v6073_v55  ;;  %v14551_v28 = vld [vmem:[#allocation16_spill] sm:$0xff] }
0x16ab   :  { %v13890_v55 = vrot.slane %v7773_v0, %v14551_v28 }
0x16ac   :  { %v10396_v36 = vpop.eup %10395  ;;  %v6093_v5 = vadd.f32 1e-05, %v6084_v61 }
0x16ad   :  { %v6108_v25 = vmul.f32 %v10396_v36, %v13761_v40 }
0x16ae   :  { %10401 = vrsqrt.f32 %v6093_v5 }
0x16af   :  { %v6123_v21 = vmul.f32 %v13738_v4, %v6108_v25 }
0x16b0   :  { %v10398_v17 = vpop.eup %10397 }
0x16b1   :  { %v6109_v39 = vmul.f32 %v10398_v17, %v13768_v2  ;;  %v6135_v11 = vadd.f32 %v13793_v32, %v6123_v21 }
0x16b3   :  { %v6124_v1 = vmul.f32 %v13738_v4, %v6109_v39 }
0x16b4   :  { %v10400_v35 = vpop.eup %10399 }
0x16b5   :  { %v6110_v38 = vmul.f32 %v10400_v35, %v13775_v26  ;;  %v6136_v8 = vadd.f32 %v13793_v32, %v6124_v1 }
0x16b7   :  { %v6142_v7 = vpack.c.bf16 %v6136_v8, %v6135_v11  ;;  %v6125_v40 = vmul.f32 %v13738_v4, %v6110_v38 }
0x16b8   :  { %v10402_v23 = vpop.eup %10401 }
0x16b9   :  { %v6111_v27 = vmul.f32 %v10402_v23, %v13781_v54  ;;  %7942 = vmatmul.mubr.msk.bf16.gmra.mrb[192].mxu0 %vm257_vm4, %v6142_v7  ;;  %v6137_v44 = vadd.f32 %v13793_v32, %v6125_v40  ;;  %v9881_v54 = vld [vmem:[%s14486_s4 + $0xc0] sm:$0xff]  }
0x16ba   :  { %6281 = vmatprep.mubr.bf16.mxu0 %v14532_v62  ;;  %8422 = vmatprep.subr.bf16.mxu1 %v9881_v54 }
0x16bb   :  { %v6126_v2 = vmul.f32 %v13738_v4, %v6111_v27  ;;  %8423 = vmatpush3.bf16.msra.mxu1 %v9882_v31 }
0x16bc   :  { %8424 = vmatprep.subr.bf16.mxu1 %v9883_v50 }
0x16bd   :  { %v6138_v26 = vadd.f32 %v13793_v32, %v6126_v2 }
0x16bf   :  { %v6143_v45 = vpack.c.bf16 %v6138_v26, %v6137_v44  ;;  %8425 = vmatpush3.bf16.msra.mxu1 %v9884_v10 }
0x16c0   :  { %8426 = vmatprep.subr.bf16.mxu1 %v9885_v6 }
0x16c1   :  { %7943 = vmatmul.mubr.msk.bf16.gmra.mrb[196].mxu0 %vm257_vm4, %v6143_v45 }
0x16c2   :  { %6291 = vmatprep.mubr.bf16.mxu0 %v14532_v62 }
0x16c3   :  { %8427 = vmatpush3.bf16.msra.mxu1 %v9886_v46 }
0x16c4   :  { %8428 = vmatprep.subr.bf16.mxu1 %v9887_v19 }
0x16c7   :  { %8429 = vmatpush3.bf16.msra.mxu1 %v9888_v33 }
0x16c8   :  { %8430 = vmatprep.subr.bf16.mxu1 %v9889_v9 }
0x16cb   :  { %8431 = vmatpush3.bf16.msra.mxu1 %v9890_v58 }
0x16cc   :  { %8432 = vmatprep.subr.bf16.mxu1 %v9891_v43 }
0x16cf   :  { %8433 = vmatpush3.bf16.msra.mxu1 %v9892_v51 }
0x16d0   :  { %8434 = vmatprep.subr.bf16.mxu1 %v9893_v63 }
0x16d3   :  { %8435 = vmatpush3.bf16.msra.mxu1 %v9894_v56 }
0x16d4   :  { %8436 = vmatprep.subr.bf16.mxu1 %v9895_v49 }
0x16d7   :  { %8437 = vmatpush3.bf16.msra.mxu1 %v9896_v42 }
0x16d8   :  { %9468 = vmatprep.subr.bf16.mxu1 %v14531_v24 }
0x172e   :  { %v6076_v29 = vpop.xlane.xlu1 %6075 }
0x172f   :  { %v6085_v30 = vmul.f32 0.015625, %v6076_v29 }
0x1731   :  { %v6094_v59 = vadd.f32 1e-05, %v6085_v30 }
0x1733   :  { %10403 = vrsqrt.f32 %v6094_v59 }
0x173d   :  { %v10404_v15 = vpop.eup %10403 }
0x173e   :  { %v6112_v57 = vmul.f32 %v10404_v15, %v13809_v18 }
0x1740   :  { %v6127_v3 = vmul.f32 %v13738_v4, %v6112_v57 }
0x1742   :  { %v6139_v13 = vadd.f32 %v13793_v32, %v6127_v3 }
0x1744   :  { %v6144_v16 = vpack.c.bf16 %v6139_v13, %v6139_v13 }
0x1746   :  { %7944 = vmatmul.mubr.msk.bf16.gmra.mrb[200].mxu0 %vm257_vm4, %v6144_v16 }
0x1749   :  { %v6253_v61 = vpop.f32.mrb[184].mxu0 }
0x174a   :  { %v13893_v18 = vadd.f32 %v6253_v61, %v13886_v37  ;;  %v6255_v4 = vpop.f32.mrb[185].mxu0 }
0x174b   :  { %v13896_v32 = vadd.f32 %v6255_v4, %v13890_v55  ;;  %v6257_v36 = vpop.f32.mrb[186].mxu0 }
0x174c   :  { %v6318_v5 = vmul.f32 0.044715, %v13893_v18  ;;  %v13900_v25 = vadd.f32 %v6257_v36, %v13886_v37  ;;  %v6259_v17 = vpop.f32.mrb[187].mxu0 }
0x174d   :  { %v6319_v39 = vmul.f32 0.044715, %v13896_v32  ;;  %v13904_v21 = vadd.f32 %v6259_v17, %v13890_v55 }
0x174e   :  { %v6336_v1 = vmul.f32 %v6318_v5, %v13893_v18  ;;  %v6320_v35 = vmul.f32 0.044715, %v13900_v25 }
0x174f   :  { %v6337_v38 = vmul.f32 %v6319_v39, %v13896_v32  ;;  %v6321_v11 = vmul.f32 0.044715, %v13904_v21 }
0x1750   :  { %v6354_v8 = vmul.f32 %v6336_v1, %v13893_v18  ;;  %v6338_v7 = vmul.f32 %v6320_v35, %v13900_v25 }
0x1751   :  { %v6355_v23 = vmul.f32 %v6337_v38, %v13896_v32  ;;  %v6339_v27 = vmul.f32 %v6321_v11, %v13904_v21 }
0x1752   :  { %v6372_v40 = vadd.f32 %v6354_v8, %v13893_v18  ;;  %v6356_v2 = vmul.f32 %v6338_v7, %v13900_v25 }
0x1753   :  { %v6357_v44 = vmul.f32 %v6339_v27, %v13904_v21  ;;  %v6263_v26 = vpop.f32.mrb[188].mxu0  ;;  %v6373_v45 = vadd.f32 %v6355_v23, %v13896_v32 }
0x1754   :  { %v6390_v54 = vmul.f32 0.7978846, %v6372_v40  ;;  %v6374_v31 = vadd.f32 %v6356_v2, %v13900_v25  ;;  %v13920_v50 = vadd.f32 %v6263_v26, %v13886_v37  ;;  %v6265_v10 = vpop.f32.mrb[189].mxu0  ;;  %v6300_v40 = vmul.f32 0.5, %v13893_v18 }
0x1755   :  { %v13923_v6 = vadd.f32 %v6265_v10, %v13890_v55  ;;  %v6267_v46 = vpop.f32.mrb[190].mxu0  ;;  %v6375_v19 = vadd.f32 %v6357_v44, %v13904_v21  ;;  %v6391_v33 = vmul.f32 0.7978846, %v6373_v45  ;;  %v6302_v2 = vmul.f32 0.5, %v13900_v25 }
0x1756   :  { %10405 = vtanh.f32 %v6390_v54  ;;  %v6392_v9 = vmul.f32 0.7978846, %v6374_v31  ;;  %v6322_v58 = vmul.f32 0.044715, %v13920_v50  ;;  %v6268_v43 = vadd.f32 %v6267_v46, %v13886_v37  ;;  %v6269_v51 = vpop.f32.mrb[191].mxu0 }
0x1757   :  { %v6323_v63 = vmul.f32 0.044715, %v13923_v6  ;;  %v6270_v56 = vadd.f32 %v6269_v51, %v13890_v55  ;;  %v6393_v49 = vmul.f32 0.7978846, %v6375_v19  ;;  %10407 = vtanh.f32 %v6391_v33 }
0x1758   :  { %10409 = vtanh.f32 %v6392_v9  ;;  %v6340_v42 = vmul.f32 %v6322_v58, %v13920_v50  ;;  %v6324_v29 = vmul.f32 0.044715, %v6268_v43  ;;  %v6301_v26 = vmul.f32 0.5, %v13896_v32 }
0x1759   :  { %v6341_v30 = vmul.f32 %v6323_v63, %v13923_v6  ;;  %v6325_v59 = vmul.f32 0.044715, %v6270_v56  ;;  %10411 = vtanh.f32 %v6393_v49  ;;  %v6303_v45 = vmul.f32 0.5, %v13904_v21 }
0x175a   :  { %v6358_v15 = vmul.f32 %v6340_v42, %v13920_v50  ;;  %v6342_v57 = vmul.f32 %v6324_v29, %v6268_v43  ;;  %v6304_v42 = vmul.f32 0.5, %v13920_v50  ;;  %v6306_v32 = vmul.f32 0.5, %v6268_v43 }
0x175b   :  { %v6359_v3 = vmul.f32 %v6341_v30, %v13923_v6  ;;  %v6343_v13 = vmul.f32 %v6325_v59, %v6270_v56  ;;  %v6305_v21 = vmul.f32 0.5, %v13923_v6  ;;  %v6307_v30 = vmul.f32 0.5, %v6270_v56 }
0x175c   :  { %v6360_v0 = vmul.f32 %v6342_v57, %v6268_v43  ;;  %v6376_v16 = vadd.f32 %v6358_v15, %v13920_v50 }
0x175d   :  { %v6361_v61 = vmul.f32 %v6343_v13, %v6270_v56  ;;  %v6377_v4 = vadd.f32 %v6359_v3, %v13923_v6 }
0x175e   :  { %v6378_v36 = vadd.f32 %v6360_v0, %v6268_v43  ;;  %v6394_v5 = vmul.f32 0.7978846, %v6376_v16 }
0x175f   :  { %v6379_v17 = vadd.f32 %v6361_v61, %v6270_v56  ;;  %v6395_v39 = vmul.f32 0.7978846, %v6377_v4 }
0x1760   :  { %v10406_v1 = vpop.eup %10405  ;;  %v6396_v35 = vmul.f32 0.7978846, %v6378_v36  ;;  %10413 = vtanh.f32 %v6394_v5 }
0x1761   :  { %v10408_v38 = vpop.eup %10407  ;;  %v6426_v11 = vadd.f32 1.0, %v10406_v1  ;;  %v6397_v8 = vmul.f32 0.7978846, %v6379_v17  ;;  %10415 = vtanh.f32 %v6395_v39 }
0x1762   :  { %v10410_v7 = vpop.eup %10409  ;;  %v6427_v23 = vadd.f32 1.0, %v10408_v38  ;;  %10417 = vtanh.f32 %v6396_v35 }
0x1763   :  { %v10412_v27 = vpop.eup %10411  ;;  %v6428_v44 = vadd.f32 1.0, %v10410_v7  ;;  %10419 = vtanh.f32 %v6397_v8  ;;  %v6444_v31 = vmul.f32 %v6426_v11, %v6300_v40 }
0x1764   :  { %v6429_v54 = vadd.f32 1.0, %v10412_v27  ;;  %v6445_v46 = vmul.f32 %v6427_v23, %v6301_v26 }
0x1765   :  { %v6446_v10 = vmul.f32 %v6428_v44, %v6302_v2 }
0x1766   :  { %v6447_v19 = vmul.f32 %v6429_v54, %v6303_v45 }
0x1767   :  { %v6462_v33 = vpack.c.bf16 %v6446_v10, %v6444_v31 }
0x1768   :  { %v6463_v9 = vpack.c.bf16 %v6447_v19, %v6445_v46 }
0x176a   :  { %v10414_v58 = vpop.eup %10413  ;;  %6633 = vmatprep.mubr.bf16.mxu1 %v6463_v9 }
0x176b   :  { %v10416_v51 = vpop.eup %10415  ;;  %6634 = vmatmul.mubr.bf16.vlgmr.msra.gmra.mrb[224].mxu1 %v6462_v33  ;;  %v6430_v18 = vadd.f32 1.0, %v10414_v58 }
0x176c   :  { %v10418_v63 = vpop.eup %10417  ;;  %v6431_v25 = vadd.f32 1.0, %v10416_v51 }
0x176d   :  { %v10420_v49 = vpop.eup %10419  ;;  %v6432_v29 = vadd.f32 1.0, %v10418_v63  ;;  %v6448_v15 = vmul.f32 %v6430_v18, %v6304_v42 }
0x176e   :  { %v6433_v59 = vadd.f32 1.0, %v10420_v49  ;;  %v6449_v3 = vmul.f32 %v6431_v25, %v6305_v21 }
0x176f   :  { %v6450_v57 = vmul.f32 %v6432_v29, %v6306_v32 }
0x1770   :  { %v6451_v13 = vmul.f32 %v6433_v59, %v6307_v30 }
0x1771   :  { %v6464_v0 = vpack.c.bf16 %v6450_v57, %v6448_v15 }
0x1772   :  { %v6465_v16 = vpack.c.bf16 %v6451_v13, %v6449_v3 }
0x1774   :  { %6641 = vmatprep.mubr.bf16.mxu1 %v6465_v16 }
0x1775   :  { %6642 = vmatmul.mubr.bf16.gmra.mrb[228].mxu1 %v6464_v0 }
0x178c   :  { %v6273_v61 = vpop.f32.mrb[192].mxu0 }
0x178d   :  { %v13943_v4 = vadd.f32 %v6273_v61, %v13886_v37  ;;  %v6275_v36 = vpop.f32.mrb[193].mxu0 }
0x178e   :  { %v13946_v50 = vadd.f32 %v6275_v36, %v13890_v55  ;;  %v6277_v43 = vpop.f32.mrb[194].mxu0 }
0x178f   :  { %v6326_v6 = vmul.f32 0.044715, %v13943_v4  ;;  %v13950_v56 = vadd.f32 %v6277_v43, %v13886_v37  ;;  %v6279_v5 = vpop.f32.mrb[195].mxu0 }
0x1790   :  { %v6327_v17 = vmul.f32 0.044715, %v13946_v50  ;;  %v13954_v39 = vadd.f32 %v6279_v5, %v13890_v55 }
0x1791   :  { %v6344_v1 = vmul.f32 %v6326_v6, %v13943_v4  ;;  %v6328_v35 = vmul.f32 0.044715, %v13950_v56 }
0x1792   :  { %v6345_v38 = vmul.f32 %v6327_v17, %v13946_v50  ;;  %v6329_v11 = vmul.f32 0.044715, %v13954_v39 }
0x1793   :  { %v6362_v8 = vmul.f32 %v6344_v1, %v13943_v4  ;;  %v6346_v7 = vmul.f32 %v6328_v35, %v13950_v56 }
0x1794   :  { %v6363_v23 = vmul.f32 %v6345_v38, %v13946_v50  ;;  %v6347_v27 = vmul.f32 %v6329_v11, %v13954_v39  ;;  %v6283_v40 = vpop.f32.mrb[196].mxu0 }
0x1795   :  { %v6364_v2 = vmul.f32 %v6346_v7, %v13950_v56  ;;  %v13966_v44 = vadd.f32 %v6283_v40, %v13886_v37  ;;  %v6285_v26 = vpop.f32.mrb[197].mxu0  ;;  %v6380_v45 = vadd.f32 %v6362_v8, %v13943_v4  ;;  %v6308_v40 = vmul.f32 0.5, %v13943_v4 }
0x1796   :  { %v6365_v54 = vmul.f32 %v6347_v27, %v13954_v39  ;;  %v13971_v31 = vadd.f32 %v6285_v26, %v13890_v55  ;;  %v6287_v10 = vpop.f32.mrb[198].mxu0  ;;  %v6381_v46 = vadd.f32 %v6363_v23, %v13946_v50 }
0x1797   :  { %v6330_v19 = vmul.f32 0.044715, %v13966_v44  ;;  %v6288_v33 = vadd.f32 %v6287_v10, %v13886_v37  ;;  %v6289_v9 = vpop.f32.mrb[199].mxu0  ;;  %v6382_v58 = vadd.f32 %v6364_v2, %v13950_v56  ;;  %v6398_v51 = vmul.f32 0.7978846, %v6380_v45 }
0x1798   :  { %v6331_v18 = vmul.f32 0.044715, %v13971_v31  ;;  %v6290_v63 = vadd.f32 %v6289_v9, %v13890_v55  ;;  %v6383_v25 = vadd.f32 %v6365_v54, %v13954_v39  ;;  %v6399_v49 = vmul.f32 0.7978846, %v6381_v46 }
0x1799   :  { %v6348_v42 = vmul.f32 %v6330_v19, %v13966_v44  ;;  %v6332_v32 = vmul.f32 0.044715, %v6288_v33  ;;  %v6400_v29 = vmul.f32 0.7978846, %v6382_v58  ;;  %10421 = vtanh.f32 %v6398_v51 }
0x179a   :  { %v6349_v21 = vmul.f32 %v6331_v18, %v13971_v31  ;;  %v6333_v30 = vmul.f32 0.044715, %v6290_v63  ;;  %v6401_v59 = vmul.f32 0.7978846, %v6383_v25  ;;  %10423 = vtanh.f32 %v6399_v49 }
0x179b   :  { %v6366_v15 = vmul.f32 %v6348_v42, %v13966_v44  ;;  %v6350_v57 = vmul.f32 %v6332_v32, %v6288_v33  ;;  %10425 = vtanh.f32 %v6400_v29  ;;  %v6310_v2 = vmul.f32 0.5, %v13950_v56 }
0x179c   :  { %v6367_v3 = vmul.f32 %v6349_v21, %v13971_v31  ;;  %v6351_v13 = vmul.f32 %v6333_v30, %v6290_v63  ;;  %10427 = vtanh.f32 %v6401_v59  ;;  %v6309_v45 = vmul.f32 0.5, %v13946_v50 }
0x179d   :  { %v6368_v0 = vmul.f32 %v6350_v57, %v6288_v33  ;;  %v6384_v16 = vadd.f32 %v6366_v15, %v13966_v44  ;;  %v6311_v54 = vmul.f32 0.5, %v13954_v39  ;;  %v6312_v56 = vmul.f32 0.5, %v13966_v44 }
0x179e   :  { %v6369_v61 = vmul.f32 %v6351_v13, %v6290_v63  ;;  %v6385_v36 = vadd.f32 %v6367_v3, %v13971_v31  ;;  %v6314_v50 = vmul.f32 0.5, %v6288_v33  ;;  %v6313_v39 = vmul.f32 0.5, %v13971_v31 }
0x179f   :  { %v6386_v43 = vadd.f32 %v6368_v0, %v6288_v33  ;;  %v6402_v6 = vmul.f32 0.7978846, %v6384_v16  ;;  %v6315_v30 = vmul.f32 0.5, %v6290_v63 }
0x17a0   :  { %v6387_v5 = vadd.f32 %v6369_v61, %v6290_v63  ;;  %v6403_v17 = vmul.f32 0.7978846, %v6385_v36 }
0x17a1   :  { %v6404_v1 = vmul.f32 0.7978846, %v6386_v43  ;;  %10429 = vtanh.f32 %v6402_v6 }
0x17a2   :  { %v6405_v35 = vmul.f32 0.7978846, %v6387_v5  ;;  %10431 = vtanh.f32 %v6403_v17 }
0x17a3   :  { %v10422_v38 = vpop.eup %10421  ;;  %10433 = vtanh.f32 %v6404_v1 }
0x17a4   :  { %v10424_v11 = vpop.eup %10423  ;;  %v6434_v8 = vadd.f32 1.0, %v10422_v38  ;;  %10435 = vtanh.f32 %v6405_v35 }
0x17a5   :  { %v10426_v7 = vpop.eup %10425  ;;  %v6435_v23 = vadd.f32 1.0, %v10424_v11 }
0x17a6   :  { %v10428_v27 = vpop.eup %10427  ;;  %v6436_v26 = vadd.f32 1.0, %v10426_v7  ;;  %v6452_v46 = vmul.f32 %v6434_v8, %v6308_v40 }
0x17a7   :  { %v6437_v10 = vadd.f32 1.0, %v10428_v27  ;;  %v6453_v9 = vmul.f32 %v6435_v23, %v6309_v45 }
0x17a8   :  { %v6454_v19 = vmul.f32 %v6436_v26, %v6310_v2 }
0x17a9   :  { %v6455_v58 = vmul.f32 %v6437_v10, %v6311_v54 }
0x17aa   :  { %v6466_v51 = vpack.c.bf16 %v6454_v19, %v6452_v46 }
0x17ab   :  { %v10430_v18 = vpop.eup %10429  ;;  %v6467_v25 = vpack.c.bf16 %v6455_v58, %v6453_v9 }
0x17ac   :  { %v10432_v49 = vpop.eup %10431  ;;  %v6438_v42 = vadd.f32 1.0, %v10430_v18 }
0x17ad   :  { %v10434_v32 = vpop.eup %10433  ;;  %6649 = vmatprep.mubr.bf16.mxu1 %v6467_v25  ;;  %v6439_v4 = vadd.f32 1.0, %v10432_v49  ;;  %v13998_v49 = vld [vmem:[%s14487_s5 + $0xd] ss:$0 sm:$0xff] }
0x17ae   :  { %v10436_v29 = vpop.eup %10435  ;;  %6650 = vmatmul.mubr.bf16.gmra.mrb[232].mxu1 %v6466_v51  ;;  %v6440_v21 = vadd.f32 1.0, %v10434_v32  ;;  %v6456_v15 = vmul.f32 %v6438_v42, %v6312_v56 }
0x17af   :  { %v6441_v59 = vadd.f32 1.0, %v10436_v29  ;;  %v6457_v3 = vmul.f32 %v6439_v4, %v6313_v39 }
0x17b0   :  { %v6458_v57 = vmul.f32 %v6440_v21, %v6314_v50 }
0x17b1   :  { %v6459_v13 = vmul.f32 %v6441_v59, %v6315_v30 }
0x17b2   :  { %v6468_v0 = vpack.c.bf16 %v6458_v57, %v6456_v15 }
0x17b3   :  { %v6469_v16 = vpack.c.bf16 %v6459_v13, %v6457_v3 }
0x17b5   :  { %6657 = vmatprep.mubr.bf16.mxu1 %v6469_v16 }
0x17b6   :  { %6658 = vmatmul.mubr.bf16.gmra.mrb[236].mxu1 %v6468_v0 }
0x1819   :  { %v6293_v61 = vpop.f32.mrb[200].mxu0 }
0x181a   :  { %v6294_v36 = vadd.f32 %v6293_v61, %v13886_v37  ;;  %v6295_v43 = vpop.f32.mrb[201].mxu0 }
0x181b   :  { %v6296_v44 = vadd.f32 %v6295_v43, %v13890_v55  ;;  %v6297_v33 = vpop.f32.mrb[202].mxu0 }
0x181c   :  { %v6334_v6 = vmul.f32 0.044715, %v6294_v36  ;;  %v6298_v5 = vpop.f32.mrb[203].mxu0  ;;  %v6316_v37 = vmul.f32 0.5, %v6294_v36 }
0x181d   :  { %v6335_v31 = vmul.f32 0.044715, %v6296_v44  ;;  %v6317_v2 = vmul.f32 0.5, %v6296_v44 }
0x181e   :  { %v6352_v63 = vmul.f32 %v6334_v6, %v6294_v36 }
0x181f   :  { %v6353_v17 = vmul.f32 %v6335_v31, %v6296_v44 }
0x1820   :  { %v6370_v1 = vmul.f32 %v6352_v63, %v6294_v36 }
0x1821   :  { %v6371_v35 = vmul.f32 %v6353_v17, %v6296_v44 }
0x1822   :  { %v6388_v38 = vadd.f32 %v6370_v1, %v6294_v36 }
0x1823   :  { %v6389_v11 = vadd.f32 %v6371_v35, %v6296_v44 }
0x1824   :  { %v6406_v8 = vmul.f32 0.7978846, %v6388_v38 }
0x1825   :  { %v6407_v7 = vmul.f32 0.7978846, %v6389_v11 }
0x1826   :  { %10437 = vtanh.f32 %v6406_v8 }
0x1827   :  { %10439 = vtanh.f32 %v6407_v7 }
0x1830   :  { %v10438_v23 = vpop.eup %10437 }
0x1831   :  { %v10440_v27 = vpop.eup %10439  ;;  %v6442_v40 = vadd.f32 1.0, %v10438_v23 }
0x1832   :  { %v6443_v55 = vadd.f32 1.0, %v10440_v27 }
0x1833   :  { %v6460_v26 = vmul.f32 %v6442_v40, %v6316_v37 }
0x1834   :  { %v6461_v45 = vmul.f32 %v6443_v55, %v6317_v2 }
0x1835   :  { %v6470_v10 = vpack.c.bf16 %v6460_v26, %v6460_v26 }
0x1836   :  { %v6471_v54 = vpack.c.bf16 %v6461_v45, %v6461_v45 }
0x1838   :  { %6665 = vmatprep.mubr.bf16.mxu1 %v6471_v54 }
0x1839   :  { %6666 = vmatmul.mubr.bf16.gmra.mrb[240].mxu1 %v6470_v10 }
0x183e   :  { %v8438_v46 = vpop.f32.mrb[224].mxu1 }
0x183f   :  { %v8439_v19 = vpop.f32.mrb[225].mxu1 }
0x1840   :  { %v8440_v9 = vadd.f32 %v8439_v19, %v8438_v46  ;;  %v8441_v58 = vpop.f32.mrb[226].mxu1 }
0x1841   :  { %v8442_v51 = vpop.f32.mrb[227].mxu1 }
0x1842   :  { %v8443_v18 = vadd.f32 %v8442_v51, %v8441_v58  ;;  %v6673_v39 = vadd.f32 %v8440_v9, %v13659_v47 }
0x1844   :  { %v6674_v25 = vadd.f32 %v8443_v18, %v13663_v41  ;;  %v6688_v13 = vadd.f32 %v13998_v49, %v6673_v39 }
0x1846   :  { %v6689_v42 = vadd.f32 %v13998_v49, %v6674_v25  ;;  %v6697_v16 = vsel %vm257_vm4, %v6688_v13, 0.0 }
0x1848   :  { %v8444_v32 = vpop.f32.mrb[228].mxu1  ;;  %v6700_v4 = vsel %vm257_vm4, %v6689_v42, 0.0 }
0x1849   :  { %v8445_v29 = vpop.f32.mrb[229].mxu1  ;;  %6701 = vadd.xlane.f32.xlu1 %v6700_v4 }
0x184a   :  { %v8446_v56 = vadd.f32 %v8445_v29, %v8444_v32  ;;  %v8447_v50 = vpop.f32.mrb[230].mxu1 }
0x184b   :  { %v8448_v21 = vpop.f32.mrb[231].mxu1 }
0x184c   :  { %v6675_v30 = vadd.f32 %v8446_v56, %v13671_v53  ;;  %v8449_v41 = vadd.f32 %v8448_v21, %v8447_v50  ;;  %v10496_v56 = vld [vmem:[%s14484_s2] ss:$0 sm:$0xff] }
0x184e   :  { %v6676_v59 = vadd.f32 %v8449_v41, %v13675_v20  ;;  %v6690_v15 = vadd.f32 %v13998_v49, %v6675_v30 }
0x1850   :  { %v6703_v57 = vsel %vm257_vm4, %v6690_v15, 0.0  ;;  %v6691_v3 = vadd.f32 %v13998_v49, %v6676_v59 }
0x1851   :  { %6704 = vadd.xlane.f32.xlu1 %v6703_v57 }
0x1852   :  { %v6706_v0 = vsel %vm257_vm4, %v6691_v3, 0.0 }
0x1853   :  { %6707 = vadd.xlane.f32.xlu0 %v6706_v0 }
0x1855   :  { %6698 = vadd.xlane.f32.xlu1 %v6697_v16 }
0x1881   :  { %v8450_v47 = vpop.f32.mrb[232].mxu1 }
0x1882   :  { %v8451_v53 = vpop.f32.mrb[233].mxu1 }
0x1883   :  { %v8452_v61 = vadd.f32 %v8451_v53, %v8450_v47  ;;  %v8453_v36 = vpop.f32.mrb[234].mxu1 }
0x1884   :  { %v8454_v20 = vpop.f32.mrb[235].mxu1 }
0x1885   :  { %v8455_v43 = vadd.f32 %v8454_v20, %v8453_v36  ;;  %v6677_v63 = vadd.f32 %v8452_v61, %v13683_v48 }
0x1887   :  { %v6678_v35 = vadd.f32 %v8455_v43, %v13687_v52  ;;  %v6692_v23 = vadd.f32 %v13998_v49, %v6677_v63  ;;  %v9899_v63 = vld [vmem:[%s14488_s6 + $0x4] ss:$8 sps:$4 sm:$0xff]  }
0x1888   :  { %7353 = vmatprep.subr.bf16.mxu0 %v9899_v63 }
0x1889   :  { %v8456_v44 = vpop.f32.mrb[236].mxu1  ;;  %v6709_v52 = vsel %vm257_vm4, %v6692_v23, 0.0 }
0x188a   :  { %v8457_v33 = vpop.f32.mrb[237].mxu1 }
0x188b   :  { %v8458_v6 = vadd.f32 %v8457_v33, %v8456_v44  ;;  %v8459_v5 = vpop.f32.mrb[238].mxu1 }
0x188c   :  { %v8460_v31 = vpop.f32.mrb[239].mxu1 }
0x188d   :  { %v6679_v17 = vadd.f32 %v8458_v6, %v13695_v14  ;;  %v8461_v1 = vadd.f32 %v8460_v31, %v8459_v5  ;;  %v6693_v14 = vadd.f32 %v13998_v49, %v6678_v35  ;;  %v9897_v31 = vld [vmem:[%s14488_s6] ss:$8 sps:$4 sm:$0xff]   ;;  %v9905_v35 = vld [vmem:[%s14488_s6 + $0x24] ss:$8 sps:$4 sm:$0xff]  }
0x188e   :  { %7354 = vmatpush1.bf16.msra.mxu0 %v9897_v31  ;;  %v9936_v31 = vld [vmem:[%s14488_s6 + $0xd0] ss:$8 sps:$4 sm:$0xff]  }
0x188f   :  { %v6680_v38 = vadd.f32 %v8461_v1, %v13699_v60  ;;  %v14016_v11 = vadd.f32 %v13998_v49, %v6679_v17  ;;  %v6712_v60 = vsel %vm257_vm4, %v6693_v14, 0.0  ;;  %v9902_v17 = vld [vmem:[%s14488_s6 + $0x14] ss:$8 sps:$4 sm:$0xff]   ;;  %v9900_v1 = vld [vmem:[%s14488_s6 + $0x10] ss:$8 sps:$4 sm:$0xff]  }
0x1890   :  { %7355 = vmatprep.subr.bf16.mxu0 %v9902_v17  ;;  %v9941_v17 = vld [vmem:[%s14488_s6 + $0xe4] ss:$8 sps:$4 sm:$0xff]  }
0x1891   :  { %v6715_v8 = vsel %vm257_vm4, %v14016_v11, 0.0  ;;  %v6695_v7 = vadd.f32 %v13998_v49, %v6680_v38  ;;  %v9903_v38 = vld [vmem:[%s14488_s6 + $0x20] ss:$8 sps:$4 sm:$0xff]  }
0x1892   :  { %6716 = vadd.xlane.f32.xlu0 %v6715_v8  ;;  %7356 = vmatpush1.bf16.msra.mxu0 %v9900_v1  ;;  %v9908_v8 = vld [vmem:[%s14488_s6 + $0x34] ss:$8 sps:$4 sm:$0xff]  }
0x1893   :  { %v6718_v48 = vsel %vm257_vm4, %v6695_v7, 0.0  ;;  %7357 = vmatprep.subr.bf16.mxu0 %v9905_v35 }
0x1894   :  { %6719 = vadd.xlane.f32.xlu1 %v6718_v48  ;;  %v9909_v48 = vld [vmem:[%s14488_s6 + $0x40] ss:$8 sps:$4 sm:$0xff]  }
0x1896   :  { %6710 = vadd.xlane.f32.xlu0 %v6709_v52  ;;  %7358 = vmatpush1.bf16.msra.mxu0 %v9903_v38  ;;  %v9912_v52 = vld [vmem:[%s14488_s6 + $0x50] ss:$8 sps:$4 sm:$0xff]  }
0x1897   :  { %7359 = vmatprep.subr.bf16.mxu0 %v9908_v8 }
0x1898   :  { %6713 = vadd.xlane.f32.xlu1 %v6712_v60  ;;  %v9917_v60 = vld [vmem:[%s14488_s6 + $0x64] ss:$8 sps:$4 sm:$0xff]  }
0x18d6   :  { %v6702_v27 = vpop.xlane.xlu1 %6701 }
0x18d7   :  { %v6725_v37 = vmul.f32 0.015625, %v6702_v27  ;;  %v9915_v27 = vld [vmem:[%s14488_s6 + $0x60] ss:$8 sps:$4 sm:$0xff]  }
0x18d9   :  { %v14026_v40 = vsub.f32 %v6689_v42, %v6725_v37  ;;  %v9920_v37 = vld [vmem:[%s14488_s6 + $0x74] ss:$8 sps:$4 sm:$0xff]  }
0x18db   :  { %v6743_v2 = vmul.f32 %v14026_v40, %v14026_v40 }
0x18dd   :  { %v6754_v55 = vsel %vm257_vm4, %v6743_v2, 0.0 }
0x18de   :  { %v6705_v26 = vpop.xlane.xlu1 %6704  ;;  %6755 = vadd.xlane.f32.xlu1 %v6754_v55 }
0x18df   :  { %v6726_v45 = vmul.f32 0.015625, %v6705_v26  ;;  %v9918_v26 = vld [vmem:[%s14488_s6 + $0x70] ss:$8 sps:$4 sm:$0xff]  }
0x18e0   :  { %v6708_v54 = vpop.xlane.xlu0 %6707 }
0x18e1   :  { %v14031_v10 = vsub.f32 %v6690_v15, %v6726_v45  ;;  %v6727_v46 = vmul.f32 0.015625, %v6708_v54  ;;  %v9923_v54 = vld [vmem:[%s14488_s6 + $0x84] ss:$8 sps:$4 sm:$0xff]  }
0x18e2   :  { %v6699_v19 = vpop.xlane.xlu1 %6698 }
0x18e3   :  { %v14033_v9 = vsub.f32 %v6691_v3, %v6727_v46  ;;  %v6724_v58 = vmul.f32 0.015625, %v6699_v19  ;;  %v6744_v51 = vmul.f32 %v14031_v10, %v14031_v10  ;;  %v9921_v46 = vld [vmem:[%s14488_s6 + $0x80] ss:$8 sps:$4 sm:$0xff]   ;;  %v9926_v19 = vld [vmem:[%s14488_s6 + $0x94] ss:$8 sps:$4 sm:$0xff]  }
0x18e5   :  { %v14037_v18 = vsub.f32 %v6688_v13, %v6724_v58  ;;  %v6757_v25 = vsel %vm257_vm4, %v6744_v51, 0.0  ;;  %v6745_v42 = vmul.f32 %v14033_v9, %v14033_v9 }
0x18e6   :  { %6758 = vadd.xlane.f32.xlu0 %v6757_v25 }
0x18e7   :  { %v6760_v32 = vsel %vm257_vm4, %v6745_v42, 0.0  ;;  %v6742_v4 = vmul.f32 %v14037_v18, %v14037_v18  ;;  %v9924_v42 = vld [vmem:[%s14488_s6 + $0x90] ss:$8 sps:$4 sm:$0xff]  }
0x18e8   :  { %6761 = vadd.xlane.f32.xlu1 %v6760_v32 }
0x18e9   :  { %v6751_v29 = vsel %vm257_vm4, %v6742_v4, 0.0 }
0x18ea   :  { %6752 = vadd.xlane.f32.xlu0 %v6751_v29  ;;  %v9929_v29 = vld [vmem:[%s14488_s6 + $0xa4] ss:$8 sps:$4 sm:$0xff]  }
0x18f9   :  { %6814 = vrot.lane.b32.xlu1 %v10496_v56, %s10525_s27 }
0x190c   :  { %v8462_v50 = vpop.f32.mrb[240].mxu1 }
0x190d   :  { %v8463_v21 = vpop.f32.mrb[241].mxu1 }
0x190e   :  { %v8464_v39 = vadd.f32 %v8463_v21, %v8462_v50  ;;  %v8465_v30 = vpop.f32.mrb[242].mxu1 }
0x190f   :  { %v8466_v41 = vpop.f32.mrb[243].mxu1 }
0x1910   :  { %v6681_v59 = vadd.f32 %v8464_v39, %v13765_v22  ;;  %v9927_v39 = vld [vmem:[%s14488_s6 + $0xa0] ss:$8 sps:$4 sm:$0xff]  }
0x1912   :  { %v14052_v15 = vadd.f32 %v13998_v49, %v6681_v59 }
0x1914   :  { %v6721_v57 = vsel %vm257_vm4, %v14052_v15, 0.0 }
0x1915   :  { %6722 = vadd.xlane.f32.xlu0 %v6721_v57 }
0x191f   :  { %v14056_v3 = vpop.xlane.xlu0 %6716 }
0x1921   :  { %v6720_v13 = vpop.xlane.xlu1 %6719 }
0x1922   :  { %v6731_v0 = vmul.f32 0.015625, %v6720_v13  ;;  %v14145_v13 = vld [vmem:[%s14484_s2 + $0x1] ss:$0 sm:$0xff] }
0x1923   :  { %v6711_v16 = vpop.xlane.xlu0 %6710 }
0x1924   :  { %v14058_v47 = vsub.f32 %v6695_v7, %v6731_v0  ;;  %v6728_v53 = vmul.f32 0.015625, %v6711_v16  ;;  %v9906_v7 = vld [vmem:[%s14488_s6 + $0x30] ss:$8 sps:$4 sm:$0xff]   ;;  %v9932_v0 = vld [vmem:[%s14488_s6 + $0xb4] ss:$8 sps:$4 sm:$0xff]  }
0x1925   :  { %v6714_v61 = vpop.xlane.xlu1 %6713  ;;  %7360 = vmatpush1.bf16.msra.mxu0 %v9906_v7  ;;  %v9939_v7 = vld [vmem:[%s14488_s6 + $0xe0] ss:$8 sps:$4 sm:$0xff]  }
0x1926   :  { %v14060_v36 = vsub.f32 %v6692_v23, %v6728_v53  ;;  %v6729_v20 = vmul.f32 0.015625, %v6714_v61  ;;  %v6749_v22 = vmul.f32 %v14058_v47, %v14058_v47  ;;  %v9911_v23 = vld [vmem:[%s14488_s6 + $0x44] ss:$8 sps:$4 sm:$0xff]   ;;  %v9930_v53 = vld [vmem:[%s14488_s6 + $0xb0] ss:$8 sps:$4 sm:$0xff]  }
0x1927   :  { %7361 = vmatprep.subr.bf16.mxu0 %v9911_v23 }
0x1928   :  { %v14064_v49 = vsub.f32 %v6693_v14, %v6729_v20  ;;  %v6772_v43 = vsel %vm257_vm4, %v6749_v22, 0.0  ;;  %v6746_v44 = vmul.f32 %v14060_v36, %v14060_v36  ;;  %v9914_v14 = vld [vmem:[%s14488_s6 + $0x54] ss:$8 sps:$4 sm:$0xff]   ;;  %v9933_v20 = vld [vmem:[%s14488_s6 + $0xc0] ss:$8 sps:$4 sm:$0xff]  }
0x1929   :  { %6773 = vadd.xlane.f32.xlu1 %v6772_v43  ;;  %7362 = vmatpush1.bf16.msra.mxu0 %v9909_v48  ;;  %v9938_v43 = vld [vmem:[%s14488_s6 + $0xd4] ss:$8 sps:$4 sm:$0xff]   ;;  %v9942_v48 = vld [vmem:[%s14488_s6 + $0xf0] ss:$8 sps:$4 sm:$0xff]  }
0x192a   :  { %v6747_v33 = vmul.f32 %v14064_v49, %v14064_v49  ;;  %v6763_v6 = vsel %vm257_vm4, %v6746_v44, 0.0  ;;  %7363 = vmatprep.subr.bf16.mxu0 %v9914_v14 }
0x192c   :  { %v6766_v5 = vsel %vm257_vm4, %v6747_v33, 0.0 }
0x192d   :  { %6764 = vadd.xlane.f32.xlu1 %v6763_v6  ;;  %6767 = vadd.xlane.f32.xlu0 %v6766_v5 }
0x192e   :  { %7364 = vmatpush1.bf16.msra.mxu0 %v9912_v52  ;;  %v9947_v52 = vld [vmem:[%s14488_s6 + $0x104] ss:$8 sps:$4 sm:$0xff]  }
0x192f   :  { %7365 = vmatprep.subr.bf16.mxu0 %v9917_v60 }
0x1932   :  { %7366 = vmatpush1.bf16.msra.mxu0 %v9915_v27 }
0x1933   :  { %7367 = vmatprep.subr.bf16.mxu0 %v9920_v37 }
0x1936   :  { %7368 = vmatpush1.bf16.msra.mxu0 %v9918_v26 }
0x1937   :  { %7369 = vmatprep.subr.bf16.mxu0 %v9923_v54 }
0x193a   :  { %7370 = vmatpush1.bf16.msra.mxu0 %v9921_v46 }
0x193b   :  { %7371 = vmatprep.subr.bf16.mxu0 %v9926_v19 }
0x193e   :  { %7372 = vmatpush1.bf16.msra.mxu0 %v9924_v42 }
0x193f   :  { %7373 = vmatprep.subr.bf16.mxu0 %v9929_v29 }
0x1942   :  { %7374 = vmatpush1.bf16.msra.mxu0 %v9927_v39 }
0x1943   :  { %7375 = vmatprep.subr.bf16.mxu0 %v9932_v0 }
0x1946   :  { %7376 = vmatpush1.bf16.msra.mxu0 %v9930_v53 }
0x196b   :  { %v6756_v2 = vpop.xlane.xlu1 %6755 }
0x196c   :  { %v6779_v55 = vmul.f32 0.015625, %v6756_v2 }
0x196e   :  { %v6788_v45 = vadd.f32 1e-05, %v6779_v55  ;;  %v6730_v55 = vmul.f32 0.015625, %v14056_v3 }
0x1970   :  { %10441 = vrsqrt.f32 %v6788_v45  ;;  %v14206_v54 = vsub.f32 %v14016_v11, %v6730_v55  ;;  %v7490_v55 = vld [vmem:[%s14489_s7 + $0x60] sm:$0xff] }
0x1972   :  { %v6748_v19 = vmul.f32 %v14206_v54, %v14206_v54 }
0x1973   :  { %v6759_v58 = vpop.xlane.xlu0 %6758 }
0x1974   :  { %v6780_v51 = vmul.f32 0.015625, %v6759_v58  ;;  %v6769_v58 = vsel %vm257_vm4, %v6748_v19, 0.0  ;;  %v9945_v19 = vld [vmem:[%s14488_s6 + $0x100] ss:$8 sps:$4 sm:$0xff]  }
0x1975   :  { %v6762_v25 = vpop.xlane.xlu1 %6761 }
0x1976   :  { %v6789_v32 = vadd.f32 1e-05, %v6780_v51  ;;  %v6781_v4 = vmul.f32 0.015625, %v6762_v25 }
0x1977   :  { %v6753_v56 = vpop.xlane.xlu0 %6752 }
0x1978   :  { %10443 = vrsqrt.f32 %v6789_v32  ;;  %v6790_v50 = vadd.f32 1e-05, %v6781_v4  ;;  %v6778_v21 = vmul.f32 0.015625, %v6753_v56 }
0x1979   :  { %v14139_v59 = vpop.permute.xlu1 %6814 }
0x197a   :  { %v10442_v30 = vpop.eup %10441  ;;  %10445 = vrsqrt.f32 %v6790_v50  ;;  %v6787_v41 = vadd.f32 1e-05, %v6778_v21 }
0x197b   :  { %v6806_v57 = vmul.f32 %v10442_v30, %v14026_v40  ;;  %v9935_v40 = vld [vmem:[%s14488_s6 + $0xc4] ss:$8 sps:$4 sm:$0xff]  }
0x197c   :  { %10447 = vrsqrt.f32 %v6787_v41  ;;  %7377 = vmatprep.subr.bf16.mxu0 %v9935_v40 }
0x197d   :  { %v6818_v16 = vmul.f32 %v14139_v59, %v6806_v57  ;;  %7378 = vmatpush1.bf16.msra.mxu0 %v9933_v20  ;;  %v76_v20 = vld [vmem:[%s14484_s2 + $0x1] sm:$0x7] }
0x197e   :  { %7379 = vmatprep.subr.bf16.mxu0 %v9938_v43 }
0x197f   :  { %v6833_v61 = vadd.f32 %v14145_v13, %v6818_v16 }
0x1981   :  { %6842 = vst.msk [vmem:[#allocation4 + $0x8] sm:$0xff] %vm257_vm4, %v6833_v61  ;;  %7380 = vmatpush1.bf16.msra.mxu0 %v9936_v31  ;;  %v7480_v31 = vld [vmem:[%s14489_s7 + $0x10] sm:$0xff] }
0x1982   :  { %v10444_v22 = vpop.eup %10443  ;;  %7381 = vmatprep.subr.bf16.mxu0 %v9941_v17 }
0x1983   :  { %v6807_v44 = vmul.f32 %v10444_v22, %v14031_v10  ;;  %v14552_v22 = vld [vmem:[#allocation15_spill] sm:$0xff] }
0x1984   :  { %v10446_v33 = vpop.eup %10445  ;;  %v6978_v43 = vsub.s32 2, %v14552_v22  ;;  %v9968_v22 = vld [vmem:[%s14488_s6 + $0x174] ss:$8 sps:$4 sm:$0xff]  }
0x1985   :  { %v6808_v6 = vmul.f32 %v10446_v33, %v14033_v9  ;;  %v6819_v5 = vmul.f32 %v14139_v59, %v6807_v44  ;;  %7382 = vmatpush1.bf16.msra.mxu0 %v9939_v7  ;;  %v7478_v44 = vld [vmem:[%s14489_s7] sm:$0xff]  ;;  %v7479_v33 = vld [vmem:[%s14489_s7 + $0x8] sm:$0xff] }
0x1986   :  { %v10448_v63 = vpop.eup %10447 }
0x1987   :  { %v6805_v1 = vmul.f32 %v10448_v63, %v14037_v18  ;;  %v6820_v10 = vmul.f32 %v14139_v59, %v6808_v6  ;;  %v6834_v35 = vadd.f32 %v14145_v13, %v6819_v5  ;;  %v9944_v18 = vld [vmem:[%s14488_s6 + $0xf4] ss:$8 sps:$4 sm:$0xff]   ;;  %v6975_v6 = vrot.slane %v76_v20, %v14551_v28 }
0x1988   :  { %v6852_v9 = vld [vmem:[#allocation4 + $0x8] sm:$0xff]  ;;  %7383 = vmatprep.subr.bf16.mxu0 %v9944_v18  ;;  %v9469_v5 = vpack.c.bf16 %v7479_v33, %v7478_v44  ;;  %v7481_v63 = vld [vmem:[%s14489_s7 + $0x18] sm:$0xff]  ;;  %v6971_v28 = vrot.slane %v76_v20, %v14550_v12  ;;  %v7484_v12 = vld [vmem:[%s14489_s7 + $0x30] sm:$0xff] }
0x1989   :  { %v6817_v38 = vmul.f32 %v14139_v59, %v6805_v1  ;;  %v6835_v8 = vadd.f32 %v14145_v13, %v6820_v10  ;;  %6843 = vst.msk [vmem:[#allocation4 + $0x10] sm:$0xff] %vm257_vm4, %v6834_v35  ;;  %6854 = vrot.lane.b32.xlu0 %v6852_v9, %s10525_s27  ;;  %7384 = vmatpush1.bf16.msra.mxu0 %v9942_v48  ;;  %v7482_v35 = vld [vmem:[%s14489_s7 + $0x20] sm:$0xff]  ;;  %v7483_v9 = vld [vmem:[%s14489_s7 + $0x28] sm:$0xff]  ;;  %v9974_v33 = vld [vmem:[%s14488_s6 + $0x194] ss:$8 sps:$4 sm:$0xff]  }
0x198a   :  { %7394 = vmatprep.subr.bf16.mxu0 %v9947_v52  ;;  %v6979_v1 = vrot.slane %v76_v20, %v6978_v43  ;;  %9470 = vmatpush1.bf16.msra.mxu1 %v9469_v5  ;;  %v9472_v10 = vpack.c.bf16 %v7481_v63, %v7480_v31  ;;  %v7487_v48 = vld [vmem:[%s14489_s7 + $0x48] sm:$0xff]  ;;  %v7488_v52 = vld [vmem:[%s14489_s7 + $0x50] sm:$0xff] }
0x198b   :  { %v6832_v23 = vadd.f32 %v14145_v13, %v6817_v38  ;;  %6844 = vst.msk [vmem:[#allocation4 + $0x18] sm:$0xff] %vm257_vm4, %v6835_v8  ;;  %9471 = vmatprep.subr.bf16.mxu1 %v14531_v24  ;;  %v9475_v38 = vpack.c.bf16 %v7483_v9, %v7482_v35  ;;  %v7485_v8 = vld [vmem:[%s14489_s7 + $0x38] sm:$0xff]  ;;  %v9963_v20 = vld [vmem:[%s14488_s6 + $0x160] ss:$8 sps:$4 sm:$0xff]   ;;  %v9977_v5 = vld [vmem:[%s14488_s6 + $0x1a4] ss:$8 sps:$4 sm:$0xff]  }
0x198c   :  { %v9478_v7 = vpack.c.bf16 %v7485_v8, %v7484_v12  ;;  %v9966_v43 = vld [vmem:[%s14488_s6 + $0x170] ss:$8 sps:$4 sm:$0xff]   ;;  %v9969_v44 = vld [vmem:[%s14488_s6 + $0x180] ss:$8 sps:$4 sm:$0xff]   ;;  %v9980_v63 = vld [vmem:[%s14488_s6 + $0x1b4] ss:$8 sps:$4 sm:$0xff]  }
0x198d   :  { %6841 = vst.msk [vmem:[#allocation4] sm:$0xff] %vm257_vm4, %v6832_v23  ;;  %v7486_v23 = vld [vmem:[%s14489_s7 + $0x40] sm:$0xff]  ;;  %v9986_v12 = vld [vmem:[%s14488_s6 + $0x1d4] ss:$8 sps:$4 sm:$0xff]  }
0x198e   :  { %9473 = vmatpush1.bf16.msra.mxu1 %v9472_v10  ;;  %v9975_v31 = vld [vmem:[%s14488_s6 + $0x1a0] ss:$8 sps:$4 sm:$0xff]   ;;  %v9978_v10 = vld [vmem:[%s14488_s6 + $0x1b0] ss:$8 sps:$4 sm:$0xff]   ;;  %v9983_v35 = vld [vmem:[%s14488_s6 + $0x1c4] ss:$8 sps:$4 sm:$0xff]  }
0x198f   :  { %9474 = vmatprep.subr.bf16.mxu1 %v14531_v24  ;;  %v9981_v9 = vld [vmem:[%s14488_s6 + $0x1c0] ss:$8 sps:$4 sm:$0xff]  }
0x1990   :  { %v6859_v14 = vld [vmem:[#allocation4 + $0x10] sm:$0xff] }
0x1991   :  { %6860 = vst.msk [vmem:[#allocation5 + $0x8] sm:$0xff] %vm257_vm4, %v6859_v14  ;;  %v9481_v14 = vpack.c.bf16 %v7487_v48, %v7486_v23  ;;  %v9989_v23 = vld [vmem:[%s14488_s6 + $0x1e4] ss:$8 sps:$4 sm:$0xff]   ;;  %v9987_v48 = vld [vmem:[%s14488_s6 + $0x1e0] ss:$8 sps:$4 sm:$0xff]  }
0x1992   :  { %v6861_v60 = vld [vmem:[#allocation4 + $0x18] sm:$0xff]  ;;  %9476 = vmatpush1.bf16.msra.mxu1 %v9475_v38 }
0x1993   :  { %6863 = vrot.lane.b32.xlu0 %v6861_v60, %s10525_s27  ;;  %9477 = vmatprep.subr.bf16.mxu1 %v14531_v24  ;;  %v7489_v60 = vld [vmem:[%s14489_s7 + $0x58] sm:$0xff] }
0x1994   :  { %v6850_v27 = vld [vmem:[#allocation4] sm:$0xff] }
0x1995   :  { %6851 = vst.msk [vmem:[#allocation5] sm:$0xff] %vm257_vm4, %v6850_v27 }
0x1996   :  { %9479 = vmatpush1.bf16.msra.mxu1 %v9478_v7 }
0x1997   :  { %9480 = vmatprep.subr.bf16.mxu1 %v14531_v24 }
0x199a   :  { %9482 = vmatpush1.bf16.msra.mxu1 %v9481_v14 }
0x199b   :  { %9483 = vmatprep.subr.bf16.mxu1 %v14531_v24 }
0x19a2   :  { %v6723_v37 = vpop.xlane.xlu0 %6722 }
0x19a3   :  { %v6732_v2 = vmul.f32 0.015625, %v6723_v37  ;;  %v9484_v37 = vpack.c.bf16 %v7489_v60, %v7488_v52  ;;  %v9992_v60 = vld [vmem:[%s14488_s6 + $0x1f4] ss:$8 sps:$4 sm:$0xff]  }
0x19a5   :  { %v14201_v26 = vsub.f32 %v14052_v15, %v6732_v2  ;;  %9485 = vmatpush1.bf16.msra.mxu1 %v9484_v37 }
0x19a6   :  { %9486 = vmatprep.subr.bf16.mxu1 %v14531_v24 }
0x19a7   :  { %v6750_v45 = vmul.f32 %v14201_v26, %v14201_v26 }
0x19a9   :  { %v6775_v46 = vsel %vm257_vm4, %v6750_v45, 0.0  ;;  %v7491_v45 = vld [vmem:[%s14489_s7 + $0x68] sm:$0xff] }
0x19aa   :  { %6776 = vadd.xlane.f32.xlu1 %v6775_v46 }
0x19b2   :  { %6770 = vadd.xlane.f32.xlu0 %v6769_v58 }
0x19b6   :  { %v6774_v51 = vpop.xlane.xlu1 %6773 }
0x19b7   :  { %v6785_v3 = vmul.f32 0.015625, %v6774_v51  ;;  %v9950_v51 = vld [vmem:[%s14488_s6 + $0x114] ss:$8 sps:$4 sm:$0xff]  }
0x19b9   :  { %v6794_v25 = vadd.f32 1e-05, %v6785_v3  ;;  %v9487_v3 = vpack.c.bf16 %v7491_v45, %v7490_v55  ;;  %v9995_v45 = vld [vmem:[%s14488_s6 + $0x204] ss:$8 sps:$4 sm:$0xff]  }
0x19ba   :  { %v6768_v15 = vpop.xlane.xlu0 %6767  ;;  %v6765_v42 = vpop.xlane.xlu1 %6764 }
0x19bb   :  { %10449 = vrsqrt.f32 %v6794_v25  ;;  %v6783_v32 = vmul.f32 0.015625, %v6768_v15  ;;  %v6782_v4 = vmul.f32 0.015625, %v6765_v42  ;;  %v7492_v25 = vld [vmem:[%s14489_s7 + $0x70] sm:$0xff]  ;;  %v7493_v15 = vld [vmem:[%s14489_s7 + $0x78] sm:$0xff]  ;;  %9488 = vmatpush1.bf16.msra.mxu1 %v9487_v3 }
0x19bc   :  { %v9948_v42 = vld [vmem:[%s14488_s6 + $0x110] ss:$8 sps:$4 sm:$0xff]   ;;  %9489 = vmatprep.subr.bf16.mxu1 %v14531_v24 }
0x19bd   :  { %v6792_v29 = vadd.f32 1e-05, %v6783_v32  ;;  %v6791_v11 = vadd.f32 1e-05, %v6782_v4  ;;  %v9953_v32 = vld [vmem:[%s14488_s6 + $0x124] ss:$8 sps:$4 sm:$0xff]   ;;  %v9490_v4 = vpack.c.bf16 %v7493_v15, %v7492_v25 }
0x19bf   :  { %10451 = vrsqrt.f32 %v6792_v29  ;;  %v7494_v29 = vld [vmem:[%s14489_s7 + $0x80] sm:$0xff]  ;;  %9491 = vmatpush1.bf16.msra.mxu1 %v9490_v4  ;;  %v9996_v4 = vld [vmem:[%s14488_s6 + $0x210] ss:$8 sps:$4 sm:$0xff]  }
0x19c0   :  { %10453 = vrsqrt.f32 %v6791_v11  ;;  %v7495_v11 = vld [vmem:[%s14489_s7 + $0x88] sm:$0xff]  ;;  %9492 = vmatprep.subr.bf16.mxu1 %v14531_v24 }
0x19c5   :  { %v10450_v56 = vpop.eup %10449 }
0x19c6   :  { %v6812_v50 = vmul.f32 %v10450_v56, %v14058_v47  ;;  %v9951_v56 = vld [vmem:[%s14488_s6 + $0x120] ss:$8 sps:$4 sm:$0xff]  }
0x19c8   :  { %v6824_v21 = vmul.f32 %v14139_v59, %v6812_v50  ;;  %7342 = vrot.lane.b32.xlu0 %v6975_v6, %s10525_s27  ;;  %v9956_v50 = vld [vmem:[%s14488_s6 + $0x134] ss:$8 sps:$4 sm:$0xff]   ;;  %v9972_v6 = vld [vmem:[%s14488_s6 + $0x190] ss:$8 sps:$4 sm:$0xff]  }
0x19c9   :  { %v10452_v39 = vpop.eup %10451 }
0x19ca   :  { %v10454_v30 = vpop.eup %10453  ;;  %v6839_v41 = vadd.f32 %v14145_v13, %v6824_v21  ;;  %v6810_v57 = vmul.f32 %v10452_v39, %v14064_v49  ;;  %v9493_v21 = vpack.c.bf16 %v7495_v11, %v7494_v29  ;;  %v7496_v39 = vld [vmem:[%s14489_s7 + $0x90] sm:$0xff]  ;;  %v10001_v29 = vld [vmem:[%s14488_s6 + $0x224] ss:$8 sps:$4 sm:$0xff]   ;;  %v9999_v11 = vld [vmem:[%s14488_s6 + $0x220] ss:$8 sps:$4 sm:$0xff]  }
0x19cb   :  { %v6809_v0 = vmul.f32 %v10454_v30, %v14060_v36  ;;  %v7497_v30 = vld [vmem:[%s14489_s7 + $0x98] sm:$0xff] }
0x19cc   :  { %6848 = vst.msk [vmem:[#allocation4 + $0x38] sm:$0xff] %vm257_vm4, %v6839_v41  ;;  %v6822_v16 = vmul.f32 %v14139_v59, %v6810_v57  ;;  %v9954_v41 = vld [vmem:[%s14488_s6 + $0x130] ss:$8 sps:$4 sm:$0xff]   ;;  %v9959_v57 = vld [vmem:[%s14488_s6 + $0x144] ss:$8 sps:$4 sm:$0xff]   ;;  %9494 = vmatpush1.bf16.msra.mxu1 %v9493_v21 }
0x19cd   :  { %v6821_v53 = vmul.f32 %v14139_v59, %v6809_v0  ;;  %v9496_v0 = vpack.c.bf16 %v7497_v30, %v7496_v39  ;;  %9495 = vmatprep.subr.bf16.mxu1 %v14531_v24  ;;  %v7500_v39 = vld [vmem:[%s14489_s7 + $0xb0] sm:$0xff]  ;;  %v7501_v30 = vld [vmem:[%s14489_s7 + $0xb8] sm:$0xff] }
0x19ce   :  { %v6837_v40 = vadd.f32 %v14145_v13, %v6822_v16  ;;  %v7498_v16 = vld [vmem:[%s14489_s7 + $0xa0] sm:$0xff] }
0x19cf   :  { %v6836_v47 = vadd.f32 %v14145_v13, %v6821_v53  ;;  %v7499_v53 = vld [vmem:[%s14489_s7 + $0xa8] sm:$0xff] }
0x19d0   :  { %6846 = vst.msk [vmem:[#allocation4 + $0x28] sm:$0xff] %vm257_vm4, %v6837_v40  ;;  %v9957_v40 = vld [vmem:[%s14488_s6 + $0x140] ss:$8 sps:$4 sm:$0xff]   ;;  %9497 = vmatpush1.bf16.msra.mxu1 %v9496_v0 }
0x19d1   :  { %6845 = vst.msk [vmem:[#allocation4 + $0x20] sm:$0xff] %vm257_vm4, %v6836_v47  ;;  %v9962_v47 = vld [vmem:[%s14488_s6 + $0x154] ss:$8 sps:$4 sm:$0xff]   ;;  %9498 = vmatprep.subr.bf16.mxu1 %v14531_v24  ;;  %v7502_v0 = vld [vmem:[%s14489_s7 + $0xc0] sm:$0xff] }
0x19d3   :  { %v6877_v61 = vld [vmem:[#allocation4 + $0x38] sm:$0xff] }
0x19d4   :  { %6879 = vrot.lane.b32.xlu1 %v6877_v61, %s10525_s27  ;;  %v9499_v61 = vpack.c.bf16 %v7499_v53, %v7498_v16 }
0x19d6   :  { %9500 = vmatpush1.bf16.msra.mxu1 %v9499_v61 }
0x19d7   :  { %v6869_v49 = vld [vmem:[#allocation4 + $0x28] sm:$0xff]  ;;  %9501 = vmatprep.subr.bf16.mxu1 %v14531_v24 }
0x19d8   :  { %6871 = vrot.lane.b32.xlu1 %v6869_v49, %s10525_s27  ;;  %v6867_v36 = vld [vmem:[#allocation4 + $0x20] sm:$0xff]  ;;  %v9971_v24 = vld [vmem:[%s14488_s6 + $0x184] ss:$8 sps:$4 sm:$0xff]  }
0x19d9   :  { %6868 = vst.msk [vmem:[#allocation5 + $0x10] sm:$0xff] %vm257_vm4, %v6867_v36  ;;  %v9960_v49 = vld [vmem:[%s14488_s6 + $0x150] ss:$8 sps:$4 sm:$0xff]   ;;  %v9965_v36 = vld [vmem:[%s14488_s6 + $0x164] ss:$8 sps:$4 sm:$0xff]  }
0x19dc   :  { %7344 = vrot.lane.b32.xlu1 %v6979_v1, %s10525_s27 }
0x19e0   :  { %7340 = vrot.lane.b32.xlu1 %v6971_v28, %s10525_s27 }
0x19fb   :  { %v6855_v17 = vpop.permute.xlu0 %6854 }
0x19fc   :  { %6858 = vst.msk [vmem:[#allocation5] sm:$0xff] %vm6857_vm12, %v6855_v17 }
0x1a03   :  { %v6885_v27 = vld [vmem:[#allocation5] sm:$0xff] }
0x1a04   :  { %v6890_v58 = vpack.c.bf16 %v6885_v27, %v6885_v27 }
0x1a05   :  { %v6864_v18 = vpop.permute.xlu0 %6863 }
0x1a06   :  { %6866 = vst.msk [vmem:[#allocation5 + $0x8] sm:$0xff] %vm6857_vm12, %v6864_v18  ;;  %v9984_v18 = vld [vmem:[%s14488_s6 + $0x1d0] ss:$8 sps:$4 sm:$0xff]  }
0x1a0d   :  { %v6886_v2 = vld [vmem:[#allocation5 + $0x8] sm:$0xff] }
0x1a0e   :  { %v6891_v46 = vpack.c.bf16 %v6886_v2, %v6886_v2  ;;  %v9990_v2 = vld [vmem:[%s14488_s6 + $0x1f0] ss:$8 sps:$4 sm:$0xff]  }
0x1a10   :  { %7385 = vmatprep.mubr.bf16.mxu0 %v6891_v46 }
0x1a11   :  { %7386 = vmatmul.mubr.bf16.vlgmr.msra.gmra.mrb[204].mxu0 %v6890_v58 }
0x1a12   :  { %7395 = vmatpush1.bf16.msra.mxu0 %v9945_v19 }
0x1a13   :  { %7396 = vmatprep.subr.bf16.mxu0 %v9950_v51 }
0x1a16   :  { %7397 = vmatpush1.bf16.msra.mxu0 %v9948_v42 }
0x1a17   :  { %7398 = vmatprep.subr.bf16.mxu0 %v9953_v32 }
0x1a1a   :  { %7399 = vmatpush1.bf16.msra.mxu0 %v9951_v56  ;;  %v10004_v56 = vld [vmem:[%s14488_s6 + $0x234] ss:$8 sps:$4 sm:$0xff]  }
0x1a1b   :  { %7400 = vmatprep.subr.bf16.mxu0 %v9956_v50 }
0x1a1e   :  { %7401 = vmatpush1.bf16.msra.mxu0 %v9954_v41  ;;  %v9502_v41 = vpack.c.bf16 %v7501_v30, %v7500_v39 }
0x1a1f   :  { %7402 = vmatprep.subr.bf16.mxu0 %v9959_v57  ;;  %v8068_v57 = vld [vmem:[%s14484_s2 + $0x3] ss:$0 sm:$0xff]  ;;  %s10535_s2 = smov [#allocation6]  }
0x1a20   :  { %9503 = vmatpush1.bf16.msra.mxu1 %v9502_v41  ;;  %7508 = vrot.lane.b32.xlu1 %v8068_v57, %s10523_s0  ;;  %s7593_s7 = sshll.u32 %s10535_s2, 4  ;;  %s7594_s7 = int_to_ptr.vmem [resolvable:$true] %s7593_s7 }
0x1a21   :  { %7562 = vmatprep.subr.mxu1 %v14530_v34  ;;  %s10497_s0 = scalar_lea.vmem %s7594_s7, 256  ;;  %p10502_p1 = scmp.lt.s32.totalorder %s7594_s7, %s7594_s7 }
0x1a22   :  { %7403 = vmatpush1.bf16.msra.mxu0 %v9957_v40  ;;  %p10498_p0 = scmp.ne.s32.totalorder %s7594_s7, %s10497_s0  ;;  %p10503_p2 = scmp.lt.s32.totalorder %s10497_s0, %s10497_s0 }
0x1a23   :  { %7404 = vmatprep.subr.bf16.mxu0 %v9962_v47 }
0x1a24   :  { %7563 = vmatpush1.msra.mxu1 %v7502_v0  ;;  %p10504_p3 = por %p10503_p2, %p10502_p1 }
0x1a26   :  { %7405 = vmatpush1.bf16.msra.mxu0 %v9960_v49  ;;  %p10505_p4 = pnand %p10504_p3, %p10498_p0 }
0x1a27   :  { %7406 = vmatprep.subr.bf16.mxu0 %v9965_v36 }
0x1a2a   :  { %7407 = vmatpush1.bf16.msra.mxu0 %v9963_v20 }
0x1a2b   :  { %7408 = vmatprep.subr.bf16.mxu0 %v9968_v22 }
0x1a2e   :  { %7409 = vmatpush1.bf16.msra.mxu0 %v9966_v43 }
0x1a2f   :  { %7410 = vmatprep.subr.bf16.mxu0 %v9971_v24 }
0x1a32   :  { %7411 = vmatpush1.bf16.msra.mxu0 %v9969_v44 }
0x1a33   :  { %7412 = vmatprep.subr.bf16.mxu0 %v9974_v33 }
0x1a36   :  { %7413 = vmatpush1.bf16.msra.mxu0 %v9972_v6 }
0x1a37   :  { %7414 = vmatprep.subr.bf16.mxu0 %v9977_v5  ;;  %v6777_v17 = vpop.xlane.xlu1 %6776 }
0x1a38   :  { %v6786_v1 = vmul.f32 0.015625, %v6777_v17 }
0x1a3a   :  { %7415 = vmatpush1.bf16.msra.mxu0 %v9975_v31  ;;  %v6795_v28 = vadd.f32 1e-05, %v6786_v1 }
0x1a3b   :  { %7416 = vmatprep.subr.bf16.mxu0 %v9980_v63 }
0x1a3c   :  { %10455 = vrsqrt.f32 %v6795_v28 }
0x1a3e   :  { %7417 = vmatpush1.bf16.msra.mxu0 %v9978_v10 }
0x1a3f   :  { %v6771_v38 = vpop.xlane.xlu0 %6770  ;;  %7418 = vmatprep.subr.bf16.mxu0 %v9983_v35 }
0x1a40   :  { %v6784_v8 = vmul.f32 0.015625, %v6771_v38 }
0x1a42   :  { %v6793_v7 = vadd.f32 1e-05, %v6784_v8  ;;  %7419 = vmatpush1.bf16.msra.mxu0 %v9981_v9 }
0x1a43   :  { %7420 = vmatprep.subr.bf16.mxu0 %v9986_v12  ;;  %v7343_v40 = vpop.permute.xlu0 %7342 }
0x1a44   :  { %10457 = vrsqrt.f32 %v6793_v7 }
0x1a46   :  { %7421 = vmatpush1.bf16.msra.mxu0 %v9984_v18  ;;  %v10456_v14 = vpop.eup %10455  ;;  %v6880_v52 = vpop.permute.xlu1 %6879 }
0x1a47   :  { %7422 = vmatprep.subr.bf16.mxu0 %v9989_v23  ;;  %v6813_v27 = vmul.f32 %v10456_v14, %v14201_v26 }
0x1a49   :  { %v6825_v37 = vmul.f32 %v14139_v59, %v6813_v27 }
0x1a4a   :  { %7423 = vmatpush1.bf16.msra.mxu0 %v9987_v48  ;;  %v6872_v55 = vpop.permute.xlu1 %6871 }
0x1a4b   :  { %7424 = vmatprep.subr.bf16.mxu0 %v9992_v60  ;;  %v6840_v46 = vadd.f32 %v14145_v13, %v6825_v37  ;;  %6874 = vst.msk [vmem:[#allocation5 + $0x10] sm:$0xff] %vm6857_vm12, %v6872_v55 }
0x1a4d   :  { %6849 = vst.msk [vmem:[#allocation4 + $0x40] sm:$0xff] %vm257_vm4, %v6840_v46 }
0x1a4e   :  { %v10458_v19 = vpop.eup %10457  ;;  %7425 = vmatpush1.bf16.msra.mxu0 %v9990_v2  ;;  %v7345_v16 = vpop.permute.xlu1 %7344 }
0x1a4f   :  { %v6811_v26 = vmul.f32 %v10458_v19, %v14206_v54  ;;  %7435 = vmatprep.subr.bf16.mxu0 %v9995_v45  ;;  %v9993_v54 = vld [vmem:[%s14488_s6 + $0x200] ss:$8 sps:$4 sm:$0xff]   ;;  %v7347_v36 = vsel %vm257_vm4, %v7343_v40, %v7345_v16 }
0x1a51   :  { %v6823_v58 = vmul.f32 %v14139_v59, %v6811_v26 }
0x1a52   :  { %v6887_v15 = vld [vmem:[#allocation5 + $0x10] sm:$0xff]  ;;  %v7341_v53 = vpop.permute.xlu1 %7340 }
0x1a53   :  { %v6838_v51 = vadd.f32 %v14145_v13, %v6823_v58  ;;  %v6892_v59 = vpack.c.bf16 %v6887_v15, %v6887_v15  ;;  %v9998_v13 = vld [vmem:[%s14488_s6 + $0x214] ss:$8 sps:$4 sm:$0xff]   ;;  %v7346_v47 = vsel %vm257_vm4, %v7341_v53, %v7343_v40 }
0x1a54   :  { %v6883_v3 = vld [vmem:[#allocation4 + $0x40] sm:$0xff] }
0x1a55   :  { %6847 = vst.msk [vmem:[#allocation4 + $0x30] sm:$0xff] %vm257_vm4, %v6838_v51  ;;  %6884 = vst.msk [vmem:[#allocation5 + $0x20] sm:$0xff] %vm257_vm4, %v6883_v3 }
0x1a5c   :  { %v6875_v25 = vld [vmem:[#allocation4 + $0x30] sm:$0xff]  ;;  %v6889_v50 = vld [vmem:[#allocation5 + $0x20] sm:$0xff] }
0x1a5d   :  { %6876 = vst.msk [vmem:[#allocation5 + $0x18] sm:$0xff] %vm257_vm4, %v6875_v25  ;;  %v6894_v21 = vpack.c.bf16 %v6889_v50, %v6889_v50 }
0x1a5e   :  { %6882 = vst.msk [vmem:[#allocation5 + $0x18] sm:$0xff] %vm6857_vm12, %v6880_v52 }
0x1a65   :  { %v6888_v42 = vld [vmem:[#allocation5 + $0x18] sm:$0xff] }
0x1a66   :  { %v6893_v32 = vpack.c.bf16 %v6888_v42, %v6888_v42 }
0x1a68   :  { %7426 = vmatprep.mubr.bf16.mxu0 %v6893_v32 }
0x1a69   :  { %7427 = vmatmul.mubr.bf16.vlgmr.msra.gmra.mrb[204].mxu0 %v6892_v59 }
0x1a6a   :  { %7436 = vmatpush1.bf16.msra.mxu0 %v9993_v54  ;;  %7467 = vmatprep.mubr.bf16.mxu0 %v14532_v62  ;;  %v10002_v62 = vld [vmem:[%s14488_s6 + $0x230] ss:$8 sps:$4 sm:$0xff]  }
0x1a6b   :  { %7437 = vmatprep.subr.bf16.mxu0 %v9998_v13 }
0x1a6e   :  { %7438 = vmatpush1.bf16.msra.mxu0 %v9996_v4 }
0x1a6f   :  { %7439 = vmatprep.subr.bf16.mxu0 %v10001_v29 }
0x1a72   :  { %7440 = vmatpush1.bf16.msra.mxu0 %v9999_v11 }
0x1a73   :  { %7441 = vmatprep.subr.bf16.mxu0 %v10004_v56 }
0x1a76   :  { %7442 = vmatpush1.bf16.msra.mxu0 %v10002_v62 }
0x1a79   :  { %8067 = vmatmul.mubr.msk.bf16.vlgmr.msra.gmra.mrb[204].mxu0 %vm257_vm4, %v6894_v21 }
0x1b4c   :  { %v7469_v61 = vpop.f32.mrb[204].mxu0 }
0x1b4d   :  { %v9504_v49 = vadd.f32 %v7469_v61, %v7346_v47  ;;  %v7471_v20 = vpop.f32.mrb[205].mxu0 }
0x1b4e   :  { %v9505_v22 = vadd.f32 %v7471_v20, %v7347_v36  ;;  %v7473_v43 = vpop.f32.mrb[206].mxu0 }
0x1b4f   :  { %7476 = vst [vmem:[#allocation6] sm:$0xff] %v9504_v49  ;;  %v7474_v34 = vpop.f32.mrb[207].mxu0 }
0x1b50   :  { %7477 = vst.msk [vmem:[#allocation6 + $0x8] sm:$0xff] %vm782_vm8, %v9505_v22  ;;  %8069 = vmatprep.mubr.msk.f32.mxu1 %vm782_vm8, %v9505_v22 }
0x1b51   :  { %7579 = vmatmul.mubr.f32.vlgmr.msra.gmra.mrb[244].mxu1 %v9504_v49 }
0x1b52   :  { %10508 = shalt.err (!%p10505_p4)
}
0x1b53   :  { %s10509_s22 = scalar_lea.hbm %s14490_s8, 256 }
0x1b54   :  { %p10510_p5 = scmp.ne.s32.totalorder %s14490_s8, %s10509_s22  ;;  %p10513_p6 = scmp.lt.u32.totalorder %s10509_s22, %s14490_s8 }
0x1b56   :  { %p10515_p7 = pnand %p10513_p6, %p10510_p5 }
0x1b58   :  { %10518 = shalt.err (!%p10515_p7)
}
0x1b59   :  { %7596 = dma.vmem_to_hbm [thread:$0]  %s7594_s7, 256, %s14490_s8, [#allocation7]   ;;  %v7509_v24 = vpop.permute.xlu1 %7508  ;;  %v14553_v5 = vld [vmem:[#allocation10_spill] sm:$0xff]  ;;  %v14554_v63 = vld [vmem:[#allocation9_spill] sm:$0xff] }
0x1c24   :  { %v7580_v44 = vpop.f32.mrb[244].mxu1 }
0x1c25   :  { %v7581_v33 = vadd.f32 %v7580_v44, %v7509_v24  ;;  %v7582_v6 = vpop.f32.mrb[245].mxu1 }
0x1c27   :  { %v7584_v31 = vmul.f32 %v7581_v33, %v14553_v5 }
0x1c29   :  { %v7585_v17 = vadd.f32 %v7584_v31, %v14554_v63 }
0x1c2b   :  { %7586 = vst.msk [vmem:[%s14491_s9] sm:$0xff] %vm34_vm0, %v7585_v17 }
0x1c2c   :  { %10519 = dma.done.wait [#allocation7], 256  }
0x1c2d   :  { %10520 = vsyncadd [#allocation7], 4294967040 }
0x1c2e   :  { %7604 = vsyncpa [#allocation7], 1 }

</bundles_post_ra>
